<compile_context>
chip_gen: v7x
topology: tpu7x:2x2x1
jax: 0.10.0
libtpu: 0.0.40
codegen_flags: <defaults>
</compile_context>

<pallas_src>
import numpy as np
import jax
import jax.numpy as jnp
from jax.experimental import pallas as pl
from jax.experimental.pallas import tpu as pltpu


# ---------------------------------------------------------------------------
# Host-side construction of pooling / upsampling matrices (glue, not hot path)
# ---------------------------------------------------------------------------
def adaptive_avg_pool_matrix(out_size: int, in_size: int) -> np.ndarray:
    """A[i, r] = 1/|bin_i| if r in bin_i else 0  (PyTorch AdaptiveAvgPool2d bins)."""
    A = np.zeros((out_size, in_size), dtype=np.float64)
    for i in range(out_size):
        start = (i * in_size) // out_size
        end = -((-(i + 1) * in_size) // out_size)  # ceil((i+1)*in/out)
        A[i, start:end] = 1.0 / (end - start)
    return A.astype(np.float32)


def bilinear_upsample_matrix(out_size: int, in_size: int) -> np.ndarray:
    """U[h, i]: F.interpolate(..., mode='bilinear', align_corners=True) weights."""
    U = np.zeros((out_size, in_size), dtype=np.float64)
    if in_size == 1:
        U[:, 0] = 1.0
    else:
        for h in range(out_size):
            src = h * (in_size - 1) / (out_size - 1)
            i0 = min(int(np.floor(src)), in_size - 1)
            i1 = min(i0 + 1, in_size - 1)
            frac = src - i0
            U[h, i0] += 1.0 - frac
            U[h, i1] += frac
    return U.astype(np.float32)


def _round_up(x: int, m: int) -> int:
    return ((x + m - 1) // m) * m


def _vmem_limit_bytes() -> int:
    """Per-generation scoped-VMEM budget (conservative fallback if query fails)."""
    try:
        cap = int(pltpu.get_tpu_info().vmem_capacity_bytes)
    except Exception:
        return 64 * 1024 * 1024  # fits every generation (v7x has 64 MiB physical)
    return max(32 * 1024 * 1024, min(cap - 16 * 1024 * 1024, 100 * 1024 * 1024))


# ---------------------------------------------------------------------------
# Fused Pallas kernel: passthrough + all pyramid branches, channel-major layout
# ---------------------------------------------------------------------------
def _make_fused_kernel(cin: int, cout: int, num_scales: int):
    def kernel(x_ref, bt_ref, w_ref, sh_ref, ut_ref, out_ref):
        x = x_ref[0]                            # (Cin, HW) f32, one VMEM read
        out_ref[0, 0:cin, :] = x                # exact f32 passthrough channels
        xb = x.astype(jnp.bfloat16)
        # merged adaptive avg-pool (ALL branches): (Cin, HW) @ (HW, S2P) -> (Cin, S2P)
        pooled = jnp.dot(xb, bt_ref[...], preferred_element_type=jnp.float32)
        # stacked 1x1 conv with BN scale folded: (NS*Cout, Cin) @ (Cin, S2P)
        z = jnp.dot(w_ref[...], pooled.astype(jnp.bfloat16),
                    preferred_element_type=jnp.float32)
        # BN shift (lane-dense operand) + ReLU
        z = jnp.maximum(z + sh_ref[...], 0.0).astype(jnp.bfloat16)
        # per-branch bilinear upsample; Ut rows outside branch i's column segment
        # are zero, so columns belonging to other branches / padding never leak.
        for i in range(num_scales):             # statically unrolled
            zi = z[i * cout:(i + 1) * cout, :]                       # (Cout, S2P)
            up = jnp.dot(zi, ut_ref[i], preferred_element_type=jnp.float32)
            off = cin + i * cout
            out_ref[0, off:off + cout, :] = up
    return kernel


def pyramid_pooling_forward(x_nchw, params, pool_scales=(1, 2, 3, 6), out_planes=512):
    """x_nchw: (N, Cin, H, W) f32. Returns (N, Cin + out_planes*len(scales), H, W)."""
    N, Cin, H, W = x_nchw.shape
    HW = H * W
    num_scales = len(pool_scales)
    x_flat = x_nchw.reshape(N, Cin, HW)        # channel-major; pure reshape, no transpose

    # ---- pack all branches' operands into merged, lane-dense matrices ----
    s2_list = [s * s for s in pool_scales]                     # [1, 4, 9, 36]
    seg = [_round_up(v, 8) for v in s2_list]                   # 8-aligned segments
    offs = np.cumsum([0] + seg[:-1]).tolist()                  # [0, 8, 16, 32]
    s2p = _round_up(int(sum(seg)), 128)                        # 72 -> 128 lanes

    Bt_all = np.zeros((HW, s2p), np.float32)                   # merged pooling
    Ut_all = np.zeros((num_scales, s2p, HW), np.float32)       # per-branch upsample
    W_all = np.zeros((num_scales * out_planes, Cin), np.float32)
    Sh_all = np.zeros((num_scales * out_planes, s2p), np.float32)

    for i, scale in enumerate(pool_scales):
        p = params[scale]
        A_h = adaptive_avg_pool_matrix(scale, H)
        A_w = adaptive_avg_pool_matrix(scale, W)
        U_h = bilinear_upsample_matrix(H, scale)
        U_w = bilinear_upsample_matrix(W, scale)
        B = np.einsum("ih,jw->ijhw", A_h, A_w).reshape(scale * scale, HW)  # (S2, HW)
        U = np.einsum("hi,wj->hwij", U_h, U_w).reshape(HW, scale * scale)  # (HW, S2)
        o = offs[i]
        Bt_all[:, o:o + scale * scale] = B.T
        Ut_all[i, o:o + scale * scale, :] = U.T                # other rows stay zero
        W_all[i * out_planes:(i + 1) * out_planes, :] = np.asarray(
            p["w"] * p["bn_scale"][:, None])                   # fold BN scale
        Sh_all[i * out_planes:(i + 1) * out_planes, :] = np.asarray(
            p["bn_shift"])[:, None]                            # lane-dense shift

    bt = jnp.asarray(Bt_all, jnp.bfloat16)
    ut = jnp.asarray(Ut_all, jnp.bfloat16)
    w = jnp.asarray(W_all, jnp.bfloat16)
    sh = jnp.asarray(Sh_all, jnp.float32)

    c_total = Cin + out_planes * num_scales
    kernel = _make_fused_kernel(Cin, out_planes, num_scales)

    def make_call(single_buffer_consts: bool):
        def cspec(shape):
            idx = lambda n, _r=len(shape): (0,) * _r
            if single_buffer_consts:
                # constant index map -> one VMEM buffer is enough
                return pl.BlockSpec(shape, idx, pipeline_mode=pl.Buffered(1))
            return pl.BlockSpec(shape, idx)

        return pl.pallas_call(
            kernel,
            out_shape=jax.ShapeDtypeStruct((N, c_total, HW), jnp.float32),
            grid=(N,),
            in_specs=[
                pl.BlockSpec((1, Cin, HW), lambda n: (n, 0, 0)),      # x (f32)
                cspec((HW, s2p)),                                      # merged Bt
                cspec((num_scales * out_planes, Cin)),                 # stacked W
                cspec((num_scales * out_planes, s2p)),                 # BN shift
                cspec((num_scales, s2p, HW)),                          # padded Ut
            ],
            out_specs=pl.BlockSpec((1, c_total, HW), lambda n: (n, 0, 0)),
            compiler_params=pltpu.CompilerParams(
                dimension_semantics=("parallel",),       # batch sharded across TCs
                vmem_limit_bytes=_vmem_limit_bytes(),
            ),
        )

    try:
        out_flat = make_call(True)(x_flat, bt, w, sh, ut)
    except Exception:
        # Fallback if this JAX build rejects pipeline_mode=pl.Buffered(1).
        out_flat = make_call(False)(x_flat, bt, w, sh, ut)

    return out_flat.reshape(N, c_total, H, W)          # free reshape, already NCHW


# ---------------------------------------------------------------------------
# Pure-JAX reference (for correctness check)
# ---------------------------------------------------------------------------
def pyramid_pooling_reference(x_nchw, params, pool_scales=(1, 2, 3, 6)):
    _, _, H, W = x_nchw.shape
    outs = [x_nchw]
    for scale in pool_scales:
        p = params[scale]
        A_h = jnp.asarray(adaptive_avg_pool_matrix(scale, H))
        A_w = jnp.asarray(adaptive_avg_pool_matrix(scale, W))
        U_h = jnp.asarray(bilinear_upsample_matrix(H, scale))
        U_w = jnp.asarray(bilinear_upsample_matrix(W, scale))
        pooled = jnp.einsum("ih,jw,nchw->ncij", A_h, A_w, x_nchw)
        z = jnp.einsum("oc,ncij->noij", p["w"], pooled)
        z = jnp.maximum(
            z * p["bn_scale"][None, :, None, None]
            + p["bn_shift"][None, :, None, None],
            0.0,
        )
        up = jnp.einsum("hi,wj,noij->nohw", U_h, U_w, z)
        outs.append(up)
    return jnp.concatenate(outs, axis=1)


# ---------------------------------------------------------------------------
# Deterministic parameter init (shapes per ConvBnRelu(fc_dim, 512, 1, 1, 0))
# ---------------------------------------------------------------------------
def init_params(key, fc_dim, out_planes, pool_scales, bn_eps=1e-5):
    params = {}
    for scale in pool_scales:
        key, k1, k2, k3, k4, k5 = jax.random.split(key, 6)
        w = jax.random.normal(k1, (out_planes, fc_dim), jnp.float32) * 0.05  # 1x1 conv, no bias
        gamma = 1.0 + 0.1 * jax.random.normal(k2, (out_planes,), jnp.float32)
        beta = 0.1 * jax.random.normal(k3, (out_planes,), jnp.float32)
        running_mean = 0.1 * jax.random.normal(k4, (out_planes,), jnp.float32)
        running_var = jax.random.uniform(k5, (out_planes,), jnp.float32, 0.5, 1.5)
        bn_scale = gamma / jnp.sqrt(running_var + bn_eps)
        bn_shift = beta - running_mean * bn_scale
        params[scale] = {"w": w, "bn_scale": bn_scale, "bn_shift": bn_shift}
    return params


if __name__ == "__main__":
    # Small shapes consistent with the module (fc_dim shrunk from 2048 -> 32).
    N, FC_DIM, H, W = 2, 32, 16, 16
    OUT_PLANES = 512
    POOL_SCALES = (1, 2, 3, 6)

    key = jax.random.PRNGKey(0)
    key, kx = jax.random.split(key)
    x = jax.random.normal(kx, (N, FC_DIM, H, W), jnp.float32)   # NCHW like PyTorch

    params = init_params(key, FC_DIM, OUT_PLANES, POOL_SCALES)

    out = pyramid_pooling_forward(x, params, POOL_SCALES, OUT_PLANES)
    out = jax.block_until_ready(out)

    expected_channels = FC_DIM + OUT_PLANES * len(POOL_SCALES)
    assert out.shape == (N, expected_channels, H, W), out.shape

    ref = jax.block_until_ready(pyramid_pooling_reference(x, params, POOL_SCALES))
    # bf16 matmul operands (f32 accumulation) -> loosen tolerance vs f32 reference.
    np.testing.assert_allclose(np.asarray(out), np.asarray(ref), rtol=1e-2, atol=1e-2)

    print("KERNEL_OK")
</pallas_src>

<mosaic_0001>
module attributes {stable_mosaic.version = 11 : i64} {
  func.func @kernel(%arg0: i32, %arg1: memref<1x32x256xf32, #tpu.memory_space<vmem>>, %arg2: memref<256x128xbf16, #tpu.memory_space<vmem>>, %arg3: memref<2048x32xbf16, #tpu.memory_space<vmem>>, %arg4: memref<2048x128xf32, #tpu.memory_space<vmem>>, %arg5: memref<4x128x256xbf16, #tpu.memory_space<vmem>>, %arg6: memref<1x2080x256xf32, #tpu.memory_space<vmem>>) attributes {dimension_semantics = [#tpu.dimension_semantics<parallel>], iteration_bounds = array<i64: 2>, scalar_prefetch = 0 : i64, scratch_operands = 0 : i64, tpu.core_type = #tpu.core_type<tc>, window_params = [{transform_indices = @transform_0, window_bounds = array<i64: 1, 32, 256>}, {pipeline_mode = #tpu.pipeline_mode<synchronous>, transform_indices = @transform_1, window_bounds = array<i64: 256, 128>}, {pipeline_mode = #tpu.pipeline_mode<synchronous>, transform_indices = @transform_2, window_bounds = array<i64: 2048, 32>}, {pipeline_mode = #tpu.pipeline_mode<synchronous>, transform_indices = @transform_3, window_bounds = array<i64: 2048, 128>}, {pipeline_mode = #tpu.pipeline_mode<synchronous>, transform_indices = @transform_4, window_bounds = array<i64: 4, 128, 256>}, {transform_indices = @transform_5, window_bounds = array<i64: 1, 2080, 256>}]} {
    %c0 = arith.constant 0 : index
    %c0_0 = arith.constant 0 : index
    %c0_1 = arith.constant 0 : index
    %0 = vector.load %arg1[%c0, %c0_0, %c0_1] : memref<1x32x256xf32, #tpu.memory_space<vmem>>, vector<1x32x256xf32>
    %1 = vector.shape_cast %0 : vector<1x32x256xf32> to vector<32x256xf32>
    %c0_2 = arith.constant 0 : index
    %c0_3 = arith.constant 0 : index
    %c0_4 = arith.constant 0 : index
    %2 = vector.load %arg6[%c0_2, %c0_3, %c0_4] : memref<1x2080x256xf32, #tpu.memory_space<vmem>>, vector<1x32x256xf32>
    %3 = vector.shape_cast %2 : vector<1x32x256xf32> to vector<32x256xf32>
    %4 = vector.shape_cast %1 : vector<32x256xf32> to vector<1x32x256xf32>
    tpu.vector_store %arg6[%c0_2, %c0_3, %c0_4], %4 {strides = array<i32>} : memref<1x2080x256xf32, #tpu.memory_space<vmem>>, vector<1x32x256xf32>,
    %5 = arith.truncf %1 : vector<32x256xf32> to vector<32x256xbf16>
    %c0_5 = arith.constant 0 : index
    %c0_6 = arith.constant 0 : index
    %6 = vector.load %arg2[%c0_5, %c0_6] : memref<256x128xbf16, #tpu.memory_space<vmem>>, vector<256x128xbf16>
    %cst = arith.constant dense<0.000000e+00> : vector<32x128xf32>
    %7 = tpu.matmul %5, %6, %cst {dimension_numbers = #tpu.dot_dimension_numbers<[1], [0], [0], [1], [0, 0, 1, 1], [], []>} : vector<32x256xbf16>, vector<256x128xbf16>, vector<32x128xf32> -> vector<32x128xf32>
    %c0_7 = arith.constant 0 : index
    %c0_8 = arith.constant 0 : index
    %8 = vector.load %arg3[%c0_7, %c0_8] : memref<2048x32xbf16, #tpu.memory_space<vmem>>, vector<2048x32xbf16>
    %9 = arith.truncf %7 : vector<32x128xf32> to vector<32x128xbf16>
    %cst_9 = arith.constant dense<0.000000e+00> : vector<2048x128xf32>
    %10 = tpu.matmul %8, %9, %cst_9 {dimension_numbers = #tpu.dot_dimension_numbers<[1], [0], [0], [1], [0, 0, 1, 1], [], []>} : vector<2048x32xbf16>, vector<32x128xbf16>, vector<2048x128xf32> -> vector<2048x128xf32>
    %c0_10 = arith.constant 0 : index
    %c0_11 = arith.constant 0 : index
    %11 = vector.load %arg4[%c0_10, %c0_11] : memref<2048x128xf32, #tpu.memory_space<vmem>>, vector<2048x128xf32>
    %12 = arith.addf %10, %11 : vector<2048x128xf32>
    %cst_12 = arith.constant 0.000000e+00 : f32
    %13 = vector.broadcast %cst_12 : f32 to vector<2048x128xf32>
    %14 = arith.maximumf %12, %13 : vector<2048x128xf32>
    %15 = arith.truncf %14 : vector<2048x128xf32> to vector<2048x128xbf16>
    %16 = vector.extract_strided_slice %15 {offsets = [0, 0], sizes = [512, 128], strides = [1, 1]} : vector<2048x128xbf16> to vector<512x128xbf16>
    %c0_13 = arith.constant 0 : index
    %c0_14 = arith.constant 0 : index
    %c0_15 = arith.constant 0 : index
    %17 = vector.load %arg5[%c0_13, %c0_14, %c0_15] : memref<4x128x256xbf16, #tpu.memory_space<vmem>>, vector<1x128x256xbf16>
    %18 = vector.shape_cast %17 : vector<1x128x256xbf16> to vector<128x256xbf16>
    %cst_16 = arith.constant dense<0.000000e+00> : vector<512x256xf32>
    %19 = tpu.matmul %16, %18, %cst_16 {dimension_numbers = #tpu.dot_dimension_numbers<[1], [0], [0], [1], [0, 0, 1, 1], [], []>} : vector<512x128xbf16>, vector<128x256xbf16>, vector<512x256xf32> -> vector<512x256xf32>
    %c0_17 = arith.constant 0 : index
    %c32 = arith.constant 32 : index
    %c0_18 = arith.constant 0 : index
    %20 = vector.load %arg6[%c0_17, %c32, %c0_18] : memref<1x2080x256xf32, #tpu.memory_space<vmem>>, vector<1x512x256xf32>
    %21 = vector.shape_cast %20 : vector<1x512x256xf32> to vector<512x256xf32>
    %22 = vector.shape_cast %19 : vector<512x256xf32> to vector<1x512x256xf32>
    tpu.vector_store %arg6[%c0_17, %c32, %c0_18], %22 {strides = array<i32>} : memref<1x2080x256xf32, #tpu.memory_space<vmem>>, vector<1x512x256xf32>,
    %23 = vector.extract_strided_slice %15 {offsets = [512, 0], sizes = [512, 128], strides = [1, 1]} : vector<2048x128xbf16> to vector<512x128xbf16>
    %c1 = arith.constant 1 : index
    %c0_19 = arith.constant 0 : index
    %c0_20 = arith.constant 0 : index
    %24 = vector.load %arg5[%c1, %c0_19, %c0_20] : memref<4x128x256xbf16, #tpu.memory_space<vmem>>, vector<1x128x256xbf16>
    %25 = vector.shape_cast %24 : vector<1x128x256xbf16> to vector<128x256xbf16>
    %cst_21 = arith.constant dense<0.000000e+00> : vector<512x256xf32>
    %26 = tpu.matmul %23, %25, %cst_21 {dimension_numbers = #tpu.dot_dimension_numbers<[1], [0], [0], [1], [0, 0, 1, 1], [], []>} : vector<512x128xbf16>, vector<128x256xbf16>, vector<512x256xf32> -> vector<512x256xf32>
    %c0_22 = arith.constant 0 : index
    %c544 = arith.constant 544 : index
    %c0_23 = arith.constant 0 : index
    %27 = vector.load %arg6[%c0_22, %c544, %c0_23] : memref<1x2080x256xf32, #tpu.memory_space<vmem>>, vector<1x512x256xf32>
    %28 = vector.shape_cast %27 : vector<1x512x256xf32> to vector<512x256xf32>
    %29 = vector.shape_cast %26 : vector<512x256xf32> to vector<1x512x256xf32>
    tpu.vector_store %arg6[%c0_22, %c544, %c0_23], %29 {strides = array<i32>} : memref<1x2080x256xf32, #tpu.memory_space<vmem>>, vector<1x512x256xf32>,
    %30 = vector.extract_strided_slice %15 {offsets = [1024, 0], sizes = [512, 128], strides = [1, 1]} : vector<2048x128xbf16> to vector<512x128xbf16>
    %c2 = arith.constant 2 : index
    %c0_24 = arith.constant 0 : index
    %c0_25 = arith.constant 0 : index
    %31 = vector.load %arg5[%c2, %c0_24, %c0_25] : memref<4x128x256xbf16, #tpu.memory_space<vmem>>, vector<1x128x256xbf16>
    %32 = vector.shape_cast %31 : vector<1x128x256xbf16> to vector<128x256xbf16>
    %cst_26 = arith.constant dense<0.000000e+00> : vector<512x256xf32>
    %33 = tpu.matmul %30, %32, %cst_26 {dimension_numbers = #tpu.dot_dimension_numbers<[1], [0], [0], [1], [0, 0, 1, 1], [], []>} : vector<512x128xbf16>, vector<128x256xbf16>, vector<512x256xf32> -> vector<512x256xf32>
    %c0_27 = arith.constant 0 : index
    %c1056 = arith.constant 1056 : index
    %c0_28 = arith.constant 0 : index
    %34 = vector.load %arg6[%c0_27, %c1056, %c0_28] : memref<1x2080x256xf32, #tpu.memory_space<vmem>>, vector<1x512x256xf32>
    %35 = vector.shape_cast %34 : vector<1x512x256xf32> to vector<512x256xf32>
    %36 = vector.shape_cast %33 : vector<512x256xf32> to vector<1x512x256xf32>
    tpu.vector_store %arg6[%c0_27, %c1056, %c0_28], %36 {strides = array<i32>} : memref<1x2080x256xf32, #tpu.memory_space<vmem>>, vector<1x512x256xf32>,
    %37 = vector.extract_strided_slice %15 {offsets = [1536, 0], sizes = [512, 128], strides = [1, 1]} : vector<2048x128xbf16> to vector<512x128xbf16>
    %c3 = arith.constant 3 : index
    %c0_29 = arith.constant 0 : index
    %c0_30 = arith.constant 0 : index
    %38 = vector.load %arg5[%c3, %c0_29, %c0_30] : memref<4x128x256xbf16, #tpu.memory_space<vmem>>, vector<1x128x256xbf16>
    %39 = vector.shape_cast %38 : vector<1x128x256xbf16> to vector<128x256xbf16>
    %cst_31 = arith.constant dense<0.000000e+00> : vector<512x256xf32>
    %40 = tpu.matmul %37, %39, %cst_31 {dimension_numbers = #tpu.dot_dimension_numbers<[1], [0], [0], [1], [0, 0, 1, 1], [], []>} : vector<512x128xbf16>, vector<128x256xbf16>, vector<512x256xf32> -> vector<512x256xf32>
    %c0_32 = arith.constant 0 : index
    %c1568 = arith.constant 1568 : index
    %c0_33 = arith.constant 0 : index
    %41 = vector.load %arg6[%c0_32, %c1568, %c0_33] : memref<1x2080x256xf32, #tpu.memory_space<vmem>>, vector<1x512x256xf32>
    %42 = vector.shape_cast %41 : vector<1x512x256xf32> to vector<512x256xf32>
    %43 = vector.shape_cast %40 : vector<512x256xf32> to vector<1x512x256xf32>
    tpu.vector_store %arg6[%c0_32, %c1568, %c0_33], %43 {strides = array<i32>} : memref<1x2080x256xf32, #tpu.memory_space<vmem>>, vector<1x512x256xf32>,
    return
  }
  func.func @transform_0(%arg0: i32) -> (i32, i32, i32) {
    %c0_i32 = arith.constant 0 : i32
    %c0_i32_0 = arith.constant 0 : i32
    %c0_i32_1 = arith.constant 0 : i32
    return %arg0, %c0_i32, %c0_i32_0 : i32, i32, i32
  }
  func.func @transform_1(%arg0: i32) -> (i32, i32) {
    %c0_i32 = arith.constant 0 : i32
    %c0_i32_0 = arith.constant 0 : i32
    %c0_i32_1 = arith.constant 0 : i32
    return %c0_i32, %c0_i32_0 : i32, i32
  }
  func.func @transform_2(%arg0: i32) -> (i32, i32) {
    %c0_i32 = arith.constant 0 : i32
    %c0_i32_0 = arith.constant 0 : i32
    %c0_i32_1 = arith.constant 0 : i32
    return %c0_i32, %c0_i32_0 : i32, i32
  }
  func.func @transform_3(%arg0: i32) -> (i32, i32) {
    %c0_i32 = arith.constant 0 : i32
    %c0_i32_0 = arith.constant 0 : i32
    %c0_i32_1 = arith.constant 0 : i32
    return %c0_i32, %c0_i32_0 : i32, i32
  }
  func.func @transform_4(%arg0: i32) -> (i32, i32, i32) {
    %c0_i32 = arith.constant 0 : i32
    %c0_i32_0 = arith.constant 0 : i32
    %c0_i32_1 = arith.constant 0 : i32
    %c0_i32_2 = arith.constant 0 : i32
    return %c0_i32, %c0_i32_0, %c0_i32_1 : i32, i32, i32
  }
  func.func @transform_5(%arg0: i32) -> (i32, i32, i32) {
    %c0_i32 = arith.constant 0 : i32
    %c0_i32_0 = arith.constant 0 : i32
    %c0_i32_1 = arith.constant 0 : i32
    return %arg0, %c0_i32, %c0_i32_0 : i32, i32, i32
  }
}

module attributes {stable_mosaic.version = 11 : i64} {
  func.func @kernel(%arg0: i32, %arg1: memref<1x32x256xf32, #tpu.memory_space<vmem>>, %arg2: memref<256x128xbf16, #tpu.memory_space<vmem>>, %arg3: memref<2048x32xbf16, #tpu.memory_space<vmem>>, %arg4: memref<2048x128xf32, #tpu.memory_space<vmem>>, %arg5: memref<4x128x256xbf16, #tpu.memory_space<vmem>>, %arg6: memref<1x2080x256xf32, #tpu.memory_space<vmem>>) attributes {dimension_semantics = [#tpu.dimension_semantics<parallel>], iteration_bounds = array<i64: 2>, scalar_prefetch = 0 : i64, scratch_operands = 0 : i64, tpu.core_type = #tpu.core_type<tc>, window_params = [{transform_indices = @transform_0, window_bounds = array<i64: 1, 32, 256>}, {pipeline_mode = #tpu.pipeline_mode<synchronous>, transform_indices = @transform_1, window_bounds = array<i64: 256, 128>}, {pipeline_mode = #tpu.pipeline_mode<synchronous>, transform_indices = @transform_2, window_bounds = array<i64: 2048, 32>}, {pipeline_mode = #tpu.pipeline_mode<synchronous>, transform_indices = @transform_3, window_bounds = array<i64: 2048, 128>}, {pipeline_mode = #tpu.pipeline_mode<synchronous>, transform_indices = @transform_4, window_bounds = array<i64: 4, 128, 256>}, {transform_indices = @transform_5, window_bounds = array<i64: 1, 2080, 256>}]} {
    %c0 = arith.constant 0 : index
    %c0_0 = arith.constant 0 : index
    %c0_1 = arith.constant 0 : index
    %0 = vector.load %arg1[%c0, %c0_0, %c0_1] : memref<1x32x256xf32, #tpu.memory_space<vmem>>, vector<1x32x256xf32>
    %1 = vector.shape_cast %0 : vector<1x32x256xf32> to vector<32x256xf32>
    %c0_2 = arith.constant 0 : index
    %c0_3 = arith.constant 0 : index
    %c0_4 = arith.constant 0 : index
    %2 = vector.load %arg6[%c0_2, %c0_3, %c0_4] : memref<1x2080x256xf32, #tpu.memory_space<vmem>>, vector<1x32x256xf32>
    %3 = vector.shape_cast %2 : vector<1x32x256xf32> to vector<32x256xf32>
    %4 = vector.shape_cast %1 : vector<32x256xf32> to vector<1x32x256xf32>
    tpu.vector_store %arg6[%c0_2, %c0_3, %c0_4], %4 {strides = array<i32>} : memref<1x2080x256xf32, #tpu.memory_space<vmem>>, vector<1x32x256xf32>,
    %5 = arith.truncf %1 : vector<32x256xf32> to vector<32x256xbf16>
    %c0_5 = arith.constant 0 : index
    %c0_6 = arith.constant 0 : index
    %6 = vector.load %arg2[%c0_5, %c0_6] : memref<256x128xbf16, #tpu.memory_space<vmem>>, vector<256x128xbf16>
    %cst = arith.constant dense<0.000000e+00> : vector<32x128xf32>
    %7 = tpu.matmul %5, %6, %cst {dimension_numbers = #tpu.dot_dimension_numbers<[1], [0], [0], [1], [0, 0, 1, 1], [], []>} : vector<32x256xbf16>, vector<256x128xbf16>, vector<32x128xf32> -> vector<32x128xf32>
    %c0_7 = arith.constant 0 : index
    %c0_8 = arith.constant 0 : index
    %8 = vector.load %arg3[%c0_7, %c0_8] : memref<2048x32xbf16, #tpu.memory_space<vmem>>, vector<2048x32xbf16>
    %9 = arith.truncf %7 : vector<32x128xf32> to vector<32x128xbf16>
    %cst_9 = arith.constant dense<0.000000e+00> : vector<2048x128xf32>
    %10 = tpu.matmul %8, %9, %cst_9 {dimension_numbers = #tpu.dot_dimension_numbers<[1], [0], [0], [1], [0, 0, 1, 1], [], []>} : vector<2048x32xbf16>, vector<32x128xbf16>, vector<2048x128xf32> -> vector<2048x128xf32>
    %c0_10 = arith.constant 0 : index
    %c0_11 = arith.constant 0 : index
    %11 = vector.load %arg4[%c0_10, %c0_11] : memref<2048x128xf32, #tpu.memory_space<vmem>>, vector<2048x128xf32>
    %12 = arith.addf %10, %11 : vector<2048x128xf32>
    %cst_12 = arith.constant 0.000000e+00 : f32
    %13 = vector.broadcast %cst_12 : f32 to vector<2048x128xf32>
    %14 = arith.maximumf %12, %13 : vector<2048x128xf32>
    %15 = arith.truncf %14 : vector<2048x128xf32> to vector<2048x128xbf16>
    %16 = vector.extract_strided_slice %15 {offsets = [0, 0], sizes = [512, 128], strides = [1, 1]} : vector<2048x128xbf16> to vector<512x128xbf16>
    %c0_13 = arith.constant 0 : index
    %c0_14 = arith.constant 0 : index
    %c0_15 = arith.constant 0 : index
    %17 = vector.load %arg5[%c0_13, %c0_14, %c0_15] : memref<4x128x256xbf16, #tpu.memory_space<vmem>>, vector<1x128x256xbf16>
    %18 = vector.shape_cast %17 : vector<1x128x256xbf16> to vector<128x256xbf16>
    %cst_16 = arith.constant dense<0.000000e+00> : vector<512x256xf32>
    %19 = tpu.matmul %16, %18, %cst_16 {dimension_numbers = #tpu.dot_dimension_numbers<[1], [0], [0], [1], [0, 0, 1, 1], [], []>} : vector<512x128xbf16>, vector<128x256xbf16>, vector<512x256xf32> -> vector<512x256xf32>
    %c0_17 = arith.constant 0 : index
    %c32 = arith.constant 32 : index
    %c0_18 = arith.constant 0 : index
    %20 = vector.load %arg6[%c0_17, %c32, %c0_18] : memref<1x2080x256xf32, #tpu.memory_space<vmem>>, vector<1x512x256xf32>
    %21 = vector.shape_cast %20 : vector<1x512x256xf32> to vector<512x256xf32>
    %22 = vector.shape_cast %19 : vector<512x256xf32> to vector<1x512x256xf32>
    tpu.vector_store %arg6[%c0_17, %c32, %c0_18], %22 {strides = array<i32>} : memref<1x2080x256xf32, #tpu.memory_space<vmem>>, vector<1x512x256xf32>,
    %23 = vector.extract_strided_slice %15 {offsets = [512, 0], sizes = [512, 128], strides = [1, 1]} : vector<2048x128xbf16> to vector<512x128xbf16>
    %c1 = arith.constant 1 : index
    %c0_19 = arith.constant 0 : index
    %c0_20 = arith.constant 0 : index
    %24 = vector.load %arg5[%c1, %c0_19, %c0_20] : memref<4x128x256xbf16, #tpu.memory_space<vmem>>, vector<1x128x256xbf16>
    %25 = vector.shape_cast %24 : vector<1x128x256xbf16> to vector<128x256xbf16>
    %cst_21 = arith.constant dense<0.000000e+00> : vector<512x256xf32>
    %26 = tpu.matmul %23, %25, %cst_21 {dimension_numbers = #tpu.dot_dimension_numbers<[1], [0], [0], [1], [0, 0, 1, 1], [], []>} : vector<512x128xbf16>, vector<128x256xbf16>, vector<512x256xf32> -> vector<512x256xf32>
    %c0_22 = arith.constant 0 : index
    %c544 = arith.constant 544 : index
    %c0_23 = arith.constant 0 : index
    %27 = vector.load %arg6[%c0_22, %c544, %c0_23] : memref<1x2080x256xf32, #tpu.memory_space<vmem>>, vector<1x512x256xf32>
    %28 = vector.shape_cast %27 : vector<1x512x256xf32> to vector<512x256xf32>
    %29 = vector.shape_cast %26 : vector<512x256xf32> to vector<1x512x256xf32>
    tpu.vector_store %arg6[%c0_22, %c544, %c0_23], %29 {strides = array<i32>} : memref<1x2080x256xf32, #tpu.memory_space<vmem>>, vector<1x512x256xf32>,
    %30 = vector.extract_strided_slice %15 {offsets = [1024, 0], sizes = [512, 128], strides = [1, 1]} : vector<2048x128xbf16> to vector<512x128xbf16>
    %c2 = arith.constant 2 : index
    %c0_24 = arith.constant 0 : index
    %c0_25 = arith.constant 0 : index
    %31 = vector.load %arg5[%c2, %c0_24, %c0_25] : memref<4x128x256xbf16, #tpu.memory_space<vmem>>, vector<1x128x256xbf16>
    %32 = vector.shape_cast %31 : vector<1x128x256xbf16> to vector<128x256xbf16>
    %cst_26 = arith.constant dense<0.000000e+00> : vector<512x256xf32>
    %33 = tpu.matmul %30, %32, %cst_26 {dimension_numbers = #tpu.dot_dimension_numbers<[1], [0], [0], [1], [0, 0, 1, 1], [], []>} : vector<512x128xbf16>, vector<128x256xbf16>, vector<512x256xf32> -> vector<512x256xf32>
    %c0_27 = arith.constant 0 : index
    %c1056 = arith.constant 1056 : index
    %c0_28 = arith.constant 0 : index
    %34 = vector.load %arg6[%c0_27, %c1056, %c0_28] : memref<1x2080x256xf32, #tpu.memory_space<vmem>>, vector<1x512x256xf32>
    %35 = vector.shape_cast %34 : vector<1x512x256xf32> to vector<512x256xf32>
    %36 = vector.shape_cast %33 : vector<512x256xf32> to vector<1x512x256xf32>
    tpu.vector_store %arg6[%c0_27, %c1056, %c0_28], %36 {strides = array<i32>} : memref<1x2080x256xf32, #tpu.memory_space<vmem>>, vector<1x512x256xf32>,
    %37 = vector.extract_strided_slice %15 {offsets = [1536, 0], sizes = [512, 128], strides = [1, 1]} : vector<2048x128xbf16> to vector<512x128xbf16>
    %c3 = arith.constant 3 : index
    %c0_29 = arith.constant 0 : index
    %c0_30 = arith.constant 0 : index
    %38 = vector.load %arg5[%c3, %c0_29, %c0_30] : memref<4x128x256xbf16, #tpu.memory_space<vmem>>, vector<1x128x256xbf16>
    %39 = vector.shape_cast %38 : vector<1x128x256xbf16> to vector<128x256xbf16>
    %cst_31 = arith.constant dense<0.000000e+00> : vector<512x256xf32>
    %40 = tpu.matmul %37, %39, %cst_31 {dimension_numbers = #tpu.dot_dimension_numbers<[1], [0], [0], [1], [0, 0, 1, 1], [], []>} : vector<512x128xbf16>, vector<128x256xbf16>, vector<512x256xf32> -> vector<512x256xf32>
    %c0_32 = arith.constant 0 : index
    %c1568 = arith.constant 1568 : index
    %c0_33 = arith.constant 0 : index
    %41 = vector.load %arg6[%c0_32, %c1568, %c0_33] : memref<1x2080x256xf32, #tpu.memory_space<vmem>>, vector<1x512x256xf32>
    %42 = vector.shape_cast %41 : vector<1x512x256xf32> to vector<512x256xf32>
    %43 = vector.shape_cast %40 : vector<512x256xf32> to vector<1x512x256xf32>
    tpu.vector_store %arg6[%c0_32, %c1568, %c0_33], %43 {strides = array<i32>} : memref<1x2080x256xf32, #tpu.memory_space<vmem>>, vector<1x512x256xf32>,
    return
  }
  func.func @transform_0(%arg0: i32) -> (i32, i32, i32) {
    %c0_i32 = arith.constant 0 : i32
    %c0_i32_0 = arith.constant 0 : i32
    %c0_i32_1 = arith.constant 0 : i32
    return %arg0, %c0_i32, %c0_i32_0 : i32, i32, i32
  }
  func.func @transform_1(%arg0: i32) -> (i32, i32) {
    %c0_i32 = arith.constant 0 : i32
    %c0_i32_0 = arith.constant 0 : i32
    %c0_i32_1 = arith.constant 0 : i32
    return %c0_i32, %c0_i32_0 : i32, i32
  }
  func.func @transform_2(%arg0: i32) -> (i32, i32) {
    %c0_i32 = arith.constant 0 : i32
    %c0_i32_0 = arith.constant 0 : i32
    %c0_i32_1 = arith.constant 0 : i32
    return %c0_i32, %c0_i32_0 : i32, i32
  }
  func.func @transform_3(%arg0: i32) -> (i32, i32) {
    %c0_i32 = arith.constant 0 : i32
    %c0_i32_0 = arith.constant 0 : i32
    %c0_i32_1 = arith.constant 0 : i32
    return %c0_i32, %c0_i32_0 : i32, i32
  }
  func.func @transform_4(%arg0: i32) -> (i32, i32, i32) {
    %c0_i32 = arith.constant 0 : i32
    %c0_i32_0 = arith.constant 0 : i32
    %c0_i32_1 = arith.constant 0 : i32
    %c0_i32_2 = arith.constant 0 : i32
    return %c0_i32, %c0_i32_0, %c0_i32_1 : i32, i32, i32
  }
  func.func @transform_5(%arg0: i32) -> (i32, i32, i32) {
    %c0_i32 = arith.constant 0 : i32
    %c0_i32_0 = arith.constant 0 : i32
    %c0_i32_1 = arith.constant 0 : i32
    return %arg0, %c0_i32, %c0_i32_0 : i32, i32, i32
  }
}

</mosaic_0001>

<bundles_post_ra>
// kernel: tpu_custom_call.1
= control target key start
LH: loop header
LB: loop body
LE: loop exit
PB: predicated region body
PF: predicated region fallthrough
CT: control target
= control target key end

     0   :  { %10 = vsyncpa [#allocation3], 0  ;;  %s8809_s0 = inlined_call_operand.hbm [shape: f32[2,32,256], index: 0, kind: input, shape index: {}]   ;;  %s8810_s1 = inlined_call_operand.hbm [shape: bf16[256,128], index: 1, kind: input, shape index: {}]   ;;  %s8811_s2 = inlined_call_operand.hbm [shape: bf16[2048,32], index: 2, kind: input, shape index: {}]   ;;  %s8812_s3 = inlined_call_operand.hbm [shape: f32[2048,128], index: 3, kind: input, shape index: {}]   ;;  %s8813_s4 = inlined_call_operand.hbm [shape: bf16[4,128,256], index: 4, kind: input, shape index: {}]   ;;  %s8814_s5 = inlined_call_operand.hbm [shape: f32[2,2080,256], index: 5, kind: output, shape index: {}]  }
   0x1   :  { %12 = vsyncpa [#allocation3 + $0x1], 0 }
   0x2   :  { %13 = vsyncpa [#allocation6], 0 }
   0x3   :  { %14 = vsyncpa [#allocation9], 0 }
   0x4   :  { %15 = vsyncpa [#allocation4], 0 }
   0x5   :  { %17 = vsyncpa [#allocation4 + $0x1], 0  ;;  %s7306_s18 = smov 0   ;;  %s7308_s19 = smov 0  }
   0x6   :  { %s7310_s20 = smov 0   ;;  %s7312_s21 = smov 0  }
   0x7 LB: > { %s7327_s22 = sadd.s32 4294967295, %s7259_s21   ;;  %s5915_s23 = sadd.s32 4294967294, %s7259_s21   ;;  %s7259_s21 = sphi %s7312_s21, %s8839_s21   ;;  %s7255_s20 = sphi %s7310_s20, %s8838_s20   ;;  %s7251_s19 = sphi %s7308_s19, %s8837_s19   ;;  %s7247_s18 = sphi %s7306_s18, %s8836_s18  }
   0x8   : > { %p43_p0 = scmp.ne.s32.totalorder %s7251_s19, %s7247_s18  ;;  %p8815_p1 = scmp.eq.s32.totalorder %s7327_s22, 0 }
   0x9   : > { %p157_p3 = scmp.eq.s32.totalorder %s5915_s23, 1  ;;  %p5916_p5 = scmp.ge.s32.totalorder %s7259_s21, 1 }
   0xa   : > { %p7336_p4 = por %p8815_p1, %p43_p0  ;;  %p164_p7 = scmp.lt.s32.totalorder %s7259_s21, 3 }
   0xb   : > { %p7341_p6 = por %p157_p3, %p43_p0  ;;  %s7261_s27 = smov [#allocation5]  }
   0xc   : > { %s8819_s24 = scalar_select %p7336_p4, 1, 0 }
   0xd   : > { %s8820_s25 = scalar_select %p7341_p6, 1, 0 }
   0xe   : > { %p7346_p8 = pnand %p5916_p5, %p164_p7  ;;  %s176_s28 = sshll.u32 %s7261_s27, 4  ;;  %s7350_s28 = int_to_ptr.vmem [resolvable:$true] %s176_s28 }
   0xf   : > { %s7262_s30 = smov [#allocation8]   ;;  %s7043_s9 = scalar_lea.hbm %s8810_s1, 2048 }
  0x10   : > { %s8821_s26 = scalar_select %p7346_p8, 1, 0 }
  0x11   : > { %p6727_p9 = pneg %p7346_p8  ;;  %s202_s6 = sshll.u32 %s7262_s30, 4  ;;  %s7361_s6 = int_to_ptr.vmem [resolvable:$true] %s202_s6 }
  0x12   : > { %p7044_p12 = scmp.ne.s32.totalorder %s8810_s1, %s7043_s9  ;;  %p7050_p5 = scmp.lt.u32.totalorder %s7043_s9, %s8810_s1 }
  0x13   : > { %p7357_p11 = pnand %p6727_p9, %p8815_p1 }
  0x15   : > { %p7371_p13 = pneg %p7357_p11 }
  0x17   : > { %p7046_p0 = pnand %p7371_p13, %p7044_p12 }
  0x19   : > { %p7047_p3 = pneg %p7046_p0 }
  0x1b   : > { %p7052_p7 = pnand %p7050_p5, %p7047_p3 }
  0x1d   : > { %7055 = shalt.err (!%p7052_p7)
}
  0x1e   : > { %s7056_s15 = scalar_lea.vmem %s7350_s28, 2048  ;;  %p7064_p2 = scmp.lt.s32.totalorder %s7350_s28, %s7350_s28 }
  0x1f   : > { %p7057_p9 = scmp.ne.s32.totalorder %s7350_s28, %s7056_s15  ;;  %p7065_p6 = scmp.lt.s32.totalorder %s7056_s15, %s7056_s15 }
  0x21   : > { %p7059_p10 = pnand %p7057_p9, %p7371_p13  ;;  %p7066_p12 = por %p7065_p6, %p7064_p2 }
  0x23   : > { %p7060_p1 = pneg %p7059_p10 }
  0x25   : > { %p7067_p0 = pnand %p7066_p12, %p7060_p1 }
  0x27   : > { %7070 = shalt.err (!%p7067_p0)
}
  0x28   : > { %s8816_s16 = smov 64   ;;  %s7264_s17 = smov 4  }
  0x29   : > { %6730 = dma.hbm_to_vmem [thread:$0]  (!%p7357_p11), %s8810_s1, 2048, %s7350_s28, [#allocation6], %s8816_s16, %s8816_s16, %s7264_s17  }
  0x2a   : > { %s7071_s8 = scalar_lea.hbm %s8812_s3, 32768 }
  0x2b   : > { %p7072_p1 = scmp.ne.s32.totalorder %s8812_s3, %s7071_s8  ;;  %p7078_p10 = scmp.lt.u32.totalorder %s7071_s8, %s8812_s3 }
  0x2d   : > { %p7074_p2 = pnand %p7072_p1, %p7371_p13 }
  0x2f   : > { %p7075_p6 = pneg %p7074_p2 }
  0x31   : > { %p7080_p3 = pnand %p7078_p10, %p7075_p6 }
  0x33   : > { %7083 = shalt.err (!%p7080_p3)
}
  0x34   : > { %s7084_s28 = scalar_lea.vmem %s7361_s6, 32768  ;;  %p7092_p12 = scmp.lt.s32.totalorder %s7361_s6, %s7361_s6 }
  0x35   : > { %p7085_p5 = scmp.ne.s32.totalorder %s7361_s6, %s7084_s28  ;;  %p7093_p0 = scmp.lt.s32.totalorder %s7084_s28, %s7084_s28 }
  0x37   : > { %p7087_p7 = pnand %p7085_p5, %p7371_p13  ;;  %p7094_p1 = por %p7093_p0, %p7092_p12 }
  0x39   : > { %p7088_p9 = pneg %p7087_p7 }
  0x3b   : > { %p7095_p2 = pnand %p7094_p1, %p7088_p9 }
  0x3d   : > { %7098 = shalt.err (!%p7095_p2)
}
  0x3e   : > { %s7265_s14 = smov 128   ;;  %s7266_s15 = smov 8  }
  0x3f   : > { %6736 = dma.hbm_to_vmem [thread:$0]  (!%p7357_p11), %s8812_s3, 32768, %s7361_s6, [#allocation9], %s7265_s14, %s7265_s14, %s7266_s15  }
  0x40   : > { %s7267_s30 = smov [#allocation7]   ;;  %s7268_s8 = smov [#allocation10]  }
  0x41   : > { %s189_s7 = sshll.u32 %s7267_s30, 4  ;;  %s215_s9 = sshll.u32 %s7268_s8, 4  ;;  %s190_s7 = int_to_ptr.vmem [resolvable:$true] %s189_s7  ;;  %s7421_s9 = int_to_ptr.vmem [resolvable:$true] %s215_s9 }
  0x42   : > { %s7099_s13 = scalar_lea.hbm %s8811_s2, 16384 }
  0x43   : > { %p7100_p6 = scmp.ne.s32.totalorder %s8811_s2, %s7099_s13  ;;  %p7106_p5 = scmp.lt.u32.totalorder %s7099_s13, %s8811_s2 }
  0x45   : > { %p7102_p10 = pnand %p7100_p6, %p7371_p13 }
  0x47   : > { %p7103_p3 = pneg %p7102_p10 }
  0x49   : > { %p7108_p7 = pnand %p7106_p5, %p7103_p3 }
  0x4b   : > { %7111 = shalt.err (!%p7108_p7)
}
  0x4c   : > { %s7112_s27 = scalar_lea.vmem %s190_s7, 16384  ;;  %p7120_p1 = scmp.lt.s32.totalorder %s190_s7, %s190_s7 }
  0x4d   : > { %p7113_p9 = scmp.ne.s32.totalorder %s190_s7, %s7112_s27  ;;  %p7121_p2 = scmp.lt.s32.totalorder %s7112_s27, %s7112_s27 }
  0x4f   : > { %p7115_p12 = pnand %p7113_p9, %p7371_p13  ;;  %p7122_p4 = por %p7121_p2, %p7120_p1 }
  0x51   : > { %p7116_p0 = pneg %p7115_p12 }
  0x53   : > { %p7123_p8 = pnand %p7122_p4, %p7116_p0 }
  0x55   : > { %7126 = shalt.err (!%p7123_p8)
}
  0x56   : > { %s8824_s16 = smov 64   ;;  %s7127_s13 = scalar_lea.hbm %s8813_s4, 8192 }
  0x57   : > { %6733 = dma.hbm_to_vmem [thread:$0]  (!%p7357_p11), %s8811_s2, 16384, %s190_s7, [#allocation6], %s8824_s16, %s8824_s16, %s7264_s17  }
  0x58   : > { %p7128_p6 = scmp.ne.s32.totalorder %s8813_s4, %s7127_s13  ;;  %p7134_p10 = scmp.lt.u32.totalorder %s7127_s13, %s8813_s4 }
  0x5a   : > { %p7130_p4 = pnand %p7128_p6, %p7371_p13 }
  0x5c   : > { %p7131_p8 = pneg %p7130_p4 }
  0x5e   : > { %p7136_p3 = pnand %p7134_p10, %p7131_p8 }
  0x60   : > { %7139 = shalt.err (!%p7136_p3)
}
  0x61   : > { %s7140_s17 = scalar_lea.vmem %s7421_s9, 8192  ;;  %p7148_p12 = scmp.lt.s32.totalorder %s7421_s9, %s7421_s9 }
  0x62   : > { %p7141_p5 = scmp.ne.s32.totalorder %s7421_s9, %s7140_s17  ;;  %p7149_p0 = scmp.lt.s32.totalorder %s7140_s17, %s7140_s17 }
  0x64   : > { %p7143_p7 = pnand %p7141_p5, %p7371_p13  ;;  %p7150_p1 = por %p7149_p0, %p7148_p12 }
  0x66   : > { %p7144_p9 = pneg %p7143_p7 }
  0x68   : > { %p7151_p2 = pnand %p7150_p1, %p7144_p9 }
  0x6a   : > { %7154 = shalt.err (!%p7151_p2)
}
  0x6b   : > { %6739 = dma.hbm_to_vmem [thread:$0]  (!%p7357_p11), %s8813_s4, 8192, %s7421_s9, [#allocation9], %s7265_s14, %s7265_s14, %s7266_s15  }
  0x6c   : > { %s7471_s29 = sadd.s32 1, %s7259_s21   ;;  %s30_s30 = sadd.s32 1, %s7255_s20 }
  0x6d   : > { %s27_s12 = ssub.s32 %s7259_s21, %s7471_s29  ;;  %p37_p6 = scmp.ne.s32.totalorder %s7255_s20, %s7251_s19 }
  0x6e   : > { %p28_p13 = scmp.eq.s32.totalorder %s27_s12, 0  ;;  %p38_p4 = scmp.eq.s32.totalorder %s7259_s21, 0 }
  0x6f   : > { %p8825_p10 = scmp.eq.s32.totalorder %s7327_s22, 1  ;;  %p6752_p5 = scmp.lt.s32.totalorder %s7259_s21, 2 }
  0x70   : > { %s7480_s8 = scalar_select %p28_p13, %s7255_s20, %s30_s30  }
  0x71   : > { %p39_p8 = por %p38_p4, %p37_p6  ;;  %p7484_p3 = por %p8825_p10, %p37_p6 }
  0x72   : > { %s229_s11 = sand.u32 1, %s7255_s20   ;;  %s6270_s14 = sshll.u32 %s7259_s21, 10 }
  0x73   : > { %s5922_s13 = sshll.u32 %s229_s11, 6  ;;  %s7494_s28 = scalar_lea.hbm %s8809_s0, %s6270_s14 }
  0x74   : > { %s233_s23 = scalar_lea.vmem [#allocation2], %s5922_s13  ;;  %p7498_p11 = pnand %p6752_p5, %p39_p8 }
  0x75   : > { %s240_s6 = sshll.u32 %s233_s23, 4  ;;  %s7502_s17 = scalar_lea.sflag [#allocation3], %s229_s11  ;;  %s7496_s6 = int_to_ptr.vmem [resolvable:$true] %s240_s6 }
  0x76   : > { %s7155_s7 = scalar_lea.hbm %s7494_s28, 1024  ;;  %p7157_p9 = pneg %p7498_p11 }
  0x77   : > { %p7156_p7 = scmp.ne.s32.totalorder %s7494_s28, %s7155_s7  ;;  %s7160_s30 = scalar_lea.hbm %s8809_s0, 2048 }
  0x78   : > { %p7161_p1 = scmp.lt.u32.totalorder %s7494_s28, %s8809_s0  ;;  %p7162_p2 = scmp.lt.u32.totalorder %s7160_s30, %s7155_s7 }
  0x79   : > { %p7158_p12 = pnand %p7157_p9, %p7156_p7  ;;  %p7164_p6 = scmp.lt.u32.totalorder %s7155_s7, %s7494_s28 }
  0x7a   : > { %p7163_p13 = por %p7162_p2, %p7161_p1 }
  0x7b   : > { %p7159_p0 = pneg %p7158_p12 }
  0x7c   : > { %p7165_p4 = por %p7164_p6, %p7163_p13 }
  0x7e   : > { %p7166_p8 = pnand %p7165_p4, %p7159_p0 }
  0x80   : > { %7169 = shalt.err (!%p7166_p8)
}
  0x81   : > { %s7170_s11 = scalar_lea.vmem %s7496_s6, 1024  ;;  %s7269_s15 = smov [#allocation2]  }
  0x82   : > { %p7171_p10 = scmp.ne.s32.totalorder %s7496_s6, %s7170_s11  ;;  %s7175_s9 = sshll.u32 %s7269_s15, 4  ;;  %s7176_s9 = int_to_ptr.vmem [resolvable:$false] %s7175_s9 }
  0x83   : > { %s7177_s23 = scalar_lea.vmem %s7176_s9, 2048  ;;  %p7178_p12 = scmp.lt.s32.totalorder %s7496_s6, %s7176_s9 }
  0x84   : > { %p7173_p5 = pnand %p7171_p10, %p7157_p9  ;;  %p7179_p1 = scmp.lt.s32.totalorder %s7177_s23, %s7170_s11 }
  0x86   : > { %p7174_p7 = pneg %p7173_p5  ;;  %p7180_p2 = por %p7179_p1, %p7178_p12 }
  0x88   : > { %p7181_p13 = pnand %p7180_p2, %p7174_p7 }
  0x8a   : > { %7184 = shalt.err (!%p7181_p13)
}
  0x8b   : > { %s7270_s7 = smov 256   ;;  %s7271_s16 = smov 16  }
  0x8c   : > { %6743 = dma.hbm_to_vmem [thread:$0]  (!%p7498_p11), %s7494_s28, 1024, %s7496_s6, %s7502_s17, %s7270_s7, %s7270_s7, %s7271_s16  }
  0x8d   : > { %p8828_p9 = scmp.ne.s32.totalorder %s8821_s26, 0 }
  0x8e   : > { %s7533_s12 = sand.u32 (!%p8828_p9), 1, %s7251_s19   ;;  %p8829_p0 = scmp.ne.s32.totalorder (!%p8828_p9), %s8819_s24, 0 }
  0x8f   : > { %252 = sbr.rel (%p8828_p9) target bundleno = 1609 (0x649), region = 40  ;;  %s5926_s30 = sshll.u32 (!%p8828_p9), %s7533_s12, 6 }
  0x90   : > { %s255_s13 = scalar_lea.sflag (!%p8828_p9), [#allocation3], %s7533_s12  ;;  %s7537_s14 = scalar_lea.vmem (!%p8828_p9), [#allocation2], %s5926_s30 }
  0x96   : > { %7230 = dma.done.wait (%p8829_p0), %s255_s13, 1024  }
  0x97   : > { %7232 = vsyncadd (%p8829_p0), %s255_s13, 4294966272  ;;  %p8830_p11 = scmp.eq.s32.totalorder %s7327_s22, 0 }
  0x99   : > { %7234 = dma.done.wait (%p8830_p11), [#allocation6], 18432   ;;  %p8831_p6 = pmov %p8830_p11 }
  0x9b   : > { %7236 = vsyncadd (%p8831_p6), [#allocation6], 4294948864  ;;  %p8832_p4 = pmov %p8831_p6 }
  0x9d   : > { %7238 = dma.done.wait (%p8832_p4), [#allocation9], 40960   ;;  %p8833_p8 = pmov %p8832_p4 }
  0x9e   : > { %v6803_v0 = vld [vmem:[#allocation5 + $0x40] sm:$0xff]   ;;  %v6805_v2 = vld [vmem:[#allocation5 + $0x48] sm:$0xff]   ;;  %v6807_v4 = vld [vmem:[#allocation5 + $0x50] sm:$0xff]   ;;  %s6705_s24 = smul.u32 4160, %s7533_s12  ;;  %vm1653_vm0 = vcmask 261120   ;;  %s7273_s9 = smov [#allocation11]  }
  0x9f   : > { %7240 = vsyncadd (%p8833_p8), [#allocation9], 4294926336  ;;  %v6804_v1 = vld [vmem:[#allocation5] sm:$0xff]   ;;  %6271 = vmatprep.subr.bf16.mxu0 %v6803_v0  ;;  %v6806_v3 = vld [vmem:[#allocation5 + $0x8] sm:$0xff]   ;;  %s6706_s28 = smul.u32 66560, %s7327_s22  ;;  %s5791_s22 = scalar_lea.sflag [#allocation4], %s7533_s12 }
  0xa0   : > { %6272 = vmatpush3.bf16.msra.mxu0 %v6804_v1  ;;  %v6808_v5 = vld [vmem:[#allocation5 + $0x10] sm:$0xff]   ;;  %v6809_v6 = vld [vmem:[#allocation5 + $0x58] sm:$0xff]   ;;  %v6811_v8 = vld [vmem:[#allocation5 + $0x60] sm:$0xff]   ;;  %s7555_s26 = scalar_lea.vmem [#allocation11], %s6705_s24  ;;  %s7189_s23 = sshll.u32 %s7273_s9, 4  ;;  %s7190_s23 = int_to_ptr.vmem [resolvable:$false] %s7189_s23 }
  0xa1   : > { %6273 = vmatprep.subr.bf16.mxu0 %v6805_v2  ;;  %v6810_v7 = vld [vmem:[#allocation5 + $0x18] sm:$0xff]   ;;  %v6812_v9 = vld [vmem:[#allocation5 + $0x20] sm:$0xff]   ;;  %v6813_v10 = vld [vmem:[#allocation5 + $0x68] sm:$0xff]   ;;  %s5804_s6 = sshll.u32 %s7555_s26, 4  ;;  %s8760_s11 = scalar_lea.hbm %s8814_s5, %s6706_s28  ;;  %s8762_s6 = int_to_ptr.vmem [resolvable:$true] %s5804_s6 }
  0xa2   : > { %v303_v11 = vld [vmem:[%s7537_s14 + $0x8] sm:$0xff]  ;;  %v305_v12 = vld [vmem:[%s7537_s14 + $0x18] sm:$0xff]  ;;  %v302_v13 = vld [vmem:[%s7537_s14] sm:$0xff]  ;;  %s7185_s15 = scalar_lea.vmem %s8762_s6, 66560  ;;  %s7191_s7 = scalar_lea.vmem %s7190_s23, 133120 }
  0xa3   : > { %v6814_v14 = vld [vmem:[#allocation5 + $0x28] sm:$0xff]   ;;  %311 = vst [vmem:[%s7555_s26 + $0x8] sm:$0xff] %v303_v11  ;;  %313 = vst [vmem:[%s7555_s26 + $0x18] sm:$0xff] %v305_v12  ;;  %v319_v15 = vpack.c.bf16 %v305_v12, %v303_v11  ;;  %v304_v16 = vld [vmem:[%s7537_s14 + $0x10] sm:$0xff]  ;;  %p7186_p10 = scmp.ne.s32.totalorder %s8762_s6, %s7185_s15  ;;  %p7192_p12 = scmp.lt.s32.totalorder %s8762_s6, %s7190_s23 }
  0xa4   : > { %6274 = vmatpush3.bf16.msra.mxu0 %v6806_v3  ;;  %310 = vst [vmem:[%s7555_s26] sm:$0xff] %v302_v13  ;;  %v307_v17 = vld [vmem:[%s7537_s14 + $0x28] sm:$0xff]  ;;  %v309_v18 = vld [vmem:[%s7537_s14 + $0x38] sm:$0xff]  ;;  %v6815_v19 = vld [vmem:[#allocation5 + $0x70] sm:$0xff]   ;;  %v318_v25 = vpack.c.bf16 %v304_v16, %v302_v13  ;;  %p7193_p1 = scmp.lt.s32.totalorder %s7191_s7, %s7185_s15 }
  0xa5   : > { %6275 = vmatprep.subr.bf16.mxu0 %v6807_v4  ;;  %312 = vst [vmem:[%s7555_s26 + $0x10] sm:$0xff] %v304_v16  ;;  %315 = vst [vmem:[%s7555_s26 + $0x28] sm:$0xff] %v307_v17  ;;  %v306_v20 = vld [vmem:[%s7537_s14 + $0x20] sm:$0xff]  ;;  %v308_v21 = vld [vmem:[%s7537_s14 + $0x30] sm:$0xff]  ;;  %482 = vmatprep.mubr.bf16.mxu0 %v319_v15  ;;  %v321_v26 = vpack.c.bf16 %v309_v18, %v307_v17  ;;  %p7187_p5 = pnand %p7186_p10, %p7484_p3 }
  0xa6   : > { %317 = vst [vmem:[%s7555_s26 + $0x38] sm:$0xff] %v309_v18  ;;  %314 = vst [vmem:[%s7555_s26 + $0x20] sm:$0xff] %v306_v20  ;;  %v6816_v22 = vld [vmem:[#allocation5 + $0x30] sm:$0xff]   ;;  %v6817_v23 = vld [vmem:[#allocation5 + $0x78] sm:$0xff]   ;;  %v320_v27 = vpack.c.bf16 %v308_v21, %v306_v20  ;;  %p7194_p2 = por %p7193_p1, %p7192_p12 }
  0xa7   : > { %316 = vst [vmem:[%s7555_s26 + $0x30] sm:$0xff] %v308_v21  ;;  %v6818_v24 = vld [vmem:[#allocation5 + $0x38] sm:$0xff]   ;;  %v6819_v28 = vld [vmem:[#allocation7] sm:$0xff]   ;;  %v6820_v43 = vld [vmem:[#allocation7 + $0x8] sm:$0xff]   ;;  %p7188_p7 = pneg %p7187_p5 }
  0xa8   : > { %6276 = vmatpush3.bf16.msra.mxu0 %v6808_v5  ;;  %6433 = vmatprep.mubr.msk.bf16.mxu1 %vm1653_vm0, %v6819_v28  ;;  %v6821_v44 = vld [vmem:[#allocation7 + $0x10] sm:$0xff]   ;;  %v6822_v45 = vld [vmem:[#allocation7 + $0x18] sm:$0xff]   ;;  %v6823_v46 = vld [vmem:[#allocation7 + $0x20] sm:$0xff]  }
  0xa9   : > { %6277 = vmatprep.subr.bf16.mxu0 %v6809_v6  ;;  %v6824_v47 = vld [vmem:[#allocation7 + $0x28] sm:$0xff]   ;;  %v6825_v48 = vld [vmem:[#allocation7 + $0x30] sm:$0xff]   ;;  %v6826_v49 = vld [vmem:[#allocation7 + $0x38] sm:$0xff]   ;;  %p7195_p13 = pnand %p7194_p2, %p7188_p7 }
  0xaa   : > { %v6827_v50 = vld [vmem:[#allocation7 + $0x40] sm:$0xff]   ;;  %v6828_v51 = vld [vmem:[#allocation7 + $0x48] sm:$0xff]   ;;  %v6829_v52 = vld [vmem:[#allocation7 + $0x50] sm:$0xff]  }
  0xab   : > { %v6830_v53 = vld [vmem:[#allocation7 + $0x58] sm:$0xff]   ;;  %v6831_v54 = vld [vmem:[#allocation7 + $0x60] sm:$0xff]   ;;  %v6832_v57 = vld [vmem:[#allocation7 + $0x68] sm:$0xff]  }
  0xac   : > { %6278 = vmatpush3.bf16.msra.mxu0 %v6810_v7  ;;  %v6863_v55 = vld [vmem:[#allocation10 + $0x100] ss:$8 sps:$4 sm:$0xff]   ;;  %v6865_v56 = vld [vmem:[#allocation10 + $0x104] ss:$8 sps:$4 sm:$0xff]   ;;  %v6833_v58 = vld [vmem:[#allocation7 + $0x70] sm:$0xff]  }
  0xad   : > { %6279 = vmatprep.subr.bf16.mxu0 %v6811_v8  ;;  %v6834_v59 = vld [vmem:[#allocation7 + $0x78] sm:$0xff]   ;;  %v6835_v60 = vld [vmem:[#allocation7 + $0x80] sm:$0xff]   ;;  %v6836_v63 = vld [vmem:[#allocation7 + $0x88] sm:$0xff]  }
  0xae   : > { %v6870_v61 = vld [vmem:[#allocation10] ss:$8 sps:$4 sm:$0xff]   ;;  %v6872_v62 = vld [vmem:[#allocation10 + $0x4] ss:$8 sps:$4 sm:$0xff]   ;;  %v6837_v0 = vld [vmem:[#allocation7 + $0x90] sm:$0xff]  }
  0xaf   : > { %v6877_v1 = vld [vmem:[#allocation10 + $0x14] ss:$8 sps:$4 sm:$0xff]   ;;  %v6875_v2 = vld [vmem:[#allocation10 + $0x10] ss:$8 sps:$4 sm:$0xff]   ;;  %v6880_v3 = vld [vmem:[#allocation10 + $0x24] ss:$8 sps:$4 sm:$0xff]  }
  0xb0   : > { %6280 = vmatpush3.bf16.msra.mxu0 %v6812_v9  ;;  %v6878_v4 = vld [vmem:[#allocation10 + $0x20] ss:$8 sps:$4 sm:$0xff]   ;;  %v6838_v5 = vld [vmem:[#allocation7 + $0x98] sm:$0xff]   ;;  %v6888_v9 = vld [vmem:[#allocation10 + $0x44] ss:$8 sps:$4 sm:$0xff]  }
  0xb1   : > { %6281 = vmatprep.subr.bf16.mxu0 %v6813_v10  ;;  %v6839_v6 = vld [vmem:[#allocation7 + $0xa0] sm:$0xff]   ;;  %v6885_v7 = vld [vmem:[#allocation10 + $0x34] ss:$8 sps:$4 sm:$0xff]   ;;  %v6883_v8 = vld [vmem:[#allocation10 + $0x30] ss:$8 sps:$4 sm:$0xff]  }
  0xb2   : > { %v6886_v10 = vld [vmem:[#allocation10 + $0x40] ss:$8 sps:$4 sm:$0xff]   ;;  %v6841_v12 = vld [vmem:[#allocation7 + $0xb0] sm:$0xff]   ;;  %v6896_v15 = vld [vmem:[#allocation10 + $0x64] ss:$8 sps:$4 sm:$0xff]  }
  0xb3   : > { %v6840_v11 = vld [vmem:[#allocation7 + $0xa8] sm:$0xff]   ;;  %v6893_v13 = vld [vmem:[#allocation10 + $0x54] ss:$8 sps:$4 sm:$0xff]   ;;  %v6843_v18 = vld [vmem:[#allocation7 + $0xc0] sm:$0xff]  }
  0xb4   : > { %6282 = vmatpush3.bf16.msra.mxu0 %v6814_v14  ;;  %v6891_v14 = vld [vmem:[#allocation10 + $0x50] ss:$8 sps:$4 sm:$0xff]   ;;  %v6894_v17 = vld [vmem:[#allocation10 + $0x60] ss:$8 sps:$4 sm:$0xff]   ;;  %v6904_v21 = vld [vmem:[#allocation10 + $0x84] ss:$8 sps:$4 sm:$0xff]  }
  0xb5   : > { %6283 = vmatprep.subr.bf16.mxu0 %v6815_v19  ;;  %v6842_v16 = vld [vmem:[#allocation7 + $0xb8] sm:$0xff]  }
  0xb6   : > { %v6901_v19 = vld [vmem:[#allocation10 + $0x74] ss:$8 sps:$4 sm:$0xff]   ;;  %v6899_v20 = vld [vmem:[#allocation10 + $0x70] ss:$8 sps:$4 sm:$0xff]  }
  0xb7   : > { %v6911_v28 = vld [vmem:[#allocation10 + $0x114] ss:$8 sps:$4 sm:$0xff]  }
  0xb8   : > { %6284 = vmatpush3.bf16.msra.mxu0 %v6816_v22  ;;  %v6844_v22 = vld [vmem:[#allocation7 + $0xc8] sm:$0xff]  }
  0xb9   : > { %6285 = vmatprep.subr.bf16.mxu0 %v6817_v23  ;;  %v7272_v23 = vmov 0  }
  0xbc   : > { %6286 = vmatpush3.bf16.msra.mxu0 %v6818_v24  ;;  %v6845_v24 = vld [vmem:[#allocation7 + $0xd0] sm:$0xff]  }
  0xbd   : > { %3575 = vmatprep.subr.bf16.mxu0 %v6872_v62 }
  0xbf   : > { %483 = vmatmul.mubr.bf16.vlgmr.msra.gmra.mrb[0].mxu0 %v318_v25  ;;  %v6846_v25 = vld [vmem:[#allocation7 + $0xd8] sm:$0xff]  }
  0xc0   : > { %490 = vmatprep.mubr.bf16.mxu0 %v321_v26  ;;  %3576 = vmatpush1.bf16.msra.mxu0 %v6870_v61  ;;  %v6847_v26 = vld [vmem:[#allocation7 + $0xe0] sm:$0xff]  }
  0xc1   : > { %3577 = vmatprep.subr.bf16.mxu0 %v6877_v1 }
  0xc4   : > { %3578 = vmatpush1.bf16.msra.mxu0 %v6875_v2 }
  0xc5   : > { %3579 = vmatprep.subr.bf16.mxu0 %v6880_v3  ;;  %v6905_v3 = vld [vmem:[#allocation7 + $0x1c0] sm:$0xff]  }
  0xc7   : > { %491 = vmatmul.mubr.bf16.gmra.mrb[4].mxu0 %v320_v27  ;;  %v6909_v27 = vld [vmem:[#allocation10 + $0x110] ss:$8 sps:$4 sm:$0xff]  }
  0xc8   : > { %3580 = vmatpush1.bf16.msra.mxu0 %v6878_v4  ;;  %3607 = vmatprep.mubr.bf16.mxu0 %v7272_v23 }
  0xc9   : > { %3581 = vmatprep.subr.bf16.mxu0 %v6885_v7 }
  0xcc   : > { %3582 = vmatpush1.bf16.msra.mxu0 %v6883_v8 }
  0xcd   : > { %3583 = vmatprep.subr.bf16.mxu0 %v6888_v9 }
  0xd0   : > { %3584 = vmatpush1.bf16.msra.mxu0 %v6886_v10 }
  0xd1   : > { %3585 = vmatprep.subr.bf16.mxu0 %v6893_v13  ;;  %v761_v13 = vld [vmem:[#allocation8 + $0x20] sm:$0xff] }
  0xd4   : > { %3586 = vmatpush1.bf16.msra.mxu0 %v6891_v14 }
  0xd5   : > { %3587 = vmatprep.subr.bf16.mxu0 %v6896_v15 }
  0xd8   : > { %3588 = vmatpush1.bf16.msra.mxu0 %v6894_v17  ;;  %v764_v17 = vld [vmem:[#allocation8 + $0x38] sm:$0xff] }
  0xd9   : > { %3589 = vmatprep.subr.bf16.mxu0 %v6901_v19 }
  0xdc   : > { %3590 = vmatpush1.bf16.msra.mxu0 %v6899_v20  ;;  %v6906_v20 = vld [vmem:[#allocation7 + $0x1c8] sm:$0xff]  }
  0xdd   : > { %4153 = vmatprep.subr.bf16.mxu0 %v6904_v21 }
 0x192   : > { %v6287_v29 = vpop.f32.mrb[0].mxu0 }
 0x193   : > { %v6288_v30 = vpop.f32.mrb[1].mxu0 }
 0x194   : > { %v6290_v31 = vpop.f32.mrb[2].mxu0  ;;  %v6289_v32 = vadd.f32 %v6288_v30, %v6287_v29  ;;  %v6848_v29 = vld [vmem:[#allocation7 + $0xe8] sm:$0xff]   ;;  %v6849_v30 = vld [vmem:[#allocation7 + $0xf0] sm:$0xff]  }
 0x195   : > { %v6291_v33 = vpop.f32.mrb[3].mxu0 }
 0x196   : > { %v6292_v34 = vadd.f32 %v6291_v33, %v6290_v31  ;;  %v6850_v31 = vld [vmem:[#allocation7 + $0xf8] sm:$0xff]   ;;  %v6852_v33 = vld [vmem:[#allocation7 + $0x108] sm:$0xff]  }
 0x198   : > { %v755_v35 = vpack.c.bf16 %v6292_v34, %v6289_v32  ;;  %v6851_v32 = vld [vmem:[#allocation7 + $0x100] sm:$0xff]   ;;  %v6853_v34 = vld [vmem:[#allocation7 + $0x110] sm:$0xff]  }
 0x19a   : > { %v6293_v36 = vpop.f32.mrb[4].mxu0  ;;  %6429 = vmatprep.subr.bf16.mxu1 %v755_v35 }
 0x19b   : > { %v6294_v37 = vpop.f32.mrb[5].mxu0  ;;  %6430 = vmatpush3.bf16.msra.mxu1 %v755_v35  ;;  %v6854_v35 = vld [vmem:[#allocation7 + $0x118] sm:$0xff]  }
 0x19c   : > { %v6295_v38 = vadd.f32 %v6294_v37, %v6293_v36  ;;  %v6296_v39 = vpop.f32.mrb[6].mxu0  ;;  %v6855_v36 = vld [vmem:[#allocation7 + $0x120] sm:$0xff]   ;;  %v6856_v37 = vld [vmem:[#allocation7 + $0x128] sm:$0xff]  }
 0x19d   : > { %v6297_v40 = vpop.f32.mrb[7].mxu0 }
 0x19e   : > { %v6298_v41 = vadd.f32 %v6297_v40, %v6296_v39  ;;  %v6858_v39 = vld [vmem:[#allocation7 + $0x138] sm:$0xff]   ;;  %v6859_v40 = vld [vmem:[#allocation7 + $0x140] sm:$0xff]  }
 0x1a0   : > { %v756_v42 = vpack.c.bf16 %v6298_v41, %v6295_v38  ;;  %v6857_v38 = vld [vmem:[#allocation7 + $0x130] sm:$0xff]   ;;  %v6860_v41 = vld [vmem:[#allocation7 + $0x148] sm:$0xff]  }
 0x1a2   : > { %6431 = vmatprep.subr.bf16.mxu1 %v756_v42 }
 0x1a3   : > { %6432 = vmatpush3.bf16.msra.mxu1 %v756_v42  ;;  %v6861_v42 = vld [vmem:[#allocation7 + $0x150] sm:$0xff]  }
 0x1a4   : > { %4731 = vmatprep.subr.bf16.mxu1 %v6865_v56  ;;  %v6897_v56 = vld [vmem:[#allocation7 + $0x1b0] sm:$0xff]  }
 0x1a6   : > { %6434 = vmatmul.mubr.msk.bf16.vlgmr.msra.gmra.mrb[0].mxu1 %vm1653_vm0, %v6820_v43  ;;  %v6862_v43 = vld [vmem:[#allocation7 + $0x158] sm:$0xff]  }
 0x1a7   : > { %6437 = vmatprep.mubr.msk.bf16.mxu1 %vm1653_vm0, %v6821_v44  ;;  %4732 = vmatpush1.bf16.msra.mxu1 %v6863_v55  ;;  %v6866_v44 = vld [vmem:[#allocation7 + $0x160] sm:$0xff]   ;;  %v6890_v55 = vld [vmem:[#allocation7 + $0x1a8] sm:$0xff]  }
 0x1a8   : > { %4733 = vmatprep.subr.bf16.mxu1 %v6911_v28 }
 0x1ab   : > { %4734 = vmatpush1.bf16.msra.mxu1 %v6909_v27 }
 0x1ae   : > { %6438 = vmatmul.mubr.msk.bf16.gmra.mrb[4].mxu1 %vm1653_vm0, %v6822_v45  ;;  %v6934_v45 = vld [vmem:[#allocation10 + $0x120] ss:$8 sps:$4 sm:$0xff]  }
 0x1af   : > { %6441 = vmatprep.mubr.msk.bf16.mxu1 %vm1653_vm0, %v6823_v46  ;;  %v6936_v46 = vld [vmem:[#allocation10 + $0x124] ss:$8 sps:$4 sm:$0xff]  }
 0x1b0   : > { %4735 = vmatprep.subr.bf16.mxu1 %v6936_v46 }
 0x1b1   : > { %4736 = vmatpush1.bf16.msra.mxu1 %v6934_v45 }
 0x1b6   : > { %6442 = vmatmul.mubr.msk.bf16.gmra.mrb[8].mxu1 %vm1653_vm0, %v6824_v47  ;;  %v6867_v47 = vld [vmem:[#allocation7 + $0x168] sm:$0xff]  }
 0x1b7   : > { %6445 = vmatprep.mubr.msk.bf16.mxu1 %vm1653_vm0, %v6825_v48  ;;  %v6868_v48 = vld [vmem:[#allocation7 + $0x170] sm:$0xff]  }
 0x1be   : > { %6446 = vmatmul.mubr.msk.bf16.gmra.mrb[12].mxu1 %vm1653_vm0, %v6826_v49  ;;  %v6869_v49 = vld [vmem:[#allocation7 + $0x178] sm:$0xff]  }
 0x1bf   : > { %6449 = vmatprep.mubr.msk.bf16.mxu1 %vm1653_vm0, %v6827_v50  ;;  %v6873_v50 = vld [vmem:[#allocation7 + $0x180] sm:$0xff]  }
 0x1c6   : > { %6450 = vmatmul.mubr.msk.bf16.gmra.mrb[16].mxu1 %vm1653_vm0, %v6828_v51  ;;  %v6874_v51 = vld [vmem:[#allocation7 + $0x188] sm:$0xff]  }
 0x1c7   : > { %6453 = vmatprep.mubr.msk.bf16.mxu1 %vm1653_vm0, %v6829_v52  ;;  %v6881_v52 = vld [vmem:[#allocation7 + $0x190] sm:$0xff]  }
 0x1ce   : > { %6454 = vmatmul.mubr.msk.bf16.gmra.mrb[20].mxu1 %vm1653_vm0, %v6830_v53  ;;  %v6882_v53 = vld [vmem:[#allocation7 + $0x198] sm:$0xff]  }
 0x1cf   : > { %6457 = vmatprep.mubr.msk.bf16.mxu1 %vm1653_vm0, %v6831_v54  ;;  %v6889_v54 = vld [vmem:[#allocation7 + $0x1a0] sm:$0xff]  }
 0x1d6   : > { %6458 = vmatmul.mubr.msk.bf16.gmra.mrb[24].mxu1 %vm1653_vm0, %v6832_v57  ;;  %v759_v57 = vld [vmem:[#allocation8 + $0x10] sm:$0xff] }
 0x1d7   : > { %6461 = vmatprep.mubr.msk.bf16.mxu1 %vm1653_vm0, %v6833_v58  ;;  %v757_v58 = vld [vmem:[#allocation8] sm:$0xff] }
 0x1de   : > { %6462 = vmatmul.mubr.msk.bf16.gmra.mrb[28].mxu1 %vm1653_vm0, %v6834_v59 }
 0x1df   : > { %6465 = vmatprep.mubr.msk.bf16.mxu1 %vm1653_vm0, %v6835_v60  ;;  %v760_v60 = vld [vmem:[#allocation8 + $0x18] sm:$0xff] }
 0x1e6   : > { %6466 = vmatmul.mubr.msk.bf16.gmra.mrb[32].mxu1 %vm1653_vm0, %v6836_v63  ;;  %v758_v63 = vld [vmem:[#allocation8 + $0x8] sm:$0xff] }
 0x1e7   : > { %6469 = vmatprep.mubr.msk.bf16.mxu1 %vm1653_vm0, %v6837_v0  ;;  %v6898_v0 = vld [vmem:[#allocation7 + $0x1b8] sm:$0xff]  }
 0x1ee   : > { %6470 = vmatmul.mubr.msk.bf16.gmra.mrb[36].mxu1 %vm1653_vm0, %v6838_v5 }
 0x1ef   : > { %6473 = vmatprep.mubr.msk.bf16.mxu1 %vm1653_vm0, %v6839_v6 }
 0x1f6   : > { %6474 = vmatmul.mubr.msk.bf16.gmra.mrb[40].mxu1 %vm1653_vm0, %v6840_v11  ;;  %v763_v11 = vld [vmem:[#allocation8 + $0x30] sm:$0xff] }
 0x1f7   : > { %6477 = vmatprep.mubr.msk.bf16.mxu1 %vm1653_vm0, %v6841_v12  ;;  %v6902_v12 = vld [vmem:[#allocation10 + $0x80] ss:$8 sps:$4 sm:$0xff]  }
 0x1fe   : > { %6478 = vmatmul.mubr.msk.bf16.gmra.mrb[44].mxu1 %vm1653_vm0, %v6842_v16 }
 0x1ff   : > { %6481 = vmatprep.mubr.msk.bf16.mxu1 %vm1653_vm0, %v6843_v18  ;;  %v6918_v18 = vld [vmem:[#allocation10 + $0x94] ss:$8 sps:$4 sm:$0xff]  }
 0x206   : > { %6482 = vmatmul.mubr.msk.bf16.gmra.mrb[48].mxu1 %vm1653_vm0, %v6844_v22  ;;  %v762_v22 = vld [vmem:[#allocation8 + $0x28] sm:$0xff] }
 0x207   : > { %6485 = vmatprep.mubr.msk.bf16.mxu1 %vm1653_vm0, %v6845_v24 }
 0x20e   : > { %6486 = vmatmul.mubr.msk.bf16.gmra.mrb[52].mxu1 %vm1653_vm0, %v6846_v25 }
 0x20f   : > { %6489 = vmatprep.mubr.msk.bf16.mxu1 %vm1653_vm0, %v6847_v26  ;;  %v6907_v26 = vld [vmem:[#allocation7 + $0x1d0] sm:$0xff]  }
 0x216   : > { %6490 = vmatmul.mubr.msk.bf16.gmra.mrb[56].mxu1 %vm1653_vm0, %v6848_v29 }
 0x217   : > { %6493 = vmatprep.mubr.msk.bf16.mxu1 %vm1653_vm0, %v6849_v30  ;;  %v6916_v30 = vld [vmem:[#allocation10 + $0x90] ss:$8 sps:$4 sm:$0xff]  }
 0x21e   : > { %6494 = vmatmul.mubr.msk.bf16.gmra.mrb[60].mxu1 %vm1653_vm0, %v6850_v31 }
 0x21f   : > { %6497 = vmatprep.mubr.msk.bf16.mxu1 %vm1653_vm0, %v6851_v32 }
 0x226   : > { %6498 = vmatmul.mubr.msk.bf16.gmra.mrb[64].mxu1 %vm1653_vm0, %v6852_v33  ;;  %v6929_v33 = vld [vmem:[#allocation10 + $0xa4] ss:$8 sps:$4 sm:$0xff]  }
 0x227   : > { %6501 = vmatprep.mubr.msk.bf16.mxu1 %vm1653_vm0, %v6853_v34 }
 0x22e   : > { %6502 = vmatmul.mubr.msk.bf16.gmra.mrb[68].mxu1 %vm1653_vm0, %v6854_v35 }
 0x22f   : > { %6505 = vmatprep.mubr.msk.bf16.mxu1 %vm1653_vm0, %v6855_v36  ;;  %v767_v36 = vld [vmem:[#allocation8 + $0x50] sm:$0xff] }
 0x236   : > { %6506 = vmatmul.mubr.msk.bf16.gmra.mrb[72].mxu1 %vm1653_vm0, %v6856_v37  ;;  %v765_v37 = vld [vmem:[#allocation8 + $0x40] sm:$0xff] }
 0x237   : > { %6509 = vmatprep.mubr.msk.bf16.mxu1 %vm1653_vm0, %v6857_v38 }
 0x23e   : > { %6510 = vmatmul.mubr.msk.bf16.gmra.mrb[76].mxu1 %vm1653_vm0, %v6858_v39  ;;  %v6927_v39 = vld [vmem:[#allocation10 + $0xa0] ss:$8 sps:$4 sm:$0xff]  }
 0x23f   : > { %6513 = vmatprep.mubr.msk.bf16.mxu1 %vm1653_vm0, %v6859_v40 }
 0x246   : > { %6514 = vmatmul.mubr.msk.bf16.gmra.mrb[80].mxu1 %vm1653_vm0, %v6860_v41 }
 0x247   : > { %6517 = vmatprep.mubr.msk.bf16.mxu1 %vm1653_vm0, %v6861_v42  ;;  %v768_v42 = vld [vmem:[#allocation8 + $0x58] sm:$0xff] }
 0x24e   : > { %6518 = vmatmul.mubr.msk.bf16.gmra.mrb[84].mxu1 %vm1653_vm0, %v6862_v43  ;;  %v6943_v43 = vld [vmem:[#allocation10 + $0xb4] ss:$8 sps:$4 sm:$0xff]  }
 0x24f   : > { %6521 = vmatprep.mubr.msk.bf16.mxu1 %vm1653_vm0, %v6866_v44  ;;  %v6908_v44 = vld [vmem:[#allocation7 + $0x1d8] sm:$0xff]  }
 0x256   : > { %6522 = vmatmul.mubr.msk.bf16.gmra.mrb[88].mxu1 %vm1653_vm0, %v6867_v47  ;;  %v766_v47 = vld [vmem:[#allocation8 + $0x48] sm:$0xff] }
 0x257   : > { %6525 = vmatprep.mubr.msk.bf16.mxu1 %vm1653_vm0, %v6868_v48  ;;  %v6912_v48 = vld [vmem:[#allocation7 + $0x1e0] sm:$0xff]  }
 0x25e   : > { %6526 = vmatmul.mubr.msk.bf16.gmra.mrb[92].mxu1 %vm1653_vm0, %v6869_v49 }
 0x25f   : > { %6529 = vmatprep.mubr.msk.bf16.mxu1 %vm1653_vm0, %v6873_v50 }
 0x266   : > { %6530 = vmatmul.mubr.msk.bf16.gmra.mrb[96].mxu1 %vm1653_vm0, %v6874_v51 }
 0x267   : > { %6533 = vmatprep.mubr.msk.bf16.mxu1 %vm1653_vm0, %v6881_v52 }
 0x26e   : > { %6534 = vmatmul.mubr.msk.bf16.gmra.mrb[100].mxu1 %vm1653_vm0, %v6882_v53 }
 0x26f   : > { %6537 = vmatprep.mubr.msk.bf16.mxu1 %vm1653_vm0, %v6889_v54  ;;  %v6941_v54 = vld [vmem:[#allocation10 + $0xb0] ss:$8 sps:$4 sm:$0xff]  }
 0x276   : > { %6538 = vmatmul.mubr.msk.bf16.gmra.mrb[104].mxu1 %vm1653_vm0, %v6890_v55 }
 0x277   : > { %6541 = vmatprep.mubr.msk.bf16.mxu1 %vm1653_vm0, %v6897_v56 }
 0x279   : > { %v6435_v59 = vpop.f32.mrb[0].mxu1 }
 0x27a   : > { %v2081_v61 = vadd.f32 %v6435_v59, %v759_v57  ;;  %v2072_v62 = vpop.f32.mrb[1].mxu1  ;;  %v6954_v57 = vld [vmem:[#allocation10 + $0xc4] ss:$8 sps:$4 sm:$0xff]   ;;  %v6959_v59 = vld [vmem:[#allocation10 + $0x130] ss:$8 sps:$4 sm:$0xff]  }
 0x27b   : > { %v2073_v1 = vadd.f32 %v2072_v62, %v757_v58  ;;  %v6436_v2 = vpop.f32.mrb[2].mxu1  ;;  %v771_v62 = vld [vmem:[#allocation8 + $0x70] sm:$0xff] }
 0x27c   : > { %v2084_v4 = vadd.f32 %v6436_v2, %v760_v60  ;;  %v2075_v5 = vpop.f32.mrb[3].mxu1  ;;  %v3097_v7 = vmax.f32 %v2081_v61, 0.0  ;;  %v6961_v60 = vld [vmem:[#allocation10 + $0x134] ss:$8 sps:$4 sm:$0xff]  }
 0x27d   : > { %v2076_v6 = vadd.f32 %v2075_v5, %v758_v63  ;;  %v3095_v9 = vmax.f32 %v2073_v1, 0.0  ;;  %v769_v63 = vld [vmem:[#allocation8 + $0x60] sm:$0xff]  ;;  %4737 = vmatprep.subr.bf16.mxu1 %v6961_v60  ;;  %v6913_v5 = vld [vmem:[#allocation7 + $0x1e8] sm:$0xff]  }
 0x27e   : > { %v3098_v8 = vmax.f32 %v2084_v4, 0.0  ;;  %6542 = vmatmul.mubr.msk.bf16.gmra.mrb[108].mxu1 %vm1653_vm0, %v6898_v0  ;;  %v6952_v1 = vld [vmem:[#allocation10 + $0xc0] ss:$8 sps:$4 sm:$0xff]   ;;  %v772_v4 = vld [vmem:[#allocation8 + $0x78] sm:$0xff] }
 0x27f   : > { %v3096_v10 = vmax.f32 %v2076_v6, 0.0  ;;  %6545 = vmatprep.mubr.msk.bf16.mxu1 %vm1653_vm0, %v6905_v3  ;;  %4738 = vmatpush1.bf16.msra.mxu1 %v6959_v59 }
 0x280   : > { %v3352_v14 = vpack.c.bf16 %v3098_v8, %v3097_v7  ;;  %v770_v8 = vld [vmem:[#allocation8 + $0x68] sm:$0xff] }
 0x281   : > { %v3351_v15 = vpack.c.bf16 %v3096_v10, %v3095_v9  ;;  %v6439_v16 = vpop.f32.mrb[4].mxu1  ;;  %v6914_v9 = vld [vmem:[#allocation7 + $0x1f0] sm:$0xff]  }
 0x282   : > { %v2097_v19 = vadd.f32 %v6439_v16, %v763_v11  ;;  %v2088_v21 = vpop.f32.mrb[5].mxu1 }
 0x283   : > { %3608 = vmatmul.mubr.bf16.vlgmr.msra.gmra.mrb[8].mxu0 %v3351_v15  ;;  %v2089_v24 = vadd.f32 %v2088_v21, %v761_v13  ;;  %v6440_v25 = vpop.f32.mrb[6].mxu1 }
 0x284   : > { %4154 = vmatpush1.bf16.msra.mxu0 %v6902_v12  ;;  %v3101_v27 = vmax.f32 %v2097_v19, 0.0  ;;  %v2100_v28 = vadd.f32 %v6440_v25, %v764_v17  ;;  %v2091_v29 = vpop.f32.mrb[7].mxu1  ;;  %3617 = vmatprep.mubr.bf16.mxu0 %v7272_v23  ;;  %v775_v19 = vld [vmem:[#allocation8 + $0x90] sm:$0xff]  ;;  %v776_v25 = vld [vmem:[#allocation8 + $0x98] sm:$0xff] }
 0x285   : > { %v3099_v31 = vmax.f32 %v2089_v24, 0.0  ;;  %v2092_v32 = vadd.f32 %v2091_v29, %v762_v22  ;;  %4155 = vmatprep.subr.bf16.mxu0 %v6918_v18  ;;  %v774_v29 = vld [vmem:[#allocation8 + $0x88] sm:$0xff] }
 0x286   : > { %6546 = vmatmul.mubr.msk.bf16.gmra.mrb[112].mxu1 %vm1653_vm0, %v6906_v20  ;;  %v3102_v34 = vmax.f32 %v2100_v28, 0.0  ;;  %v773_v20 = vld [vmem:[#allocation8 + $0x80] sm:$0xff] }
 0x287   : > { %v3100_v35 = vmax.f32 %v2092_v32, 0.0  ;;  %6549 = vmatprep.mubr.msk.bf16.mxu1 %vm1653_vm0, %v6907_v26  ;;  %v6915_v26 = vld [vmem:[#allocation7 + $0x1f8] sm:$0xff]  }
 0x288   : > { %v7631_v38 = vpack.c.bf16 %v3102_v34, %v3101_v27  ;;  %4156 = vmatpush1.bf16.msra.mxu0 %v6916_v30  ;;  %v6919_v30 = vld [vmem:[#allocation7 + $0x200] sm:$0xff]  }
 0x289   : > { %v3353_v40 = vpack.c.bf16 %v3100_v35, %v3099_v31  ;;  %v6443_v41 = vpop.f32.mrb[8].mxu1  ;;  %4157 = vmatprep.subr.bf16.mxu0 %v6929_v33 }
 0x28a   : > { %v2113_v45 = vadd.f32 %v6443_v41, %v767_v36  ;;  %v2104_v46 = vpop.f32.mrb[9].mxu1  ;;  %v6968_v41 = vld [vmem:[#allocation10 + $0xd4] ss:$8 sps:$4 sm:$0xff]  }
 0x28b   : > { %3618 = vmatmul.mubr.bf16.gmra.mrb[12].mxu0 %v3352_v14  ;;  %v2105_v49 = vadd.f32 %v2104_v46, %v765_v37  ;;  %v6444_v50 = vpop.f32.mrb[10].mxu1 }
 0x28c   : > { %3627 = vmatprep.mubr.bf16.mxu0 %v7272_v23  ;;  %v3105_v51 = vmax.f32 %v2113_v45, 0.0  ;;  %v2116_v52 = vadd.f32 %v6444_v50, %v768_v42  ;;  %v2107_v53 = vpop.f32.mrb[11].mxu1  ;;  %4158 = vmatpush1.bf16.msra.mxu0 %v6927_v39 }
 0x28d   : > { %v3103_v55 = vmax.f32 %v2105_v49, 0.0  ;;  %v2108_v56 = vadd.f32 %v2107_v53, %v766_v47  ;;  %4159 = vmatprep.subr.bf16.mxu0 %v6943_v43  ;;  %v779_v43 = vld [vmem:[#allocation8 + $0xb0] sm:$0xff]  ;;  %v780_v47 = vld [vmem:[#allocation8 + $0xb8] sm:$0xff] }
 0x28e   : > { %6550 = vmatmul.mubr.msk.bf16.gmra.mrb[116].mxu1 %vm1653_vm0, %v6908_v44  ;;  %v3106_v58 = vmax.f32 %v2116_v52, 0.0  ;;  %v6921_v52 = vld [vmem:[#allocation7 + $0x210] sm:$0xff]  }
 0x28f   : > { %6553 = vmatprep.mubr.msk.bf16.mxu1 %vm1653_vm0, %v6912_v48  ;;  %v3104_v61 = vmax.f32 %v2108_v56, 0.0  ;;  %v6920_v48 = vld [vmem:[#allocation7 + $0x208] sm:$0xff]  }
 0x290   : > { %v7636_v0 = vpack.c.bf16 %v3106_v58, %v3105_v51  ;;  %4160 = vmatpush1.bf16.msra.mxu0 %v6941_v54  ;;  %v778_v51 = vld [vmem:[#allocation8 + $0xa8] sm:$0xff] }
 0x291   : > { %v3355_v2 = vpack.c.bf16 %v3104_v61, %v3103_v55  ;;  %v6447_v3 = vpop.f32.mrb[12].mxu1  ;;  %4161 = vmatprep.subr.bf16.mxu0 %v6954_v57 }
 0x292   : > { %v2129_v6 = vadd.f32 %v6447_v3, %v771_v62  ;;  %v2120_v7 = vpop.f32.mrb[13].mxu1  ;;  %v783_v62 = vld [vmem:[#allocation8 + $0xd0] sm:$0xff] }
 0x293   : > { %3628 = vmatmul.mubr.bf16.gmra.mrb[16].mxu0 %v3353_v40  ;;  %v2121_v10 = vadd.f32 %v2120_v7, %v769_v63  ;;  %v6448_v11 = vpop.f32.mrb[14].mxu1  ;;  %v6966_v40 = vld [vmem:[#allocation10 + $0xd0] ss:$8 sps:$4 sm:$0xff]   ;;  %v781_v63 = vld [vmem:[#allocation8 + $0xc0] sm:$0xff] }
 0x294   : > { %3637 = vmatprep.mubr.bf16.mxu0 %v7272_v23  ;;  %v3109_v12 = vmax.f32 %v2129_v6, 0.0  ;;  %v2132_v13 = vadd.f32 %v6448_v11, %v772_v4  ;;  %v2123_v14 = vpop.f32.mrb[15].mxu1  ;;  %4162 = vmatpush1.bf16.msra.mxu0 %v6952_v1  ;;  %v784_v4 = vld [vmem:[#allocation8 + $0xd8] sm:$0xff] }
 0x295   : > { %v3107_v15 = vmax.f32 %v2121_v10, 0.0  ;;  %v2124_v16 = vadd.f32 %v2123_v14, %v770_v8  ;;  %4163 = vmatprep.subr.bf16.mxu0 %v6968_v41  ;;  %v782_v8 = vld [vmem:[#allocation8 + $0xc8] sm:$0xff] }
 0x296   : > { %6554 = vmatmul.mubr.msk.bf16.gmra.mrb[120].mxu1 %vm1653_vm0, %v6913_v5  ;;  %v3110_v17 = vmax.f32 %v2132_v13, 0.0  ;;  %v6922_v5 = vld [vmem:[#allocation7 + $0x218] sm:$0xff]  }
 0x297   : > { %6557 = vmatprep.mubr.msk.bf16.mxu1 %vm1653_vm0, %v6914_v9  ;;  %v3108_v18 = vmax.f32 %v2124_v16, 0.0  ;;  %v6923_v9 = vld [vmem:[#allocation7 + $0x220] sm:$0xff]  }
 0x298   : > { %v7641_v21 = vpack.c.bf16 %v3110_v17, %v3109_v12  ;;  %4164 = vmatpush1.bf16.msra.mxu0 %v6966_v40 }
 0x299   : > { %v7643_v22 = vpack.c.bf16 %v3108_v18, %v3107_v15  ;;  %v6451_v24 = vpop.f32.mrb[16].mxu1 }
 0x29a   : > { %v2145_v27 = vadd.f32 %v6451_v24, %v775_v19  ;;  %v2136_v28 = vpop.f32.mrb[17].mxu1  ;;  %v787_v19 = vld [vmem:[#allocation8 + $0xf0] sm:$0xff] }
 0x29b   : > { %3638 = vmatmul.mubr.bf16.gmra.mrb[20].mxu0 %v7631_v38  ;;  %v2137_v31 = vadd.f32 %v2136_v28, %v773_v20  ;;  %v6452_v32 = vpop.f32.mrb[18].mxu1  ;;  %v777_v38 = vld [vmem:[#allocation8 + $0xa0] sm:$0xff] }
 0x29c   : > { %3647 = vmatprep.mubr.bf16.mxu0 %v7272_v23  ;;  %v3113_v33 = vmax.f32 %v2145_v27, 0.0  ;;  %v2148_v34 = vadd.f32 %v6452_v32, %v776_v25  ;;  %v2139_v35 = vpop.f32.mrb[19].mxu1  ;;  %v785_v20 = vld [vmem:[#allocation8 + $0xe0] sm:$0xff]  ;;  %v6924_v27 = vld [vmem:[#allocation7 + $0x228] sm:$0xff]  }
 0x29d   : > { %v3111_v36 = vmax.f32 %v2137_v31, 0.0  ;;  %v2140_v37 = vadd.f32 %v2139_v35, %v774_v29  ;;  %v6925_v31 = vld [vmem:[#allocation7 + $0x230] sm:$0xff]  }
 0x29e   : > { %6558 = vmatmul.mubr.msk.bf16.gmra.mrb[124].mxu1 %vm1653_vm0, %v6915_v26  ;;  %v3114_v39 = vmax.f32 %v2148_v34, 0.0  ;;  %v788_v26 = vld [vmem:[#allocation8 + $0xf8] sm:$0xff] }
 0x29f   : > { %6561 = vmatprep.mubr.msk.bf16.mxu1 %vm1653_vm0, %v6919_v30  ;;  %v3112_v42 = vmax.f32 %v2140_v37, 0.0  ;;  %v786_v30 = vld [vmem:[#allocation8 + $0xe8] sm:$0xff] }
 0x2a0   : > { %v7649_v44 = vpack.c.bf16 %v3114_v39, %v3113_v33 }
 0x2a1   : > { %v7651_v45 = vpack.c.bf16 %v3112_v42, %v3111_v36  ;;  %v6455_v46 = vpop.f32.mrb[20].mxu1  ;;  %v791_v42 = vld [vmem:[#allocation8 + $0x110] sm:$0xff] }
 0x2a2   : > { %v2161_v49 = vadd.f32 %v6455_v46, %v779_v43  ;;  %v2152_v50 = vpop.f32.mrb[21].mxu1  ;;  %v789_v43 = vld [vmem:[#allocation8 + $0x100] sm:$0xff] }
 0x2a3   : > { %3648 = vmatmul.mubr.bf16.gmra.mrb[24].mxu0 %v3355_v2  ;;  %v2153_v53 = vadd.f32 %v2152_v50, %v777_v38  ;;  %v6456_v54 = vpop.f32.mrb[22].mxu1 }
 0x2a4   : > { %3657 = vmatprep.mubr.bf16.mxu0 %v7272_v23  ;;  %v3117_v55 = vmax.f32 %v2161_v49, 0.0  ;;  %v2164_v56 = vadd.f32 %v6456_v54, %v780_v47  ;;  %v2155_v57 = vpop.f32.mrb[23].mxu1  ;;  %v792_v47 = vld [vmem:[#allocation8 + $0x118] sm:$0xff] }
 0x2a5   : > { %v3115_v58 = vmax.f32 %v2153_v53, 0.0  ;;  %v2156_v59 = vadd.f32 %v2155_v57, %v778_v51  ;;  %v790_v51 = vld [vmem:[#allocation8 + $0x108] sm:$0xff] }
 0x2a6   : > { %6562 = vmatmul.mubr.msk.bf16.gmra.mrb[128].mxu1 %vm1653_vm0, %v6920_v48  ;;  %v3118_v60 = vmax.f32 %v2164_v56, 0.0  ;;  %v6926_v48 = vld [vmem:[#allocation7 + $0x238] sm:$0xff]  }
 0x2a7   : > { %6565 = vmatprep.mubr.msk.bf16.mxu1 %vm1653_vm0, %v6921_v52  ;;  %v3116_v61 = vmax.f32 %v2156_v59, 0.0  ;;  %v6930_v52 = vld [vmem:[#allocation7 + $0x240] sm:$0xff]  }
 0x2a8   : > { %v7656_v1 = vpack.c.bf16 %v3118_v60, %v3117_v55 }
 0x2a9   : > { %v7658_v2 = vpack.c.bf16 %v3116_v61, %v3115_v58  ;;  %v6459_v3 = vpop.f32.mrb[24].mxu1  ;;  %v6977_v61 = vld [vmem:[#allocation10 + $0xe0] ss:$8 sps:$4 sm:$0xff]  }
 0x2aa   : > { %v2177_v6 = vadd.f32 %v6459_v3, %v783_v62  ;;  %v2168_v7 = vpop.f32.mrb[25].mxu1  ;;  %v6979_v62 = vld [vmem:[#allocation10 + $0xe4] ss:$8 sps:$4 sm:$0xff]   ;;  %v795_v3 = vld [vmem:[#allocation8 + $0x130] sm:$0xff] }
 0x2ab   : > { %3658 = vmatmul.mubr.bf16.gmra.mrb[28].mxu0 %v7636_v0  ;;  %v2169_v10 = vadd.f32 %v2168_v7, %v781_v63  ;;  %v6460_v11 = vpop.f32.mrb[26].mxu1  ;;  %4165 = vmatprep.subr.bf16.mxu0 %v6979_v62  ;;  %v796_v7 = vld [vmem:[#allocation8 + $0x138] sm:$0xff] }
 0x2ac   : > { %3667 = vmatprep.mubr.bf16.mxu0 %v7272_v23  ;;  %v3121_v12 = vmax.f32 %v2177_v6, 0.0  ;;  %v2180_v13 = vadd.f32 %v6460_v11, %v784_v4  ;;  %v2171_v14 = vpop.f32.mrb[27].mxu1  ;;  %4166 = vmatpush1.bf16.msra.mxu0 %v6977_v61  ;;  %v794_v11 = vld [vmem:[#allocation8 + $0x128] sm:$0xff] }
 0x2ad   : > { %v3119_v15 = vmax.f32 %v2169_v10, 0.0  ;;  %v2172_v16 = vadd.f32 %v2171_v14, %v782_v8  ;;  %v6931_v8 = vld [vmem:[#allocation7 + $0x248] sm:$0xff]  }
 0x2ae   : > { %6566 = vmatmul.mubr.msk.bf16.gmra.mrb[132].mxu1 %vm1653_vm0, %v6922_v5  ;;  %v3122_v17 = vmax.f32 %v2180_v13, 0.0 }
 0x2af   : > { %6569 = vmatprep.mubr.msk.bf16.mxu1 %vm1653_vm0, %v6923_v9  ;;  %v3120_v18 = vmax.f32 %v2172_v16, 0.0 }
 0x2b0   : > { %v7664_v24 = vpack.c.bf16 %v3122_v17, %v3121_v12  ;;  %v6932_v12 = vld [vmem:[#allocation7 + $0x250] sm:$0xff]  }
 0x2b1   : > { %v7666_v0 = vpack.c.bf16 %v3120_v18, %v3119_v15  ;;  %v6463_v25 = vpop.f32.mrb[28].mxu1 }
 0x2b2   : > { %v2193_v28 = vadd.f32 %v6463_v25, %v787_v19  ;;  %v2184_v29 = vpop.f32.mrb[29].mxu1 }
 0x2b3   : > { %3668 = vmatmul.mubr.bf16.gmra.mrb[32].mxu0 %v7643_v22  ;;  %v2185_v32 = vadd.f32 %v2184_v29, %v785_v20  ;;  %v6464_v33 = vpop.f32.mrb[30].mxu1 }
 0x2b4   : > { %3677 = vmatprep.mubr.bf16.mxu0 %v7272_v23  ;;  %v3125_v34 = vmax.f32 %v2193_v28, 0.0  ;;  %v2196_v35 = vadd.f32 %v6464_v33, %v788_v26  ;;  %v2187_v36 = vpop.f32.mrb[31].mxu1  ;;  %v799_v26 = vld [vmem:[#allocation8 + $0x150] sm:$0xff] }
 0x2b5   : > { %v3123_v37 = vmax.f32 %v2185_v32, 0.0  ;;  %v2188_v39 = vadd.f32 %v2187_v36, %v786_v30  ;;  %v800_v30 = vld [vmem:[#allocation8 + $0x158] sm:$0xff] }
 0x2b6   : > { %6570 = vmatmul.mubr.msk.bf16.gmra.mrb[136].mxu1 %vm1653_vm0, %v6924_v27  ;;  %v3126_v40 = vmax.f32 %v2196_v35, 0.0  ;;  %v797_v27 = vld [vmem:[#allocation8 + $0x140] sm:$0xff] }
 0x2b7   : > { %6573 = vmatprep.mubr.msk.bf16.mxu1 %vm1653_vm0, %v6925_v31  ;;  %v3124_v41 = vmax.f32 %v2188_v39, 0.0  ;;  %v6933_v31 = vld [vmem:[#allocation7 + $0x258] sm:$0xff]   ;;  %v6937_v35 = vld [vmem:[#allocation7 + $0x260] sm:$0xff]  }
 0x2b8   : > { %v7672_v38 = vpack.c.bf16 %v3126_v40, %v3125_v34  ;;  %v798_v34 = vld [vmem:[#allocation8 + $0x148] sm:$0xff] }
 0x2b9   : > { %v7674_v22 = vpack.c.bf16 %v3124_v41, %v3123_v37  ;;  %v6467_v46 = vpop.f32.mrb[32].mxu1 }
 0x2ba   : > { %v2209_v49 = vadd.f32 %v6467_v46, %v791_v42  ;;  %v2200_v50 = vpop.f32.mrb[33].mxu1 }
 0x2bb   : > { %3678 = vmatmul.mubr.bf16.gmra.mrb[36].mxu0 %v7641_v21  ;;  %v2201_v53 = vadd.f32 %v2200_v50, %v789_v43  ;;  %v6468_v54 = vpop.f32.mrb[34].mxu1  ;;  %v793_v21 = vld [vmem:[#allocation8 + $0x120] sm:$0xff]  ;;  %v803_v50 = vld [vmem:[#allocation8 + $0x170] sm:$0xff] }
 0x2bc   : > { %3687 = vmatprep.mubr.bf16.mxu0 %v7272_v23  ;;  %v3129_v55 = vmax.f32 %v2209_v49, 0.0  ;;  %v2212_v56 = vadd.f32 %v6468_v54, %v792_v47  ;;  %v2203_v57 = vpop.f32.mrb[35].mxu1  ;;  %v6984_v47 = vld [vmem:[#allocation10 + $0x140] ss:$8 sps:$4 sm:$0xff]   ;;  %v804_v54 = vld [vmem:[#allocation8 + $0x178] sm:$0xff] }
 0x2bd   : > { %v3127_v58 = vmax.f32 %v2201_v53, 0.0  ;;  %v2204_v59 = vadd.f32 %v2203_v57, %v790_v51 }
 0x2be   : > { %6574 = vmatmul.mubr.msk.bf16.gmra.mrb[140].mxu1 %vm1653_vm0, %v6926_v48  ;;  %v3130_v60 = vmax.f32 %v2212_v56, 0.0  ;;  %v6986_v48 = vld [vmem:[#allocation10 + $0x144] ss:$8 sps:$4 sm:$0xff]  }
 0x2bf   : > { %6577 = vmatprep.mubr.msk.bf16.mxu1 %vm1653_vm0, %v6930_v52  ;;  %v3128_v63 = vmax.f32 %v2204_v59, 0.0  ;;  %4739 = vmatprep.subr.bf16.mxu1 %v6986_v48  ;;  %v6939_v59 = vld [vmem:[#allocation7 + $0x270] sm:$0xff]  }
 0x2c0   : > { %v7680_v4 = vpack.c.bf16 %v3130_v60, %v3129_v55  ;;  %4740 = vmatpush1.bf16.msra.mxu1 %v6984_v47  ;;  %v6938_v55 = vld [vmem:[#allocation7 + $0x268] sm:$0xff]   ;;  %v6946_v47 = vld [vmem:[#allocation7 + $0x290] sm:$0xff]  }
 0x2c1   : > { %v7682_v5 = vpack.c.bf16 %v3128_v63, %v3127_v58  ;;  %v6471_v6 = vpop.f32.mrb[36].mxu1  ;;  %v802_v58 = vld [vmem:[#allocation8 + $0x168] sm:$0xff] }
 0x2c2   : > { %v2225_v9 = vadd.f32 %v6471_v6, %v795_v3  ;;  %v2216_v10 = vpop.f32.mrb[37].mxu1 }
 0x2c3   : > { %3688 = vmatmul.mubr.bf16.gmra.mrb[40].mxu0 %v7651_v45  ;;  %v2217_v13 = vadd.f32 %v2216_v10, %v793_v21  ;;  %v6472_v14 = vpop.f32.mrb[38].mxu1  ;;  %v805_v10 = vld [vmem:[#allocation8 + $0x180] sm:$0xff] }
 0x2c4   : > { %3697 = vmatprep.mubr.bf16.mxu0 %v7272_v23  ;;  %v3133_v15 = vmax.f32 %v2225_v9, 0.0  ;;  %v2228_v16 = vadd.f32 %v6472_v14, %v796_v7  ;;  %v2219_v17 = vpop.f32.mrb[39].mxu1  ;;  %v807_v9 = vld [vmem:[#allocation8 + $0x190] sm:$0xff]  ;;  %v6940_v14 = vld [vmem:[#allocation7 + $0x278] sm:$0xff]  }
 0x2c5   : > { %v3131_v18 = vmax.f32 %v2217_v13, 0.0  ;;  %v2220_v19 = vadd.f32 %v2219_v17, %v794_v11  ;;  %v808_v13 = vld [vmem:[#allocation8 + $0x198] sm:$0xff]  ;;  %v806_v17 = vld [vmem:[#allocation8 + $0x188] sm:$0xff] }
 0x2c6   : > { %6578 = vmatmul.mubr.msk.bf16.gmra.mrb[144].mxu1 %vm1653_vm0, %v6931_v8  ;;  %v3134_v20 = vmax.f32 %v2228_v16, 0.0 }
 0x2c7   : > { %6581 = vmatprep.mubr.msk.bf16.mxu1 %vm1653_vm0, %v6932_v12  ;;  %v3132_v25 = vmax.f32 %v2220_v19, 0.0 }
 0x2c8   : > { %v7688_v28 = vpack.c.bf16 %v3134_v20, %v3133_v15 }
 0x2c9   : > { %v7690_v45 = vpack.c.bf16 %v3132_v25, %v3131_v18  ;;  %v6475_v29 = vpop.f32.mrb[40].mxu1  ;;  %v6944_v18 = vld [vmem:[#allocation7 + $0x280] sm:$0xff]  }
 0x2ca   : > { %v2241_v32 = vadd.f32 %v6475_v29, %v799_v26  ;;  %v2232_v33 = vpop.f32.mrb[41].mxu1 }
 0x2cb   : > { %3698 = vmatmul.mubr.bf16.gmra.mrb[44].mxu0 %v7649_v44  ;;  %v2233_v36 = vadd.f32 %v2232_v33, %v797_v27  ;;  %v6476_v37 = vpop.f32.mrb[42].mxu1  ;;  %v801_v44 = vld [vmem:[#allocation8 + $0x160] sm:$0xff]  ;;  %v811_v33 = vld [vmem:[#allocation8 + $0x1b0] sm:$0xff] }
 0x2cc   : > { %3707 = vmatprep.mubr.bf16.mxu0 %v7272_v23  ;;  %v3137_v39 = vmax.f32 %v2241_v32, 0.0  ;;  %v2244_v40 = vadd.f32 %v6476_v37, %v800_v30  ;;  %v2235_v41 = vpop.f32.mrb[43].mxu1 }
 0x2cd   : > { %v3135_v42 = vmax.f32 %v2233_v36, 0.0  ;;  %v2236_v43 = vadd.f32 %v2235_v41, %v798_v34  ;;  %v809_v34 = vld [vmem:[#allocation8 + $0x1a0] sm:$0xff] }
 0x2ce   : > { %6582 = vmatmul.mubr.msk.bf16.gmra.mrb[148].mxu1 %vm1653_vm0, %v6933_v31  ;;  %v3138_v46 = vmax.f32 %v2244_v40, 0.0 }
 0x2cf   : > { %6585 = vmatprep.mubr.msk.bf16.mxu1 %vm1653_vm0, %v6937_v35  ;;  %v3136_v49 = vmax.f32 %v2236_v43, 0.0  ;;  %v6991_v43 = vld [vmem:[#allocation10 + $0xf0] ss:$8 sps:$4 sm:$0xff]  }
 0x2d0   : > { %v7696_v51 = vpack.c.bf16 %v3138_v46, %v3137_v39  ;;  %v812_v39 = vld [vmem:[#allocation8 + $0x1b8] sm:$0xff] }
 0x2d1   : > { %v7698_v52 = vpack.c.bf16 %v3136_v49, %v3135_v42  ;;  %v6479_v53 = vpop.f32.mrb[44].mxu1  ;;  %v810_v42 = vld [vmem:[#allocation8 + $0x1a8] sm:$0xff]  ;;  %v6993_v46 = vld [vmem:[#allocation10 + $0xf4] ss:$8 sps:$4 sm:$0xff]  }
 0x2d2   : > { %v2257_v56 = vadd.f32 %v6479_v53, %v803_v50  ;;  %v2248_v57 = vpop.f32.mrb[45].mxu1  ;;  %4167 = vmatprep.subr.bf16.mxu0 %v6993_v46  ;;  %v823_v46 = vld [vmem:[#allocation8 + $0x210] sm:$0xff] }
 0x2d3   : > { %3708 = vmatmul.mubr.bf16.gmra.mrb[48].mxu0 %v7658_v2  ;;  %v2249_v60 = vadd.f32 %v2248_v57, %v801_v44  ;;  %v6480_v61 = vpop.f32.mrb[46].mxu1 }
 0x2d4   : > { %3717 = vmatprep.mubr.bf16.mxu0 %v7272_v23  ;;  %v3141_v62 = vmax.f32 %v2257_v56, 0.0  ;;  %v2260_v63 = vadd.f32 %v6480_v61, %v804_v54  ;;  %v2251_v3 = vpop.f32.mrb[47].mxu1  ;;  %4168 = vmatpush1.bf16.msra.mxu0 %v6991_v43 }
 0x2d5   : > { %v3139_v21 = vmax.f32 %v2249_v60, 0.0  ;;  %v2252_v6 = vadd.f32 %v2251_v3, %v802_v58  ;;  %v815_v58 = vld [vmem:[#allocation8 + $0x1d0] sm:$0xff] }
 0x2d6   : > { %6586 = vmatmul.mubr.msk.bf16.gmra.mrb[152].mxu1 %vm1653_vm0, %v6938_v55  ;;  %v3142_v7 = vmax.f32 %v2260_v63, 0.0  ;;  %v6947_v63 = vld [vmem:[#allocation7 + $0x298] sm:$0xff]  }
 0x2d7   : > { %6589 = vmatprep.mubr.msk.bf16.mxu1 %vm1653_vm0, %v6939_v59  ;;  %v3140_v8 = vmax.f32 %v2252_v6, 0.0  ;;  %v814_v6 = vld [vmem:[#allocation8 + $0x1c8] sm:$0xff] }
 0x2d8   : > { %v7704_v11 = vpack.c.bf16 %v3142_v7, %v3141_v62  ;;  %v816_v62 = vld [vmem:[#allocation8 + $0x1d8] sm:$0xff]  ;;  %v6948_v7 = vld [vmem:[#allocation7 + $0x2a0] sm:$0xff]  }
 0x2d9   : > { %v7706_v2 = vpack.c.bf16 %v3140_v8, %v3139_v21  ;;  %v6483_v12 = vpop.f32.mrb[48].mxu1 }
 0x2da   : > { %v2273_v15 = vadd.f32 %v6483_v12, %v807_v9  ;;  %v2264_v16 = vpop.f32.mrb[49].mxu1 }
 0x2db   : > { %3718 = vmatmul.mubr.bf16.gmra.mrb[52].mxu0 %v7656_v1  ;;  %v2265_v19 = vadd.f32 %v2264_v16, %v805_v10  ;;  %v6484_v20 = vpop.f32.mrb[50].mxu1  ;;  %v6945_v1 = vld [vmem:[#allocation7 + $0x288] sm:$0xff]  }
 0x2dc   : > { %3727 = vmatprep.mubr.bf16.mxu0 %v7272_v23  ;;  %v3145_v25 = vmax.f32 %v2273_v15, 0.0  ;;  %v2276_v26 = vadd.f32 %v6484_v20, %v808_v13  ;;  %v2267_v27 = vpop.f32.mrb[51].mxu1 }
 0x2dd   : > { %v3143_v29 = vmax.f32 %v2265_v19, 0.0  ;;  %v2268_v30 = vadd.f32 %v2267_v27, %v806_v17  ;;  %v817_v19 = vld [vmem:[#allocation8 + $0x1e0] sm:$0xff]  ;;  %v6949_v27 = vld [vmem:[#allocation7 + $0x2a8] sm:$0xff]  }
 0x2de   : > { %6590 = vmatmul.mubr.msk.bf16.gmra.mrb[156].mxu1 %vm1653_vm0, %v6940_v14  ;;  %v3146_v31 = vmax.f32 %v2276_v26, 0.0 }
 0x2df   : > { %6593 = vmatprep.mubr.msk.bf16.mxu1 %vm1653_vm0, %v6944_v18  ;;  %v3144_v32 = vmax.f32 %v2268_v30, 0.0  ;;  %v819_v18 = vld [vmem:[#allocation8 + $0x1f0] sm:$0xff] }
 0x2e0   : > { %v7712_v35 = vpack.c.bf16 %v3146_v31, %v3145_v25  ;;  %v820_v25 = vld [vmem:[#allocation8 + $0x1f8] sm:$0xff]  ;;  %v818_v31 = vld [vmem:[#allocation8 + $0x1e8] sm:$0xff] }
 0x2e1   : > { %v7714_v36 = vpack.c.bf16 %v3144_v32, %v3143_v29  ;;  %v6487_v37 = vpop.f32.mrb[52].mxu1  ;;  %v6950_v32 = vld [vmem:[#allocation7 + $0x2b0] sm:$0xff]  }
 0x2e2   : > { %v2289_v40 = vadd.f32 %v6487_v37, %v811_v33  ;;  %v2280_v41 = vpop.f32.mrb[53].mxu1 }
 0x2e3   : > { %3728 = vmatmul.mubr.bf16.gmra.mrb[56].mxu0 %v7666_v0  ;;  %v2281_v48 = vadd.f32 %v2280_v41, %v809_v34  ;;  %v6488_v49 = vpop.f32.mrb[54].mxu1  ;;  %v813_v0 = vld [vmem:[#allocation8 + $0x1c0] sm:$0xff] }
 0x2e4   : > { %3737 = vmatprep.mubr.bf16.mxu0 %v7272_v23  ;;  %v3149_v50 = vmax.f32 %v2289_v40, 0.0  ;;  %v2292_v44 = vadd.f32 %v6488_v49, %v812_v39  ;;  %v2283_v53 = vpop.f32.mrb[55].mxu1  ;;  %v824_v49 = vld [vmem:[#allocation8 + $0x218] sm:$0xff] }
 0x2e5   : > { %v3147_v54 = vmax.f32 %v2281_v48, 0.0  ;;  %v2284_v55 = vadd.f32 %v2283_v53, %v810_v42 }
 0x2e6   : > { %6594 = vmatmul.mubr.msk.bf16.gmra.mrb[160].mxu1 %vm1653_vm0, %v6945_v1  ;;  %v3150_v56 = vmax.f32 %v2292_v44, 0.0  ;;  %v6951_v44 = vld [vmem:[#allocation7 + $0x2b8] sm:$0xff]  }
 0x2e7   : > { %6597 = vmatprep.mubr.msk.bf16.mxu1 %vm1653_vm0, %v6946_v47  ;;  %v3148_v57 = vmax.f32 %v2284_v55, 0.0  ;;  %v821_v47 = vld [vmem:[#allocation8 + $0x200] sm:$0xff]  ;;  %v822_v55 = vld [vmem:[#allocation8 + $0x208] sm:$0xff] }
 0x2e8   : > { %v7720_v59 = vpack.c.bf16 %v3150_v56, %v3149_v50  ;;  %v6955_v56 = vld [vmem:[#allocation7 + $0x2c0] sm:$0xff]  }
 0x2e9   : > { %v7722_v60 = vpack.c.bf16 %v3148_v57, %v3147_v54  ;;  %v6491_v61 = vpop.f32.mrb[56].mxu1 }
 0x2ea   : > { %v2305_v3 = vadd.f32 %v6491_v61, %v815_v58  ;;  %v2296_v21 = vpop.f32.mrb[57].mxu1 }
 0x2eb   : > { %3738 = vmatmul.mubr.bf16.gmra.mrb[60].mxu0 %v7664_v24  ;;  %v2297_v8 = vadd.f32 %v2296_v21, %v813_v0  ;;  %v6492_v9 = vpop.f32.mrb[58].mxu1 }
 0x2ec   : > { %3747 = vmatprep.mubr.bf16.mxu0 %v7272_v23  ;;  %v3153_v10 = vmax.f32 %v2305_v3, 0.0  ;;  %v2308_v12 = vadd.f32 %v6492_v9, %v816_v62  ;;  %v2299_v13 = vpop.f32.mrb[59].mxu1 }
 0x2ed   : > { %v3151_v14 = vmax.f32 %v2297_v8, 0.0  ;;  %v2300_v15 = vadd.f32 %v2299_v13, %v814_v6  ;;  %v825_v8 = vld [vmem:[#allocation8 + $0x220] sm:$0xff]  ;;  %v6956_v13 = vld [vmem:[#allocation7 + $0x2c8] sm:$0xff]  }
 0x2ee   : > { %6598 = vmatmul.mubr.msk.bf16.gmra.mrb[164].mxu1 %vm1653_vm0, %v6947_v63  ;;  %v3154_v16 = vmax.f32 %v2308_v12, 0.0  ;;  %v828_v12 = vld [vmem:[#allocation8 + $0x238] sm:$0xff] }
 0x2ef   : > { %6601 = vmatprep.mubr.msk.bf16.mxu1 %vm1653_vm0, %v6948_v7  ;;  %v3152_v17 = vmax.f32 %v2300_v15, 0.0  ;;  %v827_v7 = vld [vmem:[#allocation8 + $0x230] sm:$0xff] }
 0x2f0   : > { %v7728_v20 = vpack.c.bf16 %v3154_v16, %v3153_v10  ;;  %v826_v16 = vld [vmem:[#allocation8 + $0x228] sm:$0xff] }
 0x2f1   : > { %v6495_v24 = vpop.f32.mrb[60].mxu1  ;;  %v7730_v26 = vpack.c.bf16 %v3152_v17, %v3151_v14  ;;  %v7748_v17 = vld [vmem:[#allocation10 + $0x184] ss:$8 sps:$4 sm:$0xff]  }
 0x2f2   : > { %v2321_v29 = vadd.f32 %v6495_v24, %v819_v18  ;;  %v2312_v30 = vpop.f32.mrb[61].mxu1  ;;  %v6957_v18 = vld [vmem:[#allocation7 + $0x2d0] sm:$0xff]   ;;  %5309 = vmatprep.subr.bf16.mxu0 %v7748_v17 }
 0x2f3   : > { %3748 = vmatmul.mubr.bf16.gmra.mrb[64].mxu0 %v7674_v22  ;;  %v2313_v33 = vadd.f32 %v2312_v30, %v817_v19  ;;  %v6496_v34 = vpop.f32.mrb[62].mxu1 }
 0x2f4   : > { %3757 = vmatprep.mubr.bf16.mxu0 %v7272_v23  ;;  %v3157_v1 = vmax.f32 %v2321_v29, 0.0  ;;  %v2324_v37 = vadd.f32 %v6496_v34, %v820_v25  ;;  %v2315_v39 = vpop.f32.mrb[63].mxu1  ;;  %v831_v34 = vld [vmem:[#allocation8 + $0x250] sm:$0xff] }
 0x2f5   : > { %v3155_v40 = vmax.f32 %v2313_v33, 0.0  ;;  %v2316_v41 = vadd.f32 %v2315_v39, %v818_v31  ;;  %v832_v39 = vld [vmem:[#allocation8 + $0x258] sm:$0xff] }
 0x2f6   : > { %6602 = vmatmul.mubr.msk.bf16.gmra.mrb[168].mxu1 %vm1653_vm0, %v6949_v27  ;;  %v3158_v42 = vmax.f32 %v2324_v37, 0.0 }
 0x2f7   : > { %6605 = vmatprep.mubr.msk.bf16.mxu1 %vm1653_vm0, %v6950_v32  ;;  %v3156_v43 = vmax.f32 %v2316_v41, 0.0  ;;  %v6958_v41 = vld [vmem:[#allocation7 + $0x2d8] sm:$0xff]  }
 0x2f8   : > { %v7736_v48 = vpack.c.bf16 %v3158_v42, %v3157_v1 }
 0x2f9   : > { %v6499_v22 = vpop.f32.mrb[64].mxu1  ;;  %v7738_v50 = vpack.c.bf16 %v3156_v43, %v3155_v40 }
 0x2fa   : > { %v2337_v53 = vadd.f32 %v6499_v22, %v823_v46  ;;  %v2328_v54 = vpop.f32.mrb[65].mxu1  ;;  %v830_v46 = vld [vmem:[#allocation8 + $0x248] sm:$0xff] }
 0x2fb   : > { %3758 = vmatmul.mubr.bf16.gmra.mrb[68].mxu0 %v7672_v38  ;;  %v2329_v57 = vadd.f32 %v2328_v54, %v821_v47  ;;  %v6500_v58 = vpop.f32.mrb[66].mxu1  ;;  %v6962_v47 = vld [vmem:[#allocation7 + $0x2e0] sm:$0xff]  }
 0x2fc   : > { %3767 = vmatprep.mubr.bf16.mxu0 %v7272_v23  ;;  %v3161_v0 = vmax.f32 %v2337_v53, 0.0  ;;  %v2340_v61 = vadd.f32 %v6500_v58, %v824_v49  ;;  %v2331_v62 = vpop.f32.mrb[67].mxu1 }
 0x2fd   : > { %v3159_v63 = vmax.f32 %v2329_v57, 0.0  ;;  %v2332_v3 = vadd.f32 %v2331_v62, %v822_v55 }
 0x2fe   : > { %6606 = vmatmul.mubr.msk.bf16.gmra.mrb[172].mxu1 %vm1653_vm0, %v6951_v44  ;;  %v3162_v21 = vmax.f32 %v2340_v61, 0.0  ;;  %v833_v61 = vld [vmem:[#allocation8 + $0x260] sm:$0xff] }
 0x2ff   : > { %6609 = vmatprep.mubr.msk.bf16.mxu1 %vm1653_vm0, %v6955_v56  ;;  %v3160_v6 = vmax.f32 %v2332_v3, 0.0  ;;  %v836_v3 = vld [vmem:[#allocation8 + $0x278] sm:$0xff] }
 0x300   : > { %v7744_v9 = vpack.c.bf16 %v3162_v21, %v3161_v0  ;;  %v835_v0 = vld [vmem:[#allocation8 + $0x270] sm:$0xff] }
 0x301   : > { %v7746_v38 = vpack.c.bf16 %v3160_v6, %v3159_v63  ;;  %v6503_v10 = vpop.f32.mrb[68].mxu1 }
 0x302   : > { %v2353_v14 = vadd.f32 %v6503_v10, %v827_v7  ;;  %v2344_v15 = vpop.f32.mrb[69].mxu1  ;;  %v7009_v10 = vld [vmem:[#allocation10 + $0x150] ss:$8 sps:$4 sm:$0xff]  }
 0x303   : > { %3768 = vmatmul.mubr.bf16.gmra.mrb[72].mxu0 %v7682_v5  ;;  %v2345_v19 = vadd.f32 %v2344_v15, %v825_v8  ;;  %v6504_v24 = vpop.f32.mrb[70].mxu1  ;;  %v829_v5 = vld [vmem:[#allocation8 + $0x240] sm:$0xff]  ;;  %v834_v8 = vld [vmem:[#allocation8 + $0x268] sm:$0xff] }
 0x304   : > { %3777 = vmatprep.mubr.bf16.mxu0 %v7272_v23  ;;  %v3165_v25 = vmax.f32 %v2353_v14, 0.0  ;;  %v2356_v27 = vadd.f32 %v6504_v24, %v828_v12  ;;  %v2347_v29 = vpop.f32.mrb[71].mxu1  ;;  %v7011_v12 = vld [vmem:[#allocation10 + $0x154] ss:$8 sps:$4 sm:$0xff]  }
 0x305   : > { %v3163_v30 = vmax.f32 %v2345_v19, 0.0  ;;  %v2348_v31 = vadd.f32 %v2347_v29, %v826_v16  ;;  %4741 = vmatprep.subr.bf16.mxu1 %v7011_v12  ;;  %v842_v12 = vld [vmem:[#allocation8 + $0x2a8] sm:$0xff] }
 0x306   : > { %6610 = vmatmul.mubr.msk.bf16.gmra.mrb[176].mxu1 %vm1653_vm0, %v6956_v13  ;;  %v3166_v32 = vmax.f32 %v2356_v27, 0.0  ;;  %v6964_v13 = vld [vmem:[#allocation7 + $0x2f0] sm:$0xff]  }
 0x307   : > { %6613 = vmatprep.mubr.msk.bf16.mxu1 %vm1653_vm0, %v6957_v18  ;;  %v3164_v33 = vmax.f32 %v2348_v31, 0.0  ;;  %4742 = vmatpush1.bf16.msra.mxu1 %v7009_v10 }
 0x308   : > { %v7755_v1 = vpack.c.bf16 %v3166_v32, %v3165_v25 }
 0x309   : > { %v6507_v37 = vpop.f32.mrb[72].mxu1  ;;  %v7757_v40 = vpack.c.bf16 %v3164_v33, %v3163_v30  ;;  %v839_v30 = vld [vmem:[#allocation8 + $0x290] sm:$0xff]  ;;  %v840_v33 = vld [vmem:[#allocation8 + $0x298] sm:$0xff] }
 0x30a   : > { %v2369_v42 = vadd.f32 %v6507_v37, %v831_v34  ;;  %v2360_v43 = vpop.f32.mrb[73].mxu1 }
 0x30b   : > { %3778 = vmatmul.mubr.bf16.gmra.mrb[76].mxu0 %v7680_v4  ;;  %v2361_v22 = vadd.f32 %v2360_v43, %v829_v5  ;;  %v6508_v49 = vpop.f32.mrb[74].mxu1  ;;  %v6963_v4 = vld [vmem:[#allocation7 + $0x2e8] sm:$0xff]   ;;  %v6965_v5 = vld [vmem:[#allocation7 + $0x2f8] sm:$0xff]  }
 0x30c   : > { %3787 = vmatprep.mubr.bf16.mxu0 %v7272_v23  ;;  %v3169_v44 = vmax.f32 %v2369_v42, 0.0  ;;  %v2372_v53 = vadd.f32 %v6508_v49, %v832_v39  ;;  %v2363_v54 = vpop.f32.mrb[75].mxu1  ;;  %v6969_v42 = vld [vmem:[#allocation7 + $0x300] sm:$0xff]  }
 0x30d   : > { %v3167_v55 = vmax.f32 %v2361_v22, 0.0  ;;  %v2364_v56 = vadd.f32 %v2363_v54, %v830_v46 }
 0x30e   : > { %6614 = vmatmul.mubr.msk.bf16.gmra.mrb[180].mxu1 %vm1653_vm0, %v6958_v41  ;;  %v3170_v57 = vmax.f32 %v2372_v53, 0.0  ;;  %v838_v41 = vld [vmem:[#allocation8 + $0x288] sm:$0xff] }
 0x30f   : > { %6617 = vmatprep.mubr.msk.bf16.mxu1 %vm1653_vm0, %v6962_v47  ;;  %v3168_v58 = vmax.f32 %v2364_v56, 0.0 }
 0x310   : > { %v7763_v62 = vpack.c.bf16 %v3170_v57, %v3169_v44  ;;  %v7018_v44 = vld [vmem:[#allocation10 + $0x164] ss:$8 sps:$4 sm:$0xff]  }
 0x311   : > { %v6511_v63 = vpop.f32.mrb[76].mxu1  ;;  %v7765_v21 = vpack.c.bf16 %v3168_v58, %v3167_v55  ;;  %v7016_v55 = vld [vmem:[#allocation10 + $0x160] ss:$8 sps:$4 sm:$0xff]   ;;  %4743 = vmatprep.subr.bf16.mxu1 %v7018_v44 }
 0x312   : > { %v2385_v6 = vadd.f32 %v6511_v63, %v835_v0  ;;  %v2376_v7 = vpop.f32.mrb[77].mxu1  ;;  %4744 = vmatpush1.bf16.msra.mxu1 %v7016_v55  ;;  %v841_v58 = vld [vmem:[#allocation8 + $0x2a0] sm:$0xff]  ;;  %v7021_v0 = vld [vmem:[#allocation10 + $0x174] ss:$8 sps:$4 sm:$0xff]  }
 0x313   : > { %3788 = vmatmul.mubr.bf16.gmra.mrb[80].mxu0 %v7690_v45  ;;  %v2377_v14 = vadd.f32 %v2376_v7, %v833_v61  ;;  %v6512_v15 = vpop.f32.mrb[78].mxu1  ;;  %v837_v45 = vld [vmem:[#allocation8 + $0x280] sm:$0xff]  ;;  %v844_v63 = vld [vmem:[#allocation8 + $0x2b8] sm:$0xff]  ;;  %v6970_v7 = vld [vmem:[#allocation7 + $0x308] sm:$0xff]   ;;  %4745 = vmatprep.subr.bf16.mxu1 %v7021_v0 }
 0x314   : > { %3797 = vmatprep.mubr.bf16.mxu0 %v7272_v23  ;;  %v3173_v16 = vmax.f32 %v2385_v6, 0.0  ;;  %v2388_v18 = vadd.f32 %v6512_v15, %v836_v3  ;;  %v2379_v19 = vpop.f32.mrb[79].mxu1  ;;  %v7019_v3 = vld [vmem:[#allocation10 + $0x170] ss:$8 sps:$4 sm:$0xff]  }
 0x315   : > { %v3171_v24 = vmax.f32 %v2377_v14, 0.0  ;;  %v2380_v25 = vadd.f32 %v2379_v19, %v834_v8 }
 0x316   : > { %6618 = vmatmul.mubr.msk.bf16.gmra.mrb[184].mxu1 %vm1653_vm0, %v6963_v4  ;;  %v3174_v27 = vmax.f32 %v2388_v18, 0.0 }
 0x317   : > { %6621 = vmatprep.mubr.msk.bf16.mxu1 %vm1653_vm0, %v6964_v13  ;;  %v3172_v29 = vmax.f32 %v2380_v25, 0.0  ;;  %v6971_v13 = vld [vmem:[#allocation7 + $0x310] sm:$0xff]   ;;  %4746 = vmatpush1.bf16.msra.mxu1 %v7019_v3 }
 0x318   : > { %v7771_v31 = vpack.c.bf16 %v3174_v27, %v3173_v16  ;;  %6689 = vmatprep.subr.bf16.mxu1 %v7748_v17  ;;  %v846_v17 = vld [vmem:[#allocation8 + $0x2c8] sm:$0xff] }
 0x319   : > { %v6515_v32 = vpop.f32.mrb[80].mxu1  ;;  %v7773_v34 = vpack.c.bf16 %v3172_v29, %v3171_v24 }
 0x31a   : > { %v2401_v37 = vadd.f32 %v6515_v32, %v839_v30  ;;  %v2392_v39 = vpop.f32.mrb[81].mxu1  ;;  %v845_v30 = vld [vmem:[#allocation8 + $0x2c0] sm:$0xff] }
 0x31b   : > { %3798 = vmatmul.mubr.bf16.gmra.mrb[84].mxu0 %v7688_v28  ;;  %v2393_v43 = vadd.f32 %v2392_v39, %v837_v45  ;;  %v6516_v46 = vpop.f32.mrb[82].mxu1  ;;  %v843_v28 = vld [vmem:[#allocation8 + $0x2b0] sm:$0xff] }
 0x31c   : > { %3807 = vmatprep.mubr.bf16.mxu0 %v7272_v23  ;;  %v3177_v47 = vmax.f32 %v2401_v37, 0.0  ;;  %v2404_v22 = vadd.f32 %v6516_v46, %v840_v33  ;;  %v2395_v49 = vpop.f32.mrb[83].mxu1  ;;  %v848_v33 = vld [vmem:[#allocation8 + $0x2d8] sm:$0xff] }
 0x31d   : > { %v3175_v53 = vmax.f32 %v2393_v43, 0.0  ;;  %v2396_v54 = vadd.f32 %v2395_v49, %v838_v41  ;;  %v6972_v37 = vld [vmem:[#allocation7 + $0x318] sm:$0xff]  }
 0x31e   : > { %6622 = vmatmul.mubr.msk.bf16.gmra.mrb[188].mxu1 %vm1653_vm0, %v6965_v5  ;;  %v3178_v56 = vmax.f32 %v2404_v22, 0.0 }
 0x31f   : > { %6625 = vmatprep.mubr.msk.bf16.mxu1 %vm1653_vm0, %v6969_v42  ;;  %v3176_v57 = vmax.f32 %v2396_v54, 0.0  ;;  %v6973_v42 = vld [vmem:[#allocation7 + $0x320] sm:$0xff]  }
 0x320   : > { %v7779_v61 = vpack.c.bf16 %v3178_v56, %v3177_v47  ;;  %v851_v56 = vld [vmem:[#allocation8 + $0x2f0] sm:$0xff] }
 0x321   : > { %v6519_v4 = vpop.f32.mrb[84].mxu1  ;;  %v7781_v6 = vpack.c.bf16 %v3176_v57, %v3175_v53  ;;  %v849_v57 = vld [vmem:[#allocation8 + $0x2e0] sm:$0xff] }
 0x322   : > { %v2417_v8 = vadd.f32 %v6519_v4, %v843_v28  ;;  %v2408_v10 = vpop.f32.mrb[85].mxu1  ;;  %v6974_v4 = vld [vmem:[#allocation7 + $0x328] sm:$0xff]  }
 0x323   : > { %3808 = vmatmul.mubr.bf16.gmra.mrb[88].mxu0 %v7698_v52  ;;  %v2409_v14 = vadd.f32 %v2408_v10, %v841_v58  ;;  %v6520_v15 = vpop.f32.mrb[86].mxu1  ;;  %v847_v52 = vld [vmem:[#allocation8 + $0x2d0] sm:$0xff]  ;;  %v852_v58 = vld [vmem:[#allocation8 + $0x2f8] sm:$0xff] }
 0x324   : > { %3817 = vmatprep.mubr.bf16.mxu0 %v7272_v23  ;;  %v3181_v16 = vmax.f32 %v2417_v8, 0.0  ;;  %v2420_v18 = vadd.f32 %v6520_v15, %v844_v63  ;;  %v2411_v19 = vpop.f32.mrb[87].mxu1  ;;  %v6975_v8 = vld [vmem:[#allocation7 + $0x330] sm:$0xff]  }
 0x325   : > { %v3179_v24 = vmax.f32 %v2409_v14, 0.0  ;;  %v2412_v25 = vadd.f32 %v2411_v19, %v842_v12 }
 0x326   : > { %6626 = vmatmul.mubr.msk.bf16.gmra.mrb[192].mxu1 %vm1653_vm0, %v6970_v7  ;;  %v3182_v27 = vmax.f32 %v2420_v18, 0.0  ;;  %v850_v7 = vld [vmem:[#allocation8 + $0x2e8] sm:$0xff] }
 0x327   : > { %6629 = vmatprep.mubr.msk.bf16.mxu1 %vm1653_vm0, %v6971_v13  ;;  %v3180_v29 = vmax.f32 %v2412_v25, 0.0  ;;  %v855_v25 = vld [vmem:[#allocation8 + $0x310] sm:$0xff] }
 0x328   : > { %v7788_v45 = vpack.c.bf16 %v3182_v27, %v3181_v16  ;;  %v853_v27 = vld [vmem:[#allocation8 + $0x300] sm:$0xff] }
 0x329   : > { %v6523_v32 = vpop.f32.mrb[88].mxu1  ;;  %v7790_v5 = vpack.c.bf16 %v3180_v29, %v3179_v24 }
 0x32a   : > { %v2433_v39 = vadd.f32 %v6523_v32, %v847_v52  ;;  %v2424_v41 = vpop.f32.mrb[89].mxu1  ;;  %v856_v52 = vld [vmem:[#allocation8 + $0x318] sm:$0xff] }
 0x32b   : > { %3818 = vmatmul.mubr.bf16.gmra.mrb[92].mxu0 %v7696_v51  ;;  %v2425_v43 = vadd.f32 %v2424_v41, %v845_v30  ;;  %v6524_v46 = vpop.f32.mrb[90].mxu1  ;;  %v6976_v32 = vld [vmem:[#allocation7 + $0x338] sm:$0xff]   ;;  %v6980_v41 = vld [vmem:[#allocation7 + $0x340] sm:$0xff]  }
 0x32c   : > { %3827 = vmatprep.mubr.bf16.mxu0 %v7272_v23  ;;  %v3185_v47 = vmax.f32 %v2433_v39, 0.0  ;;  %v2436_v22 = vadd.f32 %v6524_v46, %v848_v33  ;;  %v2427_v49 = vpop.f32.mrb[91].mxu1  ;;  %v854_v39 = vld [vmem:[#allocation8 + $0x308] sm:$0xff] }
 0x32d   : > { %v3183_v44 = vmax.f32 %v2425_v43, 0.0  ;;  %v2428_v53 = vadd.f32 %v2427_v49, %v846_v17 }
 0x32e   : > { %6630 = vmatmul.mubr.msk.bf16.gmra.mrb[196].mxu1 %vm1653_vm0, %v6972_v37  ;;  %v3186_v54 = vmax.f32 %v2436_v22, 0.0 }
 0x32f   : > { %6633 = vmatprep.mubr.msk.bf16.mxu1 %vm1653_vm0, %v6973_v42  ;;  %v3184_v55 = vmax.f32 %v2428_v53, 0.0 }
 0x330   : > { %v7796_v28 = vpack.c.bf16 %v3186_v54, %v3185_v47  ;;  %v859_v54 = vld [vmem:[#allocation8 + $0x330] sm:$0xff] }
 0x331   : > { %v6527_v51 = vpop.f32.mrb[92].mxu1  ;;  %v7798_v0 = vpack.c.bf16 %v3184_v55, %v3183_v44  ;;  %v857_v55 = vld [vmem:[#allocation8 + $0x320] sm:$0xff] }
 0x332   : > { %v2449_v63 = vadd.f32 %v6527_v51, %v851_v56  ;;  %v2440_v3 = vpop.f32.mrb[93].mxu1 }
 0x333   : > { %3828 = vmatmul.mubr.bf16.gmra.mrb[96].mxu0 %v7706_v2  ;;  %v2441_v10 = vadd.f32 %v2440_v3, %v849_v57  ;;  %v6528_v12 = vpop.f32.mrb[94].mxu1  ;;  %v860_v57 = vld [vmem:[#allocation8 + $0x338] sm:$0xff]  ;;  %v858_v3 = vld [vmem:[#allocation8 + $0x328] sm:$0xff] }
 0x334   : > { %3837 = vmatprep.mubr.bf16.mxu0 %v7272_v23  ;;  %v3189_v13 = vmax.f32 %v2449_v63, 0.0  ;;  %v2452_v14 = vadd.f32 %v6528_v12, %v852_v58  ;;  %v2443_v15 = vpop.f32.mrb[95].mxu1  ;;  %v6981_v58 = vld [vmem:[#allocation7 + $0x348] sm:$0xff]  }
 0x335   : > { %v3187_v16 = vmax.f32 %v2441_v10, 0.0  ;;  %v2444_v18 = vadd.f32 %v2443_v15, %v850_v7  ;;  %v6982_v7 = vld [vmem:[#allocation7 + $0x350] sm:$0xff]  }
 0x336   : > { %6634 = vmatmul.mubr.msk.bf16.gmra.mrb[200].mxu1 %vm1653_vm0, %v6974_v4  ;;  %v3190_v19 = vmax.f32 %v2452_v14, 0.0 }
 0x337   : > { %6637 = vmatprep.mubr.msk.bf16.mxu1 %vm1653_vm0, %v6975_v8  ;;  %v3188_v24 = vmax.f32 %v2444_v18, 0.0 }
 0x338   : > { %v7804_v29 = vpack.c.bf16 %v3190_v19, %v3189_v13 }
 0x339   : > { %v6531_v2 = vpop.f32.mrb[96].mxu1  ;;  %v7806_v30 = vpack.c.bf16 %v3188_v24, %v3187_v16  ;;  %v863_v24 = vld [vmem:[#allocation8 + $0x350] sm:$0xff] }
 0x33a   : > { %v2465_v33 = vadd.f32 %v6531_v2, %v855_v25  ;;  %v2456_v37 = vpop.f32.mrb[97].mxu1  ;;  %v861_v25 = vld [vmem:[#allocation8 + $0x340] sm:$0xff]  ;;  %v864_v2 = vld [vmem:[#allocation8 + $0x358] sm:$0xff] }
 0x33b   : > { %3838 = vmatmul.mubr.bf16.gmra.mrb[100].mxu0 %v7704_v11  ;;  %v2457_v17 = vadd.f32 %v2456_v37, %v853_v27  ;;  %v6532_v42 = vpop.f32.mrb[98].mxu1 }
 0x33c   : > { %3847 = vmatprep.mubr.bf16.mxu0 %v7272_v23  ;;  %v3193_v43 = vmax.f32 %v2465_v33, 0.0  ;;  %v2468_v46 = vadd.f32 %v6532_v42, %v856_v52  ;;  %v2459_v47 = vpop.f32.mrb[99].mxu1 }
 0x33d   : > { %v3191_v22 = vmax.f32 %v2457_v17, 0.0  ;;  %v2460_v49 = vadd.f32 %v2459_v47, %v854_v39  ;;  %v862_v39 = vld [vmem:[#allocation8 + $0x348] sm:$0xff] }
 0x33e   : > { %6638 = vmatmul.mubr.msk.bf16.gmra.mrb[204].mxu1 %vm1653_vm0, %v6976_v32  ;;  %v3194_v44 = vmax.f32 %v2468_v46, 0.0  ;;  %v6983_v32 = vld [vmem:[#allocation7 + $0x358] sm:$0xff]  }
 0x33f   : > { %6641 = vmatprep.mubr.msk.bf16.mxu1 %vm1653_vm0, %v6980_v41  ;;  %v3192_v53 = vmax.f32 %v2460_v49, 0.0  ;;  %v6987_v41 = vld [vmem:[#allocation7 + $0x360] sm:$0xff]  }
 0x340   : > { %v7812_v56 = vpack.c.bf16 %v3194_v44, %v3193_v43 }
 0x341   : > { %v6535_v11 = vpop.f32.mrb[100].mxu1  ;;  %v7814_v51 = vpack.c.bf16 %v3192_v53, %v3191_v22 }
 0x342   : > { %v2481_v4 = vadd.f32 %v6535_v11, %v859_v54  ;;  %v2472_v63 = vpop.f32.mrb[101].mxu1  ;;  %v867_v54 = vld [vmem:[#allocation8 + $0x370] sm:$0xff] }
 0x343   : > { %3848 = vmatmul.mubr.bf16.gmra.mrb[104].mxu0 %v7714_v36  ;;  %v2473_v8 = vadd.f32 %v2472_v63, %v857_v55  ;;  %v6536_v10 = vpop.f32.mrb[102].mxu1  ;;  %v865_v55 = vld [vmem:[#allocation8 + $0x360] sm:$0xff] }
 0x344   : > { %3857 = vmatprep.mubr.bf16.mxu0 %v7272_v23  ;;  %v3197_v12 = vmax.f32 %v2481_v4, 0.0  ;;  %v2484_v13 = vadd.f32 %v6536_v10, %v860_v57  ;;  %v2475_v14 = vpop.f32.mrb[103].mxu1  ;;  %v868_v57 = vld [vmem:[#allocation8 + $0x378] sm:$0xff]  ;;  %v6988_v4 = vld [vmem:[#allocation7 + $0x368] sm:$0xff]  }
 0x345   : > { %v3195_v15 = vmax.f32 %v2473_v8, 0.0  ;;  %v2476_v16 = vadd.f32 %v2475_v14, %v858_v3  ;;  %v6989_v8 = vld [vmem:[#allocation7 + $0x370] sm:$0xff]  }
 0x346   : > { %6642 = vmatmul.mubr.msk.bf16.gmra.mrb[208].mxu1 %vm1653_vm0, %v6981_v58  ;;  %v3198_v18 = vmax.f32 %v2484_v13, 0.0 }
 0x347   : > { %6645 = vmatprep.mubr.msk.bf16.mxu1 %vm1653_vm0, %v6982_v7  ;;  %v3196_v19 = vmax.f32 %v2476_v16, 0.0  ;;  %v866_v7 = vld [vmem:[#allocation8 + $0x368] sm:$0xff] }
 0x348   : > { %v7820_v27 = vpack.c.bf16 %v3198_v18, %v3197_v12 }
 0x349   : > { %v6539_v36 = vpop.f32.mrb[104].mxu1  ;;  %v7822_v52 = vpack.c.bf16 %v3196_v19, %v3195_v15 }
 0x34a   : > { %v2497_v33 = vadd.f32 %v6539_v36, %v863_v24  ;;  %v2488_v37 = vpop.f32.mrb[105].mxu1  ;;  %v871_v36 = vld [vmem:[#allocation8 + $0x390] sm:$0xff] }
 0x34b   : > { %3858 = vmatmul.mubr.bf16.gmra.mrb[108].mxu0 %v7712_v35  ;;  %v2489_v17 = vadd.f32 %v2488_v37, %v861_v25  ;;  %v6540_v42 = vpop.f32.mrb[106].mxu1 }
 0x34c   : > { %3867 = vmatprep.mubr.bf16.mxu0 %v7272_v23  ;;  %v3201_v43 = vmax.f32 %v2497_v33, 0.0  ;;  %v2500_v46 = vadd.f32 %v6540_v42, %v864_v2  ;;  %v2491_v47 = vpop.f32.mrb[107].mxu1  ;;  %v6990_v42 = vld [vmem:[#allocation7 + $0x378] sm:$0xff]  }
 0x34d   : > { %v3199_v22 = vmax.f32 %v2489_v17, 0.0  ;;  %v2492_v49 = vadd.f32 %v2491_v47, %v862_v39  ;;  %v870_v47 = vld [vmem:[#allocation8 + $0x388] sm:$0xff] }
 0x34e   : > { %6646 = vmatmul.mubr.msk.bf16.gmra.mrb[212].mxu1 %vm1653_vm0, %v6983_v32  ;;  %v3202_v44 = vmax.f32 %v2500_v46, 0.0  ;;  %v869_v32 = vld [vmem:[#allocation8 + $0x380] sm:$0xff] }
 0x34f   : > { %6649 = vmatprep.mubr.msk.bf16.mxu1 %vm1653_vm0, %v6987_v41  ;;  %v3200_v53 = vmax.f32 %v2492_v49, 0.0  ;;  %v872_v41 = vld [vmem:[#allocation8 + $0x398] sm:$0xff] }
 0x350   : > { %v7828_v11 = vpack.c.bf16 %v3202_v44, %v3201_v43 }
 0x351   : > { %v6543_v35 = vpop.f32.mrb[108].mxu1  ;;  %v7830_v58 = vpack.c.bf16 %v3200_v53, %v3199_v22  ;;  %v6994_v22 = vld [vmem:[#allocation7 + $0x380] sm:$0xff]  }
 0x352   : > { %v2513_v63 = vadd.f32 %v6543_v35, %v867_v54  ;;  %v2504_v3 = vpop.f32.mrb[109].mxu1 }
 0x353   : > { %3868 = vmatmul.mubr.bf16.gmra.mrb[112].mxu0 %v7722_v60  ;;  %v2505_v10 = vadd.f32 %v2504_v3, %v865_v55  ;;  %v6544_v12 = vpop.f32.mrb[110].mxu1 }
 0x354   : > { %3877 = vmatprep.mubr.bf16.mxu0 %v7272_v23  ;;  %v3205_v13 = vmax.f32 %v2513_v63, 0.0  ;;  %v2516_v14 = vadd.f32 %v6544_v12, %v868_v57  ;;  %v2507_v15 = vpop.f32.mrb[111].mxu1 }
 0x355   : > { %v3203_v16 = vmax.f32 %v2505_v10, 0.0  ;;  %v2508_v18 = vadd.f32 %v2507_v15, %v866_v7  ;;  %v875_v7 = vld [vmem:[#allocation8 + $0x3b0] sm:$0xff]  ;;  %v873_v10 = vld [vmem:[#allocation8 + $0x3a0] sm:$0xff]  ;;  %v876_v15 = vld [vmem:[#allocation8 + $0x3b8] sm:$0xff] }
 0x356   : > { %6650 = vmatmul.mubr.msk.bf16.gmra.mrb[216].mxu1 %vm1653_vm0, %v6988_v4  ;;  %v3609_v19 = vpop.f32.mrb[8].mxu0  ;;  %v3206_v24 = vmax.f32 %v2516_v14, 0.0 }
 0x357   : > { %3928 = vst [vmem:[%s7555_s26 + $0x40] sm:$0xff] %v3609_v19  ;;  %v3611_v25 = vpop.f32.mrb[9].mxu0  ;;  %6653 = vmatprep.mubr.msk.bf16.mxu1 %vm1653_vm0, %v6989_v8  ;;  %v3204_v60 = vmax.f32 %v2508_v18, 0.0  ;;  %v6995_v18 = vld [vmem:[#allocation7 + $0x388] sm:$0xff]  }
 0x358   : > { %3929 = vst [vmem:[%s7555_s26 + $0x48] sm:$0xff] %v3611_v25  ;;  %v3613_v2 = vpop.f32.mrb[10].mxu0  ;;  %v7838_v33 = vpack.c.bf16 %v3206_v24, %v3205_v13  ;;  %v874_v25 = vld [vmem:[#allocation8 + $0x3a8] sm:$0xff] }
 0x359   : > { %3930 = vst [vmem:[%s7555_s26 + $0x50] sm:$0xff] %v3613_v2  ;;  %v3615_v37 = vpop.f32.mrb[11].mxu0  ;;  %v6547_v39 = vpop.f32.mrb[112].mxu1  ;;  %v7841_v17 = vpack.c.bf16 %v3204_v60, %v3203_v16  ;;  %v6996_v60 = vld [vmem:[#allocation7 + $0x390] sm:$0xff]  }
 0x35a   : > { %3931 = vst [vmem:[%s7555_s26 + $0x58] sm:$0xff] %v3615_v37  ;;  %v2529_v43 = vadd.f32 %v6547_v39, %v871_v36  ;;  %v2520_v46 = vpop.f32.mrb[113].mxu1 }
 0x35b   : > { %3878 = vmatmul.mubr.bf16.gmra.mrb[116].mxu0 %v7720_v59  ;;  %v2521_v49 = vadd.f32 %v2520_v46, %v869_v32  ;;  %v6548_v44 = vpop.f32.mrb[114].mxu1 }
 0x35c   : > { %3887 = vmatprep.mubr.bf16.mxu0 %v7272_v23  ;;  %v3209_v53 = vmax.f32 %v2529_v43, 0.0  ;;  %v2532_v54 = vadd.f32 %v6548_v44, %v872_v41  ;;  %v2523_v55 = vpop.f32.mrb[115].mxu1  ;;  %v877_v44 = vld [vmem:[#allocation8 + $0x3c0] sm:$0xff] }
 0x35d   : > { %v3207_v35 = vmax.f32 %v2521_v49, 0.0  ;;  %v2524_v57 = vadd.f32 %v2523_v55, %v870_v47 }
 0x35e   : > { %6654 = vmatmul.mubr.msk.bf16.gmra.mrb[220].mxu1 %vm1653_vm0, %v6990_v42  ;;  %v3619_v4 = vpop.f32.mrb[12].mxu0  ;;  %v3210_v63 = vmax.f32 %v2532_v54, 0.0 }
 0x35f   : > { %3932 = vst [vmem:[%s7555_s26 + $0x60] sm:$0xff] %v3619_v4  ;;  %v3621_v3 = vpop.f32.mrb[13].mxu0  ;;  %6657 = vmatprep.mubr.msk.bf16.mxu1 %vm1653_vm0, %v6994_v22  ;;  %v3208_v59 = vmax.f32 %v2524_v57, 0.0  ;;  %v879_v22 = vld [vmem:[#allocation8 + $0x3d0] sm:$0xff]  ;;  %v6997_v4 = vld [vmem:[#allocation7 + $0x398] sm:$0xff]  }
 0x360   : > { %3933 = vst [vmem:[%s7555_s26 + $0x68] sm:$0xff] %v3621_v3  ;;  %v3623_v8 = vpop.f32.mrb[14].mxu0  ;;  %v7850_v12 = vpack.c.bf16 %v3210_v63, %v3209_v53 }
 0x361   : > { %3934 = vst [vmem:[%s7555_s26 + $0x70] sm:$0xff] %v3623_v8  ;;  %v3625_v13 = vpop.f32.mrb[15].mxu0  ;;  %v6551_v14 = vpop.f32.mrb[116].mxu1  ;;  %v7853_v16 = vpack.c.bf16 %v3208_v59, %v3207_v35  ;;  %v880_v35 = vld [vmem:[#allocation8 + $0x3d8] sm:$0xff]  ;;  %v878_v59 = vld [vmem:[#allocation8 + $0x3c8] sm:$0xff] }
 0x362   : > { %3935 = vst [vmem:[%s7555_s26 + $0x78] sm:$0xff] %v3625_v13  ;;  %v2545_v19 = vadd.f32 %v6551_v14, %v875_v7  ;;  %v2536_v24 = vpop.f32.mrb[117].mxu1  ;;  %v6998_v7 = vld [vmem:[#allocation7 + $0x3a0] sm:$0xff]  }
 0x363   : > { %3888 = vmatmul.mubr.bf16.gmra.mrb[120].mxu0 %v7730_v26  ;;  %v2537_v36 = vadd.f32 %v2536_v24, %v873_v10  ;;  %v6552_v2 = vpop.f32.mrb[118].mxu1 }
 0x364   : > { %3897 = vmatprep.mubr.bf16.mxu0 %v7272_v23  ;;  %v3213_v32 = vmax.f32 %v2545_v19, 0.0  ;;  %v2548_v37 = vadd.f32 %v6552_v2, %v876_v15  ;;  %v2539_v39 = vpop.f32.mrb[119].mxu1 }
 0x365   : > { %v3211_v41 = vmax.f32 %v2537_v36, 0.0  ;;  %v2540_v42 = vadd.f32 %v2539_v39, %v874_v25  ;;  %v883_v36 = vld [vmem:[#allocation8 + $0x3f0] sm:$0xff] }
 0x366   : > { %6658 = vmatmul.mubr.msk.bf16.gmra.mrb[224].mxu1 %vm1653_vm0, %v6995_v18  ;;  %v3629_v43 = vpop.f32.mrb[16].mxu0  ;;  %v3214_v46 = vmax.f32 %v2548_v37, 0.0 }
 0x367   : > { %3936 = vst [vmem:[%s7555_s26 + $0x80] sm:$0xff] %v3629_v43  ;;  %v3631_v47 = vpop.f32.mrb[17].mxu0  ;;  %6661 = vmatprep.mubr.msk.bf16.mxu1 %vm1653_vm0, %v6996_v60  ;;  %v3212_v26 = vmax.f32 %v2540_v42, 0.0  ;;  %v884_v42 = vld [vmem:[#allocation8 + $0x3f8] sm:$0xff] }
 0x368   : > { %3937 = vst [vmem:[%s7555_s26 + $0x88] sm:$0xff] %v3631_v47  ;;  %v3633_v49 = vpop.f32.mrb[18].mxu0  ;;  %v7862_v53 = vpack.c.bf16 %v3214_v46, %v3213_v32  ;;  %v881_v32 = vld [vmem:[#allocation8 + $0x3e0] sm:$0xff]  ;;  %v6999_v46 = vld [vmem:[#allocation7 + $0x3a8] sm:$0xff]  }
 0x369   : > { %3938 = vst [vmem:[%s7555_s26 + $0x90] sm:$0xff] %v3633_v49  ;;  %v3635_v54 = vpop.f32.mrb[19].mxu0  ;;  %v6555_v55 = vpop.f32.mrb[120].mxu1  ;;  %v7865_v57 = vpack.c.bf16 %v3212_v26, %v3211_v41  ;;  %v7000_v49 = vld [vmem:[#allocation7 + $0x3b0] sm:$0xff]  }
 0x36a   : > { %3939 = vst [vmem:[%s7555_s26 + $0x98] sm:$0xff] %v3635_v54  ;;  %v2561_v63 = vadd.f32 %v6555_v55, %v879_v22  ;;  %v2552_v3 = vpop.f32.mrb[121].mxu1  ;;  %v882_v22 = vld [vmem:[#allocation8 + $0x3e8] sm:$0xff] }
 0x36b   : > { %3898 = vmatmul.mubr.bf16.gmra.mrb[124].mxu0 %v7728_v20  ;;  %v2553_v8 = vadd.f32 %v2552_v3, %v877_v44  ;;  %v6556_v10 = vpop.f32.mrb[122].mxu1 }
 0x36c   : > { %3907 = vmatprep.mubr.bf16.mxu0 %v7272_v23  ;;  %v3217_v13 = vmax.f32 %v2561_v63, 0.0  ;;  %v2564_v14 = vadd.f32 %v6556_v10, %v880_v35  ;;  %v2555_v15 = vpop.f32.mrb[123].mxu1  ;;  %v887_v10 = vld [vmem:[#allocation8 + $0x410] sm:$0xff] }
 0x36d   : > { %v3215_v18 = vmax.f32 %v2553_v8, 0.0  ;;  %v2556_v19 = vadd.f32 %v2555_v15, %v878_v59  ;;  %v885_v15 = vld [vmem:[#allocation8 + $0x400] sm:$0xff] }
 0x36e   : > { %6662 = vmatmul.mubr.msk.bf16.gmra.mrb[228].mxu1 %vm1653_vm0, %v6997_v4  ;;  %v3639_v24 = vpop.f32.mrb[20].mxu0  ;;  %v3218_v25 = vmax.f32 %v2564_v14, 0.0 }
 0x36f   : > { %3940 = vst [vmem:[%s7555_s26 + $0xa0] sm:$0xff] %v3639_v24  ;;  %v3641_v60 = vpop.f32.mrb[21].mxu0  ;;  %6665 = vmatprep.mubr.msk.bf16.mxu1 %vm1653_vm0, %v6998_v7  ;;  %v3216_v20 = vmax.f32 %v2556_v19, 0.0 }
 0x370   : > { %3941 = vst [vmem:[%s7555_s26 + $0xa8] sm:$0xff] %v3641_v60  ;;  %v3643_v2 = vpop.f32.mrb[22].mxu0  ;;  %v7874_v37 = vpack.c.bf16 %v3218_v25, %v3217_v13  ;;  %v888_v25 = vld [vmem:[#allocation8 + $0x418] sm:$0xff] }
 0x371   : > { %3942 = vst [vmem:[%s7555_s26 + $0xb0] sm:$0xff] %v3643_v2  ;;  %v3645_v39 = vpop.f32.mrb[23].mxu0  ;;  %v6559_v41 = vpop.f32.mrb[124].mxu1  ;;  %v7877_v43 = vpack.c.bf16 %v3216_v20, %v3215_v18  ;;  %v7001_v60 = vld [vmem:[#allocation7 + $0x3b8] sm:$0xff]   ;;  %v886_v2 = vld [vmem:[#allocation8 + $0x408] sm:$0xff] }
 0x372   : > { %3943 = vst [vmem:[%s7555_s26 + $0xb8] sm:$0xff] %v3645_v39  ;;  %v2577_v47 = vadd.f32 %v6559_v41, %v883_v36  ;;  %v2568_v26 = vpop.f32.mrb[125].mxu1 }
 0x373   : > { %3908 = vmatmul.mubr.bf16.gmra.mrb[128].mxu0 %v7738_v50  ;;  %v2569_v44 = vadd.f32 %v2568_v26, %v881_v32  ;;  %v6560_v54 = vpop.f32.mrb[126].mxu1  ;;  %v7005_v32 = vld [vmem:[#allocation7 + $0x3c0] sm:$0xff]  }
 0x374   : > { %3917 = vmatprep.mubr.bf16.mxu0 %v7272_v23  ;;  %v3221_v55 = vmax.f32 %v2577_v47, 0.0  ;;  %v2580_v35 = vadd.f32 %v6560_v54, %v884_v42  ;;  %v2571_v4 = vpop.f32.mrb[127].mxu1 }
 0x375   : > { %v3219_v63 = vmax.f32 %v2569_v44, 0.0  ;;  %v2572_v3 = vadd.f32 %v2571_v4, %v882_v22  ;;  %v7898_v4 = vld [vmem:[#allocation10 + $0x180] ss:$8 sps:$4 sm:$0xff]  }
 0x376   : > { %6666 = vmatmul.mubr.msk.bf16.gmra.mrb[232].mxu1 %vm1653_vm0, %v6999_v46  ;;  %v3649_v59 = vpop.f32.mrb[24].mxu0  ;;  %v3222_v7 = vmax.f32 %v2580_v35, 0.0 }
 0x377   : > { %3944 = vst [vmem:[%s7555_s26 + $0xc0] sm:$0xff] %v3649_v59  ;;  %v3651_v8 = vpop.f32.mrb[25].mxu0  ;;  %6669 = vmatprep.mubr.msk.bf16.mxu1 %vm1653_vm0, %v7000_v49  ;;  %v3220_v50 = vmax.f32 %v2572_v3, 0.0  ;;  %v889_v3 = vld [vmem:[#allocation8 + $0x420] sm:$0xff] }
 0x378   : > { %3945 = vst [vmem:[%s7555_s26 + $0xc8] sm:$0xff] %v3651_v8  ;;  %v3653_v13 = vpop.f32.mrb[26].mxu0  ;;  %v7886_v14 = vpack.c.bf16 %v3222_v7, %v3221_v55  ;;  %v891_v55 = vld [vmem:[#allocation8 + $0x430] sm:$0xff] }
 0x379   : > { %3946 = vst [vmem:[%s7555_s26 + $0xd0] sm:$0xff] %v3653_v13  ;;  %v3655_v18 = vpop.f32.mrb[27].mxu0  ;;  %v7889_v19 = vpack.c.bf16 %v3220_v50, %v3219_v63  ;;  %v6563_v24 = vpop.f32.mrb[128].mxu1  ;;  %v7905_v8 = vld [vmem:[#allocation10 + $0x194] ss:$8 sps:$4 sm:$0xff]   ;;  %v7006_v13 = vld [vmem:[#allocation7 + $0x3c8] sm:$0xff]  }
 0x37a   : > { %3947 = vst [vmem:[%s7555_s26 + $0xd8] sm:$0xff] %v3655_v18  ;;  %v2593_v20 = vadd.f32 %v6563_v24, %v887_v10  ;;  %v2584_v36 = vpop.f32.mrb[129].mxu1  ;;  %v892_v10 = vld [vmem:[#allocation8 + $0x438] sm:$0xff]  ;;  %v890_v24 = vld [vmem:[#allocation8 + $0x428] sm:$0xff] }
 0x37b   : > { %3918 = vmatmul.mubr.bf16.gmra.mrb[132].mxu0 %v7736_v48  ;;  %v2585_v39 = vadd.f32 %v2584_v36, %v885_v15  ;;  %v6564_v41 = vpop.f32.mrb[130].mxu1  ;;  %v7911_v36 = vld [vmem:[#allocation10 + $0x190] ss:$8 sps:$4 sm:$0xff]  }
 0x37c   : > { %4185 = vmatprep.mubr.bf16.mxu0 %v7272_v23  ;;  %v3225_v42 = vmax.f32 %v2593_v20, 0.0  ;;  %v2596_v46 = vadd.f32 %v6564_v41, %v888_v25  ;;  %v2587_v47 = vpop.f32.mrb[131].mxu1  ;;  %v7007_v25 = vld [vmem:[#allocation7 + $0x3d0] sm:$0xff]  }
 0x37d   : > { %v3223_v26 = vmax.f32 %v2585_v39, 0.0  ;;  %v2588_v22 = vadd.f32 %v2587_v47, %v886_v2 }
 0x37e   : > { %6670 = vmatmul.mubr.msk.bf16.gmra.mrb[236].mxu1 %vm1653_vm0, %v7001_v60  ;;  %v3659_v49 = vpop.f32.mrb[28].mxu0  ;;  %v3226_v44 = vmax.f32 %v2596_v46, 0.0 }
 0x37f   : > { %3948 = vst [vmem:[%s7555_s26 + $0xe0] sm:$0xff] %v3659_v49  ;;  %v3661_v54 = vpop.f32.mrb[29].mxu0  ;;  %6673 = vmatprep.mubr.msk.bf16.mxu1 %vm1653_vm0, %v7005_v32  ;;  %v3224_v48 = vmax.f32 %v2588_v22, 0.0  ;;  %v895_v49 = vld [vmem:[#allocation8 + $0x450] sm:$0xff] }
 0x380   : > { %3949 = vst [vmem:[%s7555_s26 + $0xe8] sm:$0xff] %v3661_v54  ;;  %v3663_v35 = vpop.f32.mrb[30].mxu0  ;;  %v7900_v63 = vpack.c.bf16 %v3226_v44, %v3225_v42 }
 0x381   : > { %3950 = vst [vmem:[%s7555_s26 + $0xf0] sm:$0xff] %v3663_v35  ;;  %v3665_v59 = vpop.f32.mrb[31].mxu0  ;;  %v7903_v7 = vpack.c.bf16 %v3224_v48, %v3223_v26  ;;  %v6567_v50 = vpop.f32.mrb[132].mxu1  ;;  %v893_v48 = vld [vmem:[#allocation8 + $0x440] sm:$0xff] }
 0x382   : > { %3951 = vst [vmem:[%s7555_s26 + $0xf8] sm:$0xff] %v3665_v59  ;;  %v2609_v15 = vadd.f32 %v6567_v50, %v891_v55  ;;  %v2600_v18 = vpop.f32.mrb[133].mxu1  ;;  %v7923_v55 = vld [vmem:[#allocation10 + $0x1a0] ss:$8 sps:$4 sm:$0xff]   ;;  %v896_v50 = vld [vmem:[#allocation8 + $0x458] sm:$0xff] }
 0x383   : > { %4186 = vmatmul.mubr.bf16.vlgmr.msra.gmra.mrb[136].mxu0 %v7746_v38  ;;  %v2601_v60 = vadd.f32 %v2600_v18, %v889_v3  ;;  %v6568_v20 = vpop.f32.mrb[134].mxu1  ;;  %v7914_v38 = vld [vmem:[#allocation10 + $0x1a4] ss:$8 sps:$4 sm:$0xff]  }
 0x384   : > { %5310 = vmatpush1.bf16.msra.mxu0 %v7898_v4  ;;  %4195 = vmatprep.mubr.bf16.mxu0 %v7272_v23  ;;  %v3229_v2 = vmax.f32 %v2609_v15, 0.0  ;;  %v2612_v32 = vadd.f32 %v6568_v20, %v892_v10  ;;  %v2603_v39 = vpop.f32.mrb[135].mxu1  ;;  %v7929_v10 = vld [vmem:[#allocation10 + $0x1b4] ss:$8 sps:$4 sm:$0xff]  }
 0x385   : > { %5311 = vmatprep.subr.bf16.mxu0 %v7905_v8  ;;  %v3227_v41 = vmax.f32 %v2601_v60, 0.0  ;;  %v2604_v42 = vadd.f32 %v2603_v39, %v890_v24  ;;  %v894_v24 = vld [vmem:[#allocation8 + $0x448] sm:$0xff] }
 0x386   : > { %6674 = vmatmul.mubr.msk.bf16.gmra.mrb[240].mxu1 %vm1653_vm0, %v7006_v13  ;;  %v3669_v46 = vpop.f32.mrb[32].mxu0  ;;  %v3230_v47 = vmax.f32 %v2612_v32, 0.0  ;;  %v7008_v13 = vld [vmem:[#allocation7 + $0x3d8] sm:$0xff]  }
 0x387   : > { %3952 = vst [vmem:[%s7555_s26 + $0x100] sm:$0xff] %v3669_v46  ;;  %v3671_v26 = vpop.f32.mrb[33].mxu0  ;;  %6677 = vmatprep.mubr.msk.bf16.mxu1 %vm1653_vm0, %v7007_v25  ;;  %v3228_v22 = vmax.f32 %v2604_v42, 0.0  ;;  %v7012_v25 = vld [vmem:[#allocation7 + $0x3e0] sm:$0xff]  }
 0x388   : > { %3953 = vst [vmem:[%s7555_s26 + $0x108] sm:$0xff] %v3671_v26  ;;  %v3673_v44 = vpop.f32.mrb[34].mxu0  ;;  %5312 = vmatpush1.bf16.msra.mxu0 %v7911_v36  ;;  %v7921_v54 = vpack.c.bf16 %v3230_v47, %v3229_v2 }
 0x389   : > { %3954 = vst [vmem:[%s7555_s26 + $0x110] sm:$0xff] %v3673_v44  ;;  %v3675_v35 = vpop.f32.mrb[35].mxu0  ;;  %v7926_v3 = vpack.c.bf16 %v3228_v22, %v3227_v41  ;;  %v6571_v59 = vpop.f32.mrb[136].mxu1  ;;  %5313 = vmatprep.subr.bf16.mxu0 %v7914_v38  ;;  %v7935_v41 = vld [vmem:[#allocation10 + $0x1b0] ss:$8 sps:$4 sm:$0xff]  }
 0x38a   : > { %3955 = vst [vmem:[%s7555_s26 + $0x118] sm:$0xff] %v3675_v35  ;;  %v2625_v15 = vadd.f32 %v6571_v59, %v895_v49  ;;  %v2616_v18 = vpop.f32.mrb[137].mxu1  ;;  %v899_v44 = vld [vmem:[#allocation8 + $0x470] sm:$0xff]  ;;  %v897_v59 = vld [vmem:[#allocation8 + $0x460] sm:$0xff] }
 0x38b   : > { %4196 = vmatmul.mubr.bf16.gmra.mrb[140].mxu0 %v7744_v9  ;;  %v2617_v60 = vadd.f32 %v2616_v18, %v893_v48  ;;  %v6572_v20 = vpop.f32.mrb[138].mxu1  ;;  %v7938_v9 = vld [vmem:[#allocation10 + $0x1c4] ss:$8 sps:$4 sm:$0xff]  }
 0x38c   : > { %4205 = vmatprep.mubr.bf16.mxu0 %v7272_v23  ;;  %v3233_v2 = vmax.f32 %v2625_v15, 0.0  ;;  %v2628_v32 = vadd.f32 %v6572_v20, %v896_v50  ;;  %v2619_v39 = vpop.f32.mrb[139].mxu1  ;;  %5314 = vmatpush1.bf16.msra.mxu0 %v7923_v55  ;;  %v7947_v50 = vld [vmem:[#allocation10 + $0x1c0] ss:$8 sps:$4 sm:$0xff]  }
 0x38d   : > { %v3231_v42 = vmax.f32 %v2617_v60, 0.0  ;;  %v2620_v46 = vadd.f32 %v2619_v39, %v894_v24  ;;  %5315 = vmatprep.subr.bf16.mxu0 %v7929_v10  ;;  %v900_v24 = vld [vmem:[#allocation8 + $0x478] sm:$0xff] }
 0x38e   : > { %6678 = vmatmul.mubr.msk.bf16.gmra.mrb[244].mxu1 %vm1653_vm0, %v7008_v13  ;;  %v3679_v47 = vpop.f32.mrb[36].mxu0  ;;  %v3234_v26 = vmax.f32 %v2628_v32, 0.0  ;;  %v7014_v32 = vld [vmem:[#allocation7 + $0x3f0] sm:$0xff]  }
 0x38f   : > { %3956 = vst [vmem:[%s7555_s26 + $0x120] sm:$0xff] %v3679_v47  ;;  %v3681_v22 = vpop.f32.mrb[37].mxu0  ;;  %6681 = vmatprep.mubr.msk.bf16.mxu1 %vm1653_vm0, %v7012_v25  ;;  %v3232_v49 = vmax.f32 %v2620_v46, 0.0  ;;  %v7013_v25 = vld [vmem:[#allocation7 + $0x3e8] sm:$0xff]  }
 0x390   : > { %3957 = vst [vmem:[%s7555_s26 + $0x128] sm:$0xff] %v3681_v22  ;;  %v3683_v48 = vpop.f32.mrb[38].mxu0  ;;  %v7944_v35 = vpack.c.bf16 %v3234_v26, %v3233_v2  ;;  %5316 = vmatpush1.bf16.msra.mxu0 %v7935_v41  ;;  %v898_v2 = vld [vmem:[#allocation8 + $0x468] sm:$0xff] }
 0x391   : > { %3958 = vst [vmem:[%s7555_s26 + $0x130] sm:$0xff] %v3683_v48  ;;  %v3685_v13 = vpop.f32.mrb[39].mxu0  ;;  %v7950_v15 = vpack.c.bf16 %v3232_v49, %v3231_v42  ;;  %v6575_v18 = vpop.f32.mrb[140].mxu1  ;;  %5317 = vmatprep.subr.bf16.mxu0 %v7938_v9 }
 0x392   : > { %3959 = vst [vmem:[%s7555_s26 + $0x138] sm:$0xff] %v3685_v13  ;;  %v2641_v60 = vadd.f32 %v6575_v18, %v899_v44  ;;  %v2632_v20 = vpop.f32.mrb[141].mxu1  ;;  %v903_v13 = vld [vmem:[#allocation8 + $0x490] sm:$0xff] }
 0x393   : > { %4206 = vmatmul.mubr.bf16.gmra.mrb[144].mxu0 %v7757_v40  ;;  %v2633_v39 = vadd.f32 %v2632_v20, %v897_v59  ;;  %v6576_v46 = vpop.f32.mrb[142].mxu1 }
 0x394   : > { %4215 = vmatprep.mubr.bf16.mxu0 %v7272_v23  ;;  %v3237_v42 = vmax.f32 %v2641_v60, 0.0  ;;  %v2644_v47 = vadd.f32 %v6576_v46, %v900_v24  ;;  %v2635_v26 = vpop.f32.mrb[143].mxu1  ;;  %5318 = vmatpush1.bf16.msra.mxu0 %v7947_v50  ;;  %v901_v60 = vld [vmem:[#allocation8 + $0x480] sm:$0xff]  ;;  %v7015_v46 = vld [vmem:[#allocation7 + $0x3f8] sm:$0xff]  }
 0x395   : > { %v3235_v22 = vmax.f32 %v2633_v39, 0.0  ;;  %v2636_v49 = vadd.f32 %v2635_v26, %v898_v2 }
 0x396   : > { %6682 = vmatmul.mubr.msk.bf16.gmra.mrb[248].mxu1 %vm1653_vm0, %v7013_v25  ;;  %v3689_v44 = vpop.f32.mrb[40].mxu0  ;;  %v3238_v48 = vmax.f32 %v2644_v47, 0.0  ;;  %v904_v25 = vld [vmem:[#allocation8 + $0x498] sm:$0xff] }
 0x397   : > { %3960 = vst [vmem:[%s7555_s26 + $0x140] sm:$0xff] %v3689_v44  ;;  %v3691_v40 = vpop.f32.mrb[41].mxu0  ;;  %6685 = vmatprep.mubr.msk.bf16.mxu1 %vm1653_vm0, %v7014_v32  ;;  %v3236_v59 = vmax.f32 %v2636_v49, 0.0  ;;  %v902_v44 = vld [vmem:[#allocation8 + $0x488] sm:$0xff] }
 0x398   : > { %3961 = vst [vmem:[%s7555_s26 + $0x148] sm:$0xff] %v3691_v40  ;;  %v3693_v18 = vpop.f32.mrb[42].mxu0  ;;  %v7961_v24 = vpack.c.bf16 %v3238_v48, %v3237_v42 }
 0x399   : > { %3962 = vst [vmem:[%s7555_s26 + $0x150] sm:$0xff] %v3693_v18  ;;  %v3695_v20 = vpop.f32.mrb[43].mxu0  ;;  %v7964_v39 = vpack.c.bf16 %v3236_v59, %v3235_v22  ;;  %v6579_v2 = vpop.f32.mrb[144].mxu1 }
 0x39a   : > { %3963 = vst [vmem:[%s7555_s26 + $0x158] sm:$0xff] %v3695_v20  ;;  %v2657_v47 = vadd.f32 %v6579_v2, %v903_v13  ;;  %v2648_v26 = vpop.f32.mrb[145].mxu1 }
 0x39b   : > { %4216 = vmatmul.mubr.bf16.gmra.mrb[148].mxu0 %v7755_v1  ;;  %v2649_v32 = vadd.f32 %v2648_v26, %v901_v60  ;;  %v6580_v49 = vpop.f32.mrb[146].mxu1  ;;  %v907_v60 = vld [vmem:[#allocation8 + $0x4b0] sm:$0xff] }
 0x39c   : > { %4225 = vmatprep.mubr.bf16.mxu0 %v7272_v23  ;;  %v3241_v42 = vmax.f32 %v2657_v47, 0.0  ;;  %v2660_v48 = vadd.f32 %v6580_v49, %v904_v25  ;;  %v2651_v22 = vpop.f32.mrb[147].mxu1  ;;  %v905_v25 = vld [vmem:[#allocation8 + $0x4a0] sm:$0xff] }
 0x39d   : > { %v3239_v40 = vmax.f32 %v2649_v32, 0.0  ;;  %v2652_v59 = vadd.f32 %v2651_v22, %v902_v44  ;;  %v906_v22 = vld [vmem:[#allocation8 + $0x4a8] sm:$0xff] }
 0x39e   : > { %6686 = vmatmul.mubr.msk.bf16.gmra.mrb[252].mxu1 %vm1653_vm0, %v7015_v46  ;;  %v3699_v18 = vpop.f32.mrb[44].mxu0  ;;  %v3242_v13 = vmax.f32 %v2660_v48, 0.0  ;;  %v908_v46 = vld [vmem:[#allocation8 + $0x4b8] sm:$0xff] }
 0x39f   : > { %3964 = vst [vmem:[%s7555_s26 + $0x160] sm:$0xff] %v3699_v18  ;;  %v3701_v20 = vpop.f32.mrb[45].mxu0  ;;  %4763 = vmatprep.mubr.bf16.mxu1 %v7272_v23  ;;  %v3240_v1 = vmax.f32 %v2652_v59, 0.0  ;;  %v7979_v18 = vld [vmem:[#allocation10 + $0x1d0] ss:$8 sps:$4 sm:$0xff]  }
 0x3a0   : > { %3965 = vst [vmem:[%s7555_s26 + $0x168] sm:$0xff] %v3701_v20  ;;  %v3703_v2 = vpop.f32.mrb[46].mxu0  ;;  %v7973_v26 = vpack.c.bf16 %v3242_v13, %v3241_v42  ;;  %v7981_v59 = vld [vmem:[#allocation10 + $0x1d4] ss:$8 sps:$4 sm:$0xff]  }
 0x3a1   : > { %3966 = vst [vmem:[%s7555_s26 + $0x170] sm:$0xff] %v3703_v2  ;;  %v3705_v47 = vpop.f32.mrb[47].mxu0  ;;  %v7976_v32 = vpack.c.bf16 %v3240_v1, %v3239_v40  ;;  %v6583_v44 = vpop.f32.mrb[148].mxu1  ;;  %5319 = vmatprep.subr.bf16.mxu0 %v7981_v59 }
 0x3a2   : > { %3967 = vst [vmem:[%s7555_s26 + $0x178] sm:$0xff] %v3705_v47  ;;  %v2673_v49 = vadd.f32 %v6583_v44, %v907_v60  ;;  %v2664_v48 = vpop.f32.mrb[149].mxu1  ;;  %5320 = vmatpush1.bf16.msra.mxu0 %v7979_v18 }
 0x3a3   : > { %4226 = vmatmul.mubr.bf16.gmra.mrb[152].mxu0 %v7765_v21  ;;  %v2665_v42 = vadd.f32 %v2664_v48, %v905_v25  ;;  %v6584_v13 = vpop.f32.mrb[150].mxu1 }
 0x3a4   : > { %4235 = vmatprep.mubr.bf16.mxu0 %v7272_v23  ;;  %v3245_v20 = vmax.f32 %v2673_v49, 0.0  ;;  %v2676_v40 = vadd.f32 %v6584_v13, %v908_v46  ;;  %v2667_v1 = vpop.f32.mrb[151].mxu1  ;;  %v911_v49 = vld [vmem:[#allocation8 + $0x4d0] sm:$0xff] }
 0x3a5   : > { %v3243_v60 = vmax.f32 %v2665_v42, 0.0  ;;  %v2668_v2 = vadd.f32 %v2667_v1, %v906_v22  ;;  %v909_v22 = vld [vmem:[#allocation8 + $0x4c0] sm:$0xff] }
 0x3a6   : > { %v3709_v47 = vpop.f32.mrb[48].mxu0  ;;  %4764 = vmatmul.mubr.bf16.vlgmr.msra.gmra.mrb[0].mxu1 %v7903_v7  ;;  %v3246_v44 = vmax.f32 %v2676_v40, 0.0  ;;  %v912_v40 = vld [vmem:[#allocation8 + $0x4d8] sm:$0xff] }
 0x3a7   : > { %3968 = vst [vmem:[%s7555_s26 + $0x180] sm:$0xff] %v3709_v47  ;;  %v3711_v21 = vpop.f32.mrb[49].mxu0  ;;  %4773 = vmatprep.mubr.bf16.mxu1 %v7272_v23  ;;  %v3244_v25 = vmax.f32 %v2668_v2, 0.0  ;;  %6697 = vmatpush1.bf16.msra.mxu1 %v7898_v4  ;;  %v910_v2 = vld [vmem:[#allocation8 + $0x4c8] sm:$0xff] }
 0x3a8   : > { %3969 = vst [vmem:[%s7555_s26 + $0x188] sm:$0xff] %v3711_v21  ;;  %v3713_v46 = vpop.f32.mrb[50].mxu0  ;;  %v7992_v48 = vpack.c.bf16 %v3246_v44, %v3245_v20  ;;  %6690 = vmatprep.subr.bf16.mxu1 %v7905_v8 }
 0x3a9   : > { %3970 = vst [vmem:[%s7555_s26 + $0x190] sm:$0xff] %v3713_v46  ;;  %v3715_v42 = vpop.f32.mrb[51].mxu0  ;;  %v7996_v7 = vpack.c.bf16 %v3244_v25, %v3243_v60  ;;  %v6587_v13 = vpop.f32.mrb[152].mxu1 }
 0x3aa   : > { %3971 = vst [vmem:[%s7555_s26 + $0x198] sm:$0xff] %v3715_v42  ;;  %v2689_v1 = vadd.f32 %v6587_v13, %v911_v49  ;;  %v2680_v47 = vpop.f32.mrb[153].mxu1 }
 0x3ab   : > { %4236 = vmatmul.mubr.bf16.gmra.mrb[156].mxu0 %v7763_v62  ;;  %v2681_v4 = vadd.f32 %v2680_v47, %v909_v22  ;;  %v6588_v21 = vpop.f32.mrb[154].mxu1  ;;  %6698 = vmatpush1.bf16.msra.mxu1 %v7911_v36  ;;  %v915_v22 = vld [vmem:[#allocation8 + $0x4f0] sm:$0xff]  ;;  %v916_v47 = vld [vmem:[#allocation8 + $0x4f8] sm:$0xff] }
 0x3ac   : > { %4245 = vmatprep.mubr.bf16.mxu0 %v7272_v23  ;;  %v3249_v8 = vmax.f32 %v2689_v1, 0.0  ;;  %v2692_v20 = vadd.f32 %v6588_v21, %v912_v40  ;;  %v2683_v60 = vpop.f32.mrb[155].mxu1  ;;  %6691 = vmatprep.subr.bf16.mxu1 %v7914_v38  ;;  %v913_v38 = vld [vmem:[#allocation8 + $0x4e0] sm:$0xff]  ;;  %v914_v21 = vld [vmem:[#allocation8 + $0x4e8] sm:$0xff] }
 0x3ad   : > { %v3247_v44 = vmax.f32 %v2681_v4, 0.0  ;;  %v2684_v25 = vadd.f32 %v2683_v60, %v910_v2 }
 0x3ae   : > { %v3719_v49 = vpop.f32.mrb[52].mxu0  ;;  %4774 = vmatmul.mubr.bf16.gmra.mrb[4].mxu1 %v7900_v63  ;;  %v3250_v46 = vmax.f32 %v2692_v20, 0.0 }
 0x3af   : > { %3972 = vst [vmem:[%s7555_s26 + $0x1a0] sm:$0xff] %v3719_v49  ;;  %v3721_v62 = vpop.f32.mrb[53].mxu0  ;;  %4783 = vmatprep.mubr.bf16.mxu1 %v7272_v23  ;;  %v3248_v36 = vmax.f32 %v2684_v25, 0.0  ;;  %6699 = vmatpush1.bf16.msra.mxu1 %v7923_v55 }
 0x3b0   : > { %3973 = vst [vmem:[%s7555_s26 + $0x1a8] sm:$0xff] %v3721_v62  ;;  %v3723_v42 = vpop.f32.mrb[54].mxu0  ;;  %v8008_v13 = vpack.c.bf16 %v3250_v46, %v3249_v8  ;;  %6692 = vmatprep.subr.bf16.mxu1 %v7929_v10  ;;  %v919_v62 = vld [vmem:[#allocation8 + $0x510] sm:$0xff] }
 0x3b1   : > { %3974 = vst [vmem:[%s7555_s26 + $0x1b0] sm:$0xff] %v3723_v42  ;;  %v3725_v40 = vpop.f32.mrb[55].mxu0  ;;  %v8012_v63 = vpack.c.bf16 %v3248_v36, %v3247_v44  ;;  %v6591_v1 = vpop.f32.mrb[156].mxu1 }
 0x3b2   : > { %3975 = vst [vmem:[%s7555_s26 + $0x1b8] sm:$0xff] %v3725_v40  ;;  %v2705_v2 = vadd.f32 %v6591_v1, %v915_v22  ;;  %v2696_v4 = vpop.f32.mrb[157].mxu1  ;;  %v920_v40 = vld [vmem:[#allocation8 + $0x518] sm:$0xff] }
 0x3b3   : > { %4246 = vmatmul.mubr.bf16.gmra.mrb[160].mxu0 %v7773_v34  ;;  %v2697_v55 = vadd.f32 %v2696_v4, %v913_v38  ;;  %v6592_v20 = vpop.f32.mrb[158].mxu1  ;;  %6700 = vmatpush1.bf16.msra.mxu1 %v7935_v41 }
 0x3b4   : > { %4255 = vmatprep.mubr.bf16.mxu0 %v7272_v23  ;;  %v3253_v10 = vmax.f32 %v2705_v2, 0.0  ;;  %v2708_v8 = vadd.f32 %v6592_v20, %v916_v47  ;;  %v2699_v60 = vpop.f32.mrb[159].mxu1  ;;  %6693 = vmatprep.subr.bf16.mxu1 %v7938_v9  ;;  %v917_v9 = vld [vmem:[#allocation8 + $0x500] sm:$0xff]  ;;  %v918_v2 = vld [vmem:[#allocation8 + $0x508] sm:$0xff] }
 0x3b5   : > { %v3251_v44 = vmax.f32 %v2697_v55, 0.0  ;;  %v2700_v25 = vadd.f32 %v2699_v60, %v914_v21 }
 0x3b6   : > { %v3729_v49 = vpop.f32.mrb[56].mxu0  ;;  %4784 = vmatmul.mubr.bf16.gmra.mrb[8].mxu1 %v7926_v3  ;;  %v3254_v46 = vmax.f32 %v2708_v8, 0.0 }
 0x3b7   : > { %3976 = vst [vmem:[%s7555_s26 + $0x1c0] sm:$0xff] %v3729_v49  ;;  %v3731_v34 = vpop.f32.mrb[57].mxu0  ;;  %4793 = vmatprep.mubr.bf16.mxu1 %v7272_v23  ;;  %v3252_v41 = vmax.f32 %v2700_v25, 0.0  ;;  %6701 = vmatpush1.bf16.msra.mxu1 %v7947_v50  ;;  %v923_v25 = vld [vmem:[#allocation8 + $0x530] sm:$0xff] }
 0x3b8   : > { %3977 = vst [vmem:[%s7555_s26 + $0x1c8] sm:$0xff] %v3731_v34  ;;  %v3733_v36 = vpop.f32.mrb[58].mxu0  ;;  %v8024_v22 = vpack.c.bf16 %v3254_v46, %v3253_v10  ;;  %6694 = vmatprep.subr.bf16.mxu1 %v7981_v59  ;;  %v921_v46 = vld [vmem:[#allocation8 + $0x520] sm:$0xff] }
 0x3b9   : > { %3978 = vst [vmem:[%s7555_s26 + $0x1d0] sm:$0xff] %v3733_v36  ;;  %v3735_v42 = vpop.f32.mrb[59].mxu0  ;;  %v8028_v3 = vpack.c.bf16 %v3252_v41, %v3251_v44  ;;  %v6595_v38 = vpop.f32.mrb[160].mxu1  ;;  %v924_v36 = vld [vmem:[#allocation8 + $0x538] sm:$0xff] }
 0x3ba   : > { %3979 = vst [vmem:[%s7555_s26 + $0x1d8] sm:$0xff] %v3735_v42  ;;  %v2721_v1 = vadd.f32 %v6595_v38, %v919_v62  ;;  %v2712_v47 = vpop.f32.mrb[161].mxu1  ;;  %v922_v42 = vld [vmem:[#allocation8 + $0x528] sm:$0xff] }
 0x3bb   : > { %4256 = vmatmul.mubr.bf16.gmra.mrb[164].mxu0 %v7771_v31  ;;  %v2713_v50 = vadd.f32 %v2712_v47, %v917_v9  ;;  %v6596_v4 = vpop.f32.mrb[162].mxu1  ;;  %6702 = vmatpush1.bf16.msra.mxu1 %v7979_v18  ;;  %v7037_v38 = vld [vmem:[#allocation10 + $0x1e0] ss:$8 sps:$4 sm:$0xff]  }
 0x3bc   : > { %4265 = vmatprep.mubr.bf16.mxu0 %v7272_v23  ;;  %v3257_v59 = vmax.f32 %v2721_v1, 0.0  ;;  %v2724_v21 = vadd.f32 %v6596_v4, %v920_v40  ;;  %v2715_v55 = vpop.f32.mrb[163].mxu1  ;;  %v7039_v40 = vld [vmem:[#allocation10 + $0x1e4] ss:$8 sps:$4 sm:$0xff]  }
 0x3bd   : > { %v3255_v20 = vmax.f32 %v2713_v50, 0.0  ;;  %v2716_v10 = vadd.f32 %v2715_v55, %v918_v2  ;;  %5321 = vmatprep.subr.bf16.mxu0 %v7039_v40  ;;  %6695 = vmatprep.subr.bf16.mxu1 %v7039_v40 }
 0x3be   : > { %v3739_v8 = vpop.f32.mrb[60].mxu0  ;;  %4794 = vmatmul.mubr.bf16.gmra.mrb[12].mxu1 %v7921_v54  ;;  %v3258_v60 = vmax.f32 %v2724_v21, 0.0  ;;  %5322 = vmatpush1.bf16.msra.mxu0 %v7037_v38 }
 0x3bf   : > { %3980 = vst [vmem:[%s7555_s26 + $0x1e0] sm:$0xff] %v3739_v8  ;;  %v3741_v31 = vpop.f32.mrb[61].mxu0  ;;  %4803 = vmatprep.mubr.bf16.mxu1 %v7272_v23  ;;  %v3256_v44 = vmax.f32 %v2716_v10, 0.0  ;;  %v927_v8 = vld [vmem:[#allocation8 + $0x550] sm:$0xff]  ;;  %6703 = vmatpush1.bf16.msra.mxu1 %v7037_v38 }
 0x3c0   : > { %3981 = vst [vmem:[%s7555_s26 + $0x1e8] sm:$0xff] %v3741_v31  ;;  %v3743_v18 = vpop.f32.mrb[62].mxu0  ;;  %v8038_v49 = vpack.c.bf16 %v3258_v60, %v3257_v59 }
 0x3c1   : > { %3982 = vst [vmem:[%s7555_s26 + $0x1f0] sm:$0xff] %v3743_v18  ;;  %v3745_v34 = vpop.f32.mrb[63].mxu0  ;;  %v8041_v41 = vpack.c.bf16 %v3256_v44, %v3255_v20  ;;  %v6599_v62 = vpop.f32.mrb[164].mxu1  ;;  %v925_v44 = vld [vmem:[#allocation8 + $0x540] sm:$0xff] }
 0x3c2   : > { %3983 = vst [vmem:[%s7555_s26 + $0x1f8] sm:$0xff] %v3745_v34  ;;  %v2737_v54 = vadd.f32 %v6599_v62, %v923_v25  ;;  %v2728_v9 = vpop.f32.mrb[165].mxu1 }
 0x3c3   : > { %4266 = vmatmul.mubr.bf16.gmra.mrb[168].mxu0 %v7781_v6  ;;  %v2729_v1 = vadd.f32 %v2728_v9, %v921_v46  ;;  %v6600_v47 = vpop.f32.mrb[166].mxu1 }
 0x3c4   : > { %4275 = vmatprep.mubr.bf16.mxu0 %v7272_v23  ;;  %v3261_v2 = vmax.f32 %v2737_v54, 0.0  ;;  %v2740_v50 = vadd.f32 %v6600_v47, %v924_v36  ;;  %v2731_v4 = vpop.f32.mrb[167].mxu1  ;;  %v926_v36 = vld [vmem:[#allocation8 + $0x548] sm:$0xff] }
 0x3c5   : > { %v3259_v59 = vmax.f32 %v2729_v1, 0.0  ;;  %v2732_v21 = vadd.f32 %v2731_v4, %v922_v42 }
 0x3c6   : > { %v3749_v55 = vpop.f32.mrb[64].mxu0  ;;  %4804 = vmatmul.mubr.bf16.gmra.mrb[16].mxu1 %v7950_v15  ;;  %v3262_v20 = vmax.f32 %v2740_v50, 0.0  ;;  %v928_v15 = vld [vmem:[#allocation8 + $0x558] sm:$0xff] }
 0x3c7   : > { %3984 = vst [vmem:[%s7555_s26 + $0x200] sm:$0xff] %v3749_v55  ;;  %v3751_v6 = vpop.f32.mrb[65].mxu0  ;;  %4813 = vmatprep.mubr.bf16.mxu1 %v7272_v23  ;;  %v3260_v10 = vmax.f32 %v2732_v21, 0.0 }
 0x3c8   : > { %3985 = vst [vmem:[%s7555_s26 + $0x208] sm:$0xff] %v3751_v6  ;;  %v3753_v60 = vpop.f32.mrb[66].mxu0  ;;  %v8050_v31 = vpack.c.bf16 %v3262_v20, %v3261_v2  ;;  %v929_v20 = vld [vmem:[#allocation8 + $0x560] sm:$0xff] }
 0x3c9   : > { %3986 = vst [vmem:[%s7555_s26 + $0x210] sm:$0xff] %v3753_v60  ;;  %v3755_v25 = vpop.f32.mrb[67].mxu0  ;;  %v8053_v18 = vpack.c.bf16 %v3260_v10, %v3259_v59  ;;  %v6603_v46 = vpop.f32.mrb[168].mxu1  ;;  %v931_v59 = vld [vmem:[#allocation8 + $0x570] sm:$0xff]  ;;  %v932_v60 = vld [vmem:[#allocation8 + $0x578] sm:$0xff] }
 0x3ca   : > { %3987 = vst [vmem:[%s7555_s26 + $0x218] sm:$0xff] %v3755_v25  ;;  %v2753_v34 = vadd.f32 %v6603_v46, %v927_v8  ;;  %v2744_v62 = vpop.f32.mrb[169].mxu1  ;;  %v930_v25 = vld [vmem:[#allocation8 + $0x568] sm:$0xff] }
 0x3cb   : > { %4276 = vmatmul.mubr.bf16.gmra.mrb[172].mxu0 %v7779_v61  ;;  %v2745_v54 = vadd.f32 %v2744_v62, %v925_v44  ;;  %v6604_v9 = vpop.f32.mrb[170].mxu1 }
 0x3cc   : > { %4285 = vmatprep.mubr.bf16.mxu0 %v7272_v23  ;;  %v3265_v42 = vmax.f32 %v2753_v34, 0.0  ;;  %v2756_v38 = vadd.f32 %v6604_v9, %v928_v15  ;;  %v2747_v40 = vpop.f32.mrb[171].mxu1 }
 0x3cd   : > { %v3263_v1 = vmax.f32 %v2745_v54, 0.0  ;;  %v2748_v47 = vadd.f32 %v2747_v40, %v926_v36 }
 0x3ce   : > { %v3759_v2 = vpop.f32.mrb[68].mxu0  ;;  %4814 = vmatmul.mubr.bf16.gmra.mrb[20].mxu1 %v7944_v35  ;;  %v3266_v50 = vmax.f32 %v2756_v38, 0.0 }
 0x3cf   : > { %3988 = vst [vmem:[%s7555_s26 + $0x220] sm:$0xff] %v3759_v2  ;;  %v3761_v4 = vpop.f32.mrb[69].mxu0  ;;  %4823 = vmatprep.mubr.bf16.mxu1 %v7272_v23  ;;  %v3264_v61 = vmax.f32 %v2748_v47, 0.0 }
 0x3d0   : > { %3989 = vst [vmem:[%s7555_s26 + $0x228] sm:$0xff] %v3761_v4  ;;  %v3763_v21 = vpop.f32.mrb[70].mxu0  ;;  %v8062_v55 = vpack.c.bf16 %v3266_v50, %v3265_v42  ;;  %v933_v50 = vld [vmem:[#allocation8 + $0x580] sm:$0xff] }
 0x3d1   : > { %3990 = vst [vmem:[%s7555_s26 + $0x230] sm:$0xff] %v3763_v21  ;;  %v3765_v6 = vpop.f32.mrb[71].mxu0  ;;  %v8065_v10 = vpack.c.bf16 %v3264_v61, %v3263_v1  ;;  %v6607_v8 = vpop.f32.mrb[172].mxu1  ;;  %v935_v1 = vld [vmem:[#allocation8 + $0x590] sm:$0xff]  ;;  %v936_v21 = vld [vmem:[#allocation8 + $0x598] sm:$0xff] }
 0x3d2   : > { %3991 = vst [vmem:[%s7555_s26 + $0x238] sm:$0xff] %v3765_v6  ;;  %v2769_v35 = vadd.f32 %v6607_v8, %v931_v59  ;;  %v2760_v44 = vpop.f32.mrb[173].mxu1  ;;  %v934_v6 = vld [vmem:[#allocation8 + $0x588] sm:$0xff] }
 0x3d3   : > { %4286 = vmatmul.mubr.bf16.gmra.mrb[176].mxu0 %v7790_v5  ;;  %v2761_v46 = vadd.f32 %v2760_v44, %v929_v20  ;;  %v6608_v15 = vpop.f32.mrb[174].mxu1 }
 0x3d4   : > { %4295 = vmatprep.mubr.bf16.mxu0 %v7272_v23  ;;  %v3269_v34 = vmax.f32 %v2769_v35, 0.0  ;;  %v2772_v62 = vadd.f32 %v6608_v15, %v932_v60  ;;  %v2763_v36 = vpop.f32.mrb[175].mxu1 }
 0x3d5   : > { %v3267_v54 = vmax.f32 %v2761_v46, 0.0  ;;  %v2764_v9 = vadd.f32 %v2763_v36, %v930_v25 }
 0x3d6   : > { %v3769_v42 = vpop.f32.mrb[72].mxu0  ;;  %4824 = vmatmul.mubr.bf16.gmra.mrb[24].mxu1 %v7964_v39  ;;  %v3270_v38 = vmax.f32 %v2772_v62, 0.0 }
 0x3d7   : > { %3992 = vst [vmem:[%s7555_s26 + $0x240] sm:$0xff] %v3769_v42  ;;  %v3771_v40 = vpop.f32.mrb[73].mxu0  ;;  %4833 = vmatprep.mubr.bf16.mxu1 %v7272_v23  ;;  %v3268_v5 = vmax.f32 %v2764_v9, 0.0 }
 0x3d8   : > { %3993 = vst [vmem:[%s7555_s26 + $0x248] sm:$0xff] %v3771_v40  ;;  %v3773_v47 = vpop.f32.mrb[74].mxu0  ;;  %v8074_v2 = vpack.c.bf16 %v3270_v38, %v3269_v34  ;;  %v937_v38 = vld [vmem:[#allocation8 + $0x5a0] sm:$0xff] }
 0x3d9   : > { %3994 = vst [vmem:[%s7555_s26 + $0x250] sm:$0xff] %v3773_v47  ;;  %v3775_v4 = vpop.f32.mrb[75].mxu0  ;;  %v8077_v61 = vpack.c.bf16 %v3268_v5, %v3267_v54  ;;  %v6611_v59 = vpop.f32.mrb[176].mxu1  ;;  %v939_v54 = vld [vmem:[#allocation8 + $0x5b0] sm:$0xff]  ;;  %v940_v47 = vld [vmem:[#allocation8 + $0x5b8] sm:$0xff] }
 0x3da   : > { %3995 = vst [vmem:[%s7555_s26 + $0x258] sm:$0xff] %v3775_v4  ;;  %v2785_v39 = vadd.f32 %v6611_v59, %v935_v1  ;;  %v2776_v20 = vpop.f32.mrb[177].mxu1  ;;  %v938_v4 = vld [vmem:[#allocation8 + $0x5a8] sm:$0xff]  ;;  %v7040_v59 = vld [vmem:[#allocation10 + $0x1f0] ss:$8 sps:$4 sm:$0xff]  }
 0x3db   : > { %4296 = vmatmul.mubr.bf16.gmra.mrb[180].mxu0 %v7788_v45  ;;  %v2777_v8 = vadd.f32 %v2776_v20, %v933_v50  ;;  %v6612_v60 = vpop.f32.mrb[178].mxu1 }
 0x3dc   : > { %4305 = vmatprep.mubr.bf16.mxu0 %v7272_v23  ;;  %v3273_v35 = vmax.f32 %v2785_v39, 0.0  ;;  %v2788_v44 = vadd.f32 %v6612_v60, %v936_v21  ;;  %v2779_v25 = vpop.f32.mrb[179].mxu1  ;;  %v7042_v21 = vld [vmem:[#allocation10 + $0x1f4] ss:$8 sps:$4 sm:$0xff]  }
 0x3dd   : > { %v3271_v46 = vmax.f32 %v2777_v8, 0.0  ;;  %v2780_v15 = vadd.f32 %v2779_v25, %v934_v6  ;;  %5323 = vmatprep.subr.bf16.mxu0 %v7042_v21  ;;  %6696 = vmatprep.subr.bf16.mxu1 %v7042_v21 }
 0x3de   : > { %v3779_v34 = vpop.f32.mrb[76].mxu0  ;;  %4834 = vmatmul.mubr.bf16.gmra.mrb[28].mxu1 %v7961_v24  ;;  %v3274_v62 = vmax.f32 %v2788_v44, 0.0  ;;  %5324 = vmatpush1.bf16.msra.mxu0 %v7040_v59 }
 0x3df   : > { %3996 = vst [vmem:[%s7555_s26 + $0x260] sm:$0xff] %v3779_v34  ;;  %v3781_v36 = vpop.f32.mrb[77].mxu0  ;;  %4843 = vmatprep.mubr.bf16.mxu1 %v7272_v23  ;;  %v3272_v45 = vmax.f32 %v2780_v15, 0.0  ;;  %v943_v34 = vld [vmem:[#allocation8 + $0x5d0] sm:$0xff]  ;;  %6704 = vmatpush1.bf16.msra.mxu1 %v7040_v59 }
 0x3e0   : > { %3997 = vst [vmem:[%s7555_s26 + $0x268] sm:$0xff] %v3781_v36  ;;  %v3783_v9 = vpop.f32.mrb[78].mxu0  ;;  %v8086_v42 = vpack.c.bf16 %v3274_v62, %v3273_v35 }
 0x3e1   : > { %3998 = vst [vmem:[%s7555_s26 + $0x270] sm:$0xff] %v3783_v9  ;;  %v3785_v40 = vpop.f32.mrb[79].mxu0  ;;  %v8089_v5 = vpack.c.bf16 %v3272_v45, %v3271_v46  ;;  %v6615_v1 = vpop.f32.mrb[180].mxu1  ;;  %v941_v45 = vld [vmem:[#allocation8 + $0x5c0] sm:$0xff] }
 0x3e2   : > { %3999 = vst [vmem:[%s7555_s26 + $0x278] sm:$0xff] %v3785_v40  ;;  %v2801_v24 = vadd.f32 %v6615_v1, %v939_v54  ;;  %v2792_v50 = vpop.f32.mrb[181].mxu1 }
 0x3e3   : > { %4306 = vmatmul.mubr.bf16.gmra.mrb[184].mxu0 %v7798_v0  ;;  %v2793_v39 = vadd.f32 %v2792_v50, %v937_v38  ;;  %v6616_v20 = vpop.f32.mrb[182].mxu1 }
 0x3e4   : > { %4315 = vmatprep.mubr.bf16.mxu0 %v7272_v23  ;;  %v3277_v6 = vmax.f32 %v2801_v24, 0.0  ;;  %v2804_v8 = vadd.f32 %v6616_v20, %v940_v47  ;;  %v2795_v60 = vpop.f32.mrb[183].mxu1  ;;  %v942_v47 = vld [vmem:[#allocation8 + $0x5c8] sm:$0xff] }
 0x3e5   : > { %v3275_v35 = vmax.f32 %v2793_v39, 0.0  ;;  %v2796_v44 = vadd.f32 %v2795_v60, %v938_v4 }
 0x3e6   : > { %v3789_v25 = vpop.f32.mrb[80].mxu0  ;;  %4844 = vmatmul.mubr.bf16.gmra.mrb[32].mxu1 %v7976_v32  ;;  %v3278_v46 = vmax.f32 %v2804_v8, 0.0  ;;  %v944_v32 = vld [vmem:[#allocation8 + $0x5d8] sm:$0xff] }
 0x3e7   : > { %4000 = vst [vmem:[%s7555_s26 + $0x280] sm:$0xff] %v3789_v25  ;;  %v3791_v0 = vpop.f32.mrb[81].mxu0  ;;  %4853 = vmatprep.mubr.bf16.mxu1 %v7272_v23  ;;  %v3276_v15 = vmax.f32 %v2796_v44, 0.0 }
 0x3e8   : > { %4001 = vst [vmem:[%s7555_s26 + $0x288] sm:$0xff] %v3791_v0  ;;  %v3793_v62 = vpop.f32.mrb[82].mxu0  ;;  %v8098_v36 = vpack.c.bf16 %v3278_v46, %v3277_v6  ;;  %v945_v46 = vld [vmem:[#allocation8 + $0x5e0] sm:$0xff] }
 0x3e9   : > { %4002 = vst [vmem:[%s7555_s26 + $0x290] sm:$0xff] %v3793_v62  ;;  %v3795_v54 = vpop.f32.mrb[83].mxu0  ;;  %v8101_v9 = vpack.c.bf16 %v3276_v15, %v3275_v35  ;;  %v6619_v38 = vpop.f32.mrb[184].mxu1  ;;  %v947_v35 = vld [vmem:[#allocation8 + $0x5f0] sm:$0xff]  ;;  %v948_v62 = vld [vmem:[#allocation8 + $0x5f8] sm:$0xff] }
 0x3ea   : > { %4003 = vst [vmem:[%s7555_s26 + $0x298] sm:$0xff] %v3795_v54  ;;  %v2817_v40 = vadd.f32 %v6619_v38, %v943_v34  ;;  %v2808_v1 = vpop.f32.mrb[185].mxu1  ;;  %v946_v54 = vld [vmem:[#allocation8 + $0x5e8] sm:$0xff] }
 0x3eb   : > { %4316 = vmatmul.mubr.bf16.gmra.mrb[188].mxu0 %v7796_v28  ;;  %v2809_v24 = vadd.f32 %v2808_v1, %v941_v45  ;;  %v6620_v50 = vpop.f32.mrb[186].mxu1 }
 0x3ec   : > { %4325 = vmatprep.mubr.bf16.mxu0 %v7272_v23  ;;  %v3281_v4 = vmax.f32 %v2817_v40, 0.0  ;;  %v2820_v59 = vadd.f32 %v6620_v50, %v944_v32  ;;  %v2811_v21 = vpop.f32.mrb[187].mxu1 }
 0x3ed   : > { %v3279_v39 = vmax.f32 %v2809_v24, 0.0  ;;  %v2812_v20 = vadd.f32 %v2811_v21, %v942_v47 }
 0x3ee   : > { %v3799_v6 = vpop.f32.mrb[84].mxu0  ;;  %4854 = vmatmul.mubr.bf16.gmra.mrb[36].mxu1 %v7973_v26  ;;  %v3282_v8 = vmax.f32 %v2820_v59, 0.0 }
 0x3ef   : > { %4004 = vst [vmem:[%s7555_s26 + $0x2a0] sm:$0xff] %v3799_v6  ;;  %v3801_v60 = vpop.f32.mrb[85].mxu0  ;;  %4863 = vmatprep.mubr.bf16.mxu1 %v7272_v23  ;;  %v3280_v28 = vmax.f32 %v2812_v20, 0.0 }
 0x3f0   : > { %4005 = vst [vmem:[%s7555_s26 + $0x2a8] sm:$0xff] %v3801_v60  ;;  %v3803_v44 = vpop.f32.mrb[86].mxu0  ;;  %v8110_v25 = vpack.c.bf16 %v3282_v8, %v3281_v4  ;;  %v949_v8 = vld [vmem:[#allocation8 + $0x600] sm:$0xff] }
 0x3f1   : > { %4006 = vst [vmem:[%s7555_s26 + $0x2b0] sm:$0xff] %v3803_v44  ;;  %v3805_v0 = vpop.f32.mrb[87].mxu0  ;;  %v8113_v15 = vpack.c.bf16 %v3280_v28, %v3279_v39  ;;  %v6623_v34 = vpop.f32.mrb[188].mxu1  ;;  %v951_v39 = vld [vmem:[#allocation8 + $0x610] sm:$0xff]  ;;  %v952_v44 = vld [vmem:[#allocation8 + $0x618] sm:$0xff] }
 0x3f2   : > { %4007 = vst [vmem:[%s7555_s26 + $0x2b8] sm:$0xff] %v3805_v0  ;;  %v2833_v26 = vadd.f32 %v6623_v34, %v947_v35  ;;  %v2824_v45 = vpop.f32.mrb[189].mxu1  ;;  %v950_v0 = vld [vmem:[#allocation8 + $0x608] sm:$0xff] }
 0x3f3   : > { %4326 = vmatmul.mubr.bf16.gmra.mrb[192].mxu0 %v7806_v30  ;;  %v2825_v38 = vadd.f32 %v2824_v45, %v945_v46  ;;  %v6624_v32 = vpop.f32.mrb[190].mxu1 }
 0x3f4   : > { %4335 = vmatprep.mubr.bf16.mxu0 %v7272_v23  ;;  %v3285_v40 = vmax.f32 %v2833_v26, 0.0  ;;  %v2836_v1 = vadd.f32 %v6624_v32, %v948_v62  ;;  %v2827_v47 = vpop.f32.mrb[191].mxu1 }
 0x3f5   : > { %v3283_v24 = vmax.f32 %v2825_v38, 0.0  ;;  %v2828_v50 = vadd.f32 %v2827_v47, %v946_v54 }
 0x3f6   : > { %v3809_v4 = vpop.f32.mrb[88].mxu0  ;;  %4864 = vmatmul.mubr.bf16.gmra.mrb[40].mxu1 %v7996_v7  ;;  %v3286_v59 = vmax.f32 %v2836_v1, 0.0 }
 0x3f7   : > { %4008 = vst [vmem:[%s7555_s26 + $0x2c0] sm:$0xff] %v3809_v4  ;;  %v3811_v21 = vpop.f32.mrb[89].mxu0  ;;  %4873 = vmatprep.mubr.bf16.mxu1 %v7272_v23  ;;  %v3284_v30 = vmax.f32 %v2828_v50, 0.0 }
 0x3f8   : > { %4009 = vst [vmem:[%s7555_s26 + $0x2c8] sm:$0xff] %v3811_v21  ;;  %v3813_v20 = vpop.f32.mrb[90].mxu0  ;;  %v8122_v6 = vpack.c.bf16 %v3286_v59, %v3285_v40 }
 0x3f9   : > { %4010 = vst [vmem:[%s7555_s26 + $0x2d0] sm:$0xff] %v3813_v20  ;;  %v3815_v60 = vpop.f32.mrb[91].mxu0  ;;  %v8125_v28 = vpack.c.bf16 %v3284_v30, %v3283_v24  ;;  %v6627_v35 = vpop.f32.mrb[192].mxu1 }
 0x3fa   : > { %4011 = vst [vmem:[%s7555_s26 + $0x2d8] sm:$0xff] %v3815_v60  ;;  %v2849_v7 = vadd.f32 %v6627_v35, %v951_v39  ;;  %v2840_v46 = vpop.f32.mrb[193].mxu1  ;;  %v953_v60 = vld [vmem:[#allocation8 + $0x620] sm:$0xff] }
 0x3fb   : > { %4336 = vmatmul.mubr.bf16.gmra.mrb[196].mxu0 %v7804_v29  ;;  %v2841_v34 = vadd.f32 %v2840_v46, %v949_v8  ;;  %v6628_v62 = vpop.f32.mrb[194].mxu1 }
 0x3fc   : > { %4345 = vmatprep.mubr.bf16.mxu0 %v7272_v23  ;;  %v3289_v26 = vmax.f32 %v2849_v7, 0.0  ;;  %v2852_v45 = vadd.f32 %v6628_v62, %v952_v44  ;;  %v2843_v54 = vpop.f32.mrb[195].mxu1 }
 0x3fd   : > { %v3287_v38 = vmax.f32 %v2841_v34, 0.0  ;;  %v2844_v32 = vadd.f32 %v2843_v54, %v950_v0 }
 0x3fe   : > { %v3819_v40 = vpop.f32.mrb[92].mxu0  ;;  %4874 = vmatmul.mubr.bf16.gmra.mrb[44].mxu1 %v7992_v48  ;;  %v3290_v1 = vmax.f32 %v2852_v45, 0.0  ;;  %v955_v48 = vld [vmem:[#allocation8 + $0x630] sm:$0xff] }
 0x3ff   : > { %4012 = vst [vmem:[%s7555_s26 + $0x2e0] sm:$0xff] %v3819_v40  ;;  %v3821_v47 = vpop.f32.mrb[93].mxu0  ;;  %4883 = vmatprep.mubr.bf16.mxu1 %v7272_v23  ;;  %v3288_v29 = vmax.f32 %v2844_v32, 0.0 }
 0x400   : > { %4013 = vst [vmem:[%s7555_s26 + $0x2e8] sm:$0xff] %v3821_v47  ;;  %v3823_v24 = vpop.f32.mrb[94].mxu0  ;;  %v8134_v50 = vpack.c.bf16 %v3290_v1, %v3289_v26 }
 0x401   : > { %4014 = vst [vmem:[%s7555_s26 + $0x2f0] sm:$0xff] %v3823_v24  ;;  %v3825_v4 = vpop.f32.mrb[95].mxu0  ;;  %v8137_v59 = vpack.c.bf16 %v3288_v29, %v3287_v38  ;;  %v6631_v21 = vpop.f32.mrb[196].mxu1 }
 0x402   : > { %4015 = vst [vmem:[%s7555_s26 + $0x2f8] sm:$0xff] %v3825_v4  ;;  %v2865_v30 = vadd.f32 %v6631_v21, %v955_v48  ;;  %v2856_v8 = vpop.f32.mrb[197].mxu1  ;;  %v957_v48 = vld [vmem:[#allocation8 + $0x640] sm:$0xff]  ;;  %v960_v21 = vld [vmem:[#allocation8 + $0x658] sm:$0xff] }
 0x403   : > { %4346 = vmatmul.mubr.bf16.gmra.mrb[200].mxu0 %v7814_v51  ;;  %v2857_v44 = vadd.f32 %v2856_v8, %v953_v60  ;;  %v956_v51 = vld [vmem:[#allocation8 + $0x638] sm:$0xff]  ;;  %v6632_v7 = vpop.f32.mrb[198].mxu1 }
 0x404   : > { %4355 = vmatprep.mubr.bf16.mxu0 %v7272_v23  ;;  %v3293_v0 = vmax.f32 %v2865_v30, 0.0  ;;  %v2868_v34 = vadd.f32 %v6632_v7, %v956_v51  ;;  %v2859_v62 = vpop.f32.mrb[199].mxu1  ;;  %v958_v51 = vld [vmem:[#allocation8 + $0x648] sm:$0xff] }
 0x405   : > { %v3291_v26 = vmax.f32 %v2857_v44, 0.0 }
 0x406   : > { %v3829_v39 = vpop.f32.mrb[96].mxu0  ;;  %4884 = vmatmul.mubr.bf16.gmra.mrb[48].mxu1 %v8012_v63  ;;  %v954_v63 = vld [vmem:[#allocation8 + $0x628] sm:$0xff]  ;;  %v3294_v54 = vmax.f32 %v2868_v34, 0.0 }
 0x407   : > { %4016 = vst [vmem:[%s7555_s26 + $0x300] sm:$0xff] %v3829_v39  ;;  %v3831_v20 = vpop.f32.mrb[97].mxu0  ;;  %4893 = vmatprep.mubr.bf16.mxu1 %v7272_v23  ;;  %v2860_v45 = vadd.f32 %v2859_v62, %v954_v63  ;;  %v963_v62 = vld [vmem:[#allocation8 + $0x670] sm:$0xff] }
 0x408   : > { %4017 = vst [vmem:[%s7555_s26 + $0x308] sm:$0xff] %v3831_v20  ;;  %v3833_v35 = vpop.f32.mrb[98].mxu0  ;;  %v8150_v32 = vpack.c.bf16 %v3294_v54, %v3293_v0  ;;  %v961_v54 = vld [vmem:[#allocation8 + $0x660] sm:$0xff] }
 0x409   : > { %4018 = vst [vmem:[%s7555_s26 + $0x310] sm:$0xff] %v3833_v35  ;;  %v3835_v46 = vpop.f32.mrb[99].mxu0  ;;  %v3292_v38 = vmax.f32 %v2860_v45, 0.0  ;;  %v6635_v4 = vpop.f32.mrb[200].mxu1 }
 0x40a   : > { %4019 = vst [vmem:[%s7555_s26 + $0x318] sm:$0xff] %v3835_v46  ;;  %v2872_v30 = vpop.f32.mrb[201].mxu1 }
 0x40b   : > { %4356 = vmatmul.mubr.bf16.gmra.mrb[204].mxu0 %v7812_v56  ;;  %v8153_v1 = vpack.c.bf16 %v3292_v38, %v3291_v26  ;;  %v959_v56 = vld [vmem:[#allocation8 + $0x650] sm:$0xff]  ;;  %v2873_v39 = vadd.f32 %v2872_v30, %v957_v48  ;;  %v6636_v20 = vpop.f32.mrb[202].mxu1  ;;  %v965_v30 = vld [vmem:[#allocation8 + $0x680] sm:$0xff] }
 0x40c   : > { %4365 = vmatprep.mubr.bf16.mxu0 %v7272_v23  ;;  %v2884_v35 = vadd.f32 %v6636_v20, %v960_v21 }
 0x40d   : > { %v3295_v46 = vmax.f32 %v2873_v39, 0.0 }
 0x40e   : > { %v3839_v40 = vpop.f32.mrb[100].mxu0  ;;  %4894 = vmatmul.mubr.bf16.gmra.mrb[52].mxu1 %v8008_v13  ;;  %v2881_v13 = vadd.f32 %v6635_v4, %v959_v56  ;;  %v3298_v0 = vmax.f32 %v2884_v35, 0.0  ;;  %v962_v56 = vld [vmem:[#allocation8 + $0x668] sm:$0xff]  ;;  %v968_v35 = vld [vmem:[#allocation8 + $0x698] sm:$0xff] }
 0x40f   : > { %4020 = vst [vmem:[%s7555_s26 + $0x320] sm:$0xff] %v3839_v40  ;;  %v3841_v47 = vpop.f32.mrb[101].mxu0  ;;  %4903 = vmatprep.mubr.bf16.mxu1 %v7272_v23 }
 0x410   : > { %4021 = vst [vmem:[%s7555_s26 + $0x328] sm:$0xff] %v3841_v47  ;;  %v3843_v29 = vpop.f32.mrb[102].mxu0  ;;  %v3297_v60 = vmax.f32 %v2881_v13, 0.0  ;;  %v967_v13 = vld [vmem:[#allocation8 + $0x690] sm:$0xff] }
 0x411   : > { %4022 = vst [vmem:[%s7555_s26 + $0x330] sm:$0xff] %v3843_v29  ;;  %v3845_v24 = vpop.f32.mrb[103].mxu0  ;;  %v964_v29 = vld [vmem:[#allocation8 + $0x678] sm:$0xff] }
 0x412   : > { %4023 = vst [vmem:[%s7555_s26 + $0x338] sm:$0xff] %v3845_v24  ;;  %v8168_v38 = vpack.c.bf16 %v3298_v0, %v3297_v60 }
 0x413   : > { %4366 = vmatmul.mubr.bf16.gmra.mrb[208].mxu0 %v7822_v52  ;;  %v2875_v52 = vpop.f32.mrb[203].mxu1 }
 0x414   : > { %4375 = vmatprep.mubr.bf16.mxu0 %v7272_v23  ;;  %v2876_v34 = vadd.f32 %v2875_v52, %v958_v51  ;;  %v6639_v63 = vpop.f32.mrb[204].mxu1 }
 0x415   : > { %v2897_v45 = vadd.f32 %v6639_v63, %v963_v62 }
 0x416   : > { %v3849_v8 = vpop.f32.mrb[104].mxu0  ;;  %4904 = vmatmul.mubr.bf16.gmra.mrb[56].mxu1 %v8028_v3  ;;  %v2888_v3 = vpop.f32.mrb[205].mxu1  ;;  %v3296_v40 = vmax.f32 %v2876_v34, 0.0 }
 0x417   : > { %4024 = vst [vmem:[%s7555_s26 + $0x340] sm:$0xff] %v3849_v8  ;;  %v3851_v44 = vpop.f32.mrb[105].mxu0  ;;  %4913 = vmatprep.mubr.bf16.mxu1 %v7272_v23  ;;  %v2889_v47 = vadd.f32 %v2888_v3, %v961_v54  ;;  %v6640_v24 = vpop.f32.mrb[206].mxu1  ;;  %v3301_v4 = vmax.f32 %v2897_v45, 0.0  ;;  %v966_v3 = vld [vmem:[#allocation8 + $0x688] sm:$0xff] }
 0x418   : > { %4025 = vst [vmem:[%s7555_s26 + $0x348] sm:$0xff] %v3851_v44  ;;  %v3853_v7 = vpop.f32.mrb[106].mxu0  ;;  %v2900_v48 = vadd.f32 %v6640_v24, %v964_v29  ;;  %v2891_v21 = vpop.f32.mrb[207].mxu1  ;;  %v8172_v39 = vpack.c.bf16 %v3296_v40, %v3295_v46  ;;  %v971_v29 = vld [vmem:[#allocation8 + $0x6b0] sm:$0xff] }
 0x419   : > { %4026 = vst [vmem:[%s7555_s26 + $0x350] sm:$0xff] %v3853_v7  ;;  %v3855_v26 = vpop.f32.mrb[107].mxu0  ;;  %v3299_v20 = vmax.f32 %v2889_v47, 0.0  ;;  %v2892_v8 = vadd.f32 %v2891_v21, %v962_v56  ;;  %v6643_v60 = vpop.f32.mrb[208].mxu1  ;;  %v969_v21 = vld [vmem:[#allocation8 + $0x6a0] sm:$0xff] }
 0x41a   : > { %4027 = vst [vmem:[%s7555_s26 + $0x358] sm:$0xff] %v3855_v26  ;;  %v3302_v44 = vmax.f32 %v2900_v48, 0.0  ;;  %v2913_v52 = vadd.f32 %v6643_v60, %v967_v13  ;;  %v2904_v51 = vpop.f32.mrb[209].mxu1  ;;  %v970_v60 = vld [vmem:[#allocation8 + $0x6a8] sm:$0xff] }
 0x41b   : > { %4376 = vmatmul.mubr.bf16.gmra.mrb[212].mxu0 %v7820_v27  ;;  %v3300_v27 = vmax.f32 %v2892_v8, 0.0  ;;  %v2905_v0 = vadd.f32 %v2904_v51, %v965_v30  ;;  %v6644_v34 = vpop.f32.mrb[210].mxu1  ;;  %v972_v8 = vld [vmem:[#allocation8 + $0x6b8] sm:$0xff] }
 0x41c   : > { %4385 = vmatprep.mubr.bf16.mxu0 %v7272_v23  ;;  %v8177_v46 = vpack.c.bf16 %v3302_v44, %v3301_v4  ;;  %v3305_v63 = vmax.f32 %v2913_v52, 0.0  ;;  %v2916_v26 = vadd.f32 %v6644_v34, %v968_v35  ;;  %v2907_v45 = vpop.f32.mrb[211].mxu1 }
 0x41d   : > { %v8180_v40 = vpack.c.bf16 %v3300_v27, %v3299_v20  ;;  %v2908_v47 = vadd.f32 %v2907_v45, %v966_v3  ;;  %v975_v45 = vld [vmem:[#allocation8 + $0x6d0] sm:$0xff] }
 0x41e   : > { %v3859_v7 = vpop.f32.mrb[108].mxu0  ;;  %4914 = vmatmul.mubr.bf16.gmra.mrb[60].mxu1 %v8024_v22  ;;  %v3303_v22 = vmax.f32 %v2905_v0, 0.0  ;;  %v3306_v56 = vmax.f32 %v2916_v26, 0.0 }
 0x41f   : > { %4028 = vst [vmem:[%s7555_s26 + $0x360] sm:$0xff] %v3859_v7  ;;  %v3861_v62 = vpop.f32.mrb[109].mxu0  ;;  %4923 = vmatprep.mubr.bf16.mxu1 %v7272_v23  ;;  %v3304_v4 = vmax.f32 %v2908_v47, 0.0 }
 0x420   : > { %4029 = vst [vmem:[%s7555_s26 + $0x368] sm:$0xff] %v3861_v62  ;;  %v3863_v54 = vpop.f32.mrb[110].mxu0  ;;  %v8185_v35 = vpack.c.bf16 %v3306_v56, %v3305_v63  ;;  %v976_v56 = vld [vmem:[#allocation8 + $0x6d8] sm:$0xff] }
 0x421   : > { %4030 = vst [vmem:[%s7555_s26 + $0x370] sm:$0xff] %v3863_v54  ;;  %v3865_v24 = vpop.f32.mrb[111].mxu0  ;;  %v6647_v48 = vpop.f32.mrb[212].mxu1  ;;  %v8188_v52 = vpack.c.bf16 %v3304_v4, %v3303_v22  ;;  %v973_v22 = vld [vmem:[#allocation8 + $0x6c0] sm:$0xff] }
 0x422   : > { %4031 = vst [vmem:[%s7555_s26 + $0x378] sm:$0xff] %v3865_v24  ;;  %v2929_v13 = vadd.f32 %v6647_v48, %v971_v29  ;;  %v2920_v30 = vpop.f32.mrb[213].mxu1 }
 0x423   : > { %4386 = vmatmul.mubr.bf16.gmra.mrb[216].mxu0 %v7830_v58  ;;  %v2921_v20 = vadd.f32 %v2920_v30, %v969_v21  ;;  %v6648_v44 = vpop.f32.mrb[214].mxu1  ;;  %v974_v21 = vld [vmem:[#allocation8 + $0x6c8] sm:$0xff] }
 0x424   : > { %4395 = vmatprep.mubr.bf16.mxu0 %v7272_v23  ;;  %v3309_v51 = vmax.f32 %v2929_v13, 0.0  ;;  %v2932_v7 = vadd.f32 %v6648_v44, %v972_v8  ;;  %v2923_v27 = vpop.f32.mrb[215].mxu1 }
 0x425   : > { %v3307_v0 = vmax.f32 %v2921_v20, 0.0  ;;  %v2924_v34 = vadd.f32 %v2923_v27, %v970_v60 }
 0x426   : > { %v3869_v62 = vpop.f32.mrb[112].mxu0  ;;  %4924 = vmatmul.mubr.bf16.gmra.mrb[64].mxu1 %v8041_v41  ;;  %v3310_v58 = vmax.f32 %v2932_v7, 0.0 }
 0x427   : > { %4032 = vst [vmem:[%s7555_s26 + $0x380] sm:$0xff] %v3869_v62  ;;  %v3871_v63 = vpop.f32.mrb[113].mxu0  ;;  %4933 = vmatprep.mubr.bf16.mxu1 %v7272_v23  ;;  %v3308_v26 = vmax.f32 %v2924_v34, 0.0 }
 0x428   : > { %4033 = vst [vmem:[%s7555_s26 + $0x388] sm:$0xff] %v3871_v63  ;;  %v3873_v3 = vpop.f32.mrb[114].mxu0  ;;  %v8194_v54 = vpack.c.bf16 %v3310_v58, %v3309_v51  ;;  %v977_v58 = vld [vmem:[#allocation8 + $0x6e0] sm:$0xff] }
 0x429   : > { %4034 = vst [vmem:[%s7555_s26 + $0x390] sm:$0xff] %v3873_v3  ;;  %v3875_v47 = vpop.f32.mrb[115].mxu0  ;;  %v8197_v29 = vpack.c.bf16 %v3308_v26, %v3307_v0  ;;  %v6651_v24 = vpop.f32.mrb[216].mxu1  ;;  %v979_v0 = vld [vmem:[#allocation8 + $0x6f0] sm:$0xff]  ;;  %v980_v3 = vld [vmem:[#allocation8 + $0x6f8] sm:$0xff] }
 0x42a   : > { %4035 = vst [vmem:[%s7555_s26 + $0x398] sm:$0xff] %v3875_v47  ;;  %v2945_v41 = vadd.f32 %v6651_v24, %v975_v45  ;;  %v2936_v48 = vpop.f32.mrb[217].mxu1  ;;  %v978_v47 = vld [vmem:[#allocation8 + $0x6e8] sm:$0xff] }
 0x42b   : > { %4396 = vmatmul.mubr.bf16.gmra.mrb[220].mxu0 %v7828_v11  ;;  %v2937_v4 = vadd.f32 %v2936_v48, %v973_v22  ;;  %v6652_v13 = vpop.f32.mrb[218].mxu1 }
 0x42c   : > { %4405 = vmatprep.mubr.bf16.mxu0 %v7272_v23  ;;  %v3313_v30 = vmax.f32 %v2945_v41, 0.0  ;;  %v2948_v8 = vadd.f32 %v6652_v13, %v976_v56  ;;  %v2939_v60 = vpop.f32.mrb[219].mxu1 }
 0x42d   : > { %v3311_v20 = vmax.f32 %v2937_v4, 0.0  ;;  %v2940_v44 = vadd.f32 %v2939_v60, %v974_v21 }
 0x42e   : > { %v3879_v51 = vpop.f32.mrb[116].mxu0  ;;  %4934 = vmatmul.mubr.bf16.gmra.mrb[68].mxu1 %v8038_v49  ;;  %v3314_v7 = vmax.f32 %v2948_v8, 0.0 }
 0x42f   : > { %4036 = vst [vmem:[%s7555_s26 + $0x3a0] sm:$0xff] %v3879_v51  ;;  %v3881_v27 = vpop.f32.mrb[117].mxu0  ;;  %4943 = vmatprep.mubr.bf16.mxu1 %v7272_v23  ;;  %v3312_v11 = vmax.f32 %v2940_v44, 0.0 }
 0x430   : > { %4037 = vst [vmem:[%s7555_s26 + $0x3a8] sm:$0xff] %v3881_v27  ;;  %v3883_v34 = vpop.f32.mrb[118].mxu0  ;;  %v8206_v62 = vpack.c.bf16 %v3314_v7, %v3313_v30  ;;  %v981_v7 = vld [vmem:[#allocation8 + $0x700] sm:$0xff] }
 0x431   : > { %4038 = vst [vmem:[%s7555_s26 + $0x3b0] sm:$0xff] %v3883_v34  ;;  %v3885_v63 = vpop.f32.mrb[119].mxu0  ;;  %v8209_v26 = vpack.c.bf16 %v3312_v11, %v3311_v20  ;;  %v6655_v45 = vpop.f32.mrb[220].mxu1  ;;  %v983_v20 = vld [vmem:[#allocation8 + $0x710] sm:$0xff]  ;;  %v984_v34 = vld [vmem:[#allocation8 + $0x718] sm:$0xff] }
 0x432   : > { %4039 = vst [vmem:[%s7555_s26 + $0x3b8] sm:$0xff] %v3885_v63  ;;  %v2961_v49 = vadd.f32 %v6655_v45, %v979_v0  ;;  %v2952_v22 = vpop.f32.mrb[221].mxu1  ;;  %v982_v63 = vld [vmem:[#allocation8 + $0x708] sm:$0xff] }
 0x433   : > { %4406 = vmatmul.mubr.bf16.gmra.mrb[224].mxu0 %v7841_v17  ;;  %v2953_v24 = vadd.f32 %v2952_v22, %v977_v58  ;;  %v6656_v56 = vpop.f32.mrb[222].mxu1 }
 0x434   : > { %4415 = vmatprep.mubr.bf16.mxu0 %v7272_v23  ;;  %v3317_v41 = vmax.f32 %v2961_v49, 0.0  ;;  %v2964_v48 = vadd.f32 %v6656_v56, %v980_v3  ;;  %v2955_v21 = vpop.f32.mrb[223].mxu1 }
 0x435   : > { %v3315_v4 = vmax.f32 %v2953_v24, 0.0  ;;  %v2956_v13 = vadd.f32 %v2955_v21, %v978_v47 }
 0x436   : > { %v3889_v30 = vpop.f32.mrb[120].mxu0  ;;  %4944 = vmatmul.mubr.bf16.gmra.mrb[72].mxu1 %v8053_v18  ;;  %v3318_v8 = vmax.f32 %v2964_v48, 0.0 }
 0x437   : > { %4040 = vst [vmem:[%s7555_s26 + $0x3c0] sm:$0xff] %v3889_v30  ;;  %v3891_v60 = vpop.f32.mrb[121].mxu0  ;;  %4953 = vmatprep.mubr.bf16.mxu1 %v7272_v23  ;;  %v3316_v17 = vmax.f32 %v2956_v13, 0.0 }
 0x438   : > { %4041 = vst [vmem:[%s7555_s26 + $0x3c8] sm:$0xff] %v3891_v60  ;;  %v3893_v44 = vpop.f32.mrb[122].mxu0  ;;  %v8218_v51 = vpack.c.bf16 %v3318_v8, %v3317_v41  ;;  %v985_v8 = vld [vmem:[#allocation8 + $0x720] sm:$0xff] }
 0x439   : > { %4042 = vst [vmem:[%s7555_s26 + $0x3d0] sm:$0xff] %v3893_v44  ;;  %v3895_v27 = vpop.f32.mrb[123].mxu0  ;;  %v8221_v11 = vpack.c.bf16 %v3316_v17, %v3315_v4  ;;  %v6659_v0 = vpop.f32.mrb[224].mxu1  ;;  %v987_v4 = vld [vmem:[#allocation8 + $0x730] sm:$0xff]  ;;  %v988_v44 = vld [vmem:[#allocation8 + $0x738] sm:$0xff] }
 0x43a   : > { %4043 = vst [vmem:[%s7555_s26 + $0x3d8] sm:$0xff] %v3895_v27  ;;  %v2977_v18 = vadd.f32 %v6659_v0, %v983_v20  ;;  %v2968_v58 = vpop.f32.mrb[225].mxu1  ;;  %v986_v27 = vld [vmem:[#allocation8 + $0x728] sm:$0xff] }
 0x43b   : > { %4416 = vmatmul.mubr.bf16.gmra.mrb[228].mxu0 %v7838_v33  ;;  %v2969_v45 = vadd.f32 %v2968_v58, %v981_v7  ;;  %v6660_v3 = vpop.f32.mrb[226].mxu1 }
 0x43c   : > { %4425 = vmatprep.mubr.bf16.mxu0 %v7272_v23  ;;  %v3321_v49 = vmax.f32 %v2977_v18, 0.0  ;;  %v2980_v22 = vadd.f32 %v6660_v3, %v984_v34  ;;  %v2971_v47 = vpop.f32.mrb[227].mxu1 }
 0x43d   : > { %v3319_v24 = vmax.f32 %v2969_v45, 0.0  ;;  %v2972_v56 = vadd.f32 %v2971_v47, %v982_v63 }
 0x43e   : > { %v3899_v41 = vpop.f32.mrb[124].mxu0  ;;  %4954 = vmatmul.mubr.bf16.gmra.mrb[76].mxu1 %v8050_v31  ;;  %v3322_v48 = vmax.f32 %v2980_v22, 0.0 }
 0x43f   : > { %4044 = vst [vmem:[%s7555_s26 + $0x3e0] sm:$0xff] %v3899_v41  ;;  %v3901_v21 = vpop.f32.mrb[125].mxu0  ;;  %4963 = vmatprep.mubr.bf16.mxu1 %v7272_v23  ;;  %v3320_v33 = vmax.f32 %v2972_v56, 0.0 }
 0x440   : > { %4045 = vst [vmem:[%s7555_s26 + $0x3e8] sm:$0xff] %v3901_v21  ;;  %v3903_v13 = vpop.f32.mrb[126].mxu0  ;;  %v8230_v30 = vpack.c.bf16 %v3322_v48, %v3321_v49  ;;  %v989_v48 = vld [vmem:[#allocation8 + $0x740] sm:$0xff] }
 0x441   : > { %4046 = vst [vmem:[%s7555_s26 + $0x3f0] sm:$0xff] %v3903_v13  ;;  %v3905_v60 = vpop.f32.mrb[127].mxu0  ;;  %v8233_v17 = vpack.c.bf16 %v3320_v33, %v3319_v24  ;;  %v6663_v20 = vpop.f32.mrb[228].mxu1  ;;  %v991_v24 = vld [vmem:[#allocation8 + $0x750] sm:$0xff]  ;;  %v992_v13 = vld [vmem:[#allocation8 + $0x758] sm:$0xff] }
 0x442   : > { %4047 = vst [vmem:[%s7555_s26 + $0x3f8] sm:$0xff] %v3905_v60  ;;  %v2993_v31 = vadd.f32 %v6663_v20, %v987_v4  ;;  %v2984_v7 = vpop.f32.mrb[229].mxu1  ;;  %v990_v60 = vld [vmem:[#allocation8 + $0x748] sm:$0xff] }
 0x443   : > { %4426 = vmatmul.mubr.bf16.gmra.mrb[232].mxu0 %v7853_v16  ;;  %v2985_v0 = vadd.f32 %v2984_v7, %v985_v8  ;;  %v6664_v34 = vpop.f32.mrb[230].mxu1 }
 0x444   : > { %4435 = vmatprep.mubr.bf16.mxu0 %v7272_v23  ;;  %v3325_v18 = vmax.f32 %v2993_v31, 0.0  ;;  %v2996_v58 = vadd.f32 %v6664_v34, %v988_v44  ;;  %v2987_v63 = vpop.f32.mrb[231].mxu1 }
 0x445   : > { %v3323_v45 = vmax.f32 %v2985_v0, 0.0  ;;  %v2988_v3 = vadd.f32 %v2987_v63, %v986_v27 }
 0x446   : > { %v3909_v49 = vpop.f32.mrb[128].mxu0  ;;  %4964 = vmatmul.mubr.bf16.gmra.mrb[80].mxu1 %v8065_v10  ;;  %v3326_v22 = vmax.f32 %v2996_v58, 0.0 }
 0x447   : > { %4048 = vst [vmem:[%s7555_s26 + $0x400] sm:$0xff] %v3909_v49  ;;  %v3911_v47 = vpop.f32.mrb[129].mxu0  ;;  %4973 = vmatprep.mubr.bf16.mxu1 %v7272_v23  ;;  %v3324_v16 = vmax.f32 %v2988_v3, 0.0 }
 0x448   : > { %4049 = vst [vmem:[%s7555_s26 + $0x408] sm:$0xff] %v3911_v47  ;;  %v3913_v56 = vpop.f32.mrb[130].mxu0  ;;  %v8242_v41 = vpack.c.bf16 %v3326_v22, %v3325_v18  ;;  %v993_v22 = vld [vmem:[#allocation8 + $0x760] sm:$0xff] }
 0x449   : > { %4050 = vst [vmem:[%s7555_s26 + $0x410] sm:$0xff] %v3913_v56  ;;  %v3915_v21 = vpop.f32.mrb[131].mxu0  ;;  %v8245_v33 = vpack.c.bf16 %v3324_v16, %v3323_v45  ;;  %v6667_v4 = vpop.f32.mrb[232].mxu1  ;;  %v995_v45 = vld [vmem:[#allocation8 + $0x770] sm:$0xff]  ;;  %v996_v56 = vld [vmem:[#allocation8 + $0x778] sm:$0xff] }
 0x44a   : > { %4051 = vst [vmem:[%s7555_s26 + $0x418] sm:$0xff] %v3915_v21  ;;  %v3009_v10 = vadd.f32 %v6667_v4, %v991_v24  ;;  %v3000_v8 = vpop.f32.mrb[233].mxu1  ;;  %v994_v21 = vld [vmem:[#allocation8 + $0x768] sm:$0xff] }
 0x44b   : > { %4436 = vmatmul.mubr.bf16.gmra.mrb[236].mxu0 %v7850_v12  ;;  %v3001_v20 = vadd.f32 %v3000_v8, %v989_v48  ;;  %v6668_v44 = vpop.f32.mrb[234].mxu1 }
 0x44c   : > { %4445 = vmatprep.mubr.bf16.mxu0 %v7272_v23  ;;  %v3329_v31 = vmax.f32 %v3009_v10, 0.0  ;;  %v3012_v7 = vadd.f32 %v6668_v44, %v992_v13  ;;  %v3003_v27 = vpop.f32.mrb[235].mxu1 }
 0x44d   : > { %v3327_v0 = vmax.f32 %v3001_v20, 0.0  ;;  %v3004_v34 = vadd.f32 %v3003_v27, %v990_v60 }
 0x44e   : > { %v3919_v18 = vpop.f32.mrb[132].mxu0  ;;  %4974 = vmatmul.mubr.bf16.gmra.mrb[84].mxu1 %v8062_v55  ;;  %v3330_v58 = vmax.f32 %v3012_v7, 0.0 }
 0x44f   : > { %4052 = vst [vmem:[%s7555_s26 + $0x420] sm:$0xff] %v3919_v18  ;;  %v3921_v63 = vpop.f32.mrb[133].mxu0  ;;  %4983 = vmatprep.mubr.bf16.mxu1 %v7272_v23  ;;  %v3328_v12 = vmax.f32 %v3004_v34, 0.0 }
 0x450   : > { %4053 = vst [vmem:[%s7555_s26 + $0x428] sm:$0xff] %v3921_v63  ;;  %v3923_v3 = vpop.f32.mrb[134].mxu0  ;;  %v8254_v49 = vpack.c.bf16 %v3330_v58, %v3329_v31  ;;  %v997_v58 = vld [vmem:[#allocation8 + $0x780] sm:$0xff] }
 0x451   : > { %4054 = vst [vmem:[%s7555_s26 + $0x430] sm:$0xff] %v3923_v3  ;;  %v3925_v47 = vpop.f32.mrb[135].mxu0  ;;  %v8257_v16 = vpack.c.bf16 %v3328_v12, %v3327_v0  ;;  %v6671_v24 = vpop.f32.mrb[236].mxu1  ;;  %v999_v0 = vld [vmem:[#allocation8 + $0x790] sm:$0xff]  ;;  %v1000_v3 = vld [vmem:[#allocation8 + $0x798] sm:$0xff] }
 0x452   : > { %4055 = vst [vmem:[%s7555_s26 + $0x438] sm:$0xff] %v3925_v47  ;;  %v3025_v55 = vadd.f32 %v6671_v24, %v995_v45  ;;  %v3016_v48 = vpop.f32.mrb[237].mxu1  ;;  %v998_v47 = vld [vmem:[#allocation8 + $0x788] sm:$0xff] }
 0x453   : > { %4446 = vmatmul.mubr.bf16.gmra.mrb[240].mxu0 %v7865_v57  ;;  %v3017_v4 = vadd.f32 %v3016_v48, %v993_v22  ;;  %v6672_v13 = vpop.f32.mrb[238].mxu1 }
 0x454   : > { %4455 = vmatprep.mubr.bf16.mxu0 %v7272_v23  ;;  %v3333_v10 = vmax.f32 %v3025_v55, 0.0  ;;  %v3028_v8 = vadd.f32 %v6672_v13, %v996_v56  ;;  %v3019_v60 = vpop.f32.mrb[239].mxu1 }
 0x455   : > { %v3331_v20 = vmax.f32 %v3017_v4, 0.0  ;;  %v3020_v44 = vadd.f32 %v3019_v60, %v994_v21 }
 0x456   : > { %v4187_v31 = vpop.f32.mrb[136].mxu0  ;;  %4984 = vmatmul.mubr.bf16.gmra.mrb[88].mxu1 %v8077_v61  ;;  %v3334_v7 = vmax.f32 %v3028_v8, 0.0 }
 0x457   : > { %4506 = vst [vmem:[%s7555_s26 + $0x440] sm:$0xff] %v4187_v31  ;;  %v4189_v27 = vpop.f32.mrb[137].mxu0  ;;  %4993 = vmatprep.mubr.bf16.mxu1 %v7272_v23  ;;  %v3332_v57 = vmax.f32 %v3020_v44, 0.0 }
 0x458   : > { %4507 = vst [vmem:[%s7555_s26 + $0x448] sm:$0xff] %v4189_v27  ;;  %v4191_v34 = vpop.f32.mrb[138].mxu0  ;;  %v8266_v18 = vpack.c.bf16 %v3334_v7, %v3333_v10  ;;  %v1001_v7 = vld [vmem:[#allocation8 + $0x7a0] sm:$0xff] }
 0x459   : > { %4508 = vst [vmem:[%s7555_s26 + $0x450] sm:$0xff] %v4191_v34  ;;  %v4193_v63 = vpop.f32.mrb[139].mxu0  ;;  %v8269_v12 = vpack.c.bf16 %v3332_v57, %v3331_v20  ;;  %v6675_v45 = vpop.f32.mrb[240].mxu1  ;;  %v1003_v20 = vld [vmem:[#allocation8 + $0x7b0] sm:$0xff]  ;;  %v1004_v34 = vld [vmem:[#allocation8 + $0x7b8] sm:$0xff] }
 0x45a   : > { %4509 = vst [vmem:[%s7555_s26 + $0x458] sm:$0xff] %v4193_v63  ;;  %v3041_v61 = vadd.f32 %v6675_v45, %v999_v0  ;;  %v3032_v22 = vpop.f32.mrb[241].mxu1  ;;  %v1002_v63 = vld [vmem:[#allocation8 + $0x7a8] sm:$0xff] }
 0x45b   : > { %4456 = vmatmul.mubr.bf16.gmra.mrb[244].mxu0 %v7862_v53  ;;  %v3033_v24 = vadd.f32 %v3032_v22, %v997_v58  ;;  %v6676_v56 = vpop.f32.mrb[242].mxu1 }
 0x45c   : > { %4465 = vmatprep.mubr.bf16.mxu0 %v7272_v23  ;;  %v3337_v55 = vmax.f32 %v3041_v61, 0.0  ;;  %v3044_v48 = vadd.f32 %v6676_v56, %v1000_v3  ;;  %v3035_v21 = vpop.f32.mrb[243].mxu1 }
 0x45d   : > { %v3335_v4 = vmax.f32 %v3033_v24, 0.0  ;;  %v3036_v13 = vadd.f32 %v3035_v21, %v998_v47 }
 0x45e   : > { %v4197_v10 = vpop.f32.mrb[140].mxu0  ;;  %4994 = vmatmul.mubr.bf16.gmra.mrb[92].mxu1 %v8074_v2  ;;  %v3338_v8 = vmax.f32 %v3044_v48, 0.0 }
 0x45f   : > { %4510 = vst [vmem:[%s7555_s26 + $0x460] sm:$0xff] %v4197_v10  ;;  %v4199_v60 = vpop.f32.mrb[141].mxu0  ;;  %5003 = vmatprep.mubr.bf16.mxu1 %v7272_v23  ;;  %v3336_v53 = vmax.f32 %v3036_v13, 0.0 }
 0x460   : > { %4511 = vst [vmem:[%s7555_s26 + $0x468] sm:$0xff] %v4199_v60  ;;  %v4201_v44 = vpop.f32.mrb[142].mxu0  ;;  %v8278_v31 = vpack.c.bf16 %v3338_v8, %v3337_v55  ;;  %v1005_v8 = vld [vmem:[#allocation8 + $0x7c0] sm:$0xff] }
 0x461   : > { %4512 = vst [vmem:[%s7555_s26 + $0x470] sm:$0xff] %v4201_v44  ;;  %v4203_v27 = vpop.f32.mrb[143].mxu0  ;;  %v8281_v57 = vpack.c.bf16 %v3336_v53, %v3335_v4  ;;  %v6679_v0 = vpop.f32.mrb[244].mxu1  ;;  %v1007_v4 = vld [vmem:[#allocation8 + $0x7d0] sm:$0xff]  ;;  %v1008_v44 = vld [vmem:[#allocation8 + $0x7d8] sm:$0xff] }
 0x462   : > { %4513 = vst [vmem:[%s7555_s26 + $0x478] sm:$0xff] %v4203_v27  ;;  %v3057_v2 = vadd.f32 %v6679_v0, %v1003_v20  ;;  %v3048_v58 = vpop.f32.mrb[245].mxu1  ;;  %v1006_v27 = vld [vmem:[#allocation8 + $0x7c8] sm:$0xff] }
 0x463   : > { %4466 = vmatmul.mubr.bf16.gmra.mrb[248].mxu0 %v7877_v43  ;;  %v3049_v45 = vadd.f32 %v3048_v58, %v1001_v7  ;;  %v6680_v3 = vpop.f32.mrb[246].mxu1 }
 0x464   : > { %4475 = vmatprep.mubr.bf16.mxu0 %v7272_v23  ;;  %v3341_v61 = vmax.f32 %v3057_v2, 0.0  ;;  %v3060_v22 = vadd.f32 %v6680_v3, %v1004_v34  ;;  %v3051_v47 = vpop.f32.mrb[247].mxu1 }
 0x465   : > { %v3339_v24 = vmax.f32 %v3049_v45, 0.0  ;;  %v3052_v56 = vadd.f32 %v3051_v47, %v1002_v63 }
 0x466   : > { %v4207_v55 = vpop.f32.mrb[144].mxu0  ;;  %5004 = vmatmul.mubr.bf16.gmra.mrb[96].mxu1 %v8089_v5  ;;  %v3342_v48 = vmax.f32 %v3060_v22, 0.0 }
 0x467   : > { %4514 = vst [vmem:[%s7555_s26 + $0x480] sm:$0xff] %v4207_v55  ;;  %v4209_v21 = vpop.f32.mrb[145].mxu0  ;;  %5013 = vmatprep.mubr.bf16.mxu1 %v7272_v23  ;;  %v3340_v43 = vmax.f32 %v3052_v56, 0.0 }
 0x468   : > { %4515 = vst [vmem:[%s7555_s26 + $0x488] sm:$0xff] %v4209_v21  ;;  %v4211_v13 = vpop.f32.mrb[146].mxu0  ;;  %v8290_v10 = vpack.c.bf16 %v3342_v48, %v3341_v61  ;;  %v1009_v48 = vld [vmem:[#allocation8 + $0x7e0] sm:$0xff] }
 0x469   : > { %4516 = vst [vmem:[%s7555_s26 + $0x490] sm:$0xff] %v4211_v13  ;;  %v4213_v60 = vpop.f32.mrb[147].mxu0  ;;  %v8293_v53 = vpack.c.bf16 %v3340_v43, %v3339_v24  ;;  %v6683_v20 = vpop.f32.mrb[248].mxu1  ;;  %v1011_v24 = vld [vmem:[#allocation8 + $0x7f0] sm:$0xff]  ;;  %v1012_v13 = vld [vmem:[#allocation8 + $0x7f8] sm:$0xff] }
 0x46a   : > { %4517 = vst [vmem:[%s7555_s26 + $0x498] sm:$0xff] %v4213_v60  ;;  %v3073_v5 = vadd.f32 %v6683_v20, %v1007_v4  ;;  %v3064_v7 = vpop.f32.mrb[249].mxu1  ;;  %v1010_v60 = vld [vmem:[#allocation8 + $0x7e8] sm:$0xff] }
 0x46b   : > { %4476 = vmatmul.mubr.bf16.gmra.mrb[252].mxu0 %v7874_v37  ;;  %v3065_v0 = vadd.f32 %v3064_v7, %v1005_v8  ;;  %v6684_v34 = vpop.f32.mrb[250].mxu1 }
 0x46c   : > { %4485 = vmatprep.mubr.bf16.mxu0 %v7272_v23  ;;  %v3345_v2 = vmax.f32 %v3073_v5, 0.0  ;;  %v3076_v58 = vadd.f32 %v6684_v34, %v1008_v44  ;;  %v3067_v63 = vpop.f32.mrb[251].mxu1 }
 0x46d   : > { %v3343_v45 = vmax.f32 %v3065_v0, 0.0  ;;  %v3068_v3 = vadd.f32 %v3067_v63, %v1006_v27 }
 0x46e   : > { %v4217_v61 = vpop.f32.mrb[148].mxu0  ;;  %5014 = vmatmul.mubr.bf16.gmra.mrb[100].mxu1 %v8086_v42  ;;  %v3346_v22 = vmax.f32 %v3076_v58, 0.0 }
 0x46f   : > { %4518 = vst [vmem:[%s7555_s26 + $0x4a0] sm:$0xff] %v4217_v61  ;;  %v4219_v47 = vpop.f32.mrb[149].mxu0  ;;  %5023 = vmatprep.mubr.bf16.mxu1 %v7272_v23  ;;  %v3344_v37 = vmax.f32 %v3068_v3, 0.0 }
 0x470   : > { %4519 = vst [vmem:[%s7555_s26 + $0x4a8] sm:$0xff] %v4219_v47  ;;  %v4221_v56 = vpop.f32.mrb[150].mxu0  ;;  %v8302_v55 = vpack.c.bf16 %v3346_v22, %v3345_v2 }
 0x471   : > { %4520 = vst [vmem:[%s7555_s26 + $0x4b0] sm:$0xff] %v4221_v56  ;;  %v4223_v21 = vpop.f32.mrb[151].mxu0  ;;  %v8305_v43 = vpack.c.bf16 %v3344_v37, %v3343_v45  ;;  %v6687_v4 = vpop.f32.mrb[252].mxu1 }
 0x472   : > { %4521 = vst [vmem:[%s7555_s26 + $0x4b8] sm:$0xff] %v4223_v21  ;;  %v3089_v42 = vadd.f32 %v6687_v4, %v1011_v24  ;;  %v3080_v8 = vpop.f32.mrb[253].mxu1 }
 0x473   : > { %4486 = vmatmul.mubr.bf16.gmra.mrb[0].mxu0 %v7889_v19  ;;  %v3081_v20 = vadd.f32 %v3080_v8, %v1009_v48  ;;  %v6688_v44 = vpop.f32.mrb[254].mxu1 }
 0x474   : > { %4495 = vmatprep.mubr.bf16.mxu0 %v7272_v23  ;;  %v3349_v5 = vmax.f32 %v3089_v42, 0.0  ;;  %v3092_v7 = vadd.f32 %v6688_v44, %v1012_v13  ;;  %v3083_v27 = vpop.f32.mrb[255].mxu1 }
 0x475   : > { %v3347_v0 = vmax.f32 %v3081_v20, 0.0  ;;  %v3084_v34 = vadd.f32 %v3083_v27, %v1010_v60 }
 0x476   : > { %v4227_v2 = vpop.f32.mrb[152].mxu0  ;;  %5024 = vmatmul.mubr.bf16.gmra.mrb[104].mxu1 %v8101_v9  ;;  %v3350_v58 = vmax.f32 %v3092_v7, 0.0 }
 0x477   : > { %4522 = vst [vmem:[%s7555_s26 + $0x4c0] sm:$0xff] %v4227_v2  ;;  %v4229_v19 = vpop.f32.mrb[153].mxu0  ;;  %5033 = vmatprep.mubr.bf16.mxu1 %v7272_v23  ;;  %v3348_v63 = vmax.f32 %v3084_v34, 0.0 }
 0x478   : > { %4523 = vst [vmem:[%s7555_s26 + $0x4c8] sm:$0xff] %v4229_v19  ;;  %v4231_v45 = vpop.f32.mrb[154].mxu0  ;;  %v8314_v3 = vpack.c.bf16 %v3350_v58, %v3349_v5 }
 0x479   : > { %4524 = vst [vmem:[%s7555_s26 + $0x4d0] sm:$0xff] %v4231_v45  ;;  %v4233_v61 = vpop.f32.mrb[155].mxu0  ;;  %v8317_v22 = vpack.c.bf16 %v3348_v63, %v3347_v0  ;;  %v4765_v47 = vpop.f32.mrb[0].mxu1 }
 0x47a   : > { %4525 = vst [vmem:[%s7555_s26 + $0x4d8] sm:$0xff] %v4233_v61  ;;  %5084 = vst [vmem:[%s7555_s26 + $0x840] sm:$0xff] %v4765_v47  ;;  %v4767_v9 = vpop.f32.mrb[1].mxu1 }
 0x47b   : > { %4496 = vmatmul.mubr.bf16.gmra.mrb[4].mxu0 %v7886_v14  ;;  %5085 = vst [vmem:[%s7555_s26 + $0x848] sm:$0xff] %v4767_v9  ;;  %v4769_v37 = vpop.f32.mrb[2].mxu1 }
 0x47c   : > { %5341 = vmatprep.mubr.bf16.mxu0 %v7272_v23  ;;  %5086 = vst [vmem:[%s7555_s26 + $0x850] sm:$0xff] %v4769_v37  ;;  %v4771_v24 = vpop.f32.mrb[3].mxu1 }
 0x47d   : > { %5087 = vst [vmem:[%s7555_s26 + $0x858] sm:$0xff] %v4771_v24 }
 0x47e   : > { %v4237_v56 = vpop.f32.mrb[156].mxu0  ;;  %5034 = vmatmul.mubr.bf16.gmra.mrb[108].mxu1 %v8098_v36 }
 0x47f   : > { %4526 = vst [vmem:[%s7555_s26 + $0x4e0] sm:$0xff] %v4237_v56  ;;  %v4239_v48 = vpop.f32.mrb[157].mxu0  ;;  %5043 = vmatprep.mubr.bf16.mxu1 %v7272_v23 }
 0x480   : > { %4527 = vst [vmem:[%s7555_s26 + $0x4e8] sm:$0xff] %v4239_v48  ;;  %v4241_v14 = vpop.f32.mrb[158].mxu0 }
 0x481   : > { %4528 = vst [vmem:[%s7555_s26 + $0x4f0] sm:$0xff] %v4241_v14  ;;  %v4243_v21 = vpop.f32.mrb[159].mxu0  ;;  %v4775_v4 = vpop.f32.mrb[4].mxu1 }
 0x482   : > { %4529 = vst [vmem:[%s7555_s26 + $0x4f8] sm:$0xff] %v4243_v21  ;;  %5088 = vst [vmem:[%s7555_s26 + $0x860] sm:$0xff] %v4775_v4  ;;  %v4777_v13 = vpop.f32.mrb[5].mxu1 }
 0x483   : > { %5342 = vmatmul.mubr.bf16.vlgmr.msra.gmra.mrb[8].mxu0 %v8137_v59  ;;  %5089 = vst [vmem:[%s7555_s26 + $0x868] sm:$0xff] %v4777_v13  ;;  %v4779_v36 = vpop.f32.mrb[6].mxu1 }
 0x484   : > { %5351 = vmatprep.mubr.bf16.mxu0 %v7272_v23  ;;  %5090 = vst [vmem:[%s7555_s26 + $0x870] sm:$0xff] %v4779_v36  ;;  %v4781_v42 = vpop.f32.mrb[7].mxu1 }
 0x485   : > { %5091 = vst [vmem:[%s7555_s26 + $0x878] sm:$0xff] %v4781_v42 }
 0x486   : > { %v4247_v8 = vpop.f32.mrb[160].mxu0  ;;  %5044 = vmatmul.mubr.bf16.gmra.mrb[112].mxu1 %v8113_v15 }
 0x487   : > { %4530 = vst [vmem:[%s7555_s26 + $0x500] sm:$0xff] %v4247_v8  ;;  %v4249_v60 = vpop.f32.mrb[161].mxu0  ;;  %5053 = vmatprep.mubr.bf16.mxu1 %v7272_v23 }
 0x488   : > { %4531 = vst [vmem:[%s7555_s26 + $0x508] sm:$0xff] %v4249_v60  ;;  %v4251_v59 = vpop.f32.mrb[162].mxu0 }
 0x489   : > { %4532 = vst [vmem:[%s7555_s26 + $0x510] sm:$0xff] %v4251_v59  ;;  %v4253_v20 = vpop.f32.mrb[163].mxu0  ;;  %v4785_v44 = vpop.f32.mrb[8].mxu1 }
 0x48a   : > { %4533 = vst [vmem:[%s7555_s26 + $0x518] sm:$0xff] %v4253_v20  ;;  %5092 = vst [vmem:[%s7555_s26 + $0x880] sm:$0xff] %v4785_v44  ;;  %v4787_v5 = vpop.f32.mrb[9].mxu1 }
 0x48b   : > { %5352 = vmatmul.mubr.bf16.gmra.mrb[12].mxu0 %v8134_v50  ;;  %5093 = vst [vmem:[%s7555_s26 + $0x888] sm:$0xff] %v4787_v5  ;;  %v4789_v15 = vpop.f32.mrb[10].mxu1 }
 0x48c   : > { %5361 = vmatprep.mubr.bf16.mxu0 %v7272_v23  ;;  %5094 = vst [vmem:[%s7555_s26 + $0x890] sm:$0xff] %v4789_v15  ;;  %v4791_v7 = vpop.f32.mrb[11].mxu1 }
 0x48d   : > { %5095 = vst [vmem:[%s7555_s26 + $0x898] sm:$0xff] %v4791_v7 }
 0x48e   : > { %v4257_v27 = vpop.f32.mrb[164].mxu0  ;;  %5054 = vmatmul.mubr.bf16.gmra.mrb[116].mxu1 %v8110_v25 }
 0x48f   : > { %4534 = vst [vmem:[%s7555_s26 + $0x520] sm:$0xff] %v4257_v27  ;;  %v4259_v0 = vpop.f32.mrb[165].mxu0  ;;  %5063 = vmatprep.mubr.bf16.mxu1 %v7272_v23 }
 0x490   : > { %4535 = vst [vmem:[%s7555_s26 + $0x528] sm:$0xff] %v4259_v0  ;;  %v4261_v50 = vpop.f32.mrb[166].mxu0 }
 0x491   : > { %4536 = vst [vmem:[%s7555_s26 + $0x530] sm:$0xff] %v4261_v50  ;;  %v4263_v34 = vpop.f32.mrb[167].mxu0  ;;  %v4795_v2 = vpop.f32.mrb[12].mxu1 }
 0x492   : > { %4537 = vst [vmem:[%s7555_s26 + $0x538] sm:$0xff] %v4263_v34  ;;  %5096 = vst [vmem:[%s7555_s26 + $0x8a0] sm:$0xff] %v4795_v2  ;;  %v4797_v58 = vpop.f32.mrb[13].mxu1 }
 0x493   : > { %5362 = vmatmul.mubr.bf16.gmra.mrb[16].mxu0 %v8153_v1  ;;  %5097 = vst [vmem:[%s7555_s26 + $0x8a8] sm:$0xff] %v4797_v58  ;;  %v4799_v25 = vpop.f32.mrb[14].mxu1 }
 0x494   : > { %5371 = vmatprep.mubr.bf16.mxu0 %v7272_v23  ;;  %5098 = vst [vmem:[%s7555_s26 + $0x8b0] sm:$0xff] %v4799_v25  ;;  %v4801_v19 = vpop.f32.mrb[15].mxu1 }
 0x495   : > { %5099 = vst [vmem:[%s7555_s26 + $0x8b8] sm:$0xff] %v4801_v19 }
 0x496   : > { %v4267_v63 = vpop.f32.mrb[168].mxu0  ;;  %5064 = vmatmul.mubr.bf16.gmra.mrb[120].mxu1 %v8125_v28 }
 0x497   : > { %4538 = vst [vmem:[%s7555_s26 + $0x540] sm:$0xff] %v4267_v63  ;;  %v4269_v45 = vpop.f32.mrb[169].mxu0  ;;  %5073 = vmatprep.mubr.bf16.mxu1 %v7272_v23 }
 0x498   : > { %4539 = vst [vmem:[%s7555_s26 + $0x548] sm:$0xff] %v4269_v45  ;;  %v4271_v1 = vpop.f32.mrb[170].mxu0 }
 0x499   : > { %4540 = vst [vmem:[%s7555_s26 + $0x550] sm:$0xff] %v4271_v1  ;;  %v4273_v61 = vpop.f32.mrb[171].mxu0  ;;  %v4805_v47 = vpop.f32.mrb[16].mxu1 }
 0x49a   : > { %4541 = vst [vmem:[%s7555_s26 + $0x558] sm:$0xff] %v4273_v61  ;;  %5100 = vst [vmem:[%s7555_s26 + $0x8c0] sm:$0xff] %v4805_v47  ;;  %v4807_v9 = vpop.f32.mrb[17].mxu1 }
 0x49b   : > { %5372 = vmatmul.mubr.bf16.gmra.mrb[20].mxu0 %v8150_v32  ;;  %5101 = vst [vmem:[%s7555_s26 + $0x8c8] sm:$0xff] %v4807_v9  ;;  %v4809_v28 = vpop.f32.mrb[18].mxu1 }
 0x49c   : > { %5381 = vmatprep.mubr.bf16.mxu0 %v7272_v23  ;;  %5102 = vst [vmem:[%s7555_s26 + $0x8d0] sm:$0xff] %v4809_v28  ;;  %v4811_v37 = vpop.f32.mrb[19].mxu1 }
 0x49d   : > { %5103 = vst [vmem:[%s7555_s26 + $0x8d8] sm:$0xff] %v4811_v37 }
 0x49e   : > { %v4277_v24 = vpop.f32.mrb[172].mxu0  ;;  %5074 = vmatmul.mubr.bf16.gmra.mrb[124].mxu1 %v8122_v6 }
 0x49f   : > { %4542 = vst [vmem:[%s7555_s26 + $0x560] sm:$0xff] %v4277_v24  ;;  %v4279_v56 = vpop.f32.mrb[173].mxu0  ;;  %5631 = vmatprep.mubr.bf16.mxu1 %v7272_v23 }
 0x4a0   : > { %4543 = vst [vmem:[%s7555_s26 + $0x568] sm:$0xff] %v4279_v56  ;;  %v4281_v32 = vpop.f32.mrb[174].mxu0 }
 0x4a1   : > { %4544 = vst [vmem:[%s7555_s26 + $0x570] sm:$0xff] %v4281_v32  ;;  %v4283_v48 = vpop.f32.mrb[175].mxu0  ;;  %v4815_v14 = vpop.f32.mrb[20].mxu1 }
 0x4a2   : > { %4545 = vst [vmem:[%s7555_s26 + $0x578] sm:$0xff] %v4283_v48  ;;  %5104 = vst [vmem:[%s7555_s26 + $0x8e0] sm:$0xff] %v4815_v14  ;;  %v4817_v21 = vpop.f32.mrb[21].mxu1 }
 0x4a3   : > { %5382 = vmatmul.mubr.bf16.gmra.mrb[24].mxu0 %v8172_v39  ;;  %5105 = vst [vmem:[%s7555_s26 + $0x8e8] sm:$0xff] %v4817_v21  ;;  %v4819_v6 = vpop.f32.mrb[22].mxu1 }
 0x4a4   : > { %5391 = vmatprep.mubr.bf16.mxu0 %v7272_v23  ;;  %5106 = vst [vmem:[%s7555_s26 + $0x8f0] sm:$0xff] %v4819_v6  ;;  %v4821_v4 = vpop.f32.mrb[23].mxu1 }
 0x4a5   : > { %5107 = vst [vmem:[%s7555_s26 + $0x8f8] sm:$0xff] %v4821_v4 }
 0x4a6   : > { %v4287_v13 = vpop.f32.mrb[176].mxu0  ;;  %5632 = vmatmul.mubr.bf16.vlgmr.msra.gmra.mrb[128].mxu1 %v8302_v55 }
 0x4a7   : > { %4546 = vst [vmem:[%s7555_s26 + $0x580] sm:$0xff] %v4287_v13  ;;  %v4289_v36 = vpop.f32.mrb[177].mxu0  ;;  %5641 = vmatprep.mubr.bf16.mxu1 %v7272_v23 }
 0x4a8   : > { %4547 = vst [vmem:[%s7555_s26 + $0x588] sm:$0xff] %v4289_v36  ;;  %v4291_v39 = vpop.f32.mrb[178].mxu0 }
 0x4a9   : > { %4548 = vst [vmem:[%s7555_s26 + $0x590] sm:$0xff] %v4291_v39  ;;  %v4293_v42 = vpop.f32.mrb[179].mxu0  ;;  %v4825_v8 = vpop.f32.mrb[24].mxu1 }
 0x4aa   : > { %4549 = vst [vmem:[%s7555_s26 + $0x598] sm:$0xff] %v4293_v42  ;;  %5108 = vst [vmem:[%s7555_s26 + $0x900] sm:$0xff] %v4825_v8  ;;  %v4827_v60 = vpop.f32.mrb[25].mxu1 }
 0x4ab   : > { %5392 = vmatmul.mubr.bf16.gmra.mrb[28].mxu0 %v8168_v38  ;;  %5109 = vst [vmem:[%s7555_s26 + $0x908] sm:$0xff] %v4827_v60  ;;  %v4829_v55 = vpop.f32.mrb[26].mxu1 }
 0x4ac   : > { %5401 = vmatprep.mubr.bf16.mxu0 %v7272_v23  ;;  %5110 = vst [vmem:[%s7555_s26 + $0x910] sm:$0xff] %v4829_v55  ;;  %v4831_v59 = vpop.f32.mrb[27].mxu1 }
 0x4ad   : > { %5111 = vst [vmem:[%s7555_s26 + $0x918] sm:$0xff] %v4831_v59 }
 0x4ae   : > { %v4297_v20 = vpop.f32.mrb[180].mxu0  ;;  %5642 = vmatmul.mubr.bf16.gmra.mrb[132].mxu1 %v8317_v22 }
 0x4af   : > { %4550 = vst [vmem:[%s7555_s26 + $0x5a0] sm:$0xff] %v4297_v20  ;;  %v4299_v44 = vpop.f32.mrb[181].mxu0  ;;  %5651 = vmatprep.mubr.bf16.mxu1 %v7272_v23 }
 0x4b0   : > { %4551 = vst [vmem:[%s7555_s26 + $0x5a8] sm:$0xff] %v4299_v44  ;;  %v4301_v38 = vpop.f32.mrb[182].mxu0 }
 0x4b1   : > { %4552 = vst [vmem:[%s7555_s26 + $0x5b0] sm:$0xff] %v4301_v38  ;;  %v4303_v5 = vpop.f32.mrb[183].mxu0  ;;  %v4835_v15 = vpop.f32.mrb[28].mxu1 }
 0x4b2   : > { %4553 = vst [vmem:[%s7555_s26 + $0x5b8] sm:$0xff] %v4303_v5  ;;  %5112 = vst [vmem:[%s7555_s26 + $0x920] sm:$0xff] %v4835_v15  ;;  %v4837_v7 = vpop.f32.mrb[29].mxu1 }
 0x4b3   : > { %5402 = vmatmul.mubr.bf16.gmra.mrb[32].mxu0 %v8180_v40  ;;  %5113 = vst [vmem:[%s7555_s26 + $0x928] sm:$0xff] %v4837_v7  ;;  %v4839_v22 = vpop.f32.mrb[30].mxu1 }
 0x4b4   : > { %5411 = vmatprep.mubr.bf16.mxu0 %v7272_v23  ;;  %5114 = vst [vmem:[%s7555_s26 + $0x930] sm:$0xff] %v4839_v22  ;;  %v4841_v27 = vpop.f32.mrb[31].mxu1 }
 0x4b5   : > { %5115 = vst [vmem:[%s7555_s26 + $0x938] sm:$0xff] %v4841_v27 }
 0x4b6   : > { %v4307_v0 = vpop.f32.mrb[184].mxu0  ;;  %5652 = vmatmul.mubr.bf16.gmra.mrb[136].mxu1 %v8314_v3 }
 0x4b7   : > { %4554 = vst [vmem:[%s7555_s26 + $0x5c0] sm:$0xff] %v4307_v0  ;;  %v4309_v50 = vpop.f32.mrb[185].mxu0 }
 0x4b8   : > { %4555 = vst [vmem:[%s7555_s26 + $0x5c8] sm:$0xff] %v4309_v50  ;;  %v4311_v40 = vpop.f32.mrb[186].mxu0 }
 0x4b9   : > { %4556 = vst [vmem:[%s7555_s26 + $0x5d0] sm:$0xff] %v4311_v40  ;;  %v4313_v34 = vpop.f32.mrb[187].mxu0  ;;  %v4845_v2 = vpop.f32.mrb[32].mxu1 }
 0x4ba   : > { %4557 = vst [vmem:[%s7555_s26 + $0x5d8] sm:$0xff] %v4313_v34  ;;  %5116 = vst [vmem:[%s7555_s26 + $0x940] sm:$0xff] %v4845_v2  ;;  %v4847_v58 = vpop.f32.mrb[33].mxu1 }
 0x4bb   : > { %5412 = vmatmul.mubr.bf16.gmra.mrb[36].mxu0 %v8177_v46  ;;  %5117 = vst [vmem:[%s7555_s26 + $0x948] sm:$0xff] %v4847_v58  ;;  %v4849_v3 = vpop.f32.mrb[34].mxu1 }
 0x4bc   : > { %5421 = vmatprep.mubr.bf16.mxu0 %v7272_v23  ;;  %5118 = vst [vmem:[%s7555_s26 + $0x950] sm:$0xff] %v4849_v3  ;;  %v4851_v25 = vpop.f32.mrb[35].mxu1 }
 0x4bd   : > { %5119 = vst [vmem:[%s7555_s26 + $0x958] sm:$0xff] %v4851_v25 }
 0x4be   : > { %v4317_v19 = vpop.f32.mrb[188].mxu0 }
 0x4bf   : > { %4558 = vst [vmem:[%s7555_s26 + $0x5e0] sm:$0xff] %v4317_v19  ;;  %v4319_v63 = vpop.f32.mrb[189].mxu0 }
 0x4c0   : > { %4559 = vst [vmem:[%s7555_s26 + $0x5e8] sm:$0xff] %v4319_v63  ;;  %v4321_v45 = vpop.f32.mrb[190].mxu0 }
 0x4c1   : > { %4560 = vst [vmem:[%s7555_s26 + $0x5f0] sm:$0xff] %v4321_v45  ;;  %v4323_v46 = vpop.f32.mrb[191].mxu0  ;;  %v4855_v1 = vpop.f32.mrb[36].mxu1 }
 0x4c2   : > { %4561 = vst [vmem:[%s7555_s26 + $0x5f8] sm:$0xff] %v4323_v46  ;;  %5120 = vst [vmem:[%s7555_s26 + $0x960] sm:$0xff] %v4855_v1  ;;  %v4857_v61 = vpop.f32.mrb[37].mxu1 }
 0x4c3   : > { %5422 = vmatmul.mubr.bf16.gmra.mrb[40].mxu0 %v8188_v52  ;;  %5121 = vst [vmem:[%s7555_s26 + $0x968] sm:$0xff] %v4857_v61  ;;  %v4859_v47 = vpop.f32.mrb[38].mxu1 }
 0x4c4   : > { %5431 = vmatprep.mubr.bf16.mxu0 %v7272_v23  ;;  %5122 = vst [vmem:[%s7555_s26 + $0x970] sm:$0xff] %v4859_v47  ;;  %v4861_v9 = vpop.f32.mrb[39].mxu1 }
 0x4c5   : > { %5123 = vst [vmem:[%s7555_s26 + $0x978] sm:$0xff] %v4861_v9 }
 0x4c6   : > { %v4327_v28 = vpop.f32.mrb[192].mxu0 }
 0x4c7   : > { %4562 = vst [vmem:[%s7555_s26 + $0x600] sm:$0xff] %v4327_v28  ;;  %v4329_v37 = vpop.f32.mrb[193].mxu0 }
 0x4c8   : > { %4563 = vst [vmem:[%s7555_s26 + $0x608] sm:$0xff] %v4329_v37  ;;  %v4331_v24 = vpop.f32.mrb[194].mxu0 }
 0x4c9   : > { %4564 = vst [vmem:[%s7555_s26 + $0x610] sm:$0xff] %v4331_v24  ;;  %v4333_v52 = vpop.f32.mrb[195].mxu0  ;;  %v4865_v56 = vpop.f32.mrb[40].mxu1 }
 0x4ca   : > { %4565 = vst [vmem:[%s7555_s26 + $0x618] sm:$0xff] %v4333_v52  ;;  %5124 = vst [vmem:[%s7555_s26 + $0x980] sm:$0xff] %v4865_v56  ;;  %v4867_v32 = vpop.f32.mrb[41].mxu1 }
 0x4cb   : > { %5432 = vmatmul.mubr.bf16.gmra.mrb[44].mxu0 %v8185_v35  ;;  %5125 = vst [vmem:[%s7555_s26 + $0x988] sm:$0xff] %v4867_v32  ;;  %v4869_v48 = vpop.f32.mrb[42].mxu1 }
 0x4cc   : > { %5441 = vmatprep.mubr.bf16.mxu0 %v7272_v23  ;;  %5126 = vst [vmem:[%s7555_s26 + $0x990] sm:$0xff] %v4869_v48  ;;  %v4871_v14 = vpop.f32.mrb[43].mxu1 }
 0x4cd   : > { %5127 = vst [vmem:[%s7555_s26 + $0x998] sm:$0xff] %v4871_v14 }
 0x4ce   : > { %v4337_v21 = vpop.f32.mrb[196].mxu0 }
 0x4cf   : > { %4566 = vst [vmem:[%s7555_s26 + $0x620] sm:$0xff] %v4337_v21  ;;  %v4339_v6 = vpop.f32.mrb[197].mxu0 }
 0x4d0   : > { %4567 = vst [vmem:[%s7555_s26 + $0x628] sm:$0xff] %v4339_v6  ;;  %v4341_v4 = vpop.f32.mrb[198].mxu0 }
 0x4d1   : > { %4568 = vst [vmem:[%s7555_s26 + $0x630] sm:$0xff] %v4341_v4  ;;  %v4343_v35 = vpop.f32.mrb[199].mxu0  ;;  %v4875_v13 = vpop.f32.mrb[44].mxu1 }
 0x4d2   : > { %4569 = vst [vmem:[%s7555_s26 + $0x638] sm:$0xff] %v4343_v35  ;;  %5128 = vst [vmem:[%s7555_s26 + $0x9a0] sm:$0xff] %v4875_v13  ;;  %v4877_v36 = vpop.f32.mrb[45].mxu1 }
 0x4d3   : > { %5442 = vmatmul.mubr.bf16.gmra.mrb[48].mxu0 %v8197_v29  ;;  %5129 = vst [vmem:[%s7555_s26 + $0x9a8] sm:$0xff] %v4877_v36  ;;  %v4879_v39 = vpop.f32.mrb[46].mxu1 }
 0x4d4   : > { %5451 = vmatprep.mubr.bf16.mxu0 %v7272_v23  ;;  %5130 = vst [vmem:[%s7555_s26 + $0x9b0] sm:$0xff] %v4879_v39  ;;  %v4881_v42 = vpop.f32.mrb[47].mxu1 }
 0x4d5   : > { %5131 = vst [vmem:[%s7555_s26 + $0x9b8] sm:$0xff] %v4881_v42 }
 0x4d6   : > { %v4347_v8 = vpop.f32.mrb[200].mxu0 }
 0x4d7   : > { %4570 = vst [vmem:[%s7555_s26 + $0x640] sm:$0xff] %v4347_v8  ;;  %v4349_v60 = vpop.f32.mrb[201].mxu0 }
 0x4d8   : > { %4571 = vst [vmem:[%s7555_s26 + $0x648] sm:$0xff] %v4349_v60  ;;  %v4351_v55 = vpop.f32.mrb[202].mxu0 }
 0x4d9   : > { %4572 = vst [vmem:[%s7555_s26 + $0x650] sm:$0xff] %v4351_v55  ;;  %v4353_v29 = vpop.f32.mrb[203].mxu0  ;;  %v4885_v59 = vpop.f32.mrb[48].mxu1 }
 0x4da   : > { %4573 = vst [vmem:[%s7555_s26 + $0x658] sm:$0xff] %v4353_v29  ;;  %5132 = vst [vmem:[%s7555_s26 + $0x9c0] sm:$0xff] %v4885_v59  ;;  %v4887_v20 = vpop.f32.mrb[49].mxu1 }
 0x4db   : > { %5452 = vmatmul.mubr.bf16.gmra.mrb[52].mxu0 %v8194_v54  ;;  %5133 = vst [vmem:[%s7555_s26 + $0x9c8] sm:$0xff] %v4887_v20  ;;  %v4889_v44 = vpop.f32.mrb[50].mxu1 }
 0x4dc   : > { %5461 = vmatprep.mubr.bf16.mxu0 %v7272_v23  ;;  %5134 = vst [vmem:[%s7555_s26 + $0x9d0] sm:$0xff] %v4889_v44  ;;  %v4891_v38 = vpop.f32.mrb[51].mxu1 }
 0x4dd   : > { %5135 = vst [vmem:[%s7555_s26 + $0x9d8] sm:$0xff] %v4891_v38 }
 0x4de   : > { %v4357_v5 = vpop.f32.mrb[204].mxu0 }
 0x4df   : > { %4574 = vst [vmem:[%s7555_s26 + $0x660] sm:$0xff] %v4357_v5  ;;  %v4359_v15 = vpop.f32.mrb[205].mxu0 }
 0x4e0   : > { %4575 = vst [vmem:[%s7555_s26 + $0x668] sm:$0xff] %v4359_v15  ;;  %v4361_v7 = vpop.f32.mrb[206].mxu0 }
 0x4e1   : > { %4576 = vst [vmem:[%s7555_s26 + $0x670] sm:$0xff] %v4361_v7  ;;  %v4363_v54 = vpop.f32.mrb[207].mxu0  ;;  %v4895_v22 = vpop.f32.mrb[52].mxu1 }
 0x4e2   : > { %4577 = vst [vmem:[%s7555_s26 + $0x678] sm:$0xff] %v4363_v54  ;;  %5136 = vst [vmem:[%s7555_s26 + $0x9e0] sm:$0xff] %v4895_v22  ;;  %v4897_v27 = vpop.f32.mrb[53].mxu1 }
 0x4e3   : > { %5462 = vmatmul.mubr.bf16.gmra.mrb[56].mxu0 %v8209_v26  ;;  %5137 = vst [vmem:[%s7555_s26 + $0x9e8] sm:$0xff] %v4897_v27  ;;  %v4899_v0 = vpop.f32.mrb[54].mxu1 }
 0x4e4   : > { %5471 = vmatprep.mubr.bf16.mxu0 %v7272_v23  ;;  %5138 = vst [vmem:[%s7555_s26 + $0x9f0] sm:$0xff] %v4899_v0  ;;  %v4901_v50 = vpop.f32.mrb[55].mxu1 }
 0x4e5   : > { %5139 = vst [vmem:[%s7555_s26 + $0x9f8] sm:$0xff] %v4901_v50 }
 0x4e6   : > { %v4367_v40 = vpop.f32.mrb[208].mxu0 }
 0x4e7   : > { %4578 = vst [vmem:[%s7555_s26 + $0x680] sm:$0xff] %v4367_v40  ;;  %v4369_v34 = vpop.f32.mrb[209].mxu0 }
 0x4e8   : > { %4579 = vst [vmem:[%s7555_s26 + $0x688] sm:$0xff] %v4369_v34  ;;  %v4371_v2 = vpop.f32.mrb[210].mxu0 }
 0x4e9   : > { %4580 = vst [vmem:[%s7555_s26 + $0x690] sm:$0xff] %v4371_v2  ;;  %v4373_v26 = vpop.f32.mrb[211].mxu0  ;;  %v4905_v58 = vpop.f32.mrb[56].mxu1 }
 0x4ea   : > { %4581 = vst [vmem:[%s7555_s26 + $0x698] sm:$0xff] %v4373_v26  ;;  %5140 = vst [vmem:[%s7555_s26 + $0xa00] sm:$0xff] %v4905_v58  ;;  %v4907_v3 = vpop.f32.mrb[57].mxu1 }
 0x4eb   : > { %5472 = vmatmul.mubr.bf16.gmra.mrb[60].mxu0 %v8206_v62  ;;  %5141 = vst [vmem:[%s7555_s26 + $0xa08] sm:$0xff] %v4907_v3  ;;  %v4909_v25 = vpop.f32.mrb[58].mxu1 }
 0x4ec   : > { %5481 = vmatprep.mubr.bf16.mxu0 %v7272_v23  ;;  %5142 = vst [vmem:[%s7555_s26 + $0xa10] sm:$0xff] %v4909_v25  ;;  %v4911_v19 = vpop.f32.mrb[59].mxu1 }
 0x4ed   : > { %5143 = vst [vmem:[%s7555_s26 + $0xa18] sm:$0xff] %v4911_v19 }
 0x4ee   : > { %v4377_v63 = vpop.f32.mrb[212].mxu0 }
 0x4ef   : > { %4582 = vst [vmem:[%s7555_s26 + $0x6a0] sm:$0xff] %v4377_v63  ;;  %v4379_v45 = vpop.f32.mrb[213].mxu0 }
 0x4f0   : > { %4583 = vst [vmem:[%s7555_s26 + $0x6a8] sm:$0xff] %v4379_v45  ;;  %v4381_v46 = vpop.f32.mrb[214].mxu0 }
 0x4f1   : > { %4584 = vst [vmem:[%s7555_s26 + $0x6b0] sm:$0xff] %v4381_v46  ;;  %v4383_v62 = vpop.f32.mrb[215].mxu0  ;;  %v4915_v1 = vpop.f32.mrb[60].mxu1 }
 0x4f2   : > { %4585 = vst [vmem:[%s7555_s26 + $0x6b8] sm:$0xff] %v4383_v62  ;;  %5144 = vst [vmem:[%s7555_s26 + $0xa20] sm:$0xff] %v4915_v1  ;;  %v4917_v61 = vpop.f32.mrb[61].mxu1 }
 0x4f3   : > { %5482 = vmatmul.mubr.bf16.gmra.mrb[64].mxu0 %v8221_v11  ;;  %5145 = vst [vmem:[%s7555_s26 + $0xa28] sm:$0xff] %v4917_v61  ;;  %v4919_v47 = vpop.f32.mrb[62].mxu1 }
 0x4f4   : > { %5491 = vmatprep.mubr.bf16.mxu0 %v7272_v23  ;;  %5146 = vst [vmem:[%s7555_s26 + $0xa30] sm:$0xff] %v4919_v47  ;;  %v4921_v9 = vpop.f32.mrb[63].mxu1 }
 0x4f5   : > { %5147 = vst [vmem:[%s7555_s26 + $0xa38] sm:$0xff] %v4921_v9 }
 0x4f6   : > { %v4387_v28 = vpop.f32.mrb[216].mxu0 }
 0x4f7   : > { %4586 = vst [vmem:[%s7555_s26 + $0x6c0] sm:$0xff] %v4387_v28  ;;  %v4389_v37 = vpop.f32.mrb[217].mxu0 }
 0x4f8   : > { %4587 = vst [vmem:[%s7555_s26 + $0x6c8] sm:$0xff] %v4389_v37  ;;  %v4391_v24 = vpop.f32.mrb[218].mxu0 }
 0x4f9   : > { %4588 = vst [vmem:[%s7555_s26 + $0x6d0] sm:$0xff] %v4391_v24  ;;  %v4393_v11 = vpop.f32.mrb[219].mxu0  ;;  %v4925_v52 = vpop.f32.mrb[64].mxu1 }
 0x4fa   : > { %4589 = vst [vmem:[%s7555_s26 + $0x6d8] sm:$0xff] %v4393_v11  ;;  %5148 = vst [vmem:[%s7555_s26 + $0xa40] sm:$0xff] %v4925_v52  ;;  %v4927_v56 = vpop.f32.mrb[65].mxu1 }
 0x4fb   : > { %5492 = vmatmul.mubr.bf16.gmra.mrb[68].mxu0 %v8218_v51  ;;  %5149 = vst [vmem:[%s7555_s26 + $0xa48] sm:$0xff] %v4927_v56  ;;  %v4929_v32 = vpop.f32.mrb[66].mxu1 }
 0x4fc   : > { %5501 = vmatprep.mubr.bf16.mxu0 %v7272_v23  ;;  %5150 = vst [vmem:[%s7555_s26 + $0xa50] sm:$0xff] %v4929_v32  ;;  %v4931_v48 = vpop.f32.mrb[67].mxu1 }
 0x4fd   : > { %5151 = vst [vmem:[%s7555_s26 + $0xa58] sm:$0xff] %v4931_v48 }
 0x4fe   : > { %v4397_v14 = vpop.f32.mrb[220].mxu0 }
 0x4ff   : > { %4590 = vst [vmem:[%s7555_s26 + $0x6e0] sm:$0xff] %v4397_v14  ;;  %v4399_v21 = vpop.f32.mrb[221].mxu0 }
 0x500   : > { %4591 = vst [vmem:[%s7555_s26 + $0x6e8] sm:$0xff] %v4399_v21  ;;  %v4401_v6 = vpop.f32.mrb[222].mxu0 }
 0x501   : > { %4592 = vst [vmem:[%s7555_s26 + $0x6f0] sm:$0xff] %v4401_v6  ;;  %v4403_v51 = vpop.f32.mrb[223].mxu0  ;;  %v4935_v4 = vpop.f32.mrb[68].mxu1 }
 0x502   : > { %4593 = vst [vmem:[%s7555_s26 + $0x6f8] sm:$0xff] %v4403_v51  ;;  %5152 = vst [vmem:[%s7555_s26 + $0xa60] sm:$0xff] %v4935_v4  ;;  %v4937_v35 = vpop.f32.mrb[69].mxu1 }
 0x503   : > { %5502 = vmatmul.mubr.bf16.gmra.mrb[72].mxu0 %v8233_v17  ;;  %5153 = vst [vmem:[%s7555_s26 + $0xa68] sm:$0xff] %v4937_v35  ;;  %v4939_v13 = vpop.f32.mrb[70].mxu1 }
 0x504   : > { %5511 = vmatprep.mubr.bf16.mxu0 %v7272_v23  ;;  %5154 = vst [vmem:[%s7555_s26 + $0xa70] sm:$0xff] %v4939_v13  ;;  %v4941_v36 = vpop.f32.mrb[71].mxu1 }
 0x505   : > { %5155 = vst [vmem:[%s7555_s26 + $0xa78] sm:$0xff] %v4941_v36 }
 0x506   : > { %v4407_v39 = vpop.f32.mrb[224].mxu0 }
 0x507   : > { %4594 = vst [vmem:[%s7555_s26 + $0x700] sm:$0xff] %v4407_v39  ;;  %v4409_v42 = vpop.f32.mrb[225].mxu0 }
 0x508   : > { %4595 = vst [vmem:[%s7555_s26 + $0x708] sm:$0xff] %v4409_v42  ;;  %v4411_v8 = vpop.f32.mrb[226].mxu0 }
 0x509   : > { %4596 = vst [vmem:[%s7555_s26 + $0x710] sm:$0xff] %v4411_v8  ;;  %v4413_v17 = vpop.f32.mrb[227].mxu0  ;;  %v4945_v60 = vpop.f32.mrb[72].mxu1 }
 0x50a   : > { %4597 = vst [vmem:[%s7555_s26 + $0x718] sm:$0xff] %v4413_v17  ;;  %5156 = vst [vmem:[%s7555_s26 + $0xa80] sm:$0xff] %v4945_v60  ;;  %v4947_v55 = vpop.f32.mrb[73].mxu1 }
 0x50b   : > { %5512 = vmatmul.mubr.bf16.gmra.mrb[76].mxu0 %v8230_v30  ;;  %5157 = vst [vmem:[%s7555_s26 + $0xa88] sm:$0xff] %v4947_v55  ;;  %v4949_v29 = vpop.f32.mrb[74].mxu1 }
 0x50c   : > { %5521 = vmatprep.mubr.bf16.mxu0 %v7272_v23  ;;  %5158 = vst [vmem:[%s7555_s26 + $0xa90] sm:$0xff] %v4949_v29  ;;  %v4951_v59 = vpop.f32.mrb[75].mxu1 }
 0x50d   : > { %5159 = vst [vmem:[%s7555_s26 + $0xa98] sm:$0xff] %v4951_v59 }
 0x50e   : > { %v4417_v20 = vpop.f32.mrb[228].mxu0 }
 0x50f   : > { %4598 = vst [vmem:[%s7555_s26 + $0x720] sm:$0xff] %v4417_v20  ;;  %v4419_v44 = vpop.f32.mrb[229].mxu0 }
 0x510   : > { %4599 = vst [vmem:[%s7555_s26 + $0x728] sm:$0xff] %v4419_v44  ;;  %v4421_v38 = vpop.f32.mrb[230].mxu0 }
 0x511   : > { %4600 = vst [vmem:[%s7555_s26 + $0x730] sm:$0xff] %v4421_v38  ;;  %v4423_v30 = vpop.f32.mrb[231].mxu0  ;;  %v4955_v5 = vpop.f32.mrb[76].mxu1 }
 0x512   : > { %4601 = vst [vmem:[%s7555_s26 + $0x738] sm:$0xff] %v4423_v30  ;;  %5160 = vst [vmem:[%s7555_s26 + $0xaa0] sm:$0xff] %v4955_v5  ;;  %v4957_v15 = vpop.f32.mrb[77].mxu1 }
 0x513   : > { %5522 = vmatmul.mubr.bf16.gmra.mrb[80].mxu0 %v8245_v33  ;;  %5161 = vst [vmem:[%s7555_s26 + $0xaa8] sm:$0xff] %v4957_v15  ;;  %v4959_v7 = vpop.f32.mrb[78].mxu1 }
 0x514   : > { %5162 = vst [vmem:[%s7555_s26 + $0xab0] sm:$0xff] %v4959_v7  ;;  %5531 = vmatprep.mubr.bf16.mxu0 %v7272_v23  ;;  %v4961_v54 = vpop.f32.mrb[79].mxu1 }
 0x515   : > { %5163 = vst [vmem:[%s7555_s26 + $0xab8] sm:$0xff] %v4961_v54 }
 0x516   : > { %v4427_v22 = vpop.f32.mrb[232].mxu0 }
 0x517   : > { %4602 = vst [vmem:[%s7555_s26 + $0x740] sm:$0xff] %v4427_v22  ;;  %v4429_v27 = vpop.f32.mrb[233].mxu0 }
 0x518   : > { %4603 = vst [vmem:[%s7555_s26 + $0x748] sm:$0xff] %v4429_v27  ;;  %v4431_v0 = vpop.f32.mrb[234].mxu0 }
 0x519   : > { %4604 = vst [vmem:[%s7555_s26 + $0x750] sm:$0xff] %v4431_v0  ;;  %v4433_v33 = vpop.f32.mrb[235].mxu0  ;;  %v4965_v50 = vpop.f32.mrb[80].mxu1 }
 0x51a   : > { %4605 = vst [vmem:[%s7555_s26 + $0x758] sm:$0xff] %v4433_v33  ;;  %5164 = vst [vmem:[%s7555_s26 + $0xac0] sm:$0xff] %v4965_v50  ;;  %v4967_v40 = vpop.f32.mrb[81].mxu1 }
 0x51b   : > { %5532 = vmatmul.mubr.bf16.gmra.mrb[84].mxu0 %v8242_v41  ;;  %5165 = vst [vmem:[%s7555_s26 + $0xac8] sm:$0xff] %v4967_v40  ;;  %v4969_v34 = vpop.f32.mrb[82].mxu1 }
 0x51c   : > { %5166 = vst [vmem:[%s7555_s26 + $0xad0] sm:$0xff] %v4969_v34  ;;  %v4971_v2 = vpop.f32.mrb[83].mxu1  ;;  %5541 = vmatprep.mubr.bf16.mxu0 %v7272_v23 }
 0x51d   : > { %5167 = vst [vmem:[%s7555_s26 + $0xad8] sm:$0xff] %v4971_v2 }
 0x51e   : > { %v4437_v26 = vpop.f32.mrb[236].mxu0 }
 0x51f   : > { %4606 = vst [vmem:[%s7555_s26 + $0x760] sm:$0xff] %v4437_v26  ;;  %v4439_v58 = vpop.f32.mrb[237].mxu0 }
 0x520   : > { %4607 = vst [vmem:[%s7555_s26 + $0x768] sm:$0xff] %v4439_v58  ;;  %v4441_v3 = vpop.f32.mrb[238].mxu0 }
 0x521   : > { %4608 = vst [vmem:[%s7555_s26 + $0x770] sm:$0xff] %v4441_v3  ;;  %v4443_v41 = vpop.f32.mrb[239].mxu0  ;;  %v4975_v25 = vpop.f32.mrb[84].mxu1 }
 0x522   : > { %4609 = vst [vmem:[%s7555_s26 + $0x778] sm:$0xff] %v4443_v41  ;;  %5168 = vst [vmem:[%s7555_s26 + $0xae0] sm:$0xff] %v4975_v25  ;;  %v4977_v19 = vpop.f32.mrb[85].mxu1 }
 0x523   : > { %5169 = vst [vmem:[%s7555_s26 + $0xae8] sm:$0xff] %v4977_v19  ;;  %v4979_v63 = vpop.f32.mrb[86].mxu1  ;;  %5542 = vmatmul.mubr.bf16.gmra.mrb[88].mxu0 %v8257_v16 }
 0x524   : > { %5170 = vst [vmem:[%s7555_s26 + $0xaf0] sm:$0xff] %v4979_v63  ;;  %v4981_v45 = vpop.f32.mrb[87].mxu1  ;;  %5551 = vmatprep.mubr.bf16.mxu0 %v7272_v23 }
 0x525   : > { %5171 = vst [vmem:[%s7555_s26 + $0xaf8] sm:$0xff] %v4981_v45 }
 0x526   : > { %v4447_v46 = vpop.f32.mrb[240].mxu0 }
 0x527   : > { %4610 = vst [vmem:[%s7555_s26 + $0x780] sm:$0xff] %v4447_v46  ;;  %v4449_v62 = vpop.f32.mrb[241].mxu0 }
 0x528   : > { %4611 = vst [vmem:[%s7555_s26 + $0x788] sm:$0xff] %v4449_v62  ;;  %v4451_v1 = vpop.f32.mrb[242].mxu0 }
 0x529   : > { %4612 = vst [vmem:[%s7555_s26 + $0x790] sm:$0xff] %v4451_v1  ;;  %v4453_v61 = vpop.f32.mrb[243].mxu0  ;;  %v4985_v47 = vpop.f32.mrb[88].mxu1 }
 0x52a   : > { %4613 = vst [vmem:[%s7555_s26 + $0x798] sm:$0xff] %v4453_v61  ;;  %5172 = vst [vmem:[%s7555_s26 + $0xb00] sm:$0xff] %v4985_v47  ;;  %v4987_v16 = vpop.f32.mrb[89].mxu1 }
 0x52b   : > { %5173 = vst [vmem:[%s7555_s26 + $0xb08] sm:$0xff] %v4987_v16  ;;  %v4989_v9 = vpop.f32.mrb[90].mxu1  ;;  %5552 = vmatmul.mubr.bf16.gmra.mrb[92].mxu0 %v8254_v49 }
 0x52c   : > { %5174 = vst [vmem:[%s7555_s26 + $0xb10] sm:$0xff] %v4989_v9  ;;  %v4991_v28 = vpop.f32.mrb[91].mxu1  ;;  %5561 = vmatprep.mubr.bf16.mxu0 %v7272_v23 }
 0x52d   : > { %5175 = vst [vmem:[%s7555_s26 + $0xb18] sm:$0xff] %v4991_v28 }
 0x52e   : > { %v4457_v37 = vpop.f32.mrb[244].mxu0 }
 0x52f   : > { %4614 = vst [vmem:[%s7555_s26 + $0x7a0] sm:$0xff] %v4457_v37  ;;  %v4459_v24 = vpop.f32.mrb[245].mxu0 }
 0x530   : > { %4615 = vst [vmem:[%s7555_s26 + $0x7a8] sm:$0xff] %v4459_v24  ;;  %v4461_v11 = vpop.f32.mrb[246].mxu0 }
 0x531   : > { %4616 = vst [vmem:[%s7555_s26 + $0x7b0] sm:$0xff] %v4461_v11  ;;  %v4463_v52 = vpop.f32.mrb[247].mxu0  ;;  %v4995_v56 = vpop.f32.mrb[92].mxu1 }
 0x532   : > { %4617 = vst [vmem:[%s7555_s26 + $0x7b8] sm:$0xff] %v4463_v52  ;;  %5176 = vst [vmem:[%s7555_s26 + $0xb20] sm:$0xff] %v4995_v56  ;;  %v4997_v49 = vpop.f32.mrb[93].mxu1 }
 0x533   : > { %5177 = vst [vmem:[%s7555_s26 + $0xb28] sm:$0xff] %v4997_v49  ;;  %v4999_v32 = vpop.f32.mrb[94].mxu1  ;;  %5562 = vmatmul.mubr.bf16.gmra.mrb[96].mxu0 %v8269_v12 }
 0x534   : > { %5178 = vst [vmem:[%s7555_s26 + $0xb30] sm:$0xff] %v4999_v32  ;;  %v5001_v48 = vpop.f32.mrb[95].mxu1  ;;  %5571 = vmatprep.mubr.bf16.mxu0 %v7272_v23 }
 0x535   : > { %5179 = vst [vmem:[%s7555_s26 + $0xb38] sm:$0xff] %v5001_v48 }
 0x536   : > { %v4467_v14 = vpop.f32.mrb[248].mxu0 }
 0x537   : > { %4618 = vst [vmem:[%s7555_s26 + $0x7c0] sm:$0xff] %v4467_v14  ;;  %v4469_v21 = vpop.f32.mrb[249].mxu0 }
 0x538   : > { %4619 = vst [vmem:[%s7555_s26 + $0x7c8] sm:$0xff] %v4469_v21  ;;  %v4471_v6 = vpop.f32.mrb[250].mxu0 }
 0x539   : > { %4620 = vst [vmem:[%s7555_s26 + $0x7d0] sm:$0xff] %v4471_v6  ;;  %v4473_v51 = vpop.f32.mrb[251].mxu0  ;;  %v5005_v4 = vpop.f32.mrb[96].mxu1 }
 0x53a   : > { %4621 = vst [vmem:[%s7555_s26 + $0x7d8] sm:$0xff] %v4473_v51  ;;  %5180 = vst [vmem:[%s7555_s26 + $0xb40] sm:$0xff] %v5005_v4  ;;  %v5007_v12 = vpop.f32.mrb[97].mxu1 }
 0x53b   : > { %5181 = vst [vmem:[%s7555_s26 + $0xb48] sm:$0xff] %v5007_v12  ;;  %v5009_v35 = vpop.f32.mrb[98].mxu1  ;;  %5572 = vmatmul.mubr.bf16.gmra.mrb[100].mxu0 %v8266_v18 }
 0x53c   : > { %5182 = vst [vmem:[%s7555_s26 + $0xb50] sm:$0xff] %v5009_v35  ;;  %v5011_v13 = vpop.f32.mrb[99].mxu1  ;;  %5581 = vmatprep.mubr.bf16.mxu0 %v7272_v23 }
 0x53d   : > { %5183 = vst [vmem:[%s7555_s26 + $0xb58] sm:$0xff] %v5011_v13 }
 0x53e   : > { %v4477_v36 = vpop.f32.mrb[252].mxu0 }
 0x53f   : > { %4622 = vst [vmem:[%s7555_s26 + $0x7e0] sm:$0xff] %v4477_v36  ;;  %v4479_v39 = vpop.f32.mrb[253].mxu0 }
 0x540   : > { %4623 = vst [vmem:[%s7555_s26 + $0x7e8] sm:$0xff] %v4479_v39  ;;  %v4481_v42 = vpop.f32.mrb[254].mxu0 }
 0x541   : > { %4624 = vst [vmem:[%s7555_s26 + $0x7f0] sm:$0xff] %v4481_v42  ;;  %v4483_v8 = vpop.f32.mrb[255].mxu0  ;;  %v5015_v17 = vpop.f32.mrb[100].mxu1 }
 0x542   : > { %4625 = vst [vmem:[%s7555_s26 + $0x7f8] sm:$0xff] %v4483_v8  ;;  %5184 = vst [vmem:[%s7555_s26 + $0xb60] sm:$0xff] %v5015_v17  ;;  %v5017_v18 = vpop.f32.mrb[101].mxu1 }
 0x543   : > { %5185 = vst [vmem:[%s7555_s26 + $0xb68] sm:$0xff] %v5017_v18  ;;  %v5019_v60 = vpop.f32.mrb[102].mxu1  ;;  %5582 = vmatmul.mubr.bf16.gmra.mrb[104].mxu0 %v8281_v57 }
 0x544   : > { %5186 = vst [vmem:[%s7555_s26 + $0xb70] sm:$0xff] %v5019_v60  ;;  %v5021_v55 = vpop.f32.mrb[103].mxu1  ;;  %5591 = vmatprep.mubr.bf16.mxu0 %v7272_v23 }
 0x545   : > { %5187 = vst [vmem:[%s7555_s26 + $0xb78] sm:$0xff] %v5021_v55 }
 0x546   : > { %v4487_v29 = vpop.f32.mrb[0].mxu0 }
 0x547   : > { %4626 = vst [vmem:[%s7555_s26 + $0x800] sm:$0xff] %v4487_v29  ;;  %v4489_v59 = vpop.f32.mrb[1].mxu0 }
 0x548   : > { %4627 = vst [vmem:[%s7555_s26 + $0x808] sm:$0xff] %v4489_v59  ;;  %v4491_v20 = vpop.f32.mrb[2].mxu0 }
 0x549   : > { %4628 = vst [vmem:[%s7555_s26 + $0x810] sm:$0xff] %v4491_v20  ;;  %v4493_v44 = vpop.f32.mrb[3].mxu0  ;;  %v5025_v38 = vpop.f32.mrb[104].mxu1 }
 0x54a   : > { %4629 = vst [vmem:[%s7555_s26 + $0x818] sm:$0xff] %v4493_v44  ;;  %5188 = vst [vmem:[%s7555_s26 + $0xb80] sm:$0xff] %v5025_v38  ;;  %v5027_v57 = vpop.f32.mrb[105].mxu1 }
 0x54b   : > { %5189 = vst [vmem:[%s7555_s26 + $0xb88] sm:$0xff] %v5027_v57  ;;  %v5029_v30 = vpop.f32.mrb[106].mxu1  ;;  %5592 = vmatmul.mubr.bf16.gmra.mrb[108].mxu0 %v8278_v31 }
 0x54c   : > { %5190 = vst [vmem:[%s7555_s26 + $0xb90] sm:$0xff] %v5029_v30  ;;  %v5031_v5 = vpop.f32.mrb[107].mxu1  ;;  %5601 = vmatprep.mubr.bf16.mxu0 %v7272_v23 }
 0x54d   : > { %5191 = vst [vmem:[%s7555_s26 + $0xb98] sm:$0xff] %v5031_v5 }
 0x54e   : > { %v4497_v15 = vpop.f32.mrb[4].mxu0 }
 0x54f   : > { %4630 = vst [vmem:[%s7555_s26 + $0x820] sm:$0xff] %v4497_v15  ;;  %v4499_v7 = vpop.f32.mrb[5].mxu0 }
 0x550   : > { %4631 = vst [vmem:[%s7555_s26 + $0x828] sm:$0xff] %v4499_v7  ;;  %v4501_v54 = vpop.f32.mrb[6].mxu0 }
 0x551   : > { %4632 = vst [vmem:[%s7555_s26 + $0x830] sm:$0xff] %v4501_v54  ;;  %v4503_v22 = vpop.f32.mrb[7].mxu0  ;;  %v5035_v27 = vpop.f32.mrb[108].mxu1 }
 0x552   : > { %4633 = vst [vmem:[%s7555_s26 + $0x838] sm:$0xff] %v4503_v22  ;;  %5192 = vst [vmem:[%s7555_s26 + $0xba0] sm:$0xff] %v5035_v27  ;;  %v5037_v31 = vpop.f32.mrb[109].mxu1 }
 0x553   : > { %5193 = vst [vmem:[%s7555_s26 + $0xba8] sm:$0xff] %v5037_v31  ;;  %v5039_v0 = vpop.f32.mrb[110].mxu1  ;;  %5602 = vmatmul.mubr.bf16.gmra.mrb[112].mxu0 %v8293_v53 }
 0x554   : > { %5194 = vst [vmem:[%s7555_s26 + $0xbb0] sm:$0xff] %v5039_v0  ;;  %v5041_v33 = vpop.f32.mrb[111].mxu1  ;;  %5611 = vmatprep.mubr.bf16.mxu0 %v7272_v23 }
 0x555   : > { %5195 = vst [vmem:[%s7555_s26 + $0xbb8] sm:$0xff] %v5041_v33 }
 0x556   : > { %v5343_v50 = vpop.f32.mrb[8].mxu0 }
 0x557   : > { %5662 = vst [vmem:[%s7555_s26 + $0xc40] sm:$0xff] %v5343_v50  ;;  %v5345_v40 = vpop.f32.mrb[9].mxu0 }
 0x558   : > { %5663 = vst [vmem:[%s7555_s26 + $0xc48] sm:$0xff] %v5345_v40  ;;  %v5347_v34 = vpop.f32.mrb[10].mxu0 }
 0x559   : > { %5664 = vst [vmem:[%s7555_s26 + $0xc50] sm:$0xff] %v5347_v34  ;;  %v5045_v2 = vpop.f32.mrb[112].mxu1  ;;  %v5349_v26 = vpop.f32.mrb[11].mxu0 }
 0x55a   : > { %5196 = vst [vmem:[%s7555_s26 + $0xbc0] sm:$0xff] %v5045_v2  ;;  %5665 = vst [vmem:[%s7555_s26 + $0xc58] sm:$0xff] %v5349_v26  ;;  %v5047_v53 = vpop.f32.mrb[113].mxu1 }
 0x55b   : > { %5197 = vst [vmem:[%s7555_s26 + $0xbc8] sm:$0xff] %v5047_v53  ;;  %v5049_v58 = vpop.f32.mrb[114].mxu1  ;;  %5612 = vmatmul.mubr.bf16.gmra.mrb[116].mxu0 %v8290_v10 }
 0x55c   : > { %5198 = vst [vmem:[%s7555_s26 + $0xbd0] sm:$0xff] %v5049_v58  ;;  %v5051_v3 = vpop.f32.mrb[115].mxu1  ;;  %5621 = vmatprep.mubr.bf16.mxu0 %v7272_v23 }
 0x55d   : > { %5199 = vst [vmem:[%s7555_s26 + $0xbd8] sm:$0xff] %v5051_v3 }
 0x55e   : > { %v5353_v41 = vpop.f32.mrb[12].mxu0 }
 0x55f   : > { %5666 = vst [vmem:[%s7555_s26 + $0xc60] sm:$0xff] %v5353_v41  ;;  %v5355_v25 = vpop.f32.mrb[13].mxu0 }
 0x560   : > { %5667 = vst [vmem:[%s7555_s26 + $0xc68] sm:$0xff] %v5355_v25  ;;  %v5357_v19 = vpop.f32.mrb[14].mxu0 }
 0x561   : > { %5668 = vst [vmem:[%s7555_s26 + $0xc70] sm:$0xff] %v5357_v19  ;;  %v5055_v63 = vpop.f32.mrb[116].mxu1  ;;  %v5359_v45 = vpop.f32.mrb[15].mxu0 }
 0x562   : > { %5200 = vst [vmem:[%s7555_s26 + $0xbe0] sm:$0xff] %v5055_v63  ;;  %5669 = vst [vmem:[%s7555_s26 + $0xc78] sm:$0xff] %v5359_v45  ;;  %v5057_v10 = vpop.f32.mrb[117].mxu1 }
 0x563   : > { %5201 = vst [vmem:[%s7555_s26 + $0xbe8] sm:$0xff] %v5057_v10  ;;  %v5059_v23 = vpop.f32.mrb[118].mxu1  ;;  %5622 = vmatmul.mubr.bf16.gmra.mrb[120].mxu0 %v8305_v43 }
 0x564   : > { %5202 = vst [vmem:[%s7555_s26 + $0xbf0] sm:$0xff] %v5059_v23  ;;  %v5061_v46 = vpop.f32.mrb[119].mxu1 }
 0x565   : > { %5203 = vst [vmem:[%s7555_s26 + $0xbf8] sm:$0xff] %v5061_v46 }
 0x566   : > { %v5363_v62 = vpop.f32.mrb[16].mxu0 }
 0x567   : > { %5670 = vst [vmem:[%s7555_s26 + $0xc80] sm:$0xff] %v5363_v62  ;;  %v5365_v1 = vpop.f32.mrb[17].mxu0 }
 0x568   : > { %5671 = vst [vmem:[%s7555_s26 + $0xc88] sm:$0xff] %v5365_v1  ;;  %v5367_v61 = vpop.f32.mrb[18].mxu0 }
 0x569   : > { %5672 = vst [vmem:[%s7555_s26 + $0xc90] sm:$0xff] %v5367_v61  ;;  %v5065_v47 = vpop.f32.mrb[120].mxu1  ;;  %v5369_v16 = vpop.f32.mrb[19].mxu0 }
 0x56a   : > { %5204 = vst [vmem:[%s7555_s26 + $0xc00] sm:$0xff] %v5065_v47  ;;  %5673 = vst [vmem:[%s7555_s26 + $0xc98] sm:$0xff] %v5369_v16  ;;  %v5067_v43 = vpop.f32.mrb[121].mxu1 }
 0x56b   : > { %5205 = vst [vmem:[%s7555_s26 + $0xc08] sm:$0xff] %v5067_v43  ;;  %v5069_v9 = vpop.f32.mrb[122].mxu1 }
 0x56c   : > { %5206 = vst [vmem:[%s7555_s26 + $0xc10] sm:$0xff] %v5069_v9  ;;  %v5071_v28 = vpop.f32.mrb[123].mxu1 }
 0x56d   : > { %5207 = vst [vmem:[%s7555_s26 + $0xc18] sm:$0xff] %v5071_v28 }
 0x56e   : > { %v5373_v37 = vpop.f32.mrb[20].mxu0 }
 0x56f   : > { %5674 = vst [vmem:[%s7555_s26 + $0xca0] sm:$0xff] %v5373_v37  ;;  %v5375_v24 = vpop.f32.mrb[21].mxu0 }
 0x570   : > { %5675 = vst [vmem:[%s7555_s26 + $0xca8] sm:$0xff] %v5375_v24  ;;  %v5377_v11 = vpop.f32.mrb[22].mxu0 }
 0x571   : > { %5676 = vst [vmem:[%s7555_s26 + $0xcb0] sm:$0xff] %v5377_v11  ;;  %v5075_v52 = vpop.f32.mrb[124].mxu1  ;;  %v5379_v56 = vpop.f32.mrb[23].mxu0 }
 0x572   : > { %5208 = vst [vmem:[%s7555_s26 + $0xc20] sm:$0xff] %v5075_v52  ;;  %5677 = vst [vmem:[%s7555_s26 + $0xcb8] sm:$0xff] %v5379_v56  ;;  %v5077_v49 = vpop.f32.mrb[125].mxu1 }
 0x573   : > { %5209 = vst [vmem:[%s7555_s26 + $0xc28] sm:$0xff] %v5077_v49  ;;  %v5079_v32 = vpop.f32.mrb[126].mxu1 }
 0x574   : > { %5210 = vst [vmem:[%s7555_s26 + $0xc30] sm:$0xff] %v5079_v32  ;;  %v5081_v48 = vpop.f32.mrb[127].mxu1 }
 0x575   : > { %5211 = vst [vmem:[%s7555_s26 + $0xc38] sm:$0xff] %v5081_v48 }
 0x576   : > { %v5383_v14 = vpop.f32.mrb[24].mxu0 }
 0x577   : > { %5678 = vst [vmem:[%s7555_s26 + $0xcc0] sm:$0xff] %v5383_v14  ;;  %v5385_v21 = vpop.f32.mrb[25].mxu0 }
 0x578   : > { %5679 = vst [vmem:[%s7555_s26 + $0xcc8] sm:$0xff] %v5385_v21  ;;  %v5387_v6 = vpop.f32.mrb[26].mxu0 }
 0x579   : > { %5680 = vst [vmem:[%s7555_s26 + $0xcd0] sm:$0xff] %v5387_v6  ;;  %v5389_v51 = vpop.f32.mrb[27].mxu0  ;;  %v5633_v4 = vpop.f32.mrb[128].mxu1 }
 0x57a   : > { %5681 = vst [vmem:[%s7555_s26 + $0xcd8] sm:$0xff] %v5389_v51  ;;  %5778 = vst [vmem:[%s7555_s26 + $0xfe0] sm:$0xff] %v5633_v4  ;;  %v5635_v12 = vpop.f32.mrb[129].mxu1 }
 0x57b   : > { %5779 = vst [vmem:[%s7555_s26 + $0xfe8] sm:$0xff] %v5635_v12  ;;  %v5637_v35 = vpop.f32.mrb[130].mxu1 }
 0x57c   : > { %5780 = vst [vmem:[%s7555_s26 + $0xff0] sm:$0xff] %v5637_v35  ;;  %v5639_v13 = vpop.f32.mrb[131].mxu1 }
 0x57d   : > { %5781 = vst [vmem:[%s7555_s26 + $0xff8] sm:$0xff] %v5639_v13 }
 0x57e   : > { %v5393_v36 = vpop.f32.mrb[28].mxu0 }
 0x57f   : > { %5682 = vst [vmem:[%s7555_s26 + $0xce0] sm:$0xff] %v5393_v36  ;;  %v5395_v39 = vpop.f32.mrb[29].mxu0 }
 0x580   : > { %5683 = vst [vmem:[%s7555_s26 + $0xce8] sm:$0xff] %v5395_v39  ;;  %v5397_v42 = vpop.f32.mrb[30].mxu0 }
 0x581   : > { %5684 = vst [vmem:[%s7555_s26 + $0xcf0] sm:$0xff] %v5397_v42  ;;  %v5399_v8 = vpop.f32.mrb[31].mxu0  ;;  %v5643_v17 = vpop.f32.mrb[132].mxu1 }
 0x582   : > { %5685 = vst [vmem:[%s7555_s26 + $0xcf8] sm:$0xff] %v5399_v8  ;;  %5782 = vst [vmem:[%s7555_s26 + $0x1000] sm:$0xff] %v5643_v17  ;;  %v5645_v18 = vpop.f32.mrb[133].mxu1 }
 0x583   : > { %5783 = vst [vmem:[%s7555_s26 + $0x1008] sm:$0xff] %v5645_v18  ;;  %v5647_v60 = vpop.f32.mrb[134].mxu1 }
 0x584   : > { %5784 = vst [vmem:[%s7555_s26 + $0x1010] sm:$0xff] %v5647_v60  ;;  %v5649_v55 = vpop.f32.mrb[135].mxu1 }
 0x585   : > { %5785 = vst [vmem:[%s7555_s26 + $0x1018] sm:$0xff] %v5649_v55 }
 0x586   : > { %v5403_v29 = vpop.f32.mrb[32].mxu0 }
 0x587   : > { %5686 = vst [vmem:[%s7555_s26 + $0xd00] sm:$0xff] %v5403_v29  ;;  %v5405_v59 = vpop.f32.mrb[33].mxu0 }
 0x588   : > { %5687 = vst [vmem:[%s7555_s26 + $0xd08] sm:$0xff] %v5405_v59  ;;  %v5407_v20 = vpop.f32.mrb[34].mxu0 }
 0x589   : > { %5688 = vst [vmem:[%s7555_s26 + $0xd10] sm:$0xff] %v5407_v20  ;;  %v5409_v44 = vpop.f32.mrb[35].mxu0  ;;  %v5653_v38 = vpop.f32.mrb[136].mxu1 }
 0x58a   : > { %5689 = vst [vmem:[%s7555_s26 + $0xd18] sm:$0xff] %v5409_v44  ;;  %5786 = vst [vmem:[%s7555_s26 + $0x1020] sm:$0xff] %v5653_v38  ;;  %v5655_v57 = vpop.f32.mrb[137].mxu1 }
 0x58b   : > { %5787 = vst [vmem:[%s7555_s26 + $0x1028] sm:$0xff] %v5655_v57  ;;  %v5657_v30 = vpop.f32.mrb[138].mxu1 }
 0x58c   : > { %5788 = vst [vmem:[%s7555_s26 + $0x1030] sm:$0xff] %v5657_v30  ;;  %v5659_v5 = vpop.f32.mrb[139].mxu1 }
 0x58d   : > { %5789 = vst [vmem:[%s7555_s26 + $0x1038] sm:$0xff] %v5659_v5 }
 0x58e   : > { %v5413_v15 = vpop.f32.mrb[36].mxu0 }
 0x58f   : > { %5690 = vst [vmem:[%s7555_s26 + $0xd20] sm:$0xff] %v5413_v15  ;;  %v5415_v7 = vpop.f32.mrb[37].mxu0 }
 0x590   : > { %5691 = vst [vmem:[%s7555_s26 + $0xd28] sm:$0xff] %v5415_v7  ;;  %v5417_v54 = vpop.f32.mrb[38].mxu0 }
 0x591   : > { %5692 = vst [vmem:[%s7555_s26 + $0xd30] sm:$0xff] %v5417_v54  ;;  %v5419_v22 = vpop.f32.mrb[39].mxu0 }
 0x592   : > { %5693 = vst [vmem:[%s7555_s26 + $0xd38] sm:$0xff] %v5419_v22 }
 0x596   : > { %v5423_v27 = vpop.f32.mrb[40].mxu0 }
 0x597   : > { %5694 = vst [vmem:[%s7555_s26 + $0xd40] sm:$0xff] %v5423_v27  ;;  %v5425_v31 = vpop.f32.mrb[41].mxu0 }
 0x598   : > { %5695 = vst [vmem:[%s7555_s26 + $0xd48] sm:$0xff] %v5425_v31  ;;  %v5427_v0 = vpop.f32.mrb[42].mxu0 }
 0x599   : > { %5696 = vst [vmem:[%s7555_s26 + $0xd50] sm:$0xff] %v5427_v0  ;;  %v5429_v33 = vpop.f32.mrb[43].mxu0 }
 0x59a   : > { %5697 = vst [vmem:[%s7555_s26 + $0xd58] sm:$0xff] %v5429_v33 }
 0x59e   : > { %v5433_v50 = vpop.f32.mrb[44].mxu0 }
 0x59f   : > { %5698 = vst [vmem:[%s7555_s26 + $0xd60] sm:$0xff] %v5433_v50  ;;  %v5435_v40 = vpop.f32.mrb[45].mxu0 }
 0x5a0   : > { %5699 = vst [vmem:[%s7555_s26 + $0xd68] sm:$0xff] %v5435_v40  ;;  %v5437_v34 = vpop.f32.mrb[46].mxu0 }
 0x5a1   : > { %5700 = vst [vmem:[%s7555_s26 + $0xd70] sm:$0xff] %v5437_v34  ;;  %v5439_v2 = vpop.f32.mrb[47].mxu0 }
 0x5a2   : > { %5701 = vst [vmem:[%s7555_s26 + $0xd78] sm:$0xff] %v5439_v2 }
 0x5a6   : > { %v5443_v26 = vpop.f32.mrb[48].mxu0 }
 0x5a7   : > { %5702 = vst [vmem:[%s7555_s26 + $0xd80] sm:$0xff] %v5443_v26  ;;  %v5445_v53 = vpop.f32.mrb[49].mxu0 }
 0x5a8   : > { %5703 = vst [vmem:[%s7555_s26 + $0xd88] sm:$0xff] %v5445_v53  ;;  %v5447_v58 = vpop.f32.mrb[50].mxu0 }
 0x5a9   : > { %5704 = vst [vmem:[%s7555_s26 + $0xd90] sm:$0xff] %v5447_v58  ;;  %v5449_v3 = vpop.f32.mrb[51].mxu0 }
 0x5aa   : > { %5705 = vst [vmem:[%s7555_s26 + $0xd98] sm:$0xff] %v5449_v3 }
 0x5ae   : > { %v5453_v41 = vpop.f32.mrb[52].mxu0 }
 0x5af   : > { %5706 = vst [vmem:[%s7555_s26 + $0xda0] sm:$0xff] %v5453_v41  ;;  %v5455_v25 = vpop.f32.mrb[53].mxu0 }
 0x5b0   : > { %5707 = vst [vmem:[%s7555_s26 + $0xda8] sm:$0xff] %v5455_v25  ;;  %v5457_v19 = vpop.f32.mrb[54].mxu0 }
 0x5b1   : > { %5708 = vst [vmem:[%s7555_s26 + $0xdb0] sm:$0xff] %v5457_v19  ;;  %v5459_v63 = vpop.f32.mrb[55].mxu0 }
 0x5b2   : > { %5709 = vst [vmem:[%s7555_s26 + $0xdb8] sm:$0xff] %v5459_v63 }
 0x5b6   : > { %v5463_v45 = vpop.f32.mrb[56].mxu0 }
 0x5b7   : > { %5710 = vst [vmem:[%s7555_s26 + $0xdc0] sm:$0xff] %v5463_v45  ;;  %v5465_v10 = vpop.f32.mrb[57].mxu0 }
 0x5b8   : > { %5711 = vst [vmem:[%s7555_s26 + $0xdc8] sm:$0xff] %v5465_v10  ;;  %v5467_v23 = vpop.f32.mrb[58].mxu0 }
 0x5b9   : > { %5712 = vst [vmem:[%s7555_s26 + $0xdd0] sm:$0xff] %v5467_v23  ;;  %v5469_v46 = vpop.f32.mrb[59].mxu0 }
 0x5ba   : > { %5713 = vst [vmem:[%s7555_s26 + $0xdd8] sm:$0xff] %v5469_v46 }
 0x5be   : > { %v5473_v62 = vpop.f32.mrb[60].mxu0 }
 0x5bf   : > { %5714 = vst [vmem:[%s7555_s26 + $0xde0] sm:$0xff] %v5473_v62  ;;  %v5475_v1 = vpop.f32.mrb[61].mxu0 }
 0x5c0   : > { %5715 = vst [vmem:[%s7555_s26 + $0xde8] sm:$0xff] %v5475_v1  ;;  %v5477_v61 = vpop.f32.mrb[62].mxu0 }
 0x5c1   : > { %5716 = vst [vmem:[%s7555_s26 + $0xdf0] sm:$0xff] %v5477_v61  ;;  %v5479_v47 = vpop.f32.mrb[63].mxu0 }
 0x5c2   : > { %5717 = vst [vmem:[%s7555_s26 + $0xdf8] sm:$0xff] %v5479_v47 }
 0x5c6   : > { %v5483_v16 = vpop.f32.mrb[64].mxu0 }
 0x5c7   : > { %5718 = vst [vmem:[%s7555_s26 + $0xe00] sm:$0xff] %v5483_v16  ;;  %v5485_v43 = vpop.f32.mrb[65].mxu0 }
 0x5c8   : > { %5719 = vst [vmem:[%s7555_s26 + $0xe08] sm:$0xff] %v5485_v43  ;;  %v5487_v9 = vpop.f32.mrb[66].mxu0 }
 0x5c9   : > { %5720 = vst [vmem:[%s7555_s26 + $0xe10] sm:$0xff] %v5487_v9  ;;  %v5489_v28 = vpop.f32.mrb[67].mxu0 }
 0x5ca   : > { %5721 = vst [vmem:[%s7555_s26 + $0xe18] sm:$0xff] %v5489_v28 }
 0x5ce   : > { %v5493_v37 = vpop.f32.mrb[68].mxu0 }
 0x5cf   : > { %5722 = vst [vmem:[%s7555_s26 + $0xe20] sm:$0xff] %v5493_v37  ;;  %v5495_v24 = vpop.f32.mrb[69].mxu0 }
 0x5d0   : > { %5723 = vst [vmem:[%s7555_s26 + $0xe28] sm:$0xff] %v5495_v24  ;;  %v5497_v11 = vpop.f32.mrb[70].mxu0 }
 0x5d1   : > { %5724 = vst [vmem:[%s7555_s26 + $0xe30] sm:$0xff] %v5497_v11  ;;  %v5499_v52 = vpop.f32.mrb[71].mxu0 }
 0x5d2   : > { %5725 = vst [vmem:[%s7555_s26 + $0xe38] sm:$0xff] %v5499_v52 }
 0x5d6   : > { %v5503_v56 = vpop.f32.mrb[72].mxu0 }
 0x5d7   : > { %5726 = vst [vmem:[%s7555_s26 + $0xe40] sm:$0xff] %v5503_v56  ;;  %v5505_v49 = vpop.f32.mrb[73].mxu0 }
 0x5d8   : > { %5727 = vst [vmem:[%s7555_s26 + $0xe48] sm:$0xff] %v5505_v49  ;;  %v5507_v32 = vpop.f32.mrb[74].mxu0 }
 0x5d9   : > { %5728 = vst [vmem:[%s7555_s26 + $0xe50] sm:$0xff] %v5507_v32  ;;  %v5509_v48 = vpop.f32.mrb[75].mxu0 }
 0x5da   : > { %5729 = vst [vmem:[%s7555_s26 + $0xe58] sm:$0xff] %v5509_v48 }
 0x5de   : > { %v5513_v14 = vpop.f32.mrb[76].mxu0 }
 0x5df   : > { %5730 = vst [vmem:[%s7555_s26 + $0xe60] sm:$0xff] %v5513_v14  ;;  %v5515_v21 = vpop.f32.mrb[77].mxu0 }
 0x5e0   : > { %5731 = vst [vmem:[%s7555_s26 + $0xe68] sm:$0xff] %v5515_v21  ;;  %v5517_v6 = vpop.f32.mrb[78].mxu0 }
 0x5e1   : > { %5732 = vst [vmem:[%s7555_s26 + $0xe70] sm:$0xff] %v5517_v6  ;;  %v5519_v51 = vpop.f32.mrb[79].mxu0 }
 0x5e2   : > { %5733 = vst [vmem:[%s7555_s26 + $0xe78] sm:$0xff] %v5519_v51 }
 0x5e6   : > { %v5523_v4 = vpop.f32.mrb[80].mxu0 }
 0x5e7   : > { %5734 = vst [vmem:[%s7555_s26 + $0xe80] sm:$0xff] %v5523_v4  ;;  %v5525_v12 = vpop.f32.mrb[81].mxu0 }
 0x5e8   : > { %5735 = vst [vmem:[%s7555_s26 + $0xe88] sm:$0xff] %v5525_v12  ;;  %v5527_v35 = vpop.f32.mrb[82].mxu0 }
 0x5e9   : > { %5736 = vst [vmem:[%s7555_s26 + $0xe90] sm:$0xff] %v5527_v35  ;;  %v5529_v13 = vpop.f32.mrb[83].mxu0 }
 0x5ea   : > { %5737 = vst [vmem:[%s7555_s26 + $0xe98] sm:$0xff] %v5529_v13 }
 0x5ee   : > { %v5533_v36 = vpop.f32.mrb[84].mxu0 }
 0x5ef   : > { %5738 = vst [vmem:[%s7555_s26 + $0xea0] sm:$0xff] %v5533_v36  ;;  %v5535_v39 = vpop.f32.mrb[85].mxu0 }
 0x5f0   : > { %5739 = vst [vmem:[%s7555_s26 + $0xea8] sm:$0xff] %v5535_v39  ;;  %v5537_v42 = vpop.f32.mrb[86].mxu0 }
 0x5f1   : > { %5740 = vst [vmem:[%s7555_s26 + $0xeb0] sm:$0xff] %v5537_v42  ;;  %v5539_v8 = vpop.f32.mrb[87].mxu0 }
 0x5f2   : > { %5741 = vst [vmem:[%s7555_s26 + $0xeb8] sm:$0xff] %v5539_v8 }
 0x5f6   : > { %v5543_v17 = vpop.f32.mrb[88].mxu0 }
 0x5f7   : > { %5742 = vst [vmem:[%s7555_s26 + $0xec0] sm:$0xff] %v5543_v17  ;;  %v5545_v18 = vpop.f32.mrb[89].mxu0 }
 0x5f8   : > { %5743 = vst [vmem:[%s7555_s26 + $0xec8] sm:$0xff] %v5545_v18  ;;  %v5547_v60 = vpop.f32.mrb[90].mxu0 }
 0x5f9   : > { %5744 = vst [vmem:[%s7555_s26 + $0xed0] sm:$0xff] %v5547_v60  ;;  %v5549_v55 = vpop.f32.mrb[91].mxu0 }
 0x5fa   : > { %5745 = vst [vmem:[%s7555_s26 + $0xed8] sm:$0xff] %v5549_v55 }
 0x5fe   : > { %v5553_v29 = vpop.f32.mrb[92].mxu0 }
 0x5ff   : > { %5746 = vst [vmem:[%s7555_s26 + $0xee0] sm:$0xff] %v5553_v29  ;;  %v5555_v59 = vpop.f32.mrb[93].mxu0 }
 0x600   : > { %5747 = vst [vmem:[%s7555_s26 + $0xee8] sm:$0xff] %v5555_v59  ;;  %v5557_v20 = vpop.f32.mrb[94].mxu0 }
 0x601   : > { %5748 = vst [vmem:[%s7555_s26 + $0xef0] sm:$0xff] %v5557_v20  ;;  %v5559_v44 = vpop.f32.mrb[95].mxu0 }
 0x602   : > { %5749 = vst [vmem:[%s7555_s26 + $0xef8] sm:$0xff] %v5559_v44 }
 0x606   : > { %v5563_v38 = vpop.f32.mrb[96].mxu0 }
 0x607   : > { %5750 = vst [vmem:[%s7555_s26 + $0xf00] sm:$0xff] %v5563_v38  ;;  %v5565_v57 = vpop.f32.mrb[97].mxu0 }
 0x608   : > { %5751 = vst [vmem:[%s7555_s26 + $0xf08] sm:$0xff] %v5565_v57  ;;  %v5567_v30 = vpop.f32.mrb[98].mxu0 }
 0x609   : > { %5752 = vst [vmem:[%s7555_s26 + $0xf10] sm:$0xff] %v5567_v30  ;;  %v5569_v5 = vpop.f32.mrb[99].mxu0 }
 0x60a   : > { %5753 = vst [vmem:[%s7555_s26 + $0xf18] sm:$0xff] %v5569_v5 }
 0x60e   : > { %v5573_v15 = vpop.f32.mrb[100].mxu0 }
 0x60f   : > { %5754 = vst [vmem:[%s7555_s26 + $0xf20] sm:$0xff] %v5573_v15  ;;  %v5575_v7 = vpop.f32.mrb[101].mxu0 }
 0x610   : > { %5755 = vst [vmem:[%s7555_s26 + $0xf28] sm:$0xff] %v5575_v7  ;;  %v5577_v54 = vpop.f32.mrb[102].mxu0 }
 0x611   : > { %5756 = vst [vmem:[%s7555_s26 + $0xf30] sm:$0xff] %v5577_v54  ;;  %v5579_v22 = vpop.f32.mrb[103].mxu0 }
 0x612   : > { %5757 = vst [vmem:[%s7555_s26 + $0xf38] sm:$0xff] %v5579_v22 }
 0x616   : > { %v5583_v27 = vpop.f32.mrb[104].mxu0 }
 0x617   : > { %5758 = vst [vmem:[%s7555_s26 + $0xf40] sm:$0xff] %v5583_v27  ;;  %v5585_v31 = vpop.f32.mrb[105].mxu0 }
 0x618   : > { %5759 = vst [vmem:[%s7555_s26 + $0xf48] sm:$0xff] %v5585_v31  ;;  %v5587_v0 = vpop.f32.mrb[106].mxu0 }
 0x619   : > { %5760 = vst [vmem:[%s7555_s26 + $0xf50] sm:$0xff] %v5587_v0  ;;  %v5589_v33 = vpop.f32.mrb[107].mxu0 }
 0x61a   : > { %5761 = vst [vmem:[%s7555_s26 + $0xf58] sm:$0xff] %v5589_v33 }
 0x61e   : > { %v5593_v50 = vpop.f32.mrb[108].mxu0 }
 0x61f   : > { %5762 = vst [vmem:[%s7555_s26 + $0xf60] sm:$0xff] %v5593_v50  ;;  %v5595_v40 = vpop.f32.mrb[109].mxu0 }
 0x620   : > { %5763 = vst [vmem:[%s7555_s26 + $0xf68] sm:$0xff] %v5595_v40  ;;  %v5597_v34 = vpop.f32.mrb[110].mxu0 }
 0x621   : > { %5764 = vst [vmem:[%s7555_s26 + $0xf70] sm:$0xff] %v5597_v34  ;;  %v5599_v2 = vpop.f32.mrb[111].mxu0 }
 0x622   : > { %5765 = vst [vmem:[%s7555_s26 + $0xf78] sm:$0xff] %v5599_v2 }
 0x626   : > { %v5603_v26 = vpop.f32.mrb[112].mxu0 }
 0x627   : > { %5766 = vst [vmem:[%s7555_s26 + $0xf80] sm:$0xff] %v5603_v26  ;;  %v5605_v53 = vpop.f32.mrb[113].mxu0 }
 0x628   : > { %5767 = vst [vmem:[%s7555_s26 + $0xf88] sm:$0xff] %v5605_v53  ;;  %v5607_v58 = vpop.f32.mrb[114].mxu0 }
 0x629   : > { %5768 = vst [vmem:[%s7555_s26 + $0xf90] sm:$0xff] %v5607_v58  ;;  %v5609_v3 = vpop.f32.mrb[115].mxu0 }
 0x62a   : > { %5769 = vst [vmem:[%s7555_s26 + $0xf98] sm:$0xff] %v5609_v3 }
 0x62e   : > { %v5613_v41 = vpop.f32.mrb[116].mxu0 }
 0x62f   : > { %5770 = vst [vmem:[%s7555_s26 + $0xfa0] sm:$0xff] %v5613_v41  ;;  %v5615_v25 = vpop.f32.mrb[117].mxu0 }
 0x630   : > { %5771 = vst [vmem:[%s7555_s26 + $0xfa8] sm:$0xff] %v5615_v25  ;;  %v5617_v19 = vpop.f32.mrb[118].mxu0 }
 0x631   : > { %5772 = vst [vmem:[%s7555_s26 + $0xfb0] sm:$0xff] %v5617_v19  ;;  %v5619_v63 = vpop.f32.mrb[119].mxu0 }
 0x632   : > { %5773 = vst [vmem:[%s7555_s26 + $0xfb8] sm:$0xff] %v5619_v63 }
 0x636   : > { %v5623_v45 = vpop.f32.mrb[120].mxu0 }
 0x637   : > { %5774 = vst [vmem:[%s7555_s26 + $0xfc0] sm:$0xff] %v5623_v45  ;;  %v5625_v10 = vpop.f32.mrb[121].mxu0 }
 0x638   : > { %5775 = vst [vmem:[%s7555_s26 + $0xfc8] sm:$0xff] %v5625_v10  ;;  %v5627_v23 = vpop.f32.mrb[122].mxu0 }
 0x639   : > { %5776 = vst [vmem:[%s7555_s26 + $0xfd0] sm:$0xff] %v5627_v23  ;;  %v5629_v46 = vpop.f32.mrb[123].mxu0 }
 0x63a   : > { %5777 = vst [vmem:[%s7555_s26 + $0xfd8] sm:$0xff] %v5629_v46 }
 0x63b   : > { %7198 = shalt.err (!%p7195_p13)
}
 0x63c   : > { %s7199_s16 = scalar_lea.hbm %s8760_s11, 66560  ;;  %s7203_s14 = scalar_lea.hbm %s8814_s5, 133120 }
 0x63d   : > { %p7200_p9 = scmp.ne.s32.totalorder %s8760_s11, %s7199_s16  ;;  %p7204_p6 = scmp.lt.u32.totalorder %s8760_s11, %s8814_s5 }
 0x63e   : > { %p7205_p4 = scmp.lt.u32.totalorder %s7203_s14, %s7199_s16  ;;  %p7207_p10 = scmp.lt.u32.totalorder %s7199_s16, %s8760_s11 }
 0x63f   : > { %p7201_p0 = pnand %p7200_p9, %p7484_p3 }
 0x640   : > { %p7206_p8 = por %p7205_p4, %p7204_p6 }
 0x641   : > { %p7202_p11 = pneg %p7201_p0 }
 0x642   : > { %p7208_p5 = por %p7207_p10, %p7206_p8 }
 0x644   : > { %p7209_p7 = pnand %p7208_p5, %p7202_p11 }
 0x646   : > { %7212 = shalt.err (!%p7209_p7)
}
 0x647   : > { %s7274_s28 = smov 256   ;;  %s7275_s27 = smov 16  }
 0x648   : > { %6725 = dma.vmem_to_hbm [thread:$0]  (%p7484_p3), %s8762_s6, 66560, %s8760_s11, %s5791_s22, %s7274_s28, %s7274_s28, %s7275_s27  }
 0x649 PF: > { %s5819_s17 = sand.u32 1, %s7247_s18   ;;  %p8834_p12 = scmp.ne.s32.totalorder %s8820_s25, 0 }
 0x64a   : > { %p8835_p1 = scmp.ge.s32.totalorder %s7259_s21, 2  ;;  %s5820_s15 = scalar_lea.sflag [#allocation4], %s5819_s17 }
 0x64c   : > { %p6745_p2 = pnand %p8835_p1, %p8834_p12 }
 0x64e   : > { %7242 = dma.done.wait (!%p6745_p2), %s5820_s15, 66560  }
 0x64f   : > { %7244 = vsyncadd (!%p6745_p2), %s5820_s15, 4294900736  ;;  %p20_p13 = scmp.ge.s32.totalorder %s7471_s29, 4   ;;  %s8836_s18 = smov %s7251_s19 }
 0x650   : > { %s8837_s19 = smov %s7255_s20  ;;  %s8838_s20 = smov %s7480_s8 }
 0x651   : > { %s8839_s21 = smov %s7471_s29  ;;  %22 = sbr.rel (!%p20_p13) target bundleno = 7 (0x7), region = 104 }
 0x658   :  { %5825 = vsyncpa [#allocation3], 1 }
 0x659   :  { %5827 = vsyncpa [#allocation3 + $0x1], 1 }
 0x65a   :  { %5828 = vsyncpa [#allocation6], 1 }
 0x65b   :  { %5829 = vsyncpa [#allocation9], 1 }
 0x65c   :  { %5830 = vsyncpa [#allocation4], 1 }
 0x65d   :  { %5832 = vsyncpa [#allocation4 + $0x1], 1 }

// kernel: tpu_custom_call.1
= control target key start
LH: loop header
LB: loop body
LE: loop exit
PB: predicated region body
PF: predicated region fallthrough
CT: control target
= control target key end

     0   :  { %10 = vsyncpa [#allocation3], 0  ;;  %s8809_s0 = inlined_call_operand.hbm [shape: f32[2,32,256], index: 0, kind: input, shape index: {}]   ;;  %s8810_s1 = inlined_call_operand.hbm [shape: bf16[256,128], index: 1, kind: input, shape index: {}]   ;;  %s8811_s2 = inlined_call_operand.hbm [shape: bf16[2048,32], index: 2, kind: input, shape index: {}]   ;;  %s8812_s3 = inlined_call_operand.hbm [shape: f32[2048,128], index: 3, kind: input, shape index: {}]   ;;  %s8813_s4 = inlined_call_operand.hbm [shape: bf16[4,128,256], index: 4, kind: input, shape index: {}]   ;;  %s8814_s5 = inlined_call_operand.hbm [shape: f32[2,2080,256], index: 5, kind: output, shape index: {}]  }
   0x1   :  { %12 = vsyncpa [#allocation3 + $0x1], 0 }
   0x2   :  { %13 = vsyncpa [#allocation6], 0 }
   0x3   :  { %14 = vsyncpa [#allocation9], 0 }
   0x4   :  { %15 = vsyncpa [#allocation4], 0 }
   0x5   :  { %17 = vsyncpa [#allocation4 + $0x1], 0  ;;  %s7306_s18 = smov 0   ;;  %s7308_s19 = smov 0  }
   0x6   :  { %s7310_s20 = smov 0   ;;  %s7312_s21 = smov 0  }
   0x7 LB: > { %s7327_s22 = sadd.s32 4294967295, %s7259_s21   ;;  %s5915_s23 = sadd.s32 4294967294, %s7259_s21   ;;  %s7259_s21 = sphi %s7312_s21, %s8839_s21   ;;  %s7255_s20 = sphi %s7310_s20, %s8838_s20   ;;  %s7251_s19 = sphi %s7308_s19, %s8837_s19   ;;  %s7247_s18 = sphi %s7306_s18, %s8836_s18  }
   0x8   : > { %p43_p0 = scmp.ne.s32.totalorder %s7251_s19, %s7247_s18  ;;  %p8815_p1 = scmp.eq.s32.totalorder %s7327_s22, 0 }
   0x9   : > { %p157_p3 = scmp.eq.s32.totalorder %s5915_s23, 1  ;;  %p5916_p5 = scmp.ge.s32.totalorder %s7259_s21, 1 }
   0xa   : > { %p7336_p4 = por %p8815_p1, %p43_p0  ;;  %p164_p7 = scmp.lt.s32.totalorder %s7259_s21, 3 }
   0xb   : > { %p7341_p6 = por %p157_p3, %p43_p0  ;;  %s7261_s27 = smov [#allocation5]  }
   0xc   : > { %s8819_s24 = scalar_select %p7336_p4, 1, 0 }
   0xd   : > { %s8820_s25 = scalar_select %p7341_p6, 1, 0 }
   0xe   : > { %p7346_p8 = pnand %p5916_p5, %p164_p7  ;;  %s176_s28 = sshll.u32 %s7261_s27, 4  ;;  %s7350_s28 = int_to_ptr.vmem [resolvable:$true] %s176_s28 }
   0xf   : > { %s7262_s30 = smov [#allocation8]   ;;  %s7043_s9 = scalar_lea.hbm %s8810_s1, 2048 }
  0x10   : > { %s8821_s26 = scalar_select %p7346_p8, 1, 0 }
  0x11   : > { %p6727_p9 = pneg %p7346_p8  ;;  %s202_s6 = sshll.u32 %s7262_s30, 4  ;;  %s7361_s6 = int_to_ptr.vmem [resolvable:$true] %s202_s6 }
  0x12   : > { %p7044_p12 = scmp.ne.s32.totalorder %s8810_s1, %s7043_s9  ;;  %p7050_p5 = scmp.lt.u32.totalorder %s7043_s9, %s8810_s1 }
  0x13   : > { %p7357_p11 = pnand %p6727_p9, %p8815_p1 }
  0x15   : > { %p7371_p13 = pneg %p7357_p11 }
  0x17   : > { %p7046_p0 = pnand %p7371_p13, %p7044_p12 }
  0x19   : > { %p7047_p3 = pneg %p7046_p0 }
  0x1b   : > { %p7052_p7 = pnand %p7050_p5, %p7047_p3 }
  0x1d   : > { %7055 = shalt.err (!%p7052_p7)
}
  0x1e   : > { %s7056_s15 = scalar_lea.vmem %s7350_s28, 2048  ;;  %p7064_p2 = scmp.lt.s32.totalorder %s7350_s28, %s7350_s28 }
  0x1f   : > { %p7057_p9 = scmp.ne.s32.totalorder %s7350_s28, %s7056_s15  ;;  %p7065_p6 = scmp.lt.s32.totalorder %s7056_s15, %s7056_s15 }
  0x21   : > { %p7059_p10 = pnand %p7057_p9, %p7371_p13  ;;  %p7066_p12 = por %p7065_p6, %p7064_p2 }
  0x23   : > { %p7060_p1 = pneg %p7059_p10 }
  0x25   : > { %p7067_p0 = pnand %p7066_p12, %p7060_p1 }
  0x27   : > { %7070 = shalt.err (!%p7067_p0)
}
  0x28   : > { %s8816_s16 = smov 64   ;;  %s7264_s17 = smov 4  }
  0x29   : > { %6730 = dma.hbm_to_vmem [thread:$0]  (!%p7357_p11), %s8810_s1, 2048, %s7350_s28, [#allocation6], %s8816_s16, %s8816_s16, %s7264_s17  }
  0x2a   : > { %s7071_s8 = scalar_lea.hbm %s8812_s3, 32768 }
  0x2b   : > { %p7072_p1 = scmp.ne.s32.totalorder %s8812_s3, %s7071_s8  ;;  %p7078_p10 = scmp.lt.u32.totalorder %s7071_s8, %s8812_s3 }
  0x2d   : > { %p7074_p2 = pnand %p7072_p1, %p7371_p13 }
  0x2f   : > { %p7075_p6 = pneg %p7074_p2 }
  0x31   : > { %p7080_p3 = pnand %p7078_p10, %p7075_p6 }
  0x33   : > { %7083 = shalt.err (!%p7080_p3)
}
  0x34   : > { %s7084_s28 = scalar_lea.vmem %s7361_s6, 32768  ;;  %p7092_p12 = scmp.lt.s32.totalorder %s7361_s6, %s7361_s6 }
  0x35   : > { %p7085_p5 = scmp.ne.s32.totalorder %s7361_s6, %s7084_s28  ;;  %p7093_p0 = scmp.lt.s32.totalorder %s7084_s28, %s7084_s28 }
  0x37   : > { %p7087_p7 = pnand %p7085_p5, %p7371_p13  ;;  %p7094_p1 = por %p7093_p0, %p7092_p12 }
  0x39   : > { %p7088_p9 = pneg %p7087_p7 }
  0x3b   : > { %p7095_p2 = pnand %p7094_p1, %p7088_p9 }
  0x3d   : > { %7098 = shalt.err (!%p7095_p2)
}
  0x3e   : > { %s7265_s14 = smov 128   ;;  %s7266_s15 = smov 8  }
  0x3f   : > { %6736 = dma.hbm_to_vmem [thread:$0]  (!%p7357_p11), %s8812_s3, 32768, %s7361_s6, [#allocation9], %s7265_s14, %s7265_s14, %s7266_s15  }
  0x40   : > { %s7267_s30 = smov [#allocation7]   ;;  %s7268_s8 = smov [#allocation10]  }
  0x41   : > { %s189_s7 = sshll.u32 %s7267_s30, 4  ;;  %s215_s9 = sshll.u32 %s7268_s8, 4  ;;  %s190_s7 = int_to_ptr.vmem [resolvable:$true] %s189_s7  ;;  %s7421_s9 = int_to_ptr.vmem [resolvable:$true] %s215_s9 }
  0x42   : > { %s7099_s13 = scalar_lea.hbm %s8811_s2, 16384 }
  0x43   : > { %p7100_p6 = scmp.ne.s32.totalorder %s8811_s2, %s7099_s13  ;;  %p7106_p5 = scmp.lt.u32.totalorder %s7099_s13, %s8811_s2 }
  0x45   : > { %p7102_p10 = pnand %p7100_p6, %p7371_p13 }
  0x47   : > { %p7103_p3 = pneg %p7102_p10 }
  0x49   : > { %p7108_p7 = pnand %p7106_p5, %p7103_p3 }
  0x4b   : > { %7111 = shalt.err (!%p7108_p7)
}
  0x4c   : > { %s7112_s27 = scalar_lea.vmem %s190_s7, 16384  ;;  %p7120_p1 = scmp.lt.s32.totalorder %s190_s7, %s190_s7 }
  0x4d   : > { %p7113_p9 = scmp.ne.s32.totalorder %s190_s7, %s7112_s27  ;;  %p7121_p2 = scmp.lt.s32.totalorder %s7112_s27, %s7112_s27 }
  0x4f   : > { %p7115_p12 = pnand %p7113_p9, %p7371_p13  ;;  %p7122_p4 = por %p7121_p2, %p7120_p1 }
  0x51   : > { %p7116_p0 = pneg %p7115_p12 }
  0x53   : > { %p7123_p8 = pnand %p7122_p4, %p7116_p0 }
  0x55   : > { %7126 = shalt.err (!%p7123_p8)
}
  0x56   : > { %s8824_s16 = smov 64   ;;  %s7127_s13 = scalar_lea.hbm %s8813_s4, 8192 }
  0x57   : > { %6733 = dma.hbm_to_vmem [thread:$0]  (!%p7357_p11), %s8811_s2, 16384, %s190_s7, [#allocation6], %s8824_s16, %s8824_s16, %s7264_s17  }
  0x58   : > { %p7128_p6 = scmp.ne.s32.totalorder %s8813_s4, %s7127_s13  ;;  %p7134_p10 = scmp.lt.u32.totalorder %s7127_s13, %s8813_s4 }
  0x5a   : > { %p7130_p4 = pnand %p7128_p6, %p7371_p13 }
  0x5c   : > { %p7131_p8 = pneg %p7130_p4 }
  0x5e   : > { %p7136_p3 = pnand %p7134_p10, %p7131_p8 }
  0x60   : > { %7139 = shalt.err (!%p7136_p3)
}
  0x61   : > { %s7140_s17 = scalar_lea.vmem %s7421_s9, 8192  ;;  %p7148_p12 = scmp.lt.s32.totalorder %s7421_s9, %s7421_s9 }
  0x62   : > { %p7141_p5 = scmp.ne.s32.totalorder %s7421_s9, %s7140_s17  ;;  %p7149_p0 = scmp.lt.s32.totalorder %s7140_s17, %s7140_s17 }
  0x64   : > { %p7143_p7 = pnand %p7141_p5, %p7371_p13  ;;  %p7150_p1 = por %p7149_p0, %p7148_p12 }
  0x66   : > { %p7144_p9 = pneg %p7143_p7 }
  0x68   : > { %p7151_p2 = pnand %p7150_p1, %p7144_p9 }
  0x6a   : > { %7154 = shalt.err (!%p7151_p2)
}
  0x6b   : > { %6739 = dma.hbm_to_vmem [thread:$0]  (!%p7357_p11), %s8813_s4, 8192, %s7421_s9, [#allocation9], %s7265_s14, %s7265_s14, %s7266_s15  }
  0x6c   : > { %s7471_s29 = sadd.s32 1, %s7259_s21   ;;  %s30_s30 = sadd.s32 1, %s7255_s20 }
  0x6d   : > { %s27_s12 = ssub.s32 %s7259_s21, %s7471_s29  ;;  %p37_p6 = scmp.ne.s32.totalorder %s7255_s20, %s7251_s19 }
  0x6e   : > { %p28_p13 = scmp.eq.s32.totalorder %s27_s12, 0  ;;  %p38_p4 = scmp.eq.s32.totalorder %s7259_s21, 0 }
  0x6f   : > { %p8825_p10 = scmp.eq.s32.totalorder %s7327_s22, 1  ;;  %p6752_p5 = scmp.lt.s32.totalorder %s7259_s21, 2 }
  0x70   : > { %s7480_s8 = scalar_select %p28_p13, %s7255_s20, %s30_s30  }
  0x71   : > { %p39_p8 = por %p38_p4, %p37_p6  ;;  %p7484_p3 = por %p8825_p10, %p37_p6 }
  0x72   : > { %s229_s11 = sand.u32 1, %s7255_s20   ;;  %s6270_s14 = sshll.u32 %s7259_s21, 10 }
  0x73   : > { %s5922_s13 = sshll.u32 %s229_s11, 6  ;;  %s7494_s28 = scalar_lea.hbm %s8809_s0, %s6270_s14 }
  0x74   : > { %s233_s23 = scalar_lea.vmem [#allocation2], %s5922_s13  ;;  %p7498_p11 = pnand %p6752_p5, %p39_p8 }
  0x75   : > { %s240_s6 = sshll.u32 %s233_s23, 4  ;;  %s7502_s17 = scalar_lea.sflag [#allocation3], %s229_s11  ;;  %s7496_s6 = int_to_ptr.vmem [resolvable:$true] %s240_s6 }
  0x76   : > { %s7155_s7 = scalar_lea.hbm %s7494_s28, 1024  ;;  %p7157_p9 = pneg %p7498_p11 }
  0x77   : > { %p7156_p7 = scmp.ne.s32.totalorder %s7494_s28, %s7155_s7  ;;  %s7160_s30 = scalar_lea.hbm %s8809_s0, 2048 }
  0x78   : > { %p7161_p1 = scmp.lt.u32.totalorder %s7494_s28, %s8809_s0  ;;  %p7162_p2 = scmp.lt.u32.totalorder %s7160_s30, %s7155_s7 }
  0x79   : > { %p7158_p12 = pnand %p7157_p9, %p7156_p7  ;;  %p7164_p6 = scmp.lt.u32.totalorder %s7155_s7, %s7494_s28 }
  0x7a   : > { %p7163_p13 = por %p7162_p2, %p7161_p1 }
  0x7b   : > { %p7159_p0 = pneg %p7158_p12 }
  0x7c   : > { %p7165_p4 = por %p7164_p6, %p7163_p13 }
  0x7e   : > { %p7166_p8 = pnand %p7165_p4, %p7159_p0 }
  0x80   : > { %7169 = shalt.err (!%p7166_p8)
}
  0x81   : > { %s7170_s11 = scalar_lea.vmem %s7496_s6, 1024  ;;  %s7269_s15 = smov [#allocation2]  }
  0x82   : > { %p7171_p10 = scmp.ne.s32.totalorder %s7496_s6, %s7170_s11  ;;  %s7175_s9 = sshll.u32 %s7269_s15, 4  ;;  %s7176_s9 = int_to_ptr.vmem [resolvable:$false] %s7175_s9 }
  0x83   : > { %s7177_s23 = scalar_lea.vmem %s7176_s9, 2048  ;;  %p7178_p12 = scmp.lt.s32.totalorder %s7496_s6, %s7176_s9 }
  0x84   : > { %p7173_p5 = pnand %p7171_p10, %p7157_p9  ;;  %p7179_p1 = scmp.lt.s32.totalorder %s7177_s23, %s7170_s11 }
  0x86   : > { %p7174_p7 = pneg %p7173_p5  ;;  %p7180_p2 = por %p7179_p1, %p7178_p12 }
  0x88   : > { %p7181_p13 = pnand %p7180_p2, %p7174_p7 }
  0x8a   : > { %7184 = shalt.err (!%p7181_p13)
}
  0x8b   : > { %s7270_s7 = smov 256   ;;  %s7271_s16 = smov 16  }
  0x8c   : > { %6743 = dma.hbm_to_vmem [thread:$0]  (!%p7498_p11), %s7494_s28, 1024, %s7496_s6, %s7502_s17, %s7270_s7, %s7270_s7, %s7271_s16  }
  0x8d   : > { %p8828_p9 = scmp.ne.s32.totalorder %s8821_s26, 0 }
  0x8e   : > { %s7533_s12 = sand.u32 (!%p8828_p9), 1, %s7251_s19   ;;  %p8829_p0 = scmp.ne.s32.totalorder (!%p8828_p9), %s8819_s24, 0 }
  0x8f   : > { %252 = sbr.rel (%p8828_p9) target bundleno = 1609 (0x649), region = 40  ;;  %s5926_s30 = sshll.u32 (!%p8828_p9), %s7533_s12, 6 }
  0x90   : > { %s255_s13 = scalar_lea.sflag (!%p8828_p9), [#allocation3], %s7533_s12  ;;  %s7537_s14 = scalar_lea.vmem (!%p8828_p9), [#allocation2], %s5926_s30 }
  0x96   : > { %7230 = dma.done.wait (%p8829_p0), %s255_s13, 1024  }
  0x97   : > { %7232 = vsyncadd (%p8829_p0), %s255_s13, 4294966272  ;;  %p8830_p11 = scmp.eq.s32.totalorder %s7327_s22, 0 }
  0x99   : > { %7234 = dma.done.wait (%p8830_p11), [#allocation6], 18432   ;;  %p8831_p6 = pmov %p8830_p11 }
  0x9b   : > { %7236 = vsyncadd (%p8831_p6), [#allocation6], 4294948864  ;;  %p8832_p4 = pmov %p8831_p6 }
  0x9d   : > { %7238 = dma.done.wait (%p8832_p4), [#allocation9], 40960   ;;  %p8833_p8 = pmov %p8832_p4 }
  0x9e   : > { %v6803_v0 = vld [vmem:[#allocation5 + $0x40] sm:$0xff]   ;;  %v6805_v2 = vld [vmem:[#allocation5 + $0x48] sm:$0xff]   ;;  %v6807_v4 = vld [vmem:[#allocation5 + $0x50] sm:$0xff]   ;;  %s6705_s24 = smul.u32 4160, %s7533_s12  ;;  %vm1653_vm0 = vcmask 261120   ;;  %s7273_s9 = smov [#allocation11]  }
  0x9f   : > { %7240 = vsyncadd (%p8833_p8), [#allocation9], 4294926336  ;;  %v6804_v1 = vld [vmem:[#allocation5] sm:$0xff]   ;;  %6271 = vmatprep.subr.bf16.mxu0 %v6803_v0  ;;  %v6806_v3 = vld [vmem:[#allocation5 + $0x8] sm:$0xff]   ;;  %s6706_s28 = smul.u32 66560, %s7327_s22  ;;  %s5791_s22 = scalar_lea.sflag [#allocation4], %s7533_s12 }
  0xa0   : > { %6272 = vmatpush3.bf16.msra.mxu0 %v6804_v1  ;;  %v6808_v5 = vld [vmem:[#allocation5 + $0x10] sm:$0xff]   ;;  %v6809_v6 = vld [vmem:[#allocation5 + $0x58] sm:$0xff]   ;;  %v6811_v8 = vld [vmem:[#allocation5 + $0x60] sm:$0xff]   ;;  %s7555_s26 = scalar_lea.vmem [#allocation11], %s6705_s24  ;;  %s7189_s23 = sshll.u32 %s7273_s9, 4  ;;  %s7190_s23 = int_to_ptr.vmem [resolvable:$false] %s7189_s23 }
  0xa1   : > { %6273 = vmatprep.subr.bf16.mxu0 %v6805_v2  ;;  %v6810_v7 = vld [vmem:[#allocation5 + $0x18] sm:$0xff]   ;;  %v6812_v9 = vld [vmem:[#allocation5 + $0x20] sm:$0xff]   ;;  %v6813_v10 = vld [vmem:[#allocation5 + $0x68] sm:$0xff]   ;;  %s5804_s6 = sshll.u32 %s7555_s26, 4  ;;  %s8760_s11 = scalar_lea.hbm %s8814_s5, %s6706_s28  ;;  %s8762_s6 = int_to_ptr.vmem [resolvable:$true] %s5804_s6 }
  0xa2   : > { %v303_v11 = vld [vmem:[%s7537_s14 + $0x8] sm:$0xff]  ;;  %v305_v12 = vld [vmem:[%s7537_s14 + $0x18] sm:$0xff]  ;;  %v302_v13 = vld [vmem:[%s7537_s14] sm:$0xff]  ;;  %s7185_s15 = scalar_lea.vmem %s8762_s6, 66560  ;;  %s7191_s7 = scalar_lea.vmem %s7190_s23, 133120 }
  0xa3   : > { %v6814_v14 = vld [vmem:[#allocation5 + $0x28] sm:$0xff]   ;;  %311 = vst [vmem:[%s7555_s26 + $0x8] sm:$0xff] %v303_v11  ;;  %313 = vst [vmem:[%s7555_s26 + $0x18] sm:$0xff] %v305_v12  ;;  %v319_v15 = vpack.c.bf16 %v305_v12, %v303_v11  ;;  %v304_v16 = vld [vmem:[%s7537_s14 + $0x10] sm:$0xff]  ;;  %p7186_p10 = scmp.ne.s32.totalorder %s8762_s6, %s7185_s15  ;;  %p7192_p12 = scmp.lt.s32.totalorder %s8762_s6, %s7190_s23 }
  0xa4   : > { %6274 = vmatpush3.bf16.msra.mxu0 %v6806_v3  ;;  %310 = vst [vmem:[%s7555_s26] sm:$0xff] %v302_v13  ;;  %v307_v17 = vld [vmem:[%s7537_s14 + $0x28] sm:$0xff]  ;;  %v309_v18 = vld [vmem:[%s7537_s14 + $0x38] sm:$0xff]  ;;  %v6815_v19 = vld [vmem:[#allocation5 + $0x70] sm:$0xff]   ;;  %v318_v25 = vpack.c.bf16 %v304_v16, %v302_v13  ;;  %p7193_p1 = scmp.lt.s32.totalorder %s7191_s7, %s7185_s15 }
  0xa5   : > { %6275 = vmatprep.subr.bf16.mxu0 %v6807_v4  ;;  %312 = vst [vmem:[%s7555_s26 + $0x10] sm:$0xff] %v304_v16  ;;  %315 = vst [vmem:[%s7555_s26 + $0x28] sm:$0xff] %v307_v17  ;;  %v306_v20 = vld [vmem:[%s7537_s14 + $0x20] sm:$0xff]  ;;  %v308_v21 = vld [vmem:[%s7537_s14 + $0x30] sm:$0xff]  ;;  %482 = vmatprep.mubr.bf16.mxu0 %v319_v15  ;;  %v321_v26 = vpack.c.bf16 %v309_v18, %v307_v17  ;;  %p7187_p5 = pnand %p7186_p10, %p7484_p3 }
  0xa6   : > { %317 = vst [vmem:[%s7555_s26 + $0x38] sm:$0xff] %v309_v18  ;;  %314 = vst [vmem:[%s7555_s26 + $0x20] sm:$0xff] %v306_v20  ;;  %v6816_v22 = vld [vmem:[#allocation5 + $0x30] sm:$0xff]   ;;  %v6817_v23 = vld [vmem:[#allocation5 + $0x78] sm:$0xff]   ;;  %v320_v27 = vpack.c.bf16 %v308_v21, %v306_v20  ;;  %p7194_p2 = por %p7193_p1, %p7192_p12 }
  0xa7   : > { %316 = vst [vmem:[%s7555_s26 + $0x30] sm:$0xff] %v308_v21  ;;  %v6818_v24 = vld [vmem:[#allocation5 + $0x38] sm:$0xff]   ;;  %v6819_v28 = vld [vmem:[#allocation7] sm:$0xff]   ;;  %v6820_v43 = vld [vmem:[#allocation7 + $0x8] sm:$0xff]   ;;  %p7188_p7 = pneg %p7187_p5 }
  0xa8   : > { %6276 = vmatpush3.bf16.msra.mxu0 %v6808_v5  ;;  %6433 = vmatprep.mubr.msk.bf16.mxu1 %vm1653_vm0, %v6819_v28  ;;  %v6821_v44 = vld [vmem:[#allocation7 + $0x10] sm:$0xff]   ;;  %v6822_v45 = vld [vmem:[#allocation7 + $0x18] sm:$0xff]   ;;  %v6823_v46 = vld [vmem:[#allocation7 + $0x20] sm:$0xff]  }
  0xa9   : > { %6277 = vmatprep.subr.bf16.mxu0 %v6809_v6  ;;  %v6824_v47 = vld [vmem:[#allocation7 + $0x28] sm:$0xff]   ;;  %v6825_v48 = vld [vmem:[#allocation7 + $0x30] sm:$0xff]   ;;  %v6826_v49 = vld [vmem:[#allocation7 + $0x38] sm:$0xff]   ;;  %p7195_p13 = pnand %p7194_p2, %p7188_p7 }
  0xaa   : > { %v6827_v50 = vld [vmem:[#allocation7 + $0x40] sm:$0xff]   ;;  %v6828_v51 = vld [vmem:[#allocation7 + $0x48] sm:$0xff]   ;;  %v6829_v52 = vld [vmem:[#allocation7 + $0x50] sm:$0xff]  }
  0xab   : > { %v6830_v53 = vld [vmem:[#allocation7 + $0x58] sm:$0xff]   ;;  %v6831_v54 = vld [vmem:[#allocation7 + $0x60] sm:$0xff]   ;;  %v6832_v57 = vld [vmem:[#allocation7 + $0x68] sm:$0xff]  }
  0xac   : > { %6278 = vmatpush3.bf16.msra.mxu0 %v6810_v7  ;;  %v6863_v55 = vld [vmem:[#allocation10 + $0x100] ss:$8 sps:$4 sm:$0xff]   ;;  %v6865_v56 = vld [vmem:[#allocation10 + $0x104] ss:$8 sps:$4 sm:$0xff]   ;;  %v6833_v58 = vld [vmem:[#allocation7 + $0x70] sm:$0xff]  }
  0xad   : > { %6279 = vmatprep.subr.bf16.mxu0 %v6811_v8  ;;  %v6834_v59 = vld [vmem:[#allocation7 + $0x78] sm:$0xff]   ;;  %v6835_v60 = vld [vmem:[#allocation7 + $0x80] sm:$0xff]   ;;  %v6836_v63 = vld [vmem:[#allocation7 + $0x88] sm:$0xff]  }
  0xae   : > { %v6870_v61 = vld [vmem:[#allocation10] ss:$8 sps:$4 sm:$0xff]   ;;  %v6872_v62 = vld [vmem:[#allocation10 + $0x4] ss:$8 sps:$4 sm:$0xff]   ;;  %v6837_v0 = vld [vmem:[#allocation7 + $0x90] sm:$0xff]  }
  0xaf   : > { %v6877_v1 = vld [vmem:[#allocation10 + $0x14] ss:$8 sps:$4 sm:$0xff]   ;;  %v6875_v2 = vld [vmem:[#allocation10 + $0x10] ss:$8 sps:$4 sm:$0xff]   ;;  %v6880_v3 = vld [vmem:[#allocation10 + $0x24] ss:$8 sps:$4 sm:$0xff]  }
  0xb0   : > { %6280 = vmatpush3.bf16.msra.mxu0 %v6812_v9  ;;  %v6878_v4 = vld [vmem:[#allocation10 + $0x20] ss:$8 sps:$4 sm:$0xff]   ;;  %v6838_v5 = vld [vmem:[#allocation7 + $0x98] sm:$0xff]   ;;  %v6888_v9 = vld [vmem:[#allocation10 + $0x44] ss:$8 sps:$4 sm:$0xff]  }
  0xb1   : > { %6281 = vmatprep.subr.bf16.mxu0 %v6813_v10  ;;  %v6839_v6 = vld [vmem:[#allocation7 + $0xa0] sm:$0xff]   ;;  %v6885_v7 = vld [vmem:[#allocation10 + $0x34] ss:$8 sps:$4 sm:$0xff]   ;;  %v6883_v8 = vld [vmem:[#allocation10 + $0x30] ss:$8 sps:$4 sm:$0xff]  }
  0xb2   : > { %v6886_v10 = vld [vmem:[#allocation10 + $0x40] ss:$8 sps:$4 sm:$0xff]   ;;  %v6841_v12 = vld [vmem:[#allocation7 + $0xb0] sm:$0xff]   ;;  %v6896_v15 = vld [vmem:[#allocation10 + $0x64] ss:$8 sps:$4 sm:$0xff]  }
  0xb3   : > { %v6840_v11 = vld [vmem:[#allocation7 + $0xa8] sm:$0xff]   ;;  %v6893_v13 = vld [vmem:[#allocation10 + $0x54] ss:$8 sps:$4 sm:$0xff]   ;;  %v6843_v18 = vld [vmem:[#allocation7 + $0xc0] sm:$0xff]  }
  0xb4   : > { %6282 = vmatpush3.bf16.msra.mxu0 %v6814_v14  ;;  %v6891_v14 = vld [vmem:[#allocation10 + $0x50] ss:$8 sps:$4 sm:$0xff]   ;;  %v6894_v17 = vld [vmem:[#allocation10 + $0x60] ss:$8 sps:$4 sm:$0xff]   ;;  %v6904_v21 = vld [vmem:[#allocation10 + $0x84] ss:$8 sps:$4 sm:$0xff]  }
  0xb5   : > { %6283 = vmatprep.subr.bf16.mxu0 %v6815_v19  ;;  %v6842_v16 = vld [vmem:[#allocation7 + $0xb8] sm:$0xff]  }
  0xb6   : > { %v6901_v19 = vld [vmem:[#allocation10 + $0x74] ss:$8 sps:$4 sm:$0xff]   ;;  %v6899_v20 = vld [vmem:[#allocation10 + $0x70] ss:$8 sps:$4 sm:$0xff]  }
  0xb7   : > { %v6911_v28 = vld [vmem:[#allocation10 + $0x114] ss:$8 sps:$4 sm:$0xff]  }
  0xb8   : > { %6284 = vmatpush3.bf16.msra.mxu0 %v6816_v22  ;;  %v6844_v22 = vld [vmem:[#allocation7 + $0xc8] sm:$0xff]  }
  0xb9   : > { %6285 = vmatprep.subr.bf16.mxu0 %v6817_v23  ;;  %v7272_v23 = vmov 0  }
  0xbc   : > { %6286 = vmatpush3.bf16.msra.mxu0 %v6818_v24  ;;  %v6845_v24 = vld [vmem:[#allocation7 + $0xd0] sm:$0xff]  }
  0xbd   : > { %3575 = vmatprep.subr.bf16.mxu0 %v6872_v62 }
  0xbf   : > { %483 = vmatmul.mubr.bf16.vlgmr.msra.gmra.mrb[0].mxu0 %v318_v25  ;;  %v6846_v25 = vld [vmem:[#allocation7 + $0xd8] sm:$0xff]  }
  0xc0   : > { %490 = vmatprep.mubr.bf16.mxu0 %v321_v26  ;;  %3576 = vmatpush1.bf16.msra.mxu0 %v6870_v61  ;;  %v6847_v26 = vld [vmem:[#allocation7 + $0xe0] sm:$0xff]  }
  0xc1   : > { %3577 = vmatprep.subr.bf16.mxu0 %v6877_v1 }
  0xc4   : > { %3578 = vmatpush1.bf16.msra.mxu0 %v6875_v2 }
  0xc5   : > { %3579 = vmatprep.subr.bf16.mxu0 %v6880_v3  ;;  %v6905_v3 = vld [vmem:[#allocation7 + $0x1c0] sm:$0xff]  }
  0xc7   : > { %491 = vmatmul.mubr.bf16.gmra.mrb[4].mxu0 %v320_v27  ;;  %v6909_v27 = vld [vmem:[#allocation10 + $0x110] ss:$8 sps:$4 sm:$0xff]  }
  0xc8   : > { %3580 = vmatpush1.bf16.msra.mxu0 %v6878_v4  ;;  %3607 = vmatprep.mubr.bf16.mxu0 %v7272_v23 }
  0xc9   : > { %3581 = vmatprep.subr.bf16.mxu0 %v6885_v7 }
  0xcc   : > { %3582 = vmatpush1.bf16.msra.mxu0 %v6883_v8 }
  0xcd   : > { %3583 = vmatprep.subr.bf16.mxu0 %v6888_v9 }
  0xd0   : > { %3584 = vmatpush1.bf16.msra.mxu0 %v6886_v10 }
  0xd1   : > { %3585 = vmatprep.subr.bf16.mxu0 %v6893_v13  ;;  %v761_v13 = vld [vmem:[#allocation8 + $0x20] sm:$0xff] }
  0xd4   : > { %3586 = vmatpush1.bf16.msra.mxu0 %v6891_v14 }
  0xd5   : > { %3587 = vmatprep.subr.bf16.mxu0 %v6896_v15 }
  0xd8   : > { %3588 = vmatpush1.bf16.msra.mxu0 %v6894_v17  ;;  %v764_v17 = vld [vmem:[#allocation8 + $0x38] sm:$0xff] }
  0xd9   : > { %3589 = vmatprep.subr.bf16.mxu0 %v6901_v19 }
  0xdc   : > { %3590 = vmatpush1.bf16.msra.mxu0 %v6899_v20  ;;  %v6906_v20 = vld [vmem:[#allocation7 + $0x1c8] sm:$0xff]  }
  0xdd   : > { %4153 = vmatprep.subr.bf16.mxu0 %v6904_v21 }
 0x192   : > { %v6287_v29 = vpop.f32.mrb[0].mxu0 }
 0x193   : > { %v6288_v30 = vpop.f32.mrb[1].mxu0 }
 0x194   : > { %v6290_v31 = vpop.f32.mrb[2].mxu0  ;;  %v6289_v32 = vadd.f32 %v6288_v30, %v6287_v29  ;;  %v6848_v29 = vld [vmem:[#allocation7 + $0xe8] sm:$0xff]   ;;  %v6849_v30 = vld [vmem:[#allocation7 + $0xf0] sm:$0xff]  }
 0x195   : > { %v6291_v33 = vpop.f32.mrb[3].mxu0 }
 0x196   : > { %v6292_v34 = vadd.f32 %v6291_v33, %v6290_v31  ;;  %v6850_v31 = vld [vmem:[#allocation7 + $0xf8] sm:$0xff]   ;;  %v6852_v33 = vld [vmem:[#allocation7 + $0x108] sm:$0xff]  }
 0x198   : > { %v755_v35 = vpack.c.bf16 %v6292_v34, %v6289_v32  ;;  %v6851_v32 = vld [vmem:[#allocation7 + $0x100] sm:$0xff]   ;;  %v6853_v34 = vld [vmem:[#allocation7 + $0x110] sm:$0xff]  }
 0x19a   : > { %v6293_v36 = vpop.f32.mrb[4].mxu0  ;;  %6429 = vmatprep.subr.bf16.mxu1 %v755_v35 }
 0x19b   : > { %v6294_v37 = vpop.f32.mrb[5].mxu0  ;;  %6430 = vmatpush3.bf16.msra.mxu1 %v755_v35  ;;  %v6854_v35 = vld [vmem:[#allocation7 + $0x118] sm:$0xff]  }
 0x19c   : > { %v6295_v38 = vadd.f32 %v6294_v37, %v6293_v36  ;;  %v6296_v39 = vpop.f32.mrb[6].mxu0  ;;  %v6855_v36 = vld [vmem:[#allocation7 + $0x120] sm:$0xff]   ;;  %v6856_v37 = vld [vmem:[#allocation7 + $0x128] sm:$0xff]  }
 0x19d   : > { %v6297_v40 = vpop.f32.mrb[7].mxu0 }
 0x19e   : > { %v6298_v41 = vadd.f32 %v6297_v40, %v6296_v39  ;;  %v6858_v39 = vld [vmem:[#allocation7 + $0x138] sm:$0xff]   ;;  %v6859_v40 = vld [vmem:[#allocation7 + $0x140] sm:$0xff]  }
 0x1a0   : > { %v756_v42 = vpack.c.bf16 %v6298_v41, %v6295_v38  ;;  %v6857_v38 = vld [vmem:[#allocation7 + $0x130] sm:$0xff]   ;;  %v6860_v41 = vld [vmem:[#allocation7 + $0x148] sm:$0xff]  }
 0x1a2   : > { %6431 = vmatprep.subr.bf16.mxu1 %v756_v42 }
 0x1a3   : > { %6432 = vmatpush3.bf16.msra.mxu1 %v756_v42  ;;  %v6861_v42 = vld [vmem:[#allocation7 + $0x150] sm:$0xff]  }
 0x1a4   : > { %4731 = vmatprep.subr.bf16.mxu1 %v6865_v56  ;;  %v6897_v56 = vld [vmem:[#allocation7 + $0x1b0] sm:$0xff]  }
 0x1a6   : > { %6434 = vmatmul.mubr.msk.bf16.vlgmr.msra.gmra.mrb[0].mxu1 %vm1653_vm0, %v6820_v43  ;;  %v6862_v43 = vld [vmem:[#allocation7 + $0x158] sm:$0xff]  }
 0x1a7   : > { %6437 = vmatprep.mubr.msk.bf16.mxu1 %vm1653_vm0, %v6821_v44  ;;  %4732 = vmatpush1.bf16.msra.mxu1 %v6863_v55  ;;  %v6866_v44 = vld [vmem:[#allocation7 + $0x160] sm:$0xff]   ;;  %v6890_v55 = vld [vmem:[#allocation7 + $0x1a8] sm:$0xff]  }
 0x1a8   : > { %4733 = vmatprep.subr.bf16.mxu1 %v6911_v28 }
 0x1ab   : > { %4734 = vmatpush1.bf16.msra.mxu1 %v6909_v27 }
 0x1ae   : > { %6438 = vmatmul.mubr.msk.bf16.gmra.mrb[4].mxu1 %vm1653_vm0, %v6822_v45  ;;  %v6934_v45 = vld [vmem:[#allocation10 + $0x120] ss:$8 sps:$4 sm:$0xff]  }
 0x1af   : > { %6441 = vmatprep.mubr.msk.bf16.mxu1 %vm1653_vm0, %v6823_v46  ;;  %v6936_v46 = vld [vmem:[#allocation10 + $0x124] ss:$8 sps:$4 sm:$0xff]  }
 0x1b0   : > { %4735 = vmatprep.subr.bf16.mxu1 %v6936_v46 }
 0x1b1   : > { %4736 = vmatpush1.bf16.msra.mxu1 %v6934_v45 }
 0x1b6   : > { %6442 = vmatmul.mubr.msk.bf16.gmra.mrb[8].mxu1 %vm1653_vm0, %v6824_v47  ;;  %v6867_v47 = vld [vmem:[#allocation7 + $0x168] sm:$0xff]  }
 0x1b7   : > { %6445 = vmatprep.mubr.msk.bf16.mxu1 %vm1653_vm0, %v6825_v48  ;;  %v6868_v48 = vld [vmem:[#allocation7 + $0x170] sm:$0xff]  }
 0x1be   : > { %6446 = vmatmul.mubr.msk.bf16.gmra.mrb[12].mxu1 %vm1653_vm0, %v6826_v49  ;;  %v6869_v49 = vld [vmem:[#allocation7 + $0x178] sm:$0xff]  }
 0x1bf   : > { %6449 = vmatprep.mubr.msk.bf16.mxu1 %vm1653_vm0, %v6827_v50  ;;  %v6873_v50 = vld [vmem:[#allocation7 + $0x180] sm:$0xff]  }
 0x1c6   : > { %6450 = vmatmul.mubr.msk.bf16.gmra.mrb[16].mxu1 %vm1653_vm0, %v6828_v51  ;;  %v6874_v51 = vld [vmem:[#allocation7 + $0x188] sm:$0xff]  }
 0x1c7   : > { %6453 = vmatprep.mubr.msk.bf16.mxu1 %vm1653_vm0, %v6829_v52  ;;  %v6881_v52 = vld [vmem:[#allocation7 + $0x190] sm:$0xff]  }
 0x1ce   : > { %6454 = vmatmul.mubr.msk.bf16.gmra.mrb[20].mxu1 %vm1653_vm0, %v6830_v53  ;;  %v6882_v53 = vld [vmem:[#allocation7 + $0x198] sm:$0xff]  }
 0x1cf   : > { %6457 = vmatprep.mubr.msk.bf16.mxu1 %vm1653_vm0, %v6831_v54  ;;  %v6889_v54 = vld [vmem:[#allocation7 + $0x1a0] sm:$0xff]  }
 0x1d6   : > { %6458 = vmatmul.mubr.msk.bf16.gmra.mrb[24].mxu1 %vm1653_vm0, %v6832_v57  ;;  %v759_v57 = vld [vmem:[#allocation8 + $0x10] sm:$0xff] }
 0x1d7   : > { %6461 = vmatprep.mubr.msk.bf16.mxu1 %vm1653_vm0, %v6833_v58  ;;  %v757_v58 = vld [vmem:[#allocation8] sm:$0xff] }
 0x1de   : > { %6462 = vmatmul.mubr.msk.bf16.gmra.mrb[28].mxu1 %vm1653_vm0, %v6834_v59 }
 0x1df   : > { %6465 = vmatprep.mubr.msk.bf16.mxu1 %vm1653_vm0, %v6835_v60  ;;  %v760_v60 = vld [vmem:[#allocation8 + $0x18] sm:$0xff] }
 0x1e6   : > { %6466 = vmatmul.mubr.msk.bf16.gmra.mrb[32].mxu1 %vm1653_vm0, %v6836_v63  ;;  %v758_v63 = vld [vmem:[#allocation8 + $0x8] sm:$0xff] }
 0x1e7   : > { %6469 = vmatprep.mubr.msk.bf16.mxu1 %vm1653_vm0, %v6837_v0  ;;  %v6898_v0 = vld [vmem:[#allocation7 + $0x1b8] sm:$0xff]  }
 0x1ee   : > { %6470 = vmatmul.mubr.msk.bf16.gmra.mrb[36].mxu1 %vm1653_vm0, %v6838_v5 }
 0x1ef   : > { %6473 = vmatprep.mubr.msk.bf16.mxu1 %vm1653_vm0, %v6839_v6 }
 0x1f6   : > { %6474 = vmatmul.mubr.msk.bf16.gmra.mrb[40].mxu1 %vm1653_vm0, %v6840_v11  ;;  %v763_v11 = vld [vmem:[#allocation8 + $0x30] sm:$0xff] }
 0x1f7   : > { %6477 = vmatprep.mubr.msk.bf16.mxu1 %vm1653_vm0, %v6841_v12  ;;  %v6902_v12 = vld [vmem:[#allocation10 + $0x80] ss:$8 sps:$4 sm:$0xff]  }
 0x1fe   : > { %6478 = vmatmul.mubr.msk.bf16.gmra.mrb[44].mxu1 %vm1653_vm0, %v6842_v16 }
 0x1ff   : > { %6481 = vmatprep.mubr.msk.bf16.mxu1 %vm1653_vm0, %v6843_v18  ;;  %v6918_v18 = vld [vmem:[#allocation10 + $0x94] ss:$8 sps:$4 sm:$0xff]  }
 0x206   : > { %6482 = vmatmul.mubr.msk.bf16.gmra.mrb[48].mxu1 %vm1653_vm0, %v6844_v22  ;;  %v762_v22 = vld [vmem:[#allocation8 + $0x28] sm:$0xff] }
 0x207   : > { %6485 = vmatprep.mubr.msk.bf16.mxu1 %vm1653_vm0, %v6845_v24 }
 0x20e   : > { %6486 = vmatmul.mubr.msk.bf16.gmra.mrb[52].mxu1 %vm1653_vm0, %v6846_v25 }
 0x20f   : > { %6489 = vmatprep.mubr.msk.bf16.mxu1 %vm1653_vm0, %v6847_v26  ;;  %v6907_v26 = vld [vmem:[#allocation7 + $0x1d0] sm:$0xff]  }
 0x216   : > { %6490 = vmatmul.mubr.msk.bf16.gmra.mrb[56].mxu1 %vm1653_vm0, %v6848_v29 }
 0x217   : > { %6493 = vmatprep.mubr.msk.bf16.mxu1 %vm1653_vm0, %v6849_v30  ;;  %v6916_v30 = vld [vmem:[#allocation10 + $0x90] ss:$8 sps:$4 sm:$0xff]  }
 0x21e   : > { %6494 = vmatmul.mubr.msk.bf16.gmra.mrb[60].mxu1 %vm1653_vm0, %v6850_v31 }
 0x21f   : > { %6497 = vmatprep.mubr.msk.bf16.mxu1 %vm1653_vm0, %v6851_v32 }
 0x226   : > { %6498 = vmatmul.mubr.msk.bf16.gmra.mrb[64].mxu1 %vm1653_vm0, %v6852_v33  ;;  %v6929_v33 = vld [vmem:[#allocation10 + $0xa4] ss:$8 sps:$4 sm:$0xff]  }
 0x227   : > { %6501 = vmatprep.mubr.msk.bf16.mxu1 %vm1653_vm0, %v6853_v34 }
 0x22e   : > { %6502 = vmatmul.mubr.msk.bf16.gmra.mrb[68].mxu1 %vm1653_vm0, %v6854_v35 }
 0x22f   : > { %6505 = vmatprep.mubr.msk.bf16.mxu1 %vm1653_vm0, %v6855_v36  ;;  %v767_v36 = vld [vmem:[#allocation8 + $0x50] sm:$0xff] }
 0x236   : > { %6506 = vmatmul.mubr.msk.bf16.gmra.mrb[72].mxu1 %vm1653_vm0, %v6856_v37  ;;  %v765_v37 = vld [vmem:[#allocation8 + $0x40] sm:$0xff] }
 0x237   : > { %6509 = vmatprep.mubr.msk.bf16.mxu1 %vm1653_vm0, %v6857_v38 }
 0x23e   : > { %6510 = vmatmul.mubr.msk.bf16.gmra.mrb[76].mxu1 %vm1653_vm0, %v6858_v39  ;;  %v6927_v39 = vld [vmem:[#allocation10 + $0xa0] ss:$8 sps:$4 sm:$0xff]  }
 0x23f   : > { %6513 = vmatprep.mubr.msk.bf16.mxu1 %vm1653_vm0, %v6859_v40 }
 0x246   : > { %6514 = vmatmul.mubr.msk.bf16.gmra.mrb[80].mxu1 %vm1653_vm0, %v6860_v41 }
 0x247   : > { %6517 = vmatprep.mubr.msk.bf16.mxu1 %vm1653_vm0, %v6861_v42  ;;  %v768_v42 = vld [vmem:[#allocation8 + $0x58] sm:$0xff] }
 0x24e   : > { %6518 = vmatmul.mubr.msk.bf16.gmra.mrb[84].mxu1 %vm1653_vm0, %v6862_v43  ;;  %v6943_v43 = vld [vmem:[#allocation10 + $0xb4] ss:$8 sps:$4 sm:$0xff]  }
 0x24f   : > { %6521 = vmatprep.mubr.msk.bf16.mxu1 %vm1653_vm0, %v6866_v44  ;;  %v6908_v44 = vld [vmem:[#allocation7 + $0x1d8] sm:$0xff]  }
 0x256   : > { %6522 = vmatmul.mubr.msk.bf16.gmra.mrb[88].mxu1 %vm1653_vm0, %v6867_v47  ;;  %v766_v47 = vld [vmem:[#allocation8 + $0x48] sm:$0xff] }
 0x257   : > { %6525 = vmatprep.mubr.msk.bf16.mxu1 %vm1653_vm0, %v6868_v48  ;;  %v6912_v48 = vld [vmem:[#allocation7 + $0x1e0] sm:$0xff]  }
 0x25e   : > { %6526 = vmatmul.mubr.msk.bf16.gmra.mrb[92].mxu1 %vm1653_vm0, %v6869_v49 }
 0x25f   : > { %6529 = vmatprep.mubr.msk.bf16.mxu1 %vm1653_vm0, %v6873_v50 }
 0x266   : > { %6530 = vmatmul.mubr.msk.bf16.gmra.mrb[96].mxu1 %vm1653_vm0, %v6874_v51 }
 0x267   : > { %6533 = vmatprep.mubr.msk.bf16.mxu1 %vm1653_vm0, %v6881_v52 }
 0x26e   : > { %6534 = vmatmul.mubr.msk.bf16.gmra.mrb[100].mxu1 %vm1653_vm0, %v6882_v53 }
 0x26f   : > { %6537 = vmatprep.mubr.msk.bf16.mxu1 %vm1653_vm0, %v6889_v54  ;;  %v6941_v54 = vld [vmem:[#allocation10 + $0xb0] ss:$8 sps:$4 sm:$0xff]  }
 0x276   : > { %6538 = vmatmul.mubr.msk.bf16.gmra.mrb[104].mxu1 %vm1653_vm0, %v6890_v55 }
 0x277   : > { %6541 = vmatprep.mubr.msk.bf16.mxu1 %vm1653_vm0, %v6897_v56 }
 0x279   : > { %v6435_v59 = vpop.f32.mrb[0].mxu1 }
 0x27a   : > { %v2081_v61 = vadd.f32 %v6435_v59, %v759_v57  ;;  %v2072_v62 = vpop.f32.mrb[1].mxu1  ;;  %v6954_v57 = vld [vmem:[#allocation10 + $0xc4] ss:$8 sps:$4 sm:$0xff]   ;;  %v6959_v59 = vld [vmem:[#allocation10 + $0x130] ss:$8 sps:$4 sm:$0xff]  }
 0x27b   : > { %v2073_v1 = vadd.f32 %v2072_v62, %v757_v58  ;;  %v6436_v2 = vpop.f32.mrb[2].mxu1  ;;  %v771_v62 = vld [vmem:[#allocation8 + $0x70] sm:$0xff] }
 0x27c   : > { %v2084_v4 = vadd.f32 %v6436_v2, %v760_v60  ;;  %v2075_v5 = vpop.f32.mrb[3].mxu1  ;;  %v3097_v7 = vmax.f32 %v2081_v61, 0.0  ;;  %v6961_v60 = vld [vmem:[#allocation10 + $0x134] ss:$8 sps:$4 sm:$0xff]  }
 0x27d   : > { %v2076_v6 = vadd.f32 %v2075_v5, %v758_v63  ;;  %v3095_v9 = vmax.f32 %v2073_v1, 0.0  ;;  %v769_v63 = vld [vmem:[#allocation8 + $0x60] sm:$0xff]  ;;  %4737 = vmatprep.subr.bf16.mxu1 %v6961_v60  ;;  %v6913_v5 = vld [vmem:[#allocation7 + $0x1e8] sm:$0xff]  }
 0x27e   : > { %v3098_v8 = vmax.f32 %v2084_v4, 0.0  ;;  %6542 = vmatmul.mubr.msk.bf16.gmra.mrb[108].mxu1 %vm1653_vm0, %v6898_v0  ;;  %v6952_v1 = vld [vmem:[#allocation10 + $0xc0] ss:$8 sps:$4 sm:$0xff]   ;;  %v772_v4 = vld [vmem:[#allocation8 + $0x78] sm:$0xff] }
 0x27f   : > { %v3096_v10 = vmax.f32 %v2076_v6, 0.0  ;;  %6545 = vmatprep.mubr.msk.bf16.mxu1 %vm1653_vm0, %v6905_v3  ;;  %4738 = vmatpush1.bf16.msra.mxu1 %v6959_v59 }
 0x280   : > { %v3352_v14 = vpack.c.bf16 %v3098_v8, %v3097_v7  ;;  %v770_v8 = vld [vmem:[#allocation8 + $0x68] sm:$0xff] }
 0x281   : > { %v3351_v15 = vpack.c.bf16 %v3096_v10, %v3095_v9  ;;  %v6439_v16 = vpop.f32.mrb[4].mxu1  ;;  %v6914_v9 = vld [vmem:[#allocation7 + $0x1f0] sm:$0xff]  }
 0x282   : > { %v2097_v19 = vadd.f32 %v6439_v16, %v763_v11  ;;  %v2088_v21 = vpop.f32.mrb[5].mxu1 }
 0x283   : > { %3608 = vmatmul.mubr.bf16.vlgmr.msra.gmra.mrb[8].mxu0 %v3351_v15  ;;  %v2089_v24 = vadd.f32 %v2088_v21, %v761_v13  ;;  %v6440_v25 = vpop.f32.mrb[6].mxu1 }
 0x284   : > { %4154 = vmatpush1.bf16.msra.mxu0 %v6902_v12  ;;  %v3101_v27 = vmax.f32 %v2097_v19, 0.0  ;;  %v2100_v28 = vadd.f32 %v6440_v25, %v764_v17  ;;  %v2091_v29 = vpop.f32.mrb[7].mxu1  ;;  %3617 = vmatprep.mubr.bf16.mxu0 %v7272_v23  ;;  %v775_v19 = vld [vmem:[#allocation8 + $0x90] sm:$0xff]  ;;  %v776_v25 = vld [vmem:[#allocation8 + $0x98] sm:$0xff] }
 0x285   : > { %v3099_v31 = vmax.f32 %v2089_v24, 0.0  ;;  %v2092_v32 = vadd.f32 %v2091_v29, %v762_v22  ;;  %4155 = vmatprep.subr.bf16.mxu0 %v6918_v18  ;;  %v774_v29 = vld [vmem:[#allocation8 + $0x88] sm:$0xff] }
 0x286   : > { %6546 = vmatmul.mubr.msk.bf16.gmra.mrb[112].mxu1 %vm1653_vm0, %v6906_v20  ;;  %v3102_v34 = vmax.f32 %v2100_v28, 0.0  ;;  %v773_v20 = vld [vmem:[#allocation8 + $0x80] sm:$0xff] }
 0x287   : > { %v3100_v35 = vmax.f32 %v2092_v32, 0.0  ;;  %6549 = vmatprep.mubr.msk.bf16.mxu1 %vm1653_vm0, %v6907_v26  ;;  %v6915_v26 = vld [vmem:[#allocation7 + $0x1f8] sm:$0xff]  }
 0x288   : > { %v7631_v38 = vpack.c.bf16 %v3102_v34, %v3101_v27  ;;  %4156 = vmatpush1.bf16.msra.mxu0 %v6916_v30  ;;  %v6919_v30 = vld [vmem:[#allocation7 + $0x200] sm:$0xff]  }
 0x289   : > { %v3353_v40 = vpack.c.bf16 %v3100_v35, %v3099_v31  ;;  %v6443_v41 = vpop.f32.mrb[8].mxu1  ;;  %4157 = vmatprep.subr.bf16.mxu0 %v6929_v33 }
 0x28a   : > { %v2113_v45 = vadd.f32 %v6443_v41, %v767_v36  ;;  %v2104_v46 = vpop.f32.mrb[9].mxu1  ;;  %v6968_v41 = vld [vmem:[#allocation10 + $0xd4] ss:$8 sps:$4 sm:$0xff]  }
 0x28b   : > { %3618 = vmatmul.mubr.bf16.gmra.mrb[12].mxu0 %v3352_v14  ;;  %v2105_v49 = vadd.f32 %v2104_v46, %v765_v37  ;;  %v6444_v50 = vpop.f32.mrb[10].mxu1 }
 0x28c   : > { %3627 = vmatprep.mubr.bf16.mxu0 %v7272_v23  ;;  %v3105_v51 = vmax.f32 %v2113_v45, 0.0  ;;  %v2116_v52 = vadd.f32 %v6444_v50, %v768_v42  ;;  %v2107_v53 = vpop.f32.mrb[11].mxu1  ;;  %4158 = vmatpush1.bf16.msra.mxu0 %v6927_v39 }
 0x28d   : > { %v3103_v55 = vmax.f32 %v2105_v49, 0.0  ;;  %v2108_v56 = vadd.f32 %v2107_v53, %v766_v47  ;;  %4159 = vmatprep.subr.bf16.mxu0 %v6943_v43  ;;  %v779_v43 = vld [vmem:[#allocation8 + $0xb0] sm:$0xff]  ;;  %v780_v47 = vld [vmem:[#allocation8 + $0xb8] sm:$0xff] }
 0x28e   : > { %6550 = vmatmul.mubr.msk.bf16.gmra.mrb[116].mxu1 %vm1653_vm0, %v6908_v44  ;;  %v3106_v58 = vmax.f32 %v2116_v52, 0.0  ;;  %v6921_v52 = vld [vmem:[#allocation7 + $0x210] sm:$0xff]  }
 0x28f   : > { %6553 = vmatprep.mubr.msk.bf16.mxu1 %vm1653_vm0, %v6912_v48  ;;  %v3104_v61 = vmax.f32 %v2108_v56, 0.0  ;;  %v6920_v48 = vld [vmem:[#allocation7 + $0x208] sm:$0xff]  }
 0x290   : > { %v7636_v0 = vpack.c.bf16 %v3106_v58, %v3105_v51  ;;  %4160 = vmatpush1.bf16.msra.mxu0 %v6941_v54  ;;  %v778_v51 = vld [vmem:[#allocation8 + $0xa8] sm:$0xff] }
 0x291   : > { %v3355_v2 = vpack.c.bf16 %v3104_v61, %v3103_v55  ;;  %v6447_v3 = vpop.f32.mrb[12].mxu1  ;;  %4161 = vmatprep.subr.bf16.mxu0 %v6954_v57 }
 0x292   : > { %v2129_v6 = vadd.f32 %v6447_v3, %v771_v62  ;;  %v2120_v7 = vpop.f32.mrb[13].mxu1  ;;  %v783_v62 = vld [vmem:[#allocation8 + $0xd0] sm:$0xff] }
 0x293   : > { %3628 = vmatmul.mubr.bf16.gmra.mrb[16].mxu0 %v3353_v40  ;;  %v2121_v10 = vadd.f32 %v2120_v7, %v769_v63  ;;  %v6448_v11 = vpop.f32.mrb[14].mxu1  ;;  %v6966_v40 = vld [vmem:[#allocation10 + $0xd0] ss:$8 sps:$4 sm:$0xff]   ;;  %v781_v63 = vld [vmem:[#allocation8 + $0xc0] sm:$0xff] }
 0x294   : > { %3637 = vmatprep.mubr.bf16.mxu0 %v7272_v23  ;;  %v3109_v12 = vmax.f32 %v2129_v6, 0.0  ;;  %v2132_v13 = vadd.f32 %v6448_v11, %v772_v4  ;;  %v2123_v14 = vpop.f32.mrb[15].mxu1  ;;  %4162 = vmatpush1.bf16.msra.mxu0 %v6952_v1  ;;  %v784_v4 = vld [vmem:[#allocation8 + $0xd8] sm:$0xff] }
 0x295   : > { %v3107_v15 = vmax.f32 %v2121_v10, 0.0  ;;  %v2124_v16 = vadd.f32 %v2123_v14, %v770_v8  ;;  %4163 = vmatprep.subr.bf16.mxu0 %v6968_v41  ;;  %v782_v8 = vld [vmem:[#allocation8 + $0xc8] sm:$0xff] }
 0x296   : > { %6554 = vmatmul.mubr.msk.bf16.gmra.mrb[120].mxu1 %vm1653_vm0, %v6913_v5  ;;  %v3110_v17 = vmax.f32 %v2132_v13, 0.0  ;;  %v6922_v5 = vld [vmem:[#allocation7 + $0x218] sm:$0xff]  }
 0x297   : > { %6557 = vmatprep.mubr.msk.bf16.mxu1 %vm1653_vm0, %v6914_v9  ;;  %v3108_v18 = vmax.f32 %v2124_v16, 0.0  ;;  %v6923_v9 = vld [vmem:[#allocation7 + $0x220] sm:$0xff]  }
 0x298   : > { %v7641_v21 = vpack.c.bf16 %v3110_v17, %v3109_v12  ;;  %4164 = vmatpush1.bf16.msra.mxu0 %v6966_v40 }
 0x299   : > { %v7643_v22 = vpack.c.bf16 %v3108_v18, %v3107_v15  ;;  %v6451_v24 = vpop.f32.mrb[16].mxu1 }
 0x29a   : > { %v2145_v27 = vadd.f32 %v6451_v24, %v775_v19  ;;  %v2136_v28 = vpop.f32.mrb[17].mxu1  ;;  %v787_v19 = vld [vmem:[#allocation8 + $0xf0] sm:$0xff] }
 0x29b   : > { %3638 = vmatmul.mubr.bf16.gmra.mrb[20].mxu0 %v7631_v38  ;;  %v2137_v31 = vadd.f32 %v2136_v28, %v773_v20  ;;  %v6452_v32 = vpop.f32.mrb[18].mxu1  ;;  %v777_v38 = vld [vmem:[#allocation8 + $0xa0] sm:$0xff] }
 0x29c   : > { %3647 = vmatprep.mubr.bf16.mxu0 %v7272_v23  ;;  %v3113_v33 = vmax.f32 %v2145_v27, 0.0  ;;  %v2148_v34 = vadd.f32 %v6452_v32, %v776_v25  ;;  %v2139_v35 = vpop.f32.mrb[19].mxu1  ;;  %v785_v20 = vld [vmem:[#allocation8 + $0xe0] sm:$0xff]  ;;  %v6924_v27 = vld [vmem:[#allocation7 + $0x228] sm:$0xff]  }
 0x29d   : > { %v3111_v36 = vmax.f32 %v2137_v31, 0.0  ;;  %v2140_v37 = vadd.f32 %v2139_v35, %v774_v29  ;;  %v6925_v31 = vld [vmem:[#allocation7 + $0x230] sm:$0xff]  }
 0x29e   : > { %6558 = vmatmul.mubr.msk.bf16.gmra.mrb[124].mxu1 %vm1653_vm0, %v6915_v26  ;;  %v3114_v39 = vmax.f32 %v2148_v34, 0.0  ;;  %v788_v26 = vld [vmem:[#allocation8 + $0xf8] sm:$0xff] }
 0x29f   : > { %6561 = vmatprep.mubr.msk.bf16.mxu1 %vm1653_vm0, %v6919_v30  ;;  %v3112_v42 = vmax.f32 %v2140_v37, 0.0  ;;  %v786_v30 = vld [vmem:[#allocation8 + $0xe8] sm:$0xff] }
 0x2a0   : > { %v7649_v44 = vpack.c.bf16 %v3114_v39, %v3113_v33 }
 0x2a1   : > { %v7651_v45 = vpack.c.bf16 %v3112_v42, %v3111_v36  ;;  %v6455_v46 = vpop.f32.mrb[20].mxu1  ;;  %v791_v42 = vld [vmem:[#allocation8 + $0x110] sm:$0xff] }
 0x2a2   : > { %v2161_v49 = vadd.f32 %v6455_v46, %v779_v43  ;;  %v2152_v50 = vpop.f32.mrb[21].mxu1  ;;  %v789_v43 = vld [vmem:[#allocation8 + $0x100] sm:$0xff] }
 0x2a3   : > { %3648 = vmatmul.mubr.bf16.gmra.mrb[24].mxu0 %v3355_v2  ;;  %v2153_v53 = vadd.f32 %v2152_v50, %v777_v38  ;;  %v6456_v54 = vpop.f32.mrb[22].mxu1 }
 0x2a4   : > { %3657 = vmatprep.mubr.bf16.mxu0 %v7272_v23  ;;  %v3117_v55 = vmax.f32 %v2161_v49, 0.0  ;;  %v2164_v56 = vadd.f32 %v6456_v54, %v780_v47  ;;  %v2155_v57 = vpop.f32.mrb[23].mxu1  ;;  %v792_v47 = vld [vmem:[#allocation8 + $0x118] sm:$0xff] }
 0x2a5   : > { %v3115_v58 = vmax.f32 %v2153_v53, 0.0  ;;  %v2156_v59 = vadd.f32 %v2155_v57, %v778_v51  ;;  %v790_v51 = vld [vmem:[#allocation8 + $0x108] sm:$0xff] }
 0x2a6   : > { %6562 = vmatmul.mubr.msk.bf16.gmra.mrb[128].mxu1 %vm1653_vm0, %v6920_v48  ;;  %v3118_v60 = vmax.f32 %v2164_v56, 0.0  ;;  %v6926_v48 = vld [vmem:[#allocation7 + $0x238] sm:$0xff]  }
 0x2a7   : > { %6565 = vmatprep.mubr.msk.bf16.mxu1 %vm1653_vm0, %v6921_v52  ;;  %v3116_v61 = vmax.f32 %v2156_v59, 0.0  ;;  %v6930_v52 = vld [vmem:[#allocation7 + $0x240] sm:$0xff]  }
 0x2a8   : > { %v7656_v1 = vpack.c.bf16 %v3118_v60, %v3117_v55 }
 0x2a9   : > { %v7658_v2 = vpack.c.bf16 %v3116_v61, %v3115_v58  ;;  %v6459_v3 = vpop.f32.mrb[24].mxu1  ;;  %v6977_v61 = vld [vmem:[#allocation10 + $0xe0] ss:$8 sps:$4 sm:$0xff]  }
 0x2aa   : > { %v2177_v6 = vadd.f32 %v6459_v3, %v783_v62  ;;  %v2168_v7 = vpop.f32.mrb[25].mxu1  ;;  %v6979_v62 = vld [vmem:[#allocation10 + $0xe4] ss:$8 sps:$4 sm:$0xff]   ;;  %v795_v3 = vld [vmem:[#allocation8 + $0x130] sm:$0xff] }
 0x2ab   : > { %3658 = vmatmul.mubr.bf16.gmra.mrb[28].mxu0 %v7636_v0  ;;  %v2169_v10 = vadd.f32 %v2168_v7, %v781_v63  ;;  %v6460_v11 = vpop.f32.mrb[26].mxu1  ;;  %4165 = vmatprep.subr.bf16.mxu0 %v6979_v62  ;;  %v796_v7 = vld [vmem:[#allocation8 + $0x138] sm:$0xff] }
 0x2ac   : > { %3667 = vmatprep.mubr.bf16.mxu0 %v7272_v23  ;;  %v3121_v12 = vmax.f32 %v2177_v6, 0.0  ;;  %v2180_v13 = vadd.f32 %v6460_v11, %v784_v4  ;;  %v2171_v14 = vpop.f32.mrb[27].mxu1  ;;  %4166 = vmatpush1.bf16.msra.mxu0 %v6977_v61  ;;  %v794_v11 = vld [vmem:[#allocation8 + $0x128] sm:$0xff] }
 0x2ad   : > { %v3119_v15 = vmax.f32 %v2169_v10, 0.0  ;;  %v2172_v16 = vadd.f32 %v2171_v14, %v782_v8  ;;  %v6931_v8 = vld [vmem:[#allocation7 + $0x248] sm:$0xff]  }
 0x2ae   : > { %6566 = vmatmul.mubr.msk.bf16.gmra.mrb[132].mxu1 %vm1653_vm0, %v6922_v5  ;;  %v3122_v17 = vmax.f32 %v2180_v13, 0.0 }
 0x2af   : > { %6569 = vmatprep.mubr.msk.bf16.mxu1 %vm1653_vm0, %v6923_v9  ;;  %v3120_v18 = vmax.f32 %v2172_v16, 0.0 }
 0x2b0   : > { %v7664_v24 = vpack.c.bf16 %v3122_v17, %v3121_v12  ;;  %v6932_v12 = vld [vmem:[#allocation7 + $0x250] sm:$0xff]  }
 0x2b1   : > { %v7666_v0 = vpack.c.bf16 %v3120_v18, %v3119_v15  ;;  %v6463_v25 = vpop.f32.mrb[28].mxu1 }
 0x2b2   : > { %v2193_v28 = vadd.f32 %v6463_v25, %v787_v19  ;;  %v2184_v29 = vpop.f32.mrb[29].mxu1 }
 0x2b3   : > { %3668 = vmatmul.mubr.bf16.gmra.mrb[32].mxu0 %v7643_v22  ;;  %v2185_v32 = vadd.f32 %v2184_v29, %v785_v20  ;;  %v6464_v33 = vpop.f32.mrb[30].mxu1 }
 0x2b4   : > { %3677 = vmatprep.mubr.bf16.mxu0 %v7272_v23  ;;  %v3125_v34 = vmax.f32 %v2193_v28, 0.0  ;;  %v2196_v35 = vadd.f32 %v6464_v33, %v788_v26  ;;  %v2187_v36 = vpop.f32.mrb[31].mxu1  ;;  %v799_v26 = vld [vmem:[#allocation8 + $0x150] sm:$0xff] }
 0x2b5   : > { %v3123_v37 = vmax.f32 %v2185_v32, 0.0  ;;  %v2188_v39 = vadd.f32 %v2187_v36, %v786_v30  ;;  %v800_v30 = vld [vmem:[#allocation8 + $0x158] sm:$0xff] }
 0x2b6   : > { %6570 = vmatmul.mubr.msk.bf16.gmra.mrb[136].mxu1 %vm1653_vm0, %v6924_v27  ;;  %v3126_v40 = vmax.f32 %v2196_v35, 0.0  ;;  %v797_v27 = vld [vmem:[#allocation8 + $0x140] sm:$0xff] }
 0x2b7   : > { %6573 = vmatprep.mubr.msk.bf16.mxu1 %vm1653_vm0, %v6925_v31  ;;  %v3124_v41 = vmax.f32 %v2188_v39, 0.0  ;;  %v6933_v31 = vld [vmem:[#allocation7 + $0x258] sm:$0xff]   ;;  %v6937_v35 = vld [vmem:[#allocation7 + $0x260] sm:$0xff]  }
 0x2b8   : > { %v7672_v38 = vpack.c.bf16 %v3126_v40, %v3125_v34  ;;  %v798_v34 = vld [vmem:[#allocation8 + $0x148] sm:$0xff] }
 0x2b9   : > { %v7674_v22 = vpack.c.bf16 %v3124_v41, %v3123_v37  ;;  %v6467_v46 = vpop.f32.mrb[32].mxu1 }
 0x2ba   : > { %v2209_v49 = vadd.f32 %v6467_v46, %v791_v42  ;;  %v2200_v50 = vpop.f32.mrb[33].mxu1 }
 0x2bb   : > { %3678 = vmatmul.mubr.bf16.gmra.mrb[36].mxu0 %v7641_v21  ;;  %v2201_v53 = vadd.f32 %v2200_v50, %v789_v43  ;;  %v6468_v54 = vpop.f32.mrb[34].mxu1  ;;  %v793_v21 = vld [vmem:[#allocation8 + $0x120] sm:$0xff]  ;;  %v803_v50 = vld [vmem:[#allocation8 + $0x170] sm:$0xff] }
 0x2bc   : > { %3687 = vmatprep.mubr.bf16.mxu0 %v7272_v23  ;;  %v3129_v55 = vmax.f32 %v2209_v49, 0.0  ;;  %v2212_v56 = vadd.f32 %v6468_v54, %v792_v47  ;;  %v2203_v57 = vpop.f32.mrb[35].mxu1  ;;  %v6984_v47 = vld [vmem:[#allocation10 + $0x140] ss:$8 sps:$4 sm:$0xff]   ;;  %v804_v54 = vld [vmem:[#allocation8 + $0x178] sm:$0xff] }
 0x2bd   : > { %v3127_v58 = vmax.f32 %v2201_v53, 0.0  ;;  %v2204_v59 = vadd.f32 %v2203_v57, %v790_v51 }
 0x2be   : > { %6574 = vmatmul.mubr.msk.bf16.gmra.mrb[140].mxu1 %vm1653_vm0, %v6926_v48  ;;  %v3130_v60 = vmax.f32 %v2212_v56, 0.0  ;;  %v6986_v48 = vld [vmem:[#allocation10 + $0x144] ss:$8 sps:$4 sm:$0xff]  }
 0x2bf   : > { %6577 = vmatprep.mubr.msk.bf16.mxu1 %vm1653_vm0, %v6930_v52  ;;  %v3128_v63 = vmax.f32 %v2204_v59, 0.0  ;;  %4739 = vmatprep.subr.bf16.mxu1 %v6986_v48  ;;  %v6939_v59 = vld [vmem:[#allocation7 + $0x270] sm:$0xff]  }
 0x2c0   : > { %v7680_v4 = vpack.c.bf16 %v3130_v60, %v3129_v55  ;;  %4740 = vmatpush1.bf16.msra.mxu1 %v6984_v47  ;;  %v6938_v55 = vld [vmem:[#allocation7 + $0x268] sm:$0xff]   ;;  %v6946_v47 = vld [vmem:[#allocation7 + $0x290] sm:$0xff]  }
 0x2c1   : > { %v7682_v5 = vpack.c.bf16 %v3128_v63, %v3127_v58  ;;  %v6471_v6 = vpop.f32.mrb[36].mxu1  ;;  %v802_v58 = vld [vmem:[#allocation8 + $0x168] sm:$0xff] }
 0x2c2   : > { %v2225_v9 = vadd.f32 %v6471_v6, %v795_v3  ;;  %v2216_v10 = vpop.f32.mrb[37].mxu1 }
 0x2c3   : > { %3688 = vmatmul.mubr.bf16.gmra.mrb[40].mxu0 %v7651_v45  ;;  %v2217_v13 = vadd.f32 %v2216_v10, %v793_v21  ;;  %v6472_v14 = vpop.f32.mrb[38].mxu1  ;;  %v805_v10 = vld [vmem:[#allocation8 + $0x180] sm:$0xff] }
 0x2c4   : > { %3697 = vmatprep.mubr.bf16.mxu0 %v7272_v23  ;;  %v3133_v15 = vmax.f32 %v2225_v9, 0.0  ;;  %v2228_v16 = vadd.f32 %v6472_v14, %v796_v7  ;;  %v2219_v17 = vpop.f32.mrb[39].mxu1  ;;  %v807_v9 = vld [vmem:[#allocation8 + $0x190] sm:$0xff]  ;;  %v6940_v14 = vld [vmem:[#allocation7 + $0x278] sm:$0xff]  }
 0x2c5   : > { %v3131_v18 = vmax.f32 %v2217_v13, 0.0  ;;  %v2220_v19 = vadd.f32 %v2219_v17, %v794_v11  ;;  %v808_v13 = vld [vmem:[#allocation8 + $0x198] sm:$0xff]  ;;  %v806_v17 = vld [vmem:[#allocation8 + $0x188] sm:$0xff] }
 0x2c6   : > { %6578 = vmatmul.mubr.msk.bf16.gmra.mrb[144].mxu1 %vm1653_vm0, %v6931_v8  ;;  %v3134_v20 = vmax.f32 %v2228_v16, 0.0 }
 0x2c7   : > { %6581 = vmatprep.mubr.msk.bf16.mxu1 %vm1653_vm0, %v6932_v12  ;;  %v3132_v25 = vmax.f32 %v2220_v19, 0.0 }
 0x2c8   : > { %v7688_v28 = vpack.c.bf16 %v3134_v20, %v3133_v15 }
 0x2c9   : > { %v7690_v45 = vpack.c.bf16 %v3132_v25, %v3131_v18  ;;  %v6475_v29 = vpop.f32.mrb[40].mxu1  ;;  %v6944_v18 = vld [vmem:[#allocation7 + $0x280] sm:$0xff]  }
 0x2ca   : > { %v2241_v32 = vadd.f32 %v6475_v29, %v799_v26  ;;  %v2232_v33 = vpop.f32.mrb[41].mxu1 }
 0x2cb   : > { %3698 = vmatmul.mubr.bf16.gmra.mrb[44].mxu0 %v7649_v44  ;;  %v2233_v36 = vadd.f32 %v2232_v33, %v797_v27  ;;  %v6476_v37 = vpop.f32.mrb[42].mxu1  ;;  %v801_v44 = vld [vmem:[#allocation8 + $0x160] sm:$0xff]  ;;  %v811_v33 = vld [vmem:[#allocation8 + $0x1b0] sm:$0xff] }
 0x2cc   : > { %3707 = vmatprep.mubr.bf16.mxu0 %v7272_v23  ;;  %v3137_v39 = vmax.f32 %v2241_v32, 0.0  ;;  %v2244_v40 = vadd.f32 %v6476_v37, %v800_v30  ;;  %v2235_v41 = vpop.f32.mrb[43].mxu1 }
 0x2cd   : > { %v3135_v42 = vmax.f32 %v2233_v36, 0.0  ;;  %v2236_v43 = vadd.f32 %v2235_v41, %v798_v34  ;;  %v809_v34 = vld [vmem:[#allocation8 + $0x1a0] sm:$0xff] }
 0x2ce   : > { %6582 = vmatmul.mubr.msk.bf16.gmra.mrb[148].mxu1 %vm1653_vm0, %v6933_v31  ;;  %v3138_v46 = vmax.f32 %v2244_v40, 0.0 }
 0x2cf   : > { %6585 = vmatprep.mubr.msk.bf16.mxu1 %vm1653_vm0, %v6937_v35  ;;  %v3136_v49 = vmax.f32 %v2236_v43, 0.0  ;;  %v6991_v43 = vld [vmem:[#allocation10 + $0xf0] ss:$8 sps:$4 sm:$0xff]  }
 0x2d0   : > { %v7696_v51 = vpack.c.bf16 %v3138_v46, %v3137_v39  ;;  %v812_v39 = vld [vmem:[#allocation8 + $0x1b8] sm:$0xff] }
 0x2d1   : > { %v7698_v52 = vpack.c.bf16 %v3136_v49, %v3135_v42  ;;  %v6479_v53 = vpop.f32.mrb[44].mxu1  ;;  %v810_v42 = vld [vmem:[#allocation8 + $0x1a8] sm:$0xff]  ;;  %v6993_v46 = vld [vmem:[#allocation10 + $0xf4] ss:$8 sps:$4 sm:$0xff]  }
 0x2d2   : > { %v2257_v56 = vadd.f32 %v6479_v53, %v803_v50  ;;  %v2248_v57 = vpop.f32.mrb[45].mxu1  ;;  %4167 = vmatprep.subr.bf16.mxu0 %v6993_v46  ;;  %v823_v46 = vld [vmem:[#allocation8 + $0x210] sm:$0xff] }
 0x2d3   : > { %3708 = vmatmul.mubr.bf16.gmra.mrb[48].mxu0 %v7658_v2  ;;  %v2249_v60 = vadd.f32 %v2248_v57, %v801_v44  ;;  %v6480_v61 = vpop.f32.mrb[46].mxu1 }
 0x2d4   : > { %3717 = vmatprep.mubr.bf16.mxu0 %v7272_v23  ;;  %v3141_v62 = vmax.f32 %v2257_v56, 0.0  ;;  %v2260_v63 = vadd.f32 %v6480_v61, %v804_v54  ;;  %v2251_v3 = vpop.f32.mrb[47].mxu1  ;;  %4168 = vmatpush1.bf16.msra.mxu0 %v6991_v43 }
 0x2d5   : > { %v3139_v21 = vmax.f32 %v2249_v60, 0.0  ;;  %v2252_v6 = vadd.f32 %v2251_v3, %v802_v58  ;;  %v815_v58 = vld [vmem:[#allocation8 + $0x1d0] sm:$0xff] }
 0x2d6   : > { %6586 = vmatmul.mubr.msk.bf16.gmra.mrb[152].mxu1 %vm1653_vm0, %v6938_v55  ;;  %v3142_v7 = vmax.f32 %v2260_v63, 0.0  ;;  %v6947_v63 = vld [vmem:[#allocation7 + $0x298] sm:$0xff]  }
 0x2d7   : > { %6589 = vmatprep.mubr.msk.bf16.mxu1 %vm1653_vm0, %v6939_v59  ;;  %v3140_v8 = vmax.f32 %v2252_v6, 0.0  ;;  %v814_v6 = vld [vmem:[#allocation8 + $0x1c8] sm:$0xff] }
 0x2d8   : > { %v7704_v11 = vpack.c.bf16 %v3142_v7, %v3141_v62  ;;  %v816_v62 = vld [vmem:[#allocation8 + $0x1d8] sm:$0xff]  ;;  %v6948_v7 = vld [vmem:[#allocation7 + $0x2a0] sm:$0xff]  }
 0x2d9   : > { %v7706_v2 = vpack.c.bf16 %v3140_v8, %v3139_v21  ;;  %v6483_v12 = vpop.f32.mrb[48].mxu1 }
 0x2da   : > { %v2273_v15 = vadd.f32 %v6483_v12, %v807_v9  ;;  %v2264_v16 = vpop.f32.mrb[49].mxu1 }
 0x2db   : > { %3718 = vmatmul.mubr.bf16.gmra.mrb[52].mxu0 %v7656_v1  ;;  %v2265_v19 = vadd.f32 %v2264_v16, %v805_v10  ;;  %v6484_v20 = vpop.f32.mrb[50].mxu1  ;;  %v6945_v1 = vld [vmem:[#allocation7 + $0x288] sm:$0xff]  }
 0x2dc   : > { %3727 = vmatprep.mubr.bf16.mxu0 %v7272_v23  ;;  %v3145_v25 = vmax.f32 %v2273_v15, 0.0  ;;  %v2276_v26 = vadd.f32 %v6484_v20, %v808_v13  ;;  %v2267_v27 = vpop.f32.mrb[51].mxu1 }
 0x2dd   : > { %v3143_v29 = vmax.f32 %v2265_v19, 0.0  ;;  %v2268_v30 = vadd.f32 %v2267_v27, %v806_v17  ;;  %v817_v19 = vld [vmem:[#allocation8 + $0x1e0] sm:$0xff]  ;;  %v6949_v27 = vld [vmem:[#allocation7 + $0x2a8] sm:$0xff]  }
 0x2de   : > { %6590 = vmatmul.mubr.msk.bf16.gmra.mrb[156].mxu1 %vm1653_vm0, %v6940_v14  ;;  %v3146_v31 = vmax.f32 %v2276_v26, 0.0 }
 0x2df   : > { %6593 = vmatprep.mubr.msk.bf16.mxu1 %vm1653_vm0, %v6944_v18  ;;  %v3144_v32 = vmax.f32 %v2268_v30, 0.0  ;;  %v819_v18 = vld [vmem:[#allocation8 + $0x1f0] sm:$0xff] }
 0x2e0   : > { %v7712_v35 = vpack.c.bf16 %v3146_v31, %v3145_v25  ;;  %v820_v25 = vld [vmem:[#allocation8 + $0x1f8] sm:$0xff]  ;;  %v818_v31 = vld [vmem:[#allocation8 + $0x1e8] sm:$0xff] }
 0x2e1   : > { %v7714_v36 = vpack.c.bf16 %v3144_v32, %v3143_v29  ;;  %v6487_v37 = vpop.f32.mrb[52].mxu1  ;;  %v6950_v32 = vld [vmem:[#allocation7 + $0x2b0] sm:$0xff]  }
 0x2e2   : > { %v2289_v40 = vadd.f32 %v6487_v37, %v811_v33  ;;  %v2280_v41 = vpop.f32.mrb[53].mxu1 }
 0x2e3   : > { %3728 = vmatmul.mubr.bf16.gmra.mrb[56].mxu0 %v7666_v0  ;;  %v2281_v48 = vadd.f32 %v2280_v41, %v809_v34  ;;  %v6488_v49 = vpop.f32.mrb[54].mxu1  ;;  %v813_v0 = vld [vmem:[#allocation8 + $0x1c0] sm:$0xff] }
 0x2e4   : > { %3737 = vmatprep.mubr.bf16.mxu0 %v7272_v23  ;;  %v3149_v50 = vmax.f32 %v2289_v40, 0.0  ;;  %v2292_v44 = vadd.f32 %v6488_v49, %v812_v39  ;;  %v2283_v53 = vpop.f32.mrb[55].mxu1  ;;  %v824_v49 = vld [vmem:[#allocation8 + $0x218] sm:$0xff] }
 0x2e5   : > { %v3147_v54 = vmax.f32 %v2281_v48, 0.0  ;;  %v2284_v55 = vadd.f32 %v2283_v53, %v810_v42 }
 0x2e6   : > { %6594 = vmatmul.mubr.msk.bf16.gmra.mrb[160].mxu1 %vm1653_vm0, %v6945_v1  ;;  %v3150_v56 = vmax.f32 %v2292_v44, 0.0  ;;  %v6951_v44 = vld [vmem:[#allocation7 + $0x2b8] sm:$0xff]  }
 0x2e7   : > { %6597 = vmatprep.mubr.msk.bf16.mxu1 %vm1653_vm0, %v6946_v47  ;;  %v3148_v57 = vmax.f32 %v2284_v55, 0.0  ;;  %v821_v47 = vld [vmem:[#allocation8 + $0x200] sm:$0xff]  ;;  %v822_v55 = vld [vmem:[#allocation8 + $0x208] sm:$0xff] }
 0x2e8   : > { %v7720_v59 = vpack.c.bf16 %v3150_v56, %v3149_v50  ;;  %v6955_v56 = vld [vmem:[#allocation7 + $0x2c0] sm:$0xff]  }
 0x2e9   : > { %v7722_v60 = vpack.c.bf16 %v3148_v57, %v3147_v54  ;;  %v6491_v61 = vpop.f32.mrb[56].mxu1 }
 0x2ea   : > { %v2305_v3 = vadd.f32 %v6491_v61, %v815_v58  ;;  %v2296_v21 = vpop.f32.mrb[57].mxu1 }
 0x2eb   : > { %3738 = vmatmul.mubr.bf16.gmra.mrb[60].mxu0 %v7664_v24  ;;  %v2297_v8 = vadd.f32 %v2296_v21, %v813_v0  ;;  %v6492_v9 = vpop.f32.mrb[58].mxu1 }
 0x2ec   : > { %3747 = vmatprep.mubr.bf16.mxu0 %v7272_v23  ;;  %v3153_v10 = vmax.f32 %v2305_v3, 0.0  ;;  %v2308_v12 = vadd.f32 %v6492_v9, %v816_v62  ;;  %v2299_v13 = vpop.f32.mrb[59].mxu1 }
 0x2ed   : > { %v3151_v14 = vmax.f32 %v2297_v8, 0.0  ;;  %v2300_v15 = vadd.f32 %v2299_v13, %v814_v6  ;;  %v825_v8 = vld [vmem:[#allocation8 + $0x220] sm:$0xff]  ;;  %v6956_v13 = vld [vmem:[#allocation7 + $0x2c8] sm:$0xff]  }
 0x2ee   : > { %6598 = vmatmul.mubr.msk.bf16.gmra.mrb[164].mxu1 %vm1653_vm0, %v6947_v63  ;;  %v3154_v16 = vmax.f32 %v2308_v12, 0.0  ;;  %v828_v12 = vld [vmem:[#allocation8 + $0x238] sm:$0xff] }
 0x2ef   : > { %6601 = vmatprep.mubr.msk.bf16.mxu1 %vm1653_vm0, %v6948_v7  ;;  %v3152_v17 = vmax.f32 %v2300_v15, 0.0  ;;  %v827_v7 = vld [vmem:[#allocation8 + $0x230] sm:$0xff] }
 0x2f0   : > { %v7728_v20 = vpack.c.bf16 %v3154_v16, %v3153_v10  ;;  %v826_v16 = vld [vmem:[#allocation8 + $0x228] sm:$0xff] }
 0x2f1   : > { %v6495_v24 = vpop.f32.mrb[60].mxu1  ;;  %v7730_v26 = vpack.c.bf16 %v3152_v17, %v3151_v14  ;;  %v7748_v17 = vld [vmem:[#allocation10 + $0x184] ss:$8 sps:$4 sm:$0xff]  }
 0x2f2   : > { %v2321_v29 = vadd.f32 %v6495_v24, %v819_v18  ;;  %v2312_v30 = vpop.f32.mrb[61].mxu1  ;;  %v6957_v18 = vld [vmem:[#allocation7 + $0x2d0] sm:$0xff]   ;;  %5309 = vmatprep.subr.bf16.mxu0 %v7748_v17 }
 0x2f3   : > { %3748 = vmatmul.mubr.bf16.gmra.mrb[64].mxu0 %v7674_v22  ;;  %v2313_v33 = vadd.f32 %v2312_v30, %v817_v19  ;;  %v6496_v34 = vpop.f32.mrb[62].mxu1 }
 0x2f4   : > { %3757 = vmatprep.mubr.bf16.mxu0 %v7272_v23  ;;  %v3157_v1 = vmax.f32 %v2321_v29, 0.0  ;;  %v2324_v37 = vadd.f32 %v6496_v34, %v820_v25  ;;  %v2315_v39 = vpop.f32.mrb[63].mxu1  ;;  %v831_v34 = vld [vmem:[#allocation8 + $0x250] sm:$0xff] }
 0x2f5   : > { %v3155_v40 = vmax.f32 %v2313_v33, 0.0  ;;  %v2316_v41 = vadd.f32 %v2315_v39, %v818_v31  ;;  %v832_v39 = vld [vmem:[#allocation8 + $0x258] sm:$0xff] }
 0x2f6   : > { %6602 = vmatmul.mubr.msk.bf16.gmra.mrb[168].mxu1 %vm1653_vm0, %v6949_v27  ;;  %v3158_v42 = vmax.f32 %v2324_v37, 0.0 }
 0x2f7   : > { %6605 = vmatprep.mubr.msk.bf16.mxu1 %vm1653_vm0, %v6950_v32  ;;  %v3156_v43 = vmax.f32 %v2316_v41, 0.0  ;;  %v6958_v41 = vld [vmem:[#allocation7 + $0x2d8] sm:$0xff]  }
 0x2f8   : > { %v7736_v48 = vpack.c.bf16 %v3158_v42, %v3157_v1 }
 0x2f9   : > { %v6499_v22 = vpop.f32.mrb[64].mxu1  ;;  %v7738_v50 = vpack.c.bf16 %v3156_v43, %v3155_v40 }
 0x2fa   : > { %v2337_v53 = vadd.f32 %v6499_v22, %v823_v46  ;;  %v2328_v54 = vpop.f32.mrb[65].mxu1  ;;  %v830_v46 = vld [vmem:[#allocation8 + $0x248] sm:$0xff] }
 0x2fb   : > { %3758 = vmatmul.mubr.bf16.gmra.mrb[68].mxu0 %v7672_v38  ;;  %v2329_v57 = vadd.f32 %v2328_v54, %v821_v47  ;;  %v6500_v58 = vpop.f32.mrb[66].mxu1  ;;  %v6962_v47 = vld [vmem:[#allocation7 + $0x2e0] sm:$0xff]  }
 0x2fc   : > { %3767 = vmatprep.mubr.bf16.mxu0 %v7272_v23  ;;  %v3161_v0 = vmax.f32 %v2337_v53, 0.0  ;;  %v2340_v61 = vadd.f32 %v6500_v58, %v824_v49  ;;  %v2331_v62 = vpop.f32.mrb[67].mxu1 }
 0x2fd   : > { %v3159_v63 = vmax.f32 %v2329_v57, 0.0  ;;  %v2332_v3 = vadd.f32 %v2331_v62, %v822_v55 }
 0x2fe   : > { %6606 = vmatmul.mubr.msk.bf16.gmra.mrb[172].mxu1 %vm1653_vm0, %v6951_v44  ;;  %v3162_v21 = vmax.f32 %v2340_v61, 0.0  ;;  %v833_v61 = vld [vmem:[#allocation8 + $0x260] sm:$0xff] }
 0x2ff   : > { %6609 = vmatprep.mubr.msk.bf16.mxu1 %vm1653_vm0, %v6955_v56  ;;  %v3160_v6 = vmax.f32 %v2332_v3, 0.0  ;;  %v836_v3 = vld [vmem:[#allocation8 + $0x278] sm:$0xff] }
 0x300   : > { %v7744_v9 = vpack.c.bf16 %v3162_v21, %v3161_v0  ;;  %v835_v0 = vld [vmem:[#allocation8 + $0x270] sm:$0xff] }
 0x301   : > { %v7746_v38 = vpack.c.bf16 %v3160_v6, %v3159_v63  ;;  %v6503_v10 = vpop.f32.mrb[68].mxu1 }
 0x302   : > { %v2353_v14 = vadd.f32 %v6503_v10, %v827_v7  ;;  %v2344_v15 = vpop.f32.mrb[69].mxu1  ;;  %v7009_v10 = vld [vmem:[#allocation10 + $0x150] ss:$8 sps:$4 sm:$0xff]  }
 0x303   : > { %3768 = vmatmul.mubr.bf16.gmra.mrb[72].mxu0 %v7682_v5  ;;  %v2345_v19 = vadd.f32 %v2344_v15, %v825_v8  ;;  %v6504_v24 = vpop.f32.mrb[70].mxu1  ;;  %v829_v5 = vld [vmem:[#allocation8 + $0x240] sm:$0xff]  ;;  %v834_v8 = vld [vmem:[#allocation8 + $0x268] sm:$0xff] }
 0x304   : > { %3777 = vmatprep.mubr.bf16.mxu0 %v7272_v23  ;;  %v3165_v25 = vmax.f32 %v2353_v14, 0.0  ;;  %v2356_v27 = vadd.f32 %v6504_v24, %v828_v12  ;;  %v2347_v29 = vpop.f32.mrb[71].mxu1  ;;  %v7011_v12 = vld [vmem:[#allocation10 + $0x154] ss:$8 sps:$4 sm:$0xff]  }
 0x305   : > { %v3163_v30 = vmax.f32 %v2345_v19, 0.0  ;;  %v2348_v31 = vadd.f32 %v2347_v29, %v826_v16  ;;  %4741 = vmatprep.subr.bf16.mxu1 %v7011_v12  ;;  %v842_v12 = vld [vmem:[#allocation8 + $0x2a8] sm:$0xff] }
 0x306   : > { %6610 = vmatmul.mubr.msk.bf16.gmra.mrb[176].mxu1 %vm1653_vm0, %v6956_v13  ;;  %v3166_v32 = vmax.f32 %v2356_v27, 0.0  ;;  %v6964_v13 = vld [vmem:[#allocation7 + $0x2f0] sm:$0xff]  }
 0x307   : > { %6613 = vmatprep.mubr.msk.bf16.mxu1 %vm1653_vm0, %v6957_v18  ;;  %v3164_v33 = vmax.f32 %v2348_v31, 0.0  ;;  %4742 = vmatpush1.bf16.msra.mxu1 %v7009_v10 }
 0x308   : > { %v7755_v1 = vpack.c.bf16 %v3166_v32, %v3165_v25 }
 0x309   : > { %v6507_v37 = vpop.f32.mrb[72].mxu1  ;;  %v7757_v40 = vpack.c.bf16 %v3164_v33, %v3163_v30  ;;  %v839_v30 = vld [vmem:[#allocation8 + $0x290] sm:$0xff]  ;;  %v840_v33 = vld [vmem:[#allocation8 + $0x298] sm:$0xff] }
 0x30a   : > { %v2369_v42 = vadd.f32 %v6507_v37, %v831_v34  ;;  %v2360_v43 = vpop.f32.mrb[73].mxu1 }
 0x30b   : > { %3778 = vmatmul.mubr.bf16.gmra.mrb[76].mxu0 %v7680_v4  ;;  %v2361_v22 = vadd.f32 %v2360_v43, %v829_v5  ;;  %v6508_v49 = vpop.f32.mrb[74].mxu1  ;;  %v6963_v4 = vld [vmem:[#allocation7 + $0x2e8] sm:$0xff]   ;;  %v6965_v5 = vld [vmem:[#allocation7 + $0x2f8] sm:$0xff]  }
 0x30c   : > { %3787 = vmatprep.mubr.bf16.mxu0 %v7272_v23  ;;  %v3169_v44 = vmax.f32 %v2369_v42, 0.0  ;;  %v2372_v53 = vadd.f32 %v6508_v49, %v832_v39  ;;  %v2363_v54 = vpop.f32.mrb[75].mxu1  ;;  %v6969_v42 = vld [vmem:[#allocation7 + $0x300] sm:$0xff]  }
 0x30d   : > { %v3167_v55 = vmax.f32 %v2361_v22, 0.0  ;;  %v2364_v56 = vadd.f32 %v2363_v54, %v830_v46 }
 0x30e   : > { %6614 = vmatmul.mubr.msk.bf16.gmra.mrb[180].mxu1 %vm1653_vm0, %v6958_v41  ;;  %v3170_v57 = vmax.f32 %v2372_v53, 0.0  ;;  %v838_v41 = vld [vmem:[#allocation8 + $0x288] sm:$0xff] }
 0x30f   : > { %6617 = vmatprep.mubr.msk.bf16.mxu1 %vm1653_vm0, %v6962_v47  ;;  %v3168_v58 = vmax.f32 %v2364_v56, 0.0 }
 0x310   : > { %v7763_v62 = vpack.c.bf16 %v3170_v57, %v3169_v44  ;;  %v7018_v44 = vld [vmem:[#allocation10 + $0x164] ss:$8 sps:$4 sm:$0xff]  }
 0x311   : > { %v6511_v63 = vpop.f32.mrb[76].mxu1  ;;  %v7765_v21 = vpack.c.bf16 %v3168_v58, %v3167_v55  ;;  %v7016_v55 = vld [vmem:[#allocation10 + $0x160] ss:$8 sps:$4 sm:$0xff]   ;;  %4743 = vmatprep.subr.bf16.mxu1 %v7018_v44 }
 0x312   : > { %v2385_v6 = vadd.f32 %v6511_v63, %v835_v0  ;;  %v2376_v7 = vpop.f32.mrb[77].mxu1  ;;  %4744 = vmatpush1.bf16.msra.mxu1 %v7016_v55  ;;  %v841_v58 = vld [vmem:[#allocation8 + $0x2a0] sm:$0xff]  ;;  %v7021_v0 = vld [vmem:[#allocation10 + $0x174] ss:$8 sps:$4 sm:$0xff]  }
 0x313   : > { %3788 = vmatmul.mubr.bf16.gmra.mrb[80].mxu0 %v7690_v45  ;;  %v2377_v14 = vadd.f32 %v2376_v7, %v833_v61  ;;  %v6512_v15 = vpop.f32.mrb[78].mxu1  ;;  %v837_v45 = vld [vmem:[#allocation8 + $0x280] sm:$0xff]  ;;  %v844_v63 = vld [vmem:[#allocation8 + $0x2b8] sm:$0xff]  ;;  %v6970_v7 = vld [vmem:[#allocation7 + $0x308] sm:$0xff]   ;;  %4745 = vmatprep.subr.bf16.mxu1 %v7021_v0 }
 0x314   : > { %3797 = vmatprep.mubr.bf16.mxu0 %v7272_v23  ;;  %v3173_v16 = vmax.f32 %v2385_v6, 0.0  ;;  %v2388_v18 = vadd.f32 %v6512_v15, %v836_v3  ;;  %v2379_v19 = vpop.f32.mrb[79].mxu1  ;;  %v7019_v3 = vld [vmem:[#allocation10 + $0x170] ss:$8 sps:$4 sm:$0xff]  }
 0x315   : > { %v3171_v24 = vmax.f32 %v2377_v14, 0.0  ;;  %v2380_v25 = vadd.f32 %v2379_v19, %v834_v8 }
 0x316   : > { %6618 = vmatmul.mubr.msk.bf16.gmra.mrb[184].mxu1 %vm1653_vm0, %v6963_v4  ;;  %v3174_v27 = vmax.f32 %v2388_v18, 0.0 }
 0x317   : > { %6621 = vmatprep.mubr.msk.bf16.mxu1 %vm1653_vm0, %v6964_v13  ;;  %v3172_v29 = vmax.f32 %v2380_v25, 0.0  ;;  %v6971_v13 = vld [vmem:[#allocation7 + $0x310] sm:$0xff]   ;;  %4746 = vmatpush1.bf16.msra.mxu1 %v7019_v3 }
 0x318   : > { %v7771_v31 = vpack.c.bf16 %v3174_v27, %v3173_v16  ;;  %6689 = vmatprep.subr.bf16.mxu1 %v7748_v17  ;;  %v846_v17 = vld [vmem:[#allocation8 + $0x2c8] sm:$0xff] }
 0x319   : > { %v6515_v32 = vpop.f32.mrb[80].mxu1  ;;  %v7773_v34 = vpack.c.bf16 %v3172_v29, %v3171_v24 }
 0x31a   : > { %v2401_v37 = vadd.f32 %v6515_v32, %v839_v30  ;;  %v2392_v39 = vpop.f32.mrb[81].mxu1  ;;  %v845_v30 = vld [vmem:[#allocation8 + $0x2c0] sm:$0xff] }
 0x31b   : > { %3798 = vmatmul.mubr.bf16.gmra.mrb[84].mxu0 %v7688_v28  ;;  %v2393_v43 = vadd.f32 %v2392_v39, %v837_v45  ;;  %v6516_v46 = vpop.f32.mrb[82].mxu1  ;;  %v843_v28 = vld [vmem:[#allocation8 + $0x2b0] sm:$0xff] }
 0x31c   : > { %3807 = vmatprep.mubr.bf16.mxu0 %v7272_v23  ;;  %v3177_v47 = vmax.f32 %v2401_v37, 0.0  ;;  %v2404_v22 = vadd.f32 %v6516_v46, %v840_v33  ;;  %v2395_v49 = vpop.f32.mrb[83].mxu1  ;;  %v848_v33 = vld [vmem:[#allocation8 + $0x2d8] sm:$0xff] }
 0x31d   : > { %v3175_v53 = vmax.f32 %v2393_v43, 0.0  ;;  %v2396_v54 = vadd.f32 %v2395_v49, %v838_v41  ;;  %v6972_v37 = vld [vmem:[#allocation7 + $0x318] sm:$0xff]  }
 0x31e   : > { %6622 = vmatmul.mubr.msk.bf16.gmra.mrb[188].mxu1 %vm1653_vm0, %v6965_v5  ;;  %v3178_v56 = vmax.f32 %v2404_v22, 0.0 }
 0x31f   : > { %6625 = vmatprep.mubr.msk.bf16.mxu1 %vm1653_vm0, %v6969_v42  ;;  %v3176_v57 = vmax.f32 %v2396_v54, 0.0  ;;  %v6973_v42 = vld [vmem:[#allocation7 + $0x320] sm:$0xff]  }
 0x320   : > { %v7779_v61 = vpack.c.bf16 %v3178_v56, %v3177_v47  ;;  %v851_v56 = vld [vmem:[#allocation8 + $0x2f0] sm:$0xff] }
 0x321   : > { %v6519_v4 = vpop.f32.mrb[84].mxu1  ;;  %v7781_v6 = vpack.c.bf16 %v3176_v57, %v3175_v53  ;;  %v849_v57 = vld [vmem:[#allocation8 + $0x2e0] sm:$0xff] }
 0x322   : > { %v2417_v8 = vadd.f32 %v6519_v4, %v843_v28  ;;  %v2408_v10 = vpop.f32.mrb[85].mxu1  ;;  %v6974_v4 = vld [vmem:[#allocation7 + $0x328] sm:$0xff]  }
 0x323   : > { %3808 = vmatmul.mubr.bf16.gmra.mrb[88].mxu0 %v7698_v52  ;;  %v2409_v14 = vadd.f32 %v2408_v10, %v841_v58  ;;  %v6520_v15 = vpop.f32.mrb[86].mxu1  ;;  %v847_v52 = vld [vmem:[#allocation8 + $0x2d0] sm:$0xff]  ;;  %v852_v58 = vld [vmem:[#allocation8 + $0x2f8] sm:$0xff] }
 0x324   : > { %3817 = vmatprep.mubr.bf16.mxu0 %v7272_v23  ;;  %v3181_v16 = vmax.f32 %v2417_v8, 0.0  ;;  %v2420_v18 = vadd.f32 %v6520_v15, %v844_v63  ;;  %v2411_v19 = vpop.f32.mrb[87].mxu1  ;;  %v6975_v8 = vld [vmem:[#allocation7 + $0x330] sm:$0xff]  }
 0x325   : > { %v3179_v24 = vmax.f32 %v2409_v14, 0.0  ;;  %v2412_v25 = vadd.f32 %v2411_v19, %v842_v12 }
 0x326   : > { %6626 = vmatmul.mubr.msk.bf16.gmra.mrb[192].mxu1 %vm1653_vm0, %v6970_v7  ;;  %v3182_v27 = vmax.f32 %v2420_v18, 0.0  ;;  %v850_v7 = vld [vmem:[#allocation8 + $0x2e8] sm:$0xff] }
 0x327   : > { %6629 = vmatprep.mubr.msk.bf16.mxu1 %vm1653_vm0, %v6971_v13  ;;  %v3180_v29 = vmax.f32 %v2412_v25, 0.0  ;;  %v855_v25 = vld [vmem:[#allocation8 + $0x310] sm:$0xff] }
 0x328   : > { %v7788_v45 = vpack.c.bf16 %v3182_v27, %v3181_v16  ;;  %v853_v27 = vld [vmem:[#allocation8 + $0x300] sm:$0xff] }
 0x329   : > { %v6523_v32 = vpop.f32.mrb[88].mxu1  ;;  %v7790_v5 = vpack.c.bf16 %v3180_v29, %v3179_v24 }
 0x32a   : > { %v2433_v39 = vadd.f32 %v6523_v32, %v847_v52  ;;  %v2424_v41 = vpop.f32.mrb[89].mxu1  ;;  %v856_v52 = vld [vmem:[#allocation8 + $0x318] sm:$0xff] }
 0x32b   : > { %3818 = vmatmul.mubr.bf16.gmra.mrb[92].mxu0 %v7696_v51  ;;  %v2425_v43 = vadd.f32 %v2424_v41, %v845_v30  ;;  %v6524_v46 = vpop.f32.mrb[90].mxu1  ;;  %v6976_v32 = vld [vmem:[#allocation7 + $0x338] sm:$0xff]   ;;  %v6980_v41 = vld [vmem:[#allocation7 + $0x340] sm:$0xff]  }
 0x32c   : > { %3827 = vmatprep.mubr.bf16.mxu0 %v7272_v23  ;;  %v3185_v47 = vmax.f32 %v2433_v39, 0.0  ;;  %v2436_v22 = vadd.f32 %v6524_v46, %v848_v33  ;;  %v2427_v49 = vpop.f32.mrb[91].mxu1  ;;  %v854_v39 = vld [vmem:[#allocation8 + $0x308] sm:$0xff] }
 0x32d   : > { %v3183_v44 = vmax.f32 %v2425_v43, 0.0  ;;  %v2428_v53 = vadd.f32 %v2427_v49, %v846_v17 }
 0x32e   : > { %6630 = vmatmul.mubr.msk.bf16.gmra.mrb[196].mxu1 %vm1653_vm0, %v6972_v37  ;;  %v3186_v54 = vmax.f32 %v2436_v22, 0.0 }
 0x32f   : > { %6633 = vmatprep.mubr.msk.bf16.mxu1 %vm1653_vm0, %v6973_v42  ;;  %v3184_v55 = vmax.f32 %v2428_v53, 0.0 }
 0x330   : > { %v7796_v28 = vpack.c.bf16 %v3186_v54, %v3185_v47  ;;  %v859_v54 = vld [vmem:[#allocation8 + $0x330] sm:$0xff] }
 0x331   : > { %v6527_v51 = vpop.f32.mrb[92].mxu1  ;;  %v7798_v0 = vpack.c.bf16 %v3184_v55, %v3183_v44  ;;  %v857_v55 = vld [vmem:[#allocation8 + $0x320] sm:$0xff] }
 0x332   : > { %v2449_v63 = vadd.f32 %v6527_v51, %v851_v56  ;;  %v2440_v3 = vpop.f32.mrb[93].mxu1 }
 0x333   : > { %3828 = vmatmul.mubr.bf16.gmra.mrb[96].mxu0 %v7706_v2  ;;  %v2441_v10 = vadd.f32 %v2440_v3, %v849_v57  ;;  %v6528_v12 = vpop.f32.mrb[94].mxu1  ;;  %v860_v57 = vld [vmem:[#allocation8 + $0x338] sm:$0xff]  ;;  %v858_v3 = vld [vmem:[#allocation8 + $0x328] sm:$0xff] }
 0x334   : > { %3837 = vmatprep.mubr.bf16.mxu0 %v7272_v23  ;;  %v3189_v13 = vmax.f32 %v2449_v63, 0.0  ;;  %v2452_v14 = vadd.f32 %v6528_v12, %v852_v58  ;;  %v2443_v15 = vpop.f32.mrb[95].mxu1  ;;  %v6981_v58 = vld [vmem:[#allocation7 + $0x348] sm:$0xff]  }
 0x335   : > { %v3187_v16 = vmax.f32 %v2441_v10, 0.0  ;;  %v2444_v18 = vadd.f32 %v2443_v15, %v850_v7  ;;  %v6982_v7 = vld [vmem:[#allocation7 + $0x350] sm:$0xff]  }
 0x336   : > { %6634 = vmatmul.mubr.msk.bf16.gmra.mrb[200].mxu1 %vm1653_vm0, %v6974_v4  ;;  %v3190_v19 = vmax.f32 %v2452_v14, 0.0 }
 0x337   : > { %6637 = vmatprep.mubr.msk.bf16.mxu1 %vm1653_vm0, %v6975_v8  ;;  %v3188_v24 = vmax.f32 %v2444_v18, 0.0 }
 0x338   : > { %v7804_v29 = vpack.c.bf16 %v3190_v19, %v3189_v13 }
 0x339   : > { %v6531_v2 = vpop.f32.mrb[96].mxu1  ;;  %v7806_v30 = vpack.c.bf16 %v3188_v24, %v3187_v16  ;;  %v863_v24 = vld [vmem:[#allocation8 + $0x350] sm:$0xff] }
 0x33a   : > { %v2465_v33 = vadd.f32 %v6531_v2, %v855_v25  ;;  %v2456_v37 = vpop.f32.mrb[97].mxu1  ;;  %v861_v25 = vld [vmem:[#allocation8 + $0x340] sm:$0xff]  ;;  %v864_v2 = vld [vmem:[#allocation8 + $0x358] sm:$0xff] }
 0x33b   : > { %3838 = vmatmul.mubr.bf16.gmra.mrb[100].mxu0 %v7704_v11  ;;  %v2457_v17 = vadd.f32 %v2456_v37, %v853_v27  ;;  %v6532_v42 = vpop.f32.mrb[98].mxu1 }
 0x33c   : > { %3847 = vmatprep.mubr.bf16.mxu0 %v7272_v23  ;;  %v3193_v43 = vmax.f32 %v2465_v33, 0.0  ;;  %v2468_v46 = vadd.f32 %v6532_v42, %v856_v52  ;;  %v2459_v47 = vpop.f32.mrb[99].mxu1 }
 0x33d   : > { %v3191_v22 = vmax.f32 %v2457_v17, 0.0  ;;  %v2460_v49 = vadd.f32 %v2459_v47, %v854_v39  ;;  %v862_v39 = vld [vmem:[#allocation8 + $0x348] sm:$0xff] }
 0x33e   : > { %6638 = vmatmul.mubr.msk.bf16.gmra.mrb[204].mxu1 %vm1653_vm0, %v6976_v32  ;;  %v3194_v44 = vmax.f32 %v2468_v46, 0.0  ;;  %v6983_v32 = vld [vmem:[#allocation7 + $0x358] sm:$0xff]  }
 0x33f   : > { %6641 = vmatprep.mubr.msk.bf16.mxu1 %vm1653_vm0, %v6980_v41  ;;  %v3192_v53 = vmax.f32 %v2460_v49, 0.0  ;;  %v6987_v41 = vld [vmem:[#allocation7 + $0x360] sm:$0xff]  }
 0x340   : > { %v7812_v56 = vpack.c.bf16 %v3194_v44, %v3193_v43 }
 0x341   : > { %v6535_v11 = vpop.f32.mrb[100].mxu1  ;;  %v7814_v51 = vpack.c.bf16 %v3192_v53, %v3191_v22 }
 0x342   : > { %v2481_v4 = vadd.f32 %v6535_v11, %v859_v54  ;;  %v2472_v63 = vpop.f32.mrb[101].mxu1  ;;  %v867_v54 = vld [vmem:[#allocation8 + $0x370] sm:$0xff] }
 0x343   : > { %3848 = vmatmul.mubr.bf16.gmra.mrb[104].mxu0 %v7714_v36  ;;  %v2473_v8 = vadd.f32 %v2472_v63, %v857_v55  ;;  %v6536_v10 = vpop.f32.mrb[102].mxu1  ;;  %v865_v55 = vld [vmem:[#allocation8 + $0x360] sm:$0xff] }
 0x344   : > { %3857 = vmatprep.mubr.bf16.mxu0 %v7272_v23  ;;  %v3197_v12 = vmax.f32 %v2481_v4, 0.0  ;;  %v2484_v13 = vadd.f32 %v6536_v10, %v860_v57  ;;  %v2475_v14 = vpop.f32.mrb[103].mxu1  ;;  %v868_v57 = vld [vmem:[#allocation8 + $0x378] sm:$0xff]  ;;  %v6988_v4 = vld [vmem:[#allocation7 + $0x368] sm:$0xff]  }
 0x345   : > { %v3195_v15 = vmax.f32 %v2473_v8, 0.0  ;;  %v2476_v16 = vadd.f32 %v2475_v14, %v858_v3  ;;  %v6989_v8 = vld [vmem:[#allocation7 + $0x370] sm:$0xff]  }
 0x346   : > { %6642 = vmatmul.mubr.msk.bf16.gmra.mrb[208].mxu1 %vm1653_vm0, %v6981_v58  ;;  %v3198_v18 = vmax.f32 %v2484_v13, 0.0 }
 0x347   : > { %6645 = vmatprep.mubr.msk.bf16.mxu1 %vm1653_vm0, %v6982_v7  ;;  %v3196_v19 = vmax.f32 %v2476_v16, 0.0  ;;  %v866_v7 = vld [vmem:[#allocation8 + $0x368] sm:$0xff] }
 0x348   : > { %v7820_v27 = vpack.c.bf16 %v3198_v18, %v3197_v12 }
 0x349   : > { %v6539_v36 = vpop.f32.mrb[104].mxu1  ;;  %v7822_v52 = vpack.c.bf16 %v3196_v19, %v3195_v15 }
 0x34a   : > { %v2497_v33 = vadd.f32 %v6539_v36, %v863_v24  ;;  %v2488_v37 = vpop.f32.mrb[105].mxu1  ;;  %v871_v36 = vld [vmem:[#allocation8 + $0x390] sm:$0xff] }
 0x34b   : > { %3858 = vmatmul.mubr.bf16.gmra.mrb[108].mxu0 %v7712_v35  ;;  %v2489_v17 = vadd.f32 %v2488_v37, %v861_v25  ;;  %v6540_v42 = vpop.f32.mrb[106].mxu1 }
 0x34c   : > { %3867 = vmatprep.mubr.bf16.mxu0 %v7272_v23  ;;  %v3201_v43 = vmax.f32 %v2497_v33, 0.0  ;;  %v2500_v46 = vadd.f32 %v6540_v42, %v864_v2  ;;  %v2491_v47 = vpop.f32.mrb[107].mxu1  ;;  %v6990_v42 = vld [vmem:[#allocation7 + $0x378] sm:$0xff]  }
 0x34d   : > { %v3199_v22 = vmax.f32 %v2489_v17, 0.0  ;;  %v2492_v49 = vadd.f32 %v2491_v47, %v862_v39  ;;  %v870_v47 = vld [vmem:[#allocation8 + $0x388] sm:$0xff] }
 0x34e   : > { %6646 = vmatmul.mubr.msk.bf16.gmra.mrb[212].mxu1 %vm1653_vm0, %v6983_v32  ;;  %v3202_v44 = vmax.f32 %v2500_v46, 0.0  ;;  %v869_v32 = vld [vmem:[#allocation8 + $0x380] sm:$0xff] }
 0x34f   : > { %6649 = vmatprep.mubr.msk.bf16.mxu1 %vm1653_vm0, %v6987_v41  ;;  %v3200_v53 = vmax.f32 %v2492_v49, 0.0  ;;  %v872_v41 = vld [vmem:[#allocation8 + $0x398] sm:$0xff] }
 0x350   : > { %v7828_v11 = vpack.c.bf16 %v3202_v44, %v3201_v43 }
 0x351   : > { %v6543_v35 = vpop.f32.mrb[108].mxu1  ;;  %v7830_v58 = vpack.c.bf16 %v3200_v53, %v3199_v22  ;;  %v6994_v22 = vld [vmem:[#allocation7 + $0x380] sm:$0xff]  }
 0x352   : > { %v2513_v63 = vadd.f32 %v6543_v35, %v867_v54  ;;  %v2504_v3 = vpop.f32.mrb[109].mxu1 }
 0x353   : > { %3868 = vmatmul.mubr.bf16.gmra.mrb[112].mxu0 %v7722_v60  ;;  %v2505_v10 = vadd.f32 %v2504_v3, %v865_v55  ;;  %v6544_v12 = vpop.f32.mrb[110].mxu1 }
 0x354   : > { %3877 = vmatprep.mubr.bf16.mxu0 %v7272_v23  ;;  %v3205_v13 = vmax.f32 %v2513_v63, 0.0  ;;  %v2516_v14 = vadd.f32 %v6544_v12, %v868_v57  ;;  %v2507_v15 = vpop.f32.mrb[111].mxu1 }
 0x355   : > { %v3203_v16 = vmax.f32 %v2505_v10, 0.0  ;;  %v2508_v18 = vadd.f32 %v2507_v15, %v866_v7  ;;  %v875_v7 = vld [vmem:[#allocation8 + $0x3b0] sm:$0xff]  ;;  %v873_v10 = vld [vmem:[#allocation8 + $0x3a0] sm:$0xff]  ;;  %v876_v15 = vld [vmem:[#allocation8 + $0x3b8] sm:$0xff] }
 0x356   : > { %6650 = vmatmul.mubr.msk.bf16.gmra.mrb[216].mxu1 %vm1653_vm0, %v6988_v4  ;;  %v3609_v19 = vpop.f32.mrb[8].mxu0  ;;  %v3206_v24 = vmax.f32 %v2516_v14, 0.0 }
 0x357   : > { %3928 = vst [vmem:[%s7555_s26 + $0x40] sm:$0xff] %v3609_v19  ;;  %v3611_v25 = vpop.f32.mrb[9].mxu0  ;;  %6653 = vmatprep.mubr.msk.bf16.mxu1 %vm1653_vm0, %v6989_v8  ;;  %v3204_v60 = vmax.f32 %v2508_v18, 0.0  ;;  %v6995_v18 = vld [vmem:[#allocation7 + $0x388] sm:$0xff]  }
 0x358   : > { %3929 = vst [vmem:[%s7555_s26 + $0x48] sm:$0xff] %v3611_v25  ;;  %v3613_v2 = vpop.f32.mrb[10].mxu0  ;;  %v7838_v33 = vpack.c.bf16 %v3206_v24, %v3205_v13  ;;  %v874_v25 = vld [vmem:[#allocation8 + $0x3a8] sm:$0xff] }
 0x359   : > { %3930 = vst [vmem:[%s7555_s26 + $0x50] sm:$0xff] %v3613_v2  ;;  %v3615_v37 = vpop.f32.mrb[11].mxu0  ;;  %v6547_v39 = vpop.f32.mrb[112].mxu1  ;;  %v7841_v17 = vpack.c.bf16 %v3204_v60, %v3203_v16  ;;  %v6996_v60 = vld [vmem:[#allocation7 + $0x390] sm:$0xff]  }
 0x35a   : > { %3931 = vst [vmem:[%s7555_s26 + $0x58] sm:$0xff] %v3615_v37  ;;  %v2529_v43 = vadd.f32 %v6547_v39, %v871_v36  ;;  %v2520_v46 = vpop.f32.mrb[113].mxu1 }
 0x35b   : > { %3878 = vmatmul.mubr.bf16.gmra.mrb[116].mxu0 %v7720_v59  ;;  %v2521_v49 = vadd.f32 %v2520_v46, %v869_v32  ;;  %v6548_v44 = vpop.f32.mrb[114].mxu1 }
 0x35c   : > { %3887 = vmatprep.mubr.bf16.mxu0 %v7272_v23  ;;  %v3209_v53 = vmax.f32 %v2529_v43, 0.0  ;;  %v2532_v54 = vadd.f32 %v6548_v44, %v872_v41  ;;  %v2523_v55 = vpop.f32.mrb[115].mxu1  ;;  %v877_v44 = vld [vmem:[#allocation8 + $0x3c0] sm:$0xff] }
 0x35d   : > { %v3207_v35 = vmax.f32 %v2521_v49, 0.0  ;;  %v2524_v57 = vadd.f32 %v2523_v55, %v870_v47 }
 0x35e   : > { %6654 = vmatmul.mubr.msk.bf16.gmra.mrb[220].mxu1 %vm1653_vm0, %v6990_v42  ;;  %v3619_v4 = vpop.f32.mrb[12].mxu0  ;;  %v3210_v63 = vmax.f32 %v2532_v54, 0.0 }
 0x35f   : > { %3932 = vst [vmem:[%s7555_s26 + $0x60] sm:$0xff] %v3619_v4  ;;  %v3621_v3 = vpop.f32.mrb[13].mxu0  ;;  %6657 = vmatprep.mubr.msk.bf16.mxu1 %vm1653_vm0, %v6994_v22  ;;  %v3208_v59 = vmax.f32 %v2524_v57, 0.0  ;;  %v879_v22 = vld [vmem:[#allocation8 + $0x3d0] sm:$0xff]  ;;  %v6997_v4 = vld [vmem:[#allocation7 + $0x398] sm:$0xff]  }
 0x360   : > { %3933 = vst [vmem:[%s7555_s26 + $0x68] sm:$0xff] %v3621_v3  ;;  %v3623_v8 = vpop.f32.mrb[14].mxu0  ;;  %v7850_v12 = vpack.c.bf16 %v3210_v63, %v3209_v53 }
 0x361   : > { %3934 = vst [vmem:[%s7555_s26 + $0x70] sm:$0xff] %v3623_v8  ;;  %v3625_v13 = vpop.f32.mrb[15].mxu0  ;;  %v6551_v14 = vpop.f32.mrb[116].mxu1  ;;  %v7853_v16 = vpack.c.bf16 %v3208_v59, %v3207_v35  ;;  %v880_v35 = vld [vmem:[#allocation8 + $0x3d8] sm:$0xff]  ;;  %v878_v59 = vld [vmem:[#allocation8 + $0x3c8] sm:$0xff] }
 0x362   : > { %3935 = vst [vmem:[%s7555_s26 + $0x78] sm:$0xff] %v3625_v13  ;;  %v2545_v19 = vadd.f32 %v6551_v14, %v875_v7  ;;  %v2536_v24 = vpop.f32.mrb[117].mxu1  ;;  %v6998_v7 = vld [vmem:[#allocation7 + $0x3a0] sm:$0xff]  }
 0x363   : > { %3888 = vmatmul.mubr.bf16.gmra.mrb[120].mxu0 %v7730_v26  ;;  %v2537_v36 = vadd.f32 %v2536_v24, %v873_v10  ;;  %v6552_v2 = vpop.f32.mrb[118].mxu1 }
 0x364   : > { %3897 = vmatprep.mubr.bf16.mxu0 %v7272_v23  ;;  %v3213_v32 = vmax.f32 %v2545_v19, 0.0  ;;  %v2548_v37 = vadd.f32 %v6552_v2, %v876_v15  ;;  %v2539_v39 = vpop.f32.mrb[119].mxu1 }
 0x365   : > { %v3211_v41 = vmax.f32 %v2537_v36, 0.0  ;;  %v2540_v42 = vadd.f32 %v2539_v39, %v874_v25  ;;  %v883_v36 = vld [vmem:[#allocation8 + $0x3f0] sm:$0xff] }
 0x366   : > { %6658 = vmatmul.mubr.msk.bf16.gmra.mrb[224].mxu1 %vm1653_vm0, %v6995_v18  ;;  %v3629_v43 = vpop.f32.mrb[16].mxu0  ;;  %v3214_v46 = vmax.f32 %v2548_v37, 0.0 }
 0x367   : > { %3936 = vst [vmem:[%s7555_s26 + $0x80] sm:$0xff] %v3629_v43  ;;  %v3631_v47 = vpop.f32.mrb[17].mxu0  ;;  %6661 = vmatprep.mubr.msk.bf16.mxu1 %vm1653_vm0, %v6996_v60  ;;  %v3212_v26 = vmax.f32 %v2540_v42, 0.0  ;;  %v884_v42 = vld [vmem:[#allocation8 + $0x3f8] sm:$0xff] }
 0x368   : > { %3937 = vst [vmem:[%s7555_s26 + $0x88] sm:$0xff] %v3631_v47  ;;  %v3633_v49 = vpop.f32.mrb[18].mxu0  ;;  %v7862_v53 = vpack.c.bf16 %v3214_v46, %v3213_v32  ;;  %v881_v32 = vld [vmem:[#allocation8 + $0x3e0] sm:$0xff]  ;;  %v6999_v46 = vld [vmem:[#allocation7 + $0x3a8] sm:$0xff]  }
 0x369   : > { %3938 = vst [vmem:[%s7555_s26 + $0x90] sm:$0xff] %v3633_v49  ;;  %v3635_v54 = vpop.f32.mrb[19].mxu0  ;;  %v6555_v55 = vpop.f32.mrb[120].mxu1  ;;  %v7865_v57 = vpack.c.bf16 %v3212_v26, %v3211_v41  ;;  %v7000_v49 = vld [vmem:[#allocation7 + $0x3b0] sm:$0xff]  }
 0x36a   : > { %3939 = vst [vmem:[%s7555_s26 + $0x98] sm:$0xff] %v3635_v54  ;;  %v2561_v63 = vadd.f32 %v6555_v55, %v879_v22  ;;  %v2552_v3 = vpop.f32.mrb[121].mxu1  ;;  %v882_v22 = vld [vmem:[#allocation8 + $0x3e8] sm:$0xff] }
 0x36b   : > { %3898 = vmatmul.mubr.bf16.gmra.mrb[124].mxu0 %v7728_v20  ;;  %v2553_v8 = vadd.f32 %v2552_v3, %v877_v44  ;;  %v6556_v10 = vpop.f32.mrb[122].mxu1 }
 0x36c   : > { %3907 = vmatprep.mubr.bf16.mxu0 %v7272_v23  ;;  %v3217_v13 = vmax.f32 %v2561_v63, 0.0  ;;  %v2564_v14 = vadd.f32 %v6556_v10, %v880_v35  ;;  %v2555_v15 = vpop.f32.mrb[123].mxu1  ;;  %v887_v10 = vld [vmem:[#allocation8 + $0x410] sm:$0xff] }
 0x36d   : > { %v3215_v18 = vmax.f32 %v2553_v8, 0.0  ;;  %v2556_v19 = vadd.f32 %v2555_v15, %v878_v59  ;;  %v885_v15 = vld [vmem:[#allocation8 + $0x400] sm:$0xff] }
 0x36e   : > { %6662 = vmatmul.mubr.msk.bf16.gmra.mrb[228].mxu1 %vm1653_vm0, %v6997_v4  ;;  %v3639_v24 = vpop.f32.mrb[20].mxu0  ;;  %v3218_v25 = vmax.f32 %v2564_v14, 0.0 }
 0x36f   : > { %3940 = vst [vmem:[%s7555_s26 + $0xa0] sm:$0xff] %v3639_v24  ;;  %v3641_v60 = vpop.f32.mrb[21].mxu0  ;;  %6665 = vmatprep.mubr.msk.bf16.mxu1 %vm1653_vm0, %v6998_v7  ;;  %v3216_v20 = vmax.f32 %v2556_v19, 0.0 }
 0x370   : > { %3941 = vst [vmem:[%s7555_s26 + $0xa8] sm:$0xff] %v3641_v60  ;;  %v3643_v2 = vpop.f32.mrb[22].mxu0  ;;  %v7874_v37 = vpack.c.bf16 %v3218_v25, %v3217_v13  ;;  %v888_v25 = vld [vmem:[#allocation8 + $0x418] sm:$0xff] }
 0x371   : > { %3942 = vst [vmem:[%s7555_s26 + $0xb0] sm:$0xff] %v3643_v2  ;;  %v3645_v39 = vpop.f32.mrb[23].mxu0  ;;  %v6559_v41 = vpop.f32.mrb[124].mxu1  ;;  %v7877_v43 = vpack.c.bf16 %v3216_v20, %v3215_v18  ;;  %v7001_v60 = vld [vmem:[#allocation7 + $0x3b8] sm:$0xff]   ;;  %v886_v2 = vld [vmem:[#allocation8 + $0x408] sm:$0xff] }
 0x372   : > { %3943 = vst [vmem:[%s7555_s26 + $0xb8] sm:$0xff] %v3645_v39  ;;  %v2577_v47 = vadd.f32 %v6559_v41, %v883_v36  ;;  %v2568_v26 = vpop.f32.mrb[125].mxu1 }
 0x373   : > { %3908 = vmatmul.mubr.bf16.gmra.mrb[128].mxu0 %v7738_v50  ;;  %v2569_v44 = vadd.f32 %v2568_v26, %v881_v32  ;;  %v6560_v54 = vpop.f32.mrb[126].mxu1  ;;  %v7005_v32 = vld [vmem:[#allocation7 + $0x3c0] sm:$0xff]  }
 0x374   : > { %3917 = vmatprep.mubr.bf16.mxu0 %v7272_v23  ;;  %v3221_v55 = vmax.f32 %v2577_v47, 0.0  ;;  %v2580_v35 = vadd.f32 %v6560_v54, %v884_v42  ;;  %v2571_v4 = vpop.f32.mrb[127].mxu1 }
 0x375   : > { %v3219_v63 = vmax.f32 %v2569_v44, 0.0  ;;  %v2572_v3 = vadd.f32 %v2571_v4, %v882_v22  ;;  %v7898_v4 = vld [vmem:[#allocation10 + $0x180] ss:$8 sps:$4 sm:$0xff]  }
 0x376   : > { %6666 = vmatmul.mubr.msk.bf16.gmra.mrb[232].mxu1 %vm1653_vm0, %v6999_v46  ;;  %v3649_v59 = vpop.f32.mrb[24].mxu0  ;;  %v3222_v7 = vmax.f32 %v2580_v35, 0.0 }
 0x377   : > { %3944 = vst [vmem:[%s7555_s26 + $0xc0] sm:$0xff] %v3649_v59  ;;  %v3651_v8 = vpop.f32.mrb[25].mxu0  ;;  %6669 = vmatprep.mubr.msk.bf16.mxu1 %vm1653_vm0, %v7000_v49  ;;  %v3220_v50 = vmax.f32 %v2572_v3, 0.0  ;;  %v889_v3 = vld [vmem:[#allocation8 + $0x420] sm:$0xff] }
 0x378   : > { %3945 = vst [vmem:[%s7555_s26 + $0xc8] sm:$0xff] %v3651_v8  ;;  %v3653_v13 = vpop.f32.mrb[26].mxu0  ;;  %v7886_v14 = vpack.c.bf16 %v3222_v7, %v3221_v55  ;;  %v891_v55 = vld [vmem:[#allocation8 + $0x430] sm:$0xff] }
 0x379   : > { %3946 = vst [vmem:[%s7555_s26 + $0xd0] sm:$0xff] %v3653_v13  ;;  %v3655_v18 = vpop.f32.mrb[27].mxu0  ;;  %v7889_v19 = vpack.c.bf16 %v3220_v50, %v3219_v63  ;;  %v6563_v24 = vpop.f32.mrb[128].mxu1  ;;  %v7905_v8 = vld [vmem:[#allocation10 + $0x194] ss:$8 sps:$4 sm:$0xff]   ;;  %v7006_v13 = vld [vmem:[#allocation7 + $0x3c8] sm:$0xff]  }
 0x37a   : > { %3947 = vst [vmem:[%s7555_s26 + $0xd8] sm:$0xff] %v3655_v18  ;;  %v2593_v20 = vadd.f32 %v6563_v24, %v887_v10  ;;  %v2584_v36 = vpop.f32.mrb[129].mxu1  ;;  %v892_v10 = vld [vmem:[#allocation8 + $0x438] sm:$0xff]  ;;  %v890_v24 = vld [vmem:[#allocation8 + $0x428] sm:$0xff] }
 0x37b   : > { %3918 = vmatmul.mubr.bf16.gmra.mrb[132].mxu0 %v7736_v48  ;;  %v2585_v39 = vadd.f32 %v2584_v36, %v885_v15  ;;  %v6564_v41 = vpop.f32.mrb[130].mxu1  ;;  %v7911_v36 = vld [vmem:[#allocation10 + $0x190] ss:$8 sps:$4 sm:$0xff]  }
 0x37c   : > { %4185 = vmatprep.mubr.bf16.mxu0 %v7272_v23  ;;  %v3225_v42 = vmax.f32 %v2593_v20, 0.0  ;;  %v2596_v46 = vadd.f32 %v6564_v41, %v888_v25  ;;  %v2587_v47 = vpop.f32.mrb[131].mxu1  ;;  %v7007_v25 = vld [vmem:[#allocation7 + $0x3d0] sm:$0xff]  }
 0x37d   : > { %v3223_v26 = vmax.f32 %v2585_v39, 0.0  ;;  %v2588_v22 = vadd.f32 %v2587_v47, %v886_v2 }
 0x37e   : > { %6670 = vmatmul.mubr.msk.bf16.gmra.mrb[236].mxu1 %vm1653_vm0, %v7001_v60  ;;  %v3659_v49 = vpop.f32.mrb[28].mxu0  ;;  %v3226_v44 = vmax.f32 %v2596_v46, 0.0 }
 0x37f   : > { %3948 = vst [vmem:[%s7555_s26 + $0xe0] sm:$0xff] %v3659_v49  ;;  %v3661_v54 = vpop.f32.mrb[29].mxu0  ;;  %6673 = vmatprep.mubr.msk.bf16.mxu1 %vm1653_vm0, %v7005_v32  ;;  %v3224_v48 = vmax.f32 %v2588_v22, 0.0  ;;  %v895_v49 = vld [vmem:[#allocation8 + $0x450] sm:$0xff] }
 0x380   : > { %3949 = vst [vmem:[%s7555_s26 + $0xe8] sm:$0xff] %v3661_v54  ;;  %v3663_v35 = vpop.f32.mrb[30].mxu0  ;;  %v7900_v63 = vpack.c.bf16 %v3226_v44, %v3225_v42 }
 0x381   : > { %3950 = vst [vmem:[%s7555_s26 + $0xf0] sm:$0xff] %v3663_v35  ;;  %v3665_v59 = vpop.f32.mrb[31].mxu0  ;;  %v7903_v7 = vpack.c.bf16 %v3224_v48, %v3223_v26  ;;  %v6567_v50 = vpop.f32.mrb[132].mxu1  ;;  %v893_v48 = vld [vmem:[#allocation8 + $0x440] sm:$0xff] }
 0x382   : > { %3951 = vst [vmem:[%s7555_s26 + $0xf8] sm:$0xff] %v3665_v59  ;;  %v2609_v15 = vadd.f32 %v6567_v50, %v891_v55  ;;  %v2600_v18 = vpop.f32.mrb[133].mxu1  ;;  %v7923_v55 = vld [vmem:[#allocation10 + $0x1a0] ss:$8 sps:$4 sm:$0xff]   ;;  %v896_v50 = vld [vmem:[#allocation8 + $0x458] sm:$0xff] }
 0x383   : > { %4186 = vmatmul.mubr.bf16.vlgmr.msra.gmra.mrb[136].mxu0 %v7746_v38  ;;  %v2601_v60 = vadd.f32 %v2600_v18, %v889_v3  ;;  %v6568_v20 = vpop.f32.mrb[134].mxu1  ;;  %v7914_v38 = vld [vmem:[#allocation10 + $0x1a4] ss:$8 sps:$4 sm:$0xff]  }
 0x384   : > { %5310 = vmatpush1.bf16.msra.mxu0 %v7898_v4  ;;  %4195 = vmatprep.mubr.bf16.mxu0 %v7272_v23  ;;  %v3229_v2 = vmax.f32 %v2609_v15, 0.0  ;;  %v2612_v32 = vadd.f32 %v6568_v20, %v892_v10  ;;  %v2603_v39 = vpop.f32.mrb[135].mxu1  ;;  %v7929_v10 = vld [vmem:[#allocation10 + $0x1b4] ss:$8 sps:$4 sm:$0xff]  }
 0x385   : > { %5311 = vmatprep.subr.bf16.mxu0 %v7905_v8  ;;  %v3227_v41 = vmax.f32 %v2601_v60, 0.0  ;;  %v2604_v42 = vadd.f32 %v2603_v39, %v890_v24  ;;  %v894_v24 = vld [vmem:[#allocation8 + $0x448] sm:$0xff] }
 0x386   : > { %6674 = vmatmul.mubr.msk.bf16.gmra.mrb[240].mxu1 %vm1653_vm0, %v7006_v13  ;;  %v3669_v46 = vpop.f32.mrb[32].mxu0  ;;  %v3230_v47 = vmax.f32 %v2612_v32, 0.0  ;;  %v7008_v13 = vld [vmem:[#allocation7 + $0x3d8] sm:$0xff]  }
 0x387   : > { %3952 = vst [vmem:[%s7555_s26 + $0x100] sm:$0xff] %v3669_v46  ;;  %v3671_v26 = vpop.f32.mrb[33].mxu0  ;;  %6677 = vmatprep.mubr.msk.bf16.mxu1 %vm1653_vm0, %v7007_v25  ;;  %v3228_v22 = vmax.f32 %v2604_v42, 0.0  ;;  %v7012_v25 = vld [vmem:[#allocation7 + $0x3e0] sm:$0xff]  }
 0x388   : > { %3953 = vst [vmem:[%s7555_s26 + $0x108] sm:$0xff] %v3671_v26  ;;  %v3673_v44 = vpop.f32.mrb[34].mxu0  ;;  %5312 = vmatpush1.bf16.msra.mxu0 %v7911_v36  ;;  %v7921_v54 = vpack.c.bf16 %v3230_v47, %v3229_v2 }
 0x389   : > { %3954 = vst [vmem:[%s7555_s26 + $0x110] sm:$0xff] %v3673_v44  ;;  %v3675_v35 = vpop.f32.mrb[35].mxu0  ;;  %v7926_v3 = vpack.c.bf16 %v3228_v22, %v3227_v41  ;;  %v6571_v59 = vpop.f32.mrb[136].mxu1  ;;  %5313 = vmatprep.subr.bf16.mxu0 %v7914_v38  ;;  %v7935_v41 = vld [vmem:[#allocation10 + $0x1b0] ss:$8 sps:$4 sm:$0xff]  }
 0x38a   : > { %3955 = vst [vmem:[%s7555_s26 + $0x118] sm:$0xff] %v3675_v35  ;;  %v2625_v15 = vadd.f32 %v6571_v59, %v895_v49  ;;  %v2616_v18 = vpop.f32.mrb[137].mxu1  ;;  %v899_v44 = vld [vmem:[#allocation8 + $0x470] sm:$0xff]  ;;  %v897_v59 = vld [vmem:[#allocation8 + $0x460] sm:$0xff] }
 0x38b   : > { %4196 = vmatmul.mubr.bf16.gmra.mrb[140].mxu0 %v7744_v9  ;;  %v2617_v60 = vadd.f32 %v2616_v18, %v893_v48  ;;  %v6572_v20 = vpop.f32.mrb[138].mxu1  ;;  %v7938_v9 = vld [vmem:[#allocation10 + $0x1c4] ss:$8 sps:$4 sm:$0xff]  }
 0x38c   : > { %4205 = vmatprep.mubr.bf16.mxu0 %v7272_v23  ;;  %v3233_v2 = vmax.f32 %v2625_v15, 0.0  ;;  %v2628_v32 = vadd.f32 %v6572_v20, %v896_v50  ;;  %v2619_v39 = vpop.f32.mrb[139].mxu1  ;;  %5314 = vmatpush1.bf16.msra.mxu0 %v7923_v55  ;;  %v7947_v50 = vld [vmem:[#allocation10 + $0x1c0] ss:$8 sps:$4 sm:$0xff]  }
 0x38d   : > { %v3231_v42 = vmax.f32 %v2617_v60, 0.0  ;;  %v2620_v46 = vadd.f32 %v2619_v39, %v894_v24  ;;  %5315 = vmatprep.subr.bf16.mxu0 %v7929_v10  ;;  %v900_v24 = vld [vmem:[#allocation8 + $0x478] sm:$0xff] }
 0x38e   : > { %6678 = vmatmul.mubr.msk.bf16.gmra.mrb[244].mxu1 %vm1653_vm0, %v7008_v13  ;;  %v3679_v47 = vpop.f32.mrb[36].mxu0  ;;  %v3234_v26 = vmax.f32 %v2628_v32, 0.0  ;;  %v7014_v32 = vld [vmem:[#allocation7 + $0x3f0] sm:$0xff]  }
 0x38f   : > { %3956 = vst [vmem:[%s7555_s26 + $0x120] sm:$0xff] %v3679_v47  ;;  %v3681_v22 = vpop.f32.mrb[37].mxu0  ;;  %6681 = vmatprep.mubr.msk.bf16.mxu1 %vm1653_vm0, %v7012_v25  ;;  %v3232_v49 = vmax.f32 %v2620_v46, 0.0  ;;  %v7013_v25 = vld [vmem:[#allocation7 + $0x3e8] sm:$0xff]  }
 0x390   : > { %3957 = vst [vmem:[%s7555_s26 + $0x128] sm:$0xff] %v3681_v22  ;;  %v3683_v48 = vpop.f32.mrb[38].mxu0  ;;  %v7944_v35 = vpack.c.bf16 %v3234_v26, %v3233_v2  ;;  %5316 = vmatpush1.bf16.msra.mxu0 %v7935_v41  ;;  %v898_v2 = vld [vmem:[#allocation8 + $0x468] sm:$0xff] }
 0x391   : > { %3958 = vst [vmem:[%s7555_s26 + $0x130] sm:$0xff] %v3683_v48  ;;  %v3685_v13 = vpop.f32.mrb[39].mxu0  ;;  %v7950_v15 = vpack.c.bf16 %v3232_v49, %v3231_v42  ;;  %v6575_v18 = vpop.f32.mrb[140].mxu1  ;;  %5317 = vmatprep.subr.bf16.mxu0 %v7938_v9 }
 0x392   : > { %3959 = vst [vmem:[%s7555_s26 + $0x138] sm:$0xff] %v3685_v13  ;;  %v2641_v60 = vadd.f32 %v6575_v18, %v899_v44  ;;  %v2632_v20 = vpop.f32.mrb[141].mxu1  ;;  %v903_v13 = vld [vmem:[#allocation8 + $0x490] sm:$0xff] }
 0x393   : > { %4206 = vmatmul.mubr.bf16.gmra.mrb[144].mxu0 %v7757_v40  ;;  %v2633_v39 = vadd.f32 %v2632_v20, %v897_v59  ;;  %v6576_v46 = vpop.f32.mrb[142].mxu1 }
 0x394   : > { %4215 = vmatprep.mubr.bf16.mxu0 %v7272_v23  ;;  %v3237_v42 = vmax.f32 %v2641_v60, 0.0  ;;  %v2644_v47 = vadd.f32 %v6576_v46, %v900_v24  ;;  %v2635_v26 = vpop.f32.mrb[143].mxu1  ;;  %5318 = vmatpush1.bf16.msra.mxu0 %v7947_v50  ;;  %v901_v60 = vld [vmem:[#allocation8 + $0x480] sm:$0xff]  ;;  %v7015_v46 = vld [vmem:[#allocation7 + $0x3f8] sm:$0xff]  }
 0x395   : > { %v3235_v22 = vmax.f32 %v2633_v39, 0.0  ;;  %v2636_v49 = vadd.f32 %v2635_v26, %v898_v2 }
 0x396   : > { %6682 = vmatmul.mubr.msk.bf16.gmra.mrb[248].mxu1 %vm1653_vm0, %v7013_v25  ;;  %v3689_v44 = vpop.f32.mrb[40].mxu0  ;;  %v3238_v48 = vmax.f32 %v2644_v47, 0.0  ;;  %v904_v25 = vld [vmem:[#allocation8 + $0x498] sm:$0xff] }
 0x397   : > { %3960 = vst [vmem:[%s7555_s26 + $0x140] sm:$0xff] %v3689_v44  ;;  %v3691_v40 = vpop.f32.mrb[41].mxu0  ;;  %6685 = vmatprep.mubr.msk.bf16.mxu1 %vm1653_vm0, %v7014_v32  ;;  %v3236_v59 = vmax.f32 %v2636_v49, 0.0  ;;  %v902_v44 = vld [vmem:[#allocation8 + $0x488] sm:$0xff] }
 0x398   : > { %3961 = vst [vmem:[%s7555_s26 + $0x148] sm:$0xff] %v3691_v40  ;;  %v3693_v18 = vpop.f32.mrb[42].mxu0  ;;  %v7961_v24 = vpack.c.bf16 %v3238_v48, %v3237_v42 }
 0x399   : > { %3962 = vst [vmem:[%s7555_s26 + $0x150] sm:$0xff] %v3693_v18  ;;  %v3695_v20 = vpop.f32.mrb[43].mxu0  ;;  %v7964_v39 = vpack.c.bf16 %v3236_v59, %v3235_v22  ;;  %v6579_v2 = vpop.f32.mrb[144].mxu1 }
 0x39a   : > { %3963 = vst [vmem:[%s7555_s26 + $0x158] sm:$0xff] %v3695_v20  ;;  %v2657_v47 = vadd.f32 %v6579_v2, %v903_v13  ;;  %v2648_v26 = vpop.f32.mrb[145].mxu1 }
 0x39b   : > { %4216 = vmatmul.mubr.bf16.gmra.mrb[148].mxu0 %v7755_v1  ;;  %v2649_v32 = vadd.f32 %v2648_v26, %v901_v60  ;;  %v6580_v49 = vpop.f32.mrb[146].mxu1  ;;  %v907_v60 = vld [vmem:[#allocation8 + $0x4b0] sm:$0xff] }
 0x39c   : > { %4225 = vmatprep.mubr.bf16.mxu0 %v7272_v23  ;;  %v3241_v42 = vmax.f32 %v2657_v47, 0.0  ;;  %v2660_v48 = vadd.f32 %v6580_v49, %v904_v25  ;;  %v2651_v22 = vpop.f32.mrb[147].mxu1  ;;  %v905_v25 = vld [vmem:[#allocation8 + $0x4a0] sm:$0xff] }
 0x39d   : > { %v3239_v40 = vmax.f32 %v2649_v32, 0.0  ;;  %v2652_v59 = vadd.f32 %v2651_v22, %v902_v44  ;;  %v906_v22 = vld [vmem:[#allocation8 + $0x4a8] sm:$0xff] }
 0x39e   : > { %6686 = vmatmul.mubr.msk.bf16.gmra.mrb[252].mxu1 %vm1653_vm0, %v7015_v46  ;;  %v3699_v18 = vpop.f32.mrb[44].mxu0  ;;  %v3242_v13 = vmax.f32 %v2660_v48, 0.0  ;;  %v908_v46 = vld [vmem:[#allocation8 + $0x4b8] sm:$0xff] }
 0x39f   : > { %3964 = vst [vmem:[%s7555_s26 + $0x160] sm:$0xff] %v3699_v18  ;;  %v3701_v20 = vpop.f32.mrb[45].mxu0  ;;  %4763 = vmatprep.mubr.bf16.mxu1 %v7272_v23  ;;  %v3240_v1 = vmax.f32 %v2652_v59, 0.0  ;;  %v7979_v18 = vld [vmem:[#allocation10 + $0x1d0] ss:$8 sps:$4 sm:$0xff]  }
 0x3a0   : > { %3965 = vst [vmem:[%s7555_s26 + $0x168] sm:$0xff] %v3701_v20  ;;  %v3703_v2 = vpop.f32.mrb[46].mxu0  ;;  %v7973_v26 = vpack.c.bf16 %v3242_v13, %v3241_v42  ;;  %v7981_v59 = vld [vmem:[#allocation10 + $0x1d4] ss:$8 sps:$4 sm:$0xff]  }
 0x3a1   : > { %3966 = vst [vmem:[%s7555_s26 + $0x170] sm:$0xff] %v3703_v2  ;;  %v3705_v47 = vpop.f32.mrb[47].mxu0  ;;  %v7976_v32 = vpack.c.bf16 %v3240_v1, %v3239_v40  ;;  %v6583_v44 = vpop.f32.mrb[148].mxu1  ;;  %5319 = vmatprep.subr.bf16.mxu0 %v7981_v59 }
 0x3a2   : > { %3967 = vst [vmem:[%s7555_s26 + $0x178] sm:$0xff] %v3705_v47  ;;  %v2673_v49 = vadd.f32 %v6583_v44, %v907_v60  ;;  %v2664_v48 = vpop.f32.mrb[149].mxu1  ;;  %5320 = vmatpush1.bf16.msra.mxu0 %v7979_v18 }
 0x3a3   : > { %4226 = vmatmul.mubr.bf16.gmra.mrb[152].mxu0 %v7765_v21  ;;  %v2665_v42 = vadd.f32 %v2664_v48, %v905_v25  ;;  %v6584_v13 = vpop.f32.mrb[150].mxu1 }
 0x3a4   : > { %4235 = vmatprep.mubr.bf16.mxu0 %v7272_v23  ;;  %v3245_v20 = vmax.f32 %v2673_v49, 0.0  ;;  %v2676_v40 = vadd.f32 %v6584_v13, %v908_v46  ;;  %v2667_v1 = vpop.f32.mrb[151].mxu1  ;;  %v911_v49 = vld [vmem:[#allocation8 + $0x4d0] sm:$0xff] }
 0x3a5   : > { %v3243_v60 = vmax.f32 %v2665_v42, 0.0  ;;  %v2668_v2 = vadd.f32 %v2667_v1, %v906_v22  ;;  %v909_v22 = vld [vmem:[#allocation8 + $0x4c0] sm:$0xff] }
 0x3a6   : > { %v3709_v47 = vpop.f32.mrb[48].mxu0  ;;  %4764 = vmatmul.mubr.bf16.vlgmr.msra.gmra.mrb[0].mxu1 %v7903_v7  ;;  %v3246_v44 = vmax.f32 %v2676_v40, 0.0  ;;  %v912_v40 = vld [vmem:[#allocation8 + $0x4d8] sm:$0xff] }
 0x3a7   : > { %3968 = vst [vmem:[%s7555_s26 + $0x180] sm:$0xff] %v3709_v47  ;;  %v3711_v21 = vpop.f32.mrb[49].mxu0  ;;  %4773 = vmatprep.mubr.bf16.mxu1 %v7272_v23  ;;  %v3244_v25 = vmax.f32 %v2668_v2, 0.0  ;;  %6697 = vmatpush1.bf16.msra.mxu1 %v7898_v4  ;;  %v910_v2 = vld [vmem:[#allocation8 + $0x4c8] sm:$0xff] }
 0x3a8   : > { %3969 = vst [vmem:[%s7555_s26 + $0x188] sm:$0xff] %v3711_v21  ;;  %v3713_v46 = vpop.f32.mrb[50].mxu0  ;;  %v7992_v48 = vpack.c.bf16 %v3246_v44, %v3245_v20  ;;  %6690 = vmatprep.subr.bf16.mxu1 %v7905_v8 }
 0x3a9   : > { %3970 = vst [vmem:[%s7555_s26 + $0x190] sm:$0xff] %v3713_v46  ;;  %v3715_v42 = vpop.f32.mrb[51].mxu0  ;;  %v7996_v7 = vpack.c.bf16 %v3244_v25, %v3243_v60  ;;  %v6587_v13 = vpop.f32.mrb[152].mxu1 }
 0x3aa   : > { %3971 = vst [vmem:[%s7555_s26 + $0x198] sm:$0xff] %v3715_v42  ;;  %v2689_v1 = vadd.f32 %v6587_v13, %v911_v49  ;;  %v2680_v47 = vpop.f32.mrb[153].mxu1 }
 0x3ab   : > { %4236 = vmatmul.mubr.bf16.gmra.mrb[156].mxu0 %v7763_v62  ;;  %v2681_v4 = vadd.f32 %v2680_v47, %v909_v22  ;;  %v6588_v21 = vpop.f32.mrb[154].mxu1  ;;  %6698 = vmatpush1.bf16.msra.mxu1 %v7911_v36  ;;  %v915_v22 = vld [vmem:[#allocation8 + $0x4f0] sm:$0xff]  ;;  %v916_v47 = vld [vmem:[#allocation8 + $0x4f8] sm:$0xff] }
 0x3ac   : > { %4245 = vmatprep.mubr.bf16.mxu0 %v7272_v23  ;;  %v3249_v8 = vmax.f32 %v2689_v1, 0.0  ;;  %v2692_v20 = vadd.f32 %v6588_v21, %v912_v40  ;;  %v2683_v60 = vpop.f32.mrb[155].mxu1  ;;  %6691 = vmatprep.subr.bf16.mxu1 %v7914_v38  ;;  %v913_v38 = vld [vmem:[#allocation8 + $0x4e0] sm:$0xff]  ;;  %v914_v21 = vld [vmem:[#allocation8 + $0x4e8] sm:$0xff] }
 0x3ad   : > { %v3247_v44 = vmax.f32 %v2681_v4, 0.0  ;;  %v2684_v25 = vadd.f32 %v2683_v60, %v910_v2 }
 0x3ae   : > { %v3719_v49 = vpop.f32.mrb[52].mxu0  ;;  %4774 = vmatmul.mubr.bf16.gmra.mrb[4].mxu1 %v7900_v63  ;;  %v3250_v46 = vmax.f32 %v2692_v20, 0.0 }
 0x3af   : > { %3972 = vst [vmem:[%s7555_s26 + $0x1a0] sm:$0xff] %v3719_v49  ;;  %v3721_v62 = vpop.f32.mrb[53].mxu0  ;;  %4783 = vmatprep.mubr.bf16.mxu1 %v7272_v23  ;;  %v3248_v36 = vmax.f32 %v2684_v25, 0.0  ;;  %6699 = vmatpush1.bf16.msra.mxu1 %v7923_v55 }
 0x3b0   : > { %3973 = vst [vmem:[%s7555_s26 + $0x1a8] sm:$0xff] %v3721_v62  ;;  %v3723_v42 = vpop.f32.mrb[54].mxu0  ;;  %v8008_v13 = vpack.c.bf16 %v3250_v46, %v3249_v8  ;;  %6692 = vmatprep.subr.bf16.mxu1 %v7929_v10  ;;  %v919_v62 = vld [vmem:[#allocation8 + $0x510] sm:$0xff] }
 0x3b1   : > { %3974 = vst [vmem:[%s7555_s26 + $0x1b0] sm:$0xff] %v3723_v42  ;;  %v3725_v40 = vpop.f32.mrb[55].mxu0  ;;  %v8012_v63 = vpack.c.bf16 %v3248_v36, %v3247_v44  ;;  %v6591_v1 = vpop.f32.mrb[156].mxu1 }
 0x3b2   : > { %3975 = vst [vmem:[%s7555_s26 + $0x1b8] sm:$0xff] %v3725_v40  ;;  %v2705_v2 = vadd.f32 %v6591_v1, %v915_v22  ;;  %v2696_v4 = vpop.f32.mrb[157].mxu1  ;;  %v920_v40 = vld [vmem:[#allocation8 + $0x518] sm:$0xff] }
 0x3b3   : > { %4246 = vmatmul.mubr.bf16.gmra.mrb[160].mxu0 %v7773_v34  ;;  %v2697_v55 = vadd.f32 %v2696_v4, %v913_v38  ;;  %v6592_v20 = vpop.f32.mrb[158].mxu1  ;;  %6700 = vmatpush1.bf16.msra.mxu1 %v7935_v41 }
 0x3b4   : > { %4255 = vmatprep.mubr.bf16.mxu0 %v7272_v23  ;;  %v3253_v10 = vmax.f32 %v2705_v2, 0.0  ;;  %v2708_v8 = vadd.f32 %v6592_v20, %v916_v47  ;;  %v2699_v60 = vpop.f32.mrb[159].mxu1  ;;  %6693 = vmatprep.subr.bf16.mxu1 %v7938_v9  ;;  %v917_v9 = vld [vmem:[#allocation8 + $0x500] sm:$0xff]  ;;  %v918_v2 = vld [vmem:[#allocation8 + $0x508] sm:$0xff] }
 0x3b5   : > { %v3251_v44 = vmax.f32 %v2697_v55, 0.0  ;;  %v2700_v25 = vadd.f32 %v2699_v60, %v914_v21 }
 0x3b6   : > { %v3729_v49 = vpop.f32.mrb[56].mxu0  ;;  %4784 = vmatmul.mubr.bf16.gmra.mrb[8].mxu1 %v7926_v3  ;;  %v3254_v46 = vmax.f32 %v2708_v8, 0.0 }
 0x3b7   : > { %3976 = vst [vmem:[%s7555_s26 + $0x1c0] sm:$0xff] %v3729_v49  ;;  %v3731_v34 = vpop.f32.mrb[57].mxu0  ;;  %4793 = vmatprep.mubr.bf16.mxu1 %v7272_v23  ;;  %v3252_v41 = vmax.f32 %v2700_v25, 0.0  ;;  %6701 = vmatpush1.bf16.msra.mxu1 %v7947_v50  ;;  %v923_v25 = vld [vmem:[#allocation8 + $0x530] sm:$0xff] }
 0x3b8   : > { %3977 = vst [vmem:[%s7555_s26 + $0x1c8] sm:$0xff] %v3731_v34  ;;  %v3733_v36 = vpop.f32.mrb[58].mxu0  ;;  %v8024_v22 = vpack.c.bf16 %v3254_v46, %v3253_v10  ;;  %6694 = vmatprep.subr.bf16.mxu1 %v7981_v59  ;;  %v921_v46 = vld [vmem:[#allocation8 + $0x520] sm:$0xff] }
 0x3b9   : > { %3978 = vst [vmem:[%s7555_s26 + $0x1d0] sm:$0xff] %v3733_v36  ;;  %v3735_v42 = vpop.f32.mrb[59].mxu0  ;;  %v8028_v3 = vpack.c.bf16 %v3252_v41, %v3251_v44  ;;  %v6595_v38 = vpop.f32.mrb[160].mxu1  ;;  %v924_v36 = vld [vmem:[#allocation8 + $0x538] sm:$0xff] }
 0x3ba   : > { %3979 = vst [vmem:[%s7555_s26 + $0x1d8] sm:$0xff] %v3735_v42  ;;  %v2721_v1 = vadd.f32 %v6595_v38, %v919_v62  ;;  %v2712_v47 = vpop.f32.mrb[161].mxu1  ;;  %v922_v42 = vld [vmem:[#allocation8 + $0x528] sm:$0xff] }
 0x3bb   : > { %4256 = vmatmul.mubr.bf16.gmra.mrb[164].mxu0 %v7771_v31  ;;  %v2713_v50 = vadd.f32 %v2712_v47, %v917_v9  ;;  %v6596_v4 = vpop.f32.mrb[162].mxu1  ;;  %6702 = vmatpush1.bf16.msra.mxu1 %v7979_v18  ;;  %v7037_v38 = vld [vmem:[#allocation10 + $0x1e0] ss:$8 sps:$4 sm:$0xff]  }
 0x3bc   : > { %4265 = vmatprep.mubr.bf16.mxu0 %v7272_v23  ;;  %v3257_v59 = vmax.f32 %v2721_v1, 0.0  ;;  %v2724_v21 = vadd.f32 %v6596_v4, %v920_v40  ;;  %v2715_v55 = vpop.f32.mrb[163].mxu1  ;;  %v7039_v40 = vld [vmem:[#allocation10 + $0x1e4] ss:$8 sps:$4 sm:$0xff]  }
 0x3bd   : > { %v3255_v20 = vmax.f32 %v2713_v50, 0.0  ;;  %v2716_v10 = vadd.f32 %v2715_v55, %v918_v2  ;;  %5321 = vmatprep.subr.bf16.mxu0 %v7039_v40  ;;  %6695 = vmatprep.subr.bf16.mxu1 %v7039_v40 }
 0x3be   : > { %v3739_v8 = vpop.f32.mrb[60].mxu0  ;;  %4794 = vmatmul.mubr.bf16.gmra.mrb[12].mxu1 %v7921_v54  ;;  %v3258_v60 = vmax.f32 %v2724_v21, 0.0  ;;  %5322 = vmatpush1.bf16.msra.mxu0 %v7037_v38 }
 0x3bf   : > { %3980 = vst [vmem:[%s7555_s26 + $0x1e0] sm:$0xff] %v3739_v8  ;;  %v3741_v31 = vpop.f32.mrb[61].mxu0  ;;  %4803 = vmatprep.mubr.bf16.mxu1 %v7272_v23  ;;  %v3256_v44 = vmax.f32 %v2716_v10, 0.0  ;;  %v927_v8 = vld [vmem:[#allocation8 + $0x550] sm:$0xff]  ;;  %6703 = vmatpush1.bf16.msra.mxu1 %v7037_v38 }
 0x3c0   : > { %3981 = vst [vmem:[%s7555_s26 + $0x1e8] sm:$0xff] %v3741_v31  ;;  %v3743_v18 = vpop.f32.mrb[62].mxu0  ;;  %v8038_v49 = vpack.c.bf16 %v3258_v60, %v3257_v59 }
 0x3c1   : > { %3982 = vst [vmem:[%s7555_s26 + $0x1f0] sm:$0xff] %v3743_v18  ;;  %v3745_v34 = vpop.f32.mrb[63].mxu0  ;;  %v8041_v41 = vpack.c.bf16 %v3256_v44, %v3255_v20  ;;  %v6599_v62 = vpop.f32.mrb[164].mxu1  ;;  %v925_v44 = vld [vmem:[#allocation8 + $0x540] sm:$0xff] }
 0x3c2   : > { %3983 = vst [vmem:[%s7555_s26 + $0x1f8] sm:$0xff] %v3745_v34  ;;  %v2737_v54 = vadd.f32 %v6599_v62, %v923_v25  ;;  %v2728_v9 = vpop.f32.mrb[165].mxu1 }
 0x3c3   : > { %4266 = vmatmul.mubr.bf16.gmra.mrb[168].mxu0 %v7781_v6  ;;  %v2729_v1 = vadd.f32 %v2728_v9, %v921_v46  ;;  %v6600_v47 = vpop.f32.mrb[166].mxu1 }
 0x3c4   : > { %4275 = vmatprep.mubr.bf16.mxu0 %v7272_v23  ;;  %v3261_v2 = vmax.f32 %v2737_v54, 0.0  ;;  %v2740_v50 = vadd.f32 %v6600_v47, %v924_v36  ;;  %v2731_v4 = vpop.f32.mrb[167].mxu1  ;;  %v926_v36 = vld [vmem:[#allocation8 + $0x548] sm:$0xff] }
 0x3c5   : > { %v3259_v59 = vmax.f32 %v2729_v1, 0.0  ;;  %v2732_v21 = vadd.f32 %v2731_v4, %v922_v42 }
 0x3c6   : > { %v3749_v55 = vpop.f32.mrb[64].mxu0  ;;  %4804 = vmatmul.mubr.bf16.gmra.mrb[16].mxu1 %v7950_v15  ;;  %v3262_v20 = vmax.f32 %v2740_v50, 0.0  ;;  %v928_v15 = vld [vmem:[#allocation8 + $0x558] sm:$0xff] }
 0x3c7   : > { %3984 = vst [vmem:[%s7555_s26 + $0x200] sm:$0xff] %v3749_v55  ;;  %v3751_v6 = vpop.f32.mrb[65].mxu0  ;;  %4813 = vmatprep.mubr.bf16.mxu1 %v7272_v23  ;;  %v3260_v10 = vmax.f32 %v2732_v21, 0.0 }
 0x3c8   : > { %3985 = vst [vmem:[%s7555_s26 + $0x208] sm:$0xff] %v3751_v6  ;;  %v3753_v60 = vpop.f32.mrb[66].mxu0  ;;  %v8050_v31 = vpack.c.bf16 %v3262_v20, %v3261_v2  ;;  %v929_v20 = vld [vmem:[#allocation8 + $0x560] sm:$0xff] }
 0x3c9   : > { %3986 = vst [vmem:[%s7555_s26 + $0x210] sm:$0xff] %v3753_v60  ;;  %v3755_v25 = vpop.f32.mrb[67].mxu0  ;;  %v8053_v18 = vpack.c.bf16 %v3260_v10, %v3259_v59  ;;  %v6603_v46 = vpop.f32.mrb[168].mxu1  ;;  %v931_v59 = vld [vmem:[#allocation8 + $0x570] sm:$0xff]  ;;  %v932_v60 = vld [vmem:[#allocation8 + $0x578] sm:$0xff] }
 0x3ca   : > { %3987 = vst [vmem:[%s7555_s26 + $0x218] sm:$0xff] %v3755_v25  ;;  %v2753_v34 = vadd.f32 %v6603_v46, %v927_v8  ;;  %v2744_v62 = vpop.f32.mrb[169].mxu1  ;;  %v930_v25 = vld [vmem:[#allocation8 + $0x568] sm:$0xff] }
 0x3cb   : > { %4276 = vmatmul.mubr.bf16.gmra.mrb[172].mxu0 %v7779_v61  ;;  %v2745_v54 = vadd.f32 %v2744_v62, %v925_v44  ;;  %v6604_v9 = vpop.f32.mrb[170].mxu1 }
 0x3cc   : > { %4285 = vmatprep.mubr.bf16.mxu0 %v7272_v23  ;;  %v3265_v42 = vmax.f32 %v2753_v34, 0.0  ;;  %v2756_v38 = vadd.f32 %v6604_v9, %v928_v15  ;;  %v2747_v40 = vpop.f32.mrb[171].mxu1 }
 0x3cd   : > { %v3263_v1 = vmax.f32 %v2745_v54, 0.0  ;;  %v2748_v47 = vadd.f32 %v2747_v40, %v926_v36 }
 0x3ce   : > { %v3759_v2 = vpop.f32.mrb[68].mxu0  ;;  %4814 = vmatmul.mubr.bf16.gmra.mrb[20].mxu1 %v7944_v35  ;;  %v3266_v50 = vmax.f32 %v2756_v38, 0.0 }
 0x3cf   : > { %3988 = vst [vmem:[%s7555_s26 + $0x220] sm:$0xff] %v3759_v2  ;;  %v3761_v4 = vpop.f32.mrb[69].mxu0  ;;  %4823 = vmatprep.mubr.bf16.mxu1 %v7272_v23  ;;  %v3264_v61 = vmax.f32 %v2748_v47, 0.0 }
 0x3d0   : > { %3989 = vst [vmem:[%s7555_s26 + $0x228] sm:$0xff] %v3761_v4  ;;  %v3763_v21 = vpop.f32.mrb[70].mxu0  ;;  %v8062_v55 = vpack.c.bf16 %v3266_v50, %v3265_v42  ;;  %v933_v50 = vld [vmem:[#allocation8 + $0x580] sm:$0xff] }
 0x3d1   : > { %3990 = vst [vmem:[%s7555_s26 + $0x230] sm:$0xff] %v3763_v21  ;;  %v3765_v6 = vpop.f32.mrb[71].mxu0  ;;  %v8065_v10 = vpack.c.bf16 %v3264_v61, %v3263_v1  ;;  %v6607_v8 = vpop.f32.mrb[172].mxu1  ;;  %v935_v1 = vld [vmem:[#allocation8 + $0x590] sm:$0xff]  ;;  %v936_v21 = vld [vmem:[#allocation8 + $0x598] sm:$0xff] }
 0x3d2   : > { %3991 = vst [vmem:[%s7555_s26 + $0x238] sm:$0xff] %v3765_v6  ;;  %v2769_v35 = vadd.f32 %v6607_v8, %v931_v59  ;;  %v2760_v44 = vpop.f32.mrb[173].mxu1  ;;  %v934_v6 = vld [vmem:[#allocation8 + $0x588] sm:$0xff] }
 0x3d3   : > { %4286 = vmatmul.mubr.bf16.gmra.mrb[176].mxu0 %v7790_v5  ;;  %v2761_v46 = vadd.f32 %v2760_v44, %v929_v20  ;;  %v6608_v15 = vpop.f32.mrb[174].mxu1 }
 0x3d4   : > { %4295 = vmatprep.mubr.bf16.mxu0 %v7272_v23  ;;  %v3269_v34 = vmax.f32 %v2769_v35, 0.0  ;;  %v2772_v62 = vadd.f32 %v6608_v15, %v932_v60  ;;  %v2763_v36 = vpop.f32.mrb[175].mxu1 }
 0x3d5   : > { %v3267_v54 = vmax.f32 %v2761_v46, 0.0  ;;  %v2764_v9 = vadd.f32 %v2763_v36, %v930_v25 }
 0x3d6   : > { %v3769_v42 = vpop.f32.mrb[72].mxu0  ;;  %4824 = vmatmul.mubr.bf16.gmra.mrb[24].mxu1 %v7964_v39  ;;  %v3270_v38 = vmax.f32 %v2772_v62, 0.0 }
 0x3d7   : > { %3992 = vst [vmem:[%s7555_s26 + $0x240] sm:$0xff] %v3769_v42  ;;  %v3771_v40 = vpop.f32.mrb[73].mxu0  ;;  %4833 = vmatprep.mubr.bf16.mxu1 %v7272_v23  ;;  %v3268_v5 = vmax.f32 %v2764_v9, 0.0 }
 0x3d8   : > { %3993 = vst [vmem:[%s7555_s26 + $0x248] sm:$0xff] %v3771_v40  ;;  %v3773_v47 = vpop.f32.mrb[74].mxu0  ;;  %v8074_v2 = vpack.c.bf16 %v3270_v38, %v3269_v34  ;;  %v937_v38 = vld [vmem:[#allocation8 + $0x5a0] sm:$0xff] }
 0x3d9   : > { %3994 = vst [vmem:[%s7555_s26 + $0x250] sm:$0xff] %v3773_v47  ;;  %v3775_v4 = vpop.f32.mrb[75].mxu0  ;;  %v8077_v61 = vpack.c.bf16 %v3268_v5, %v3267_v54  ;;  %v6611_v59 = vpop.f32.mrb[176].mxu1  ;;  %v939_v54 = vld [vmem:[#allocation8 + $0x5b0] sm:$0xff]  ;;  %v940_v47 = vld [vmem:[#allocation8 + $0x5b8] sm:$0xff] }
 0x3da   : > { %3995 = vst [vmem:[%s7555_s26 + $0x258] sm:$0xff] %v3775_v4  ;;  %v2785_v39 = vadd.f32 %v6611_v59, %v935_v1  ;;  %v2776_v20 = vpop.f32.mrb[177].mxu1  ;;  %v938_v4 = vld [vmem:[#allocation8 + $0x5a8] sm:$0xff]  ;;  %v7040_v59 = vld [vmem:[#allocation10 + $0x1f0] ss:$8 sps:$4 sm:$0xff]  }
 0x3db   : > { %4296 = vmatmul.mubr.bf16.gmra.mrb[180].mxu0 %v7788_v45  ;;  %v2777_v8 = vadd.f32 %v2776_v20, %v933_v50  ;;  %v6612_v60 = vpop.f32.mrb[178].mxu1 }
 0x3dc   : > { %4305 = vmatprep.mubr.bf16.mxu0 %v7272_v23  ;;  %v3273_v35 = vmax.f32 %v2785_v39, 0.0  ;;  %v2788_v44 = vadd.f32 %v6612_v60, %v936_v21  ;;  %v2779_v25 = vpop.f32.mrb[179].mxu1  ;;  %v7042_v21 = vld [vmem:[#allocation10 + $0x1f4] ss:$8 sps:$4 sm:$0xff]  }
 0x3dd   : > { %v3271_v46 = vmax.f32 %v2777_v8, 0.0  ;;  %v2780_v15 = vadd.f32 %v2779_v25, %v934_v6  ;;  %5323 = vmatprep.subr.bf16.mxu0 %v7042_v21  ;;  %6696 = vmatprep.subr.bf16.mxu1 %v7042_v21 }
 0x3de   : > { %v3779_v34 = vpop.f32.mrb[76].mxu0  ;;  %4834 = vmatmul.mubr.bf16.gmra.mrb[28].mxu1 %v7961_v24  ;;  %v3274_v62 = vmax.f32 %v2788_v44, 0.0  ;;  %5324 = vmatpush1.bf16.msra.mxu0 %v7040_v59 }
 0x3df   : > { %3996 = vst [vmem:[%s7555_s26 + $0x260] sm:$0xff] %v3779_v34  ;;  %v3781_v36 = vpop.f32.mrb[77].mxu0  ;;  %4843 = vmatprep.mubr.bf16.mxu1 %v7272_v23  ;;  %v3272_v45 = vmax.f32 %v2780_v15, 0.0  ;;  %v943_v34 = vld [vmem:[#allocation8 + $0x5d0] sm:$0xff]  ;;  %6704 = vmatpush1.bf16.msra.mxu1 %v7040_v59 }
 0x3e0   : > { %3997 = vst [vmem:[%s7555_s26 + $0x268] sm:$0xff] %v3781_v36  ;;  %v3783_v9 = vpop.f32.mrb[78].mxu0  ;;  %v8086_v42 = vpack.c.bf16 %v3274_v62, %v3273_v35 }
 0x3e1   : > { %3998 = vst [vmem:[%s7555_s26 + $0x270] sm:$0xff] %v3783_v9  ;;  %v3785_v40 = vpop.f32.mrb[79].mxu0  ;;  %v8089_v5 = vpack.c.bf16 %v3272_v45, %v3271_v46  ;;  %v6615_v1 = vpop.f32.mrb[180].mxu1  ;;  %v941_v45 = vld [vmem:[#allocation8 + $0x5c0] sm:$0xff] }
 0x3e2   : > { %3999 = vst [vmem:[%s7555_s26 + $0x278] sm:$0xff] %v3785_v40  ;;  %v2801_v24 = vadd.f32 %v6615_v1, %v939_v54  ;;  %v2792_v50 = vpop.f32.mrb[181].mxu1 }
 0x3e3   : > { %4306 = vmatmul.mubr.bf16.gmra.mrb[184].mxu0 %v7798_v0  ;;  %v2793_v39 = vadd.f32 %v2792_v50, %v937_v38  ;;  %v6616_v20 = vpop.f32.mrb[182].mxu1 }
 0x3e4   : > { %4315 = vmatprep.mubr.bf16.mxu0 %v7272_v23  ;;  %v3277_v6 = vmax.f32 %v2801_v24, 0.0  ;;  %v2804_v8 = vadd.f32 %v6616_v20, %v940_v47  ;;  %v2795_v60 = vpop.f32.mrb[183].mxu1  ;;  %v942_v47 = vld [vmem:[#allocation8 + $0x5c8] sm:$0xff] }
 0x3e5   : > { %v3275_v35 = vmax.f32 %v2793_v39, 0.0  ;;  %v2796_v44 = vadd.f32 %v2795_v60, %v938_v4 }
 0x3e6   : > { %v3789_v25 = vpop.f32.mrb[80].mxu0  ;;  %4844 = vmatmul.mubr.bf16.gmra.mrb[32].mxu1 %v7976_v32  ;;  %v3278_v46 = vmax.f32 %v2804_v8, 0.0  ;;  %v944_v32 = vld [vmem:[#allocation8 + $0x5d8] sm:$0xff] }
 0x3e7   : > { %4000 = vst [vmem:[%s7555_s26 + $0x280] sm:$0xff] %v3789_v25  ;;  %v3791_v0 = vpop.f32.mrb[81].mxu0  ;;  %4853 = vmatprep.mubr.bf16.mxu1 %v7272_v23  ;;  %v3276_v15 = vmax.f32 %v2796_v44, 0.0 }
 0x3e8   : > { %4001 = vst [vmem:[%s7555_s26 + $0x288] sm:$0xff] %v3791_v0  ;;  %v3793_v62 = vpop.f32.mrb[82].mxu0  ;;  %v8098_v36 = vpack.c.bf16 %v3278_v46, %v3277_v6  ;;  %v945_v46 = vld [vmem:[#allocation8 + $0x5e0] sm:$0xff] }
 0x3e9   : > { %4002 = vst [vmem:[%s7555_s26 + $0x290] sm:$0xff] %v3793_v62  ;;  %v3795_v54 = vpop.f32.mrb[83].mxu0  ;;  %v8101_v9 = vpack.c.bf16 %v3276_v15, %v3275_v35  ;;  %v6619_v38 = vpop.f32.mrb[184].mxu1  ;;  %v947_v35 = vld [vmem:[#allocation8 + $0x5f0] sm:$0xff]  ;;  %v948_v62 = vld [vmem:[#allocation8 + $0x5f8] sm:$0xff] }
 0x3ea   : > { %4003 = vst [vmem:[%s7555_s26 + $0x298] sm:$0xff] %v3795_v54  ;;  %v2817_v40 = vadd.f32 %v6619_v38, %v943_v34  ;;  %v2808_v1 = vpop.f32.mrb[185].mxu1  ;;  %v946_v54 = vld [vmem:[#allocation8 + $0x5e8] sm:$0xff] }
 0x3eb   : > { %4316 = vmatmul.mubr.bf16.gmra.mrb[188].mxu0 %v7796_v28  ;;  %v2809_v24 = vadd.f32 %v2808_v1, %v941_v45  ;;  %v6620_v50 = vpop.f32.mrb[186].mxu1 }
 0x3ec   : > { %4325 = vmatprep.mubr.bf16.mxu0 %v7272_v23  ;;  %v3281_v4 = vmax.f32 %v2817_v40, 0.0  ;;  %v2820_v59 = vadd.f32 %v6620_v50, %v944_v32  ;;  %v2811_v21 = vpop.f32.mrb[187].mxu1 }
 0x3ed   : > { %v3279_v39 = vmax.f32 %v2809_v24, 0.0  ;;  %v2812_v20 = vadd.f32 %v2811_v21, %v942_v47 }
 0x3ee   : > { %v3799_v6 = vpop.f32.mrb[84].mxu0  ;;  %4854 = vmatmul.mubr.bf16.gmra.mrb[36].mxu1 %v7973_v26  ;;  %v3282_v8 = vmax.f32 %v2820_v59, 0.0 }
 0x3ef   : > { %4004 = vst [vmem:[%s7555_s26 + $0x2a0] sm:$0xff] %v3799_v6  ;;  %v3801_v60 = vpop.f32.mrb[85].mxu0  ;;  %4863 = vmatprep.mubr.bf16.mxu1 %v7272_v23  ;;  %v3280_v28 = vmax.f32 %v2812_v20, 0.0 }
 0x3f0   : > { %4005 = vst [vmem:[%s7555_s26 + $0x2a8] sm:$0xff] %v3801_v60  ;;  %v3803_v44 = vpop.f32.mrb[86].mxu0  ;;  %v8110_v25 = vpack.c.bf16 %v3282_v8, %v3281_v4  ;;  %v949_v8 = vld [vmem:[#allocation8 + $0x600] sm:$0xff] }
 0x3f1   : > { %4006 = vst [vmem:[%s7555_s26 + $0x2b0] sm:$0xff] %v3803_v44  ;;  %v3805_v0 = vpop.f32.mrb[87].mxu0  ;;  %v8113_v15 = vpack.c.bf16 %v3280_v28, %v3279_v39  ;;  %v6623_v34 = vpop.f32.mrb[188].mxu1  ;;  %v951_v39 = vld [vmem:[#allocation8 + $0x610] sm:$0xff]  ;;  %v952_v44 = vld [vmem:[#allocation8 + $0x618] sm:$0xff] }
 0x3f2   : > { %4007 = vst [vmem:[%s7555_s26 + $0x2b8] sm:$0xff] %v3805_v0  ;;  %v2833_v26 = vadd.f32 %v6623_v34, %v947_v35  ;;  %v2824_v45 = vpop.f32.mrb[189].mxu1  ;;  %v950_v0 = vld [vmem:[#allocation8 + $0x608] sm:$0xff] }
 0x3f3   : > { %4326 = vmatmul.mubr.bf16.gmra.mrb[192].mxu0 %v7806_v30  ;;  %v2825_v38 = vadd.f32 %v2824_v45, %v945_v46  ;;  %v6624_v32 = vpop.f32.mrb[190].mxu1 }
 0x3f4   : > { %4335 = vmatprep.mubr.bf16.mxu0 %v7272_v23  ;;  %v3285_v40 = vmax.f32 %v2833_v26, 0.0  ;;  %v2836_v1 = vadd.f32 %v6624_v32, %v948_v62  ;;  %v2827_v47 = vpop.f32.mrb[191].mxu1 }
 0x3f5   : > { %v3283_v24 = vmax.f32 %v2825_v38, 0.0  ;;  %v2828_v50 = vadd.f32 %v2827_v47, %v946_v54 }
 0x3f6   : > { %v3809_v4 = vpop.f32.mrb[88].mxu0  ;;  %4864 = vmatmul.mubr.bf16.gmra.mrb[40].mxu1 %v7996_v7  ;;  %v3286_v59 = vmax.f32 %v2836_v1, 0.0 }
 0x3f7   : > { %4008 = vst [vmem:[%s7555_s26 + $0x2c0] sm:$0xff] %v3809_v4  ;;  %v3811_v21 = vpop.f32.mrb[89].mxu0  ;;  %4873 = vmatprep.mubr.bf16.mxu1 %v7272_v23  ;;  %v3284_v30 = vmax.f32 %v2828_v50, 0.0 }
 0x3f8   : > { %4009 = vst [vmem:[%s7555_s26 + $0x2c8] sm:$0xff] %v3811_v21  ;;  %v3813_v20 = vpop.f32.mrb[90].mxu0  ;;  %v8122_v6 = vpack.c.bf16 %v3286_v59, %v3285_v40 }
 0x3f9   : > { %4010 = vst [vmem:[%s7555_s26 + $0x2d0] sm:$0xff] %v3813_v20  ;;  %v3815_v60 = vpop.f32.mrb[91].mxu0  ;;  %v8125_v28 = vpack.c.bf16 %v3284_v30, %v3283_v24  ;;  %v6627_v35 = vpop.f32.mrb[192].mxu1 }
 0x3fa   : > { %4011 = vst [vmem:[%s7555_s26 + $0x2d8] sm:$0xff] %v3815_v60  ;;  %v2849_v7 = vadd.f32 %v6627_v35, %v951_v39  ;;  %v2840_v46 = vpop.f32.mrb[193].mxu1  ;;  %v953_v60 = vld [vmem:[#allocation8 + $0x620] sm:$0xff] }
 0x3fb   : > { %4336 = vmatmul.mubr.bf16.gmra.mrb[196].mxu0 %v7804_v29  ;;  %v2841_v34 = vadd.f32 %v2840_v46, %v949_v8  ;;  %v6628_v62 = vpop.f32.mrb[194].mxu1 }
 0x3fc   : > { %4345 = vmatprep.mubr.bf16.mxu0 %v7272_v23  ;;  %v3289_v26 = vmax.f32 %v2849_v7, 0.0  ;;  %v2852_v45 = vadd.f32 %v6628_v62, %v952_v44  ;;  %v2843_v54 = vpop.f32.mrb[195].mxu1 }
 0x3fd   : > { %v3287_v38 = vmax.f32 %v2841_v34, 0.0  ;;  %v2844_v32 = vadd.f32 %v2843_v54, %v950_v0 }
 0x3fe   : > { %v3819_v40 = vpop.f32.mrb[92].mxu0  ;;  %4874 = vmatmul.mubr.bf16.gmra.mrb[44].mxu1 %v7992_v48  ;;  %v3290_v1 = vmax.f32 %v2852_v45, 0.0  ;;  %v955_v48 = vld [vmem:[#allocation8 + $0x630] sm:$0xff] }
 0x3ff   : > { %4012 = vst [vmem:[%s7555_s26 + $0x2e0] sm:$0xff] %v3819_v40  ;;  %v3821_v47 = vpop.f32.mrb[93].mxu0  ;;  %4883 = vmatprep.mubr.bf16.mxu1 %v7272_v23  ;;  %v3288_v29 = vmax.f32 %v2844_v32, 0.0 }
 0x400   : > { %4013 = vst [vmem:[%s7555_s26 + $0x2e8] sm:$0xff] %v3821_v47  ;;  %v3823_v24 = vpop.f32.mrb[94].mxu0  ;;  %v8134_v50 = vpack.c.bf16 %v3290_v1, %v3289_v26 }
 0x401   : > { %4014 = vst [vmem:[%s7555_s26 + $0x2f0] sm:$0xff] %v3823_v24  ;;  %v3825_v4 = vpop.f32.mrb[95].mxu0  ;;  %v8137_v59 = vpack.c.bf16 %v3288_v29, %v3287_v38  ;;  %v6631_v21 = vpop.f32.mrb[196].mxu1 }
 0x402   : > { %4015 = vst [vmem:[%s7555_s26 + $0x2f8] sm:$0xff] %v3825_v4  ;;  %v2865_v30 = vadd.f32 %v6631_v21, %v955_v48  ;;  %v2856_v8 = vpop.f32.mrb[197].mxu1  ;;  %v957_v48 = vld [vmem:[#allocation8 + $0x640] sm:$0xff]  ;;  %v960_v21 = vld [vmem:[#allocation8 + $0x658] sm:$0xff] }
 0x403   : > { %4346 = vmatmul.mubr.bf16.gmra.mrb[200].mxu0 %v7814_v51  ;;  %v2857_v44 = vadd.f32 %v2856_v8, %v953_v60  ;;  %v956_v51 = vld [vmem:[#allocation8 + $0x638] sm:$0xff]  ;;  %v6632_v7 = vpop.f32.mrb[198].mxu1 }
 0x404   : > { %4355 = vmatprep.mubr.bf16.mxu0 %v7272_v23  ;;  %v3293_v0 = vmax.f32 %v2865_v30, 0.0  ;;  %v2868_v34 = vadd.f32 %v6632_v7, %v956_v51  ;;  %v2859_v62 = vpop.f32.mrb[199].mxu1  ;;  %v958_v51 = vld [vmem:[#allocation8 + $0x648] sm:$0xff] }
 0x405   : > { %v3291_v26 = vmax.f32 %v2857_v44, 0.0 }
 0x406   : > { %v3829_v39 = vpop.f32.mrb[96].mxu0  ;;  %4884 = vmatmul.mubr.bf16.gmra.mrb[48].mxu1 %v8012_v63  ;;  %v954_v63 = vld [vmem:[#allocation8 + $0x628] sm:$0xff]  ;;  %v3294_v54 = vmax.f32 %v2868_v34, 0.0 }
 0x407   : > { %4016 = vst [vmem:[%s7555_s26 + $0x300] sm:$0xff] %v3829_v39  ;;  %v3831_v20 = vpop.f32.mrb[97].mxu0  ;;  %4893 = vmatprep.mubr.bf16.mxu1 %v7272_v23  ;;  %v2860_v45 = vadd.f32 %v2859_v62, %v954_v63  ;;  %v963_v62 = vld [vmem:[#allocation8 + $0x670] sm:$0xff] }
 0x408   : > { %4017 = vst [vmem:[%s7555_s26 + $0x308] sm:$0xff] %v3831_v20  ;;  %v3833_v35 = vpop.f32.mrb[98].mxu0  ;;  %v8150_v32 = vpack.c.bf16 %v3294_v54, %v3293_v0  ;;  %v961_v54 = vld [vmem:[#allocation8 + $0x660] sm:$0xff] }
 0x409   : > { %4018 = vst [vmem:[%s7555_s26 + $0x310] sm:$0xff] %v3833_v35  ;;  %v3835_v46 = vpop.f32.mrb[99].mxu0  ;;  %v3292_v38 = vmax.f32 %v2860_v45, 0.0  ;;  %v6635_v4 = vpop.f32.mrb[200].mxu1 }
 0x40a   : > { %4019 = vst [vmem:[%s7555_s26 + $0x318] sm:$0xff] %v3835_v46  ;;  %v2872_v30 = vpop.f32.mrb[201].mxu1 }
 0x40b   : > { %4356 = vmatmul.mubr.bf16.gmra.mrb[204].mxu0 %v7812_v56  ;;  %v8153_v1 = vpack.c.bf16 %v3292_v38, %v3291_v26  ;;  %v959_v56 = vld [vmem:[#allocation8 + $0x650] sm:$0xff]  ;;  %v2873_v39 = vadd.f32 %v2872_v30, %v957_v48  ;;  %v6636_v20 = vpop.f32.mrb[202].mxu1  ;;  %v965_v30 = vld [vmem:[#allocation8 + $0x680] sm:$0xff] }
 0x40c   : > { %4365 = vmatprep.mubr.bf16.mxu0 %v7272_v23  ;;  %v2884_v35 = vadd.f32 %v6636_v20, %v960_v21 }
 0x40d   : > { %v3295_v46 = vmax.f32 %v2873_v39, 0.0 }
 0x40e   : > { %v3839_v40 = vpop.f32.mrb[100].mxu0  ;;  %4894 = vmatmul.mubr.bf16.gmra.mrb[52].mxu1 %v8008_v13  ;;  %v2881_v13 = vadd.f32 %v6635_v4, %v959_v56  ;;  %v3298_v0 = vmax.f32 %v2884_v35, 0.0  ;;  %v962_v56 = vld [vmem:[#allocation8 + $0x668] sm:$0xff]  ;;  %v968_v35 = vld [vmem:[#allocation8 + $0x698] sm:$0xff] }
 0x40f   : > { %4020 = vst [vmem:[%s7555_s26 + $0x320] sm:$0xff] %v3839_v40  ;;  %v3841_v47 = vpop.f32.mrb[101].mxu0  ;;  %4903 = vmatprep.mubr.bf16.mxu1 %v7272_v23 }
 0x410   : > { %4021 = vst [vmem:[%s7555_s26 + $0x328] sm:$0xff] %v3841_v47  ;;  %v3843_v29 = vpop.f32.mrb[102].mxu0  ;;  %v3297_v60 = vmax.f32 %v2881_v13, 0.0  ;;  %v967_v13 = vld [vmem:[#allocation8 + $0x690] sm:$0xff] }
 0x411   : > { %4022 = vst [vmem:[%s7555_s26 + $0x330] sm:$0xff] %v3843_v29  ;;  %v3845_v24 = vpop.f32.mrb[103].mxu0  ;;  %v964_v29 = vld [vmem:[#allocation8 + $0x678] sm:$0xff] }
 0x412   : > { %4023 = vst [vmem:[%s7555_s26 + $0x338] sm:$0xff] %v3845_v24  ;;  %v8168_v38 = vpack.c.bf16 %v3298_v0, %v3297_v60 }
 0x413   : > { %4366 = vmatmul.mubr.bf16.gmra.mrb[208].mxu0 %v7822_v52  ;;  %v2875_v52 = vpop.f32.mrb[203].mxu1 }
 0x414   : > { %4375 = vmatprep.mubr.bf16.mxu0 %v7272_v23  ;;  %v2876_v34 = vadd.f32 %v2875_v52, %v958_v51  ;;  %v6639_v63 = vpop.f32.mrb[204].mxu1 }
 0x415   : > { %v2897_v45 = vadd.f32 %v6639_v63, %v963_v62 }
 0x416   : > { %v3849_v8 = vpop.f32.mrb[104].mxu0  ;;  %4904 = vmatmul.mubr.bf16.gmra.mrb[56].mxu1 %v8028_v3  ;;  %v2888_v3 = vpop.f32.mrb[205].mxu1  ;;  %v3296_v40 = vmax.f32 %v2876_v34, 0.0 }
 0x417   : > { %4024 = vst [vmem:[%s7555_s26 + $0x340] sm:$0xff] %v3849_v8  ;;  %v3851_v44 = vpop.f32.mrb[105].mxu0  ;;  %4913 = vmatprep.mubr.bf16.mxu1 %v7272_v23  ;;  %v2889_v47 = vadd.f32 %v2888_v3, %v961_v54  ;;  %v6640_v24 = vpop.f32.mrb[206].mxu1  ;;  %v3301_v4 = vmax.f32 %v2897_v45, 0.0  ;;  %v966_v3 = vld [vmem:[#allocation8 + $0x688] sm:$0xff] }
 0x418   : > { %4025 = vst [vmem:[%s7555_s26 + $0x348] sm:$0xff] %v3851_v44  ;;  %v3853_v7 = vpop.f32.mrb[106].mxu0  ;;  %v2900_v48 = vadd.f32 %v6640_v24, %v964_v29  ;;  %v2891_v21 = vpop.f32.mrb[207].mxu1  ;;  %v8172_v39 = vpack.c.bf16 %v3296_v40, %v3295_v46  ;;  %v971_v29 = vld [vmem:[#allocation8 + $0x6b0] sm:$0xff] }
 0x419   : > { %4026 = vst [vmem:[%s7555_s26 + $0x350] sm:$0xff] %v3853_v7  ;;  %v3855_v26 = vpop.f32.mrb[107].mxu0  ;;  %v3299_v20 = vmax.f32 %v2889_v47, 0.0  ;;  %v2892_v8 = vadd.f32 %v2891_v21, %v962_v56  ;;  %v6643_v60 = vpop.f32.mrb[208].mxu1  ;;  %v969_v21 = vld [vmem:[#allocation8 + $0x6a0] sm:$0xff] }
 0x41a   : > { %4027 = vst [vmem:[%s7555_s26 + $0x358] sm:$0xff] %v3855_v26  ;;  %v3302_v44 = vmax.f32 %v2900_v48, 0.0  ;;  %v2913_v52 = vadd.f32 %v6643_v60, %v967_v13  ;;  %v2904_v51 = vpop.f32.mrb[209].mxu1  ;;  %v970_v60 = vld [vmem:[#allocation8 + $0x6a8] sm:$0xff] }
 0x41b   : > { %4376 = vmatmul.mubr.bf16.gmra.mrb[212].mxu0 %v7820_v27  ;;  %v3300_v27 = vmax.f32 %v2892_v8, 0.0  ;;  %v2905_v0 = vadd.f32 %v2904_v51, %v965_v30  ;;  %v6644_v34 = vpop.f32.mrb[210].mxu1  ;;  %v972_v8 = vld [vmem:[#allocation8 + $0x6b8] sm:$0xff] }
 0x41c   : > { %4385 = vmatprep.mubr.bf16.mxu0 %v7272_v23  ;;  %v8177_v46 = vpack.c.bf16 %v3302_v44, %v3301_v4  ;;  %v3305_v63 = vmax.f32 %v2913_v52, 0.0  ;;  %v2916_v26 = vadd.f32 %v6644_v34, %v968_v35  ;;  %v2907_v45 = vpop.f32.mrb[211].mxu1 }
 0x41d   : > { %v8180_v40 = vpack.c.bf16 %v3300_v27, %v3299_v20  ;;  %v2908_v47 = vadd.f32 %v2907_v45, %v966_v3  ;;  %v975_v45 = vld [vmem:[#allocation8 + $0x6d0] sm:$0xff] }
 0x41e   : > { %v3859_v7 = vpop.f32.mrb[108].mxu0  ;;  %4914 = vmatmul.mubr.bf16.gmra.mrb[60].mxu1 %v8024_v22  ;;  %v3303_v22 = vmax.f32 %v2905_v0, 0.0  ;;  %v3306_v56 = vmax.f32 %v2916_v26, 0.0 }
 0x41f   : > { %4028 = vst [vmem:[%s7555_s26 + $0x360] sm:$0xff] %v3859_v7  ;;  %v3861_v62 = vpop.f32.mrb[109].mxu0  ;;  %4923 = vmatprep.mubr.bf16.mxu1 %v7272_v23  ;;  %v3304_v4 = vmax.f32 %v2908_v47, 0.0 }
 0x420   : > { %4029 = vst [vmem:[%s7555_s26 + $0x368] sm:$0xff] %v3861_v62  ;;  %v3863_v54 = vpop.f32.mrb[110].mxu0  ;;  %v8185_v35 = vpack.c.bf16 %v3306_v56, %v3305_v63  ;;  %v976_v56 = vld [vmem:[#allocation8 + $0x6d8] sm:$0xff] }
 0x421   : > { %4030 = vst [vmem:[%s7555_s26 + $0x370] sm:$0xff] %v3863_v54  ;;  %v3865_v24 = vpop.f32.mrb[111].mxu0  ;;  %v6647_v48 = vpop.f32.mrb[212].mxu1  ;;  %v8188_v52 = vpack.c.bf16 %v3304_v4, %v3303_v22  ;;  %v973_v22 = vld [vmem:[#allocation8 + $0x6c0] sm:$0xff] }
 0x422   : > { %4031 = vst [vmem:[%s7555_s26 + $0x378] sm:$0xff] %v3865_v24  ;;  %v2929_v13 = vadd.f32 %v6647_v48, %v971_v29  ;;  %v2920_v30 = vpop.f32.mrb[213].mxu1 }
 0x423   : > { %4386 = vmatmul.mubr.bf16.gmra.mrb[216].mxu0 %v7830_v58  ;;  %v2921_v20 = vadd.f32 %v2920_v30, %v969_v21  ;;  %v6648_v44 = vpop.f32.mrb[214].mxu1  ;;  %v974_v21 = vld [vmem:[#allocation8 + $0x6c8] sm:$0xff] }
 0x424   : > { %4395 = vmatprep.mubr.bf16.mxu0 %v7272_v23  ;;  %v3309_v51 = vmax.f32 %v2929_v13, 0.0  ;;  %v2932_v7 = vadd.f32 %v6648_v44, %v972_v8  ;;  %v2923_v27 = vpop.f32.mrb[215].mxu1 }
 0x425   : > { %v3307_v0 = vmax.f32 %v2921_v20, 0.0  ;;  %v2924_v34 = vadd.f32 %v2923_v27, %v970_v60 }
 0x426   : > { %v3869_v62 = vpop.f32.mrb[112].mxu0  ;;  %4924 = vmatmul.mubr.bf16.gmra.mrb[64].mxu1 %v8041_v41  ;;  %v3310_v58 = vmax.f32 %v2932_v7, 0.0 }
 0x427   : > { %4032 = vst [vmem:[%s7555_s26 + $0x380] sm:$0xff] %v3869_v62  ;;  %v3871_v63 = vpop.f32.mrb[113].mxu0  ;;  %4933 = vmatprep.mubr.bf16.mxu1 %v7272_v23  ;;  %v3308_v26 = vmax.f32 %v2924_v34, 0.0 }
 0x428   : > { %4033 = vst [vmem:[%s7555_s26 + $0x388] sm:$0xff] %v3871_v63  ;;  %v3873_v3 = vpop.f32.mrb[114].mxu0  ;;  %v8194_v54 = vpack.c.bf16 %v3310_v58, %v3309_v51  ;;  %v977_v58 = vld [vmem:[#allocation8 + $0x6e0] sm:$0xff] }
 0x429   : > { %4034 = vst [vmem:[%s7555_s26 + $0x390] sm:$0xff] %v3873_v3  ;;  %v3875_v47 = vpop.f32.mrb[115].mxu0  ;;  %v8197_v29 = vpack.c.bf16 %v3308_v26, %v3307_v0  ;;  %v6651_v24 = vpop.f32.mrb[216].mxu1  ;;  %v979_v0 = vld [vmem:[#allocation8 + $0x6f0] sm:$0xff]  ;;  %v980_v3 = vld [vmem:[#allocation8 + $0x6f8] sm:$0xff] }
 0x42a   : > { %4035 = vst [vmem:[%s7555_s26 + $0x398] sm:$0xff] %v3875_v47  ;;  %v2945_v41 = vadd.f32 %v6651_v24, %v975_v45  ;;  %v2936_v48 = vpop.f32.mrb[217].mxu1  ;;  %v978_v47 = vld [vmem:[#allocation8 + $0x6e8] sm:$0xff] }
 0x42b   : > { %4396 = vmatmul.mubr.bf16.gmra.mrb[220].mxu0 %v7828_v11  ;;  %v2937_v4 = vadd.f32 %v2936_v48, %v973_v22  ;;  %v6652_v13 = vpop.f32.mrb[218].mxu1 }
 0x42c   : > { %4405 = vmatprep.mubr.bf16.mxu0 %v7272_v23  ;;  %v3313_v30 = vmax.f32 %v2945_v41, 0.0  ;;  %v2948_v8 = vadd.f32 %v6652_v13, %v976_v56  ;;  %v2939_v60 = vpop.f32.mrb[219].mxu1 }
 0x42d   : > { %v3311_v20 = vmax.f32 %v2937_v4, 0.0  ;;  %v2940_v44 = vadd.f32 %v2939_v60, %v974_v21 }
 0x42e   : > { %v3879_v51 = vpop.f32.mrb[116].mxu0  ;;  %4934 = vmatmul.mubr.bf16.gmra.mrb[68].mxu1 %v8038_v49  ;;  %v3314_v7 = vmax.f32 %v2948_v8, 0.0 }
 0x42f   : > { %4036 = vst [vmem:[%s7555_s26 + $0x3a0] sm:$0xff] %v3879_v51  ;;  %v3881_v27 = vpop.f32.mrb[117].mxu0  ;;  %4943 = vmatprep.mubr.bf16.mxu1 %v7272_v23  ;;  %v3312_v11 = vmax.f32 %v2940_v44, 0.0 }
 0x430   : > { %4037 = vst [vmem:[%s7555_s26 + $0x3a8] sm:$0xff] %v3881_v27  ;;  %v3883_v34 = vpop.f32.mrb[118].mxu0  ;;  %v8206_v62 = vpack.c.bf16 %v3314_v7, %v3313_v30  ;;  %v981_v7 = vld [vmem:[#allocation8 + $0x700] sm:$0xff] }
 0x431   : > { %4038 = vst [vmem:[%s7555_s26 + $0x3b0] sm:$0xff] %v3883_v34  ;;  %v3885_v63 = vpop.f32.mrb[119].mxu0  ;;  %v8209_v26 = vpack.c.bf16 %v3312_v11, %v3311_v20  ;;  %v6655_v45 = vpop.f32.mrb[220].mxu1  ;;  %v983_v20 = vld [vmem:[#allocation8 + $0x710] sm:$0xff]  ;;  %v984_v34 = vld [vmem:[#allocation8 + $0x718] sm:$0xff] }
 0x432   : > { %4039 = vst [vmem:[%s7555_s26 + $0x3b8] sm:$0xff] %v3885_v63  ;;  %v2961_v49 = vadd.f32 %v6655_v45, %v979_v0  ;;  %v2952_v22 = vpop.f32.mrb[221].mxu1  ;;  %v982_v63 = vld [vmem:[#allocation8 + $0x708] sm:$0xff] }
 0x433   : > { %4406 = vmatmul.mubr.bf16.gmra.mrb[224].mxu0 %v7841_v17  ;;  %v2953_v24 = vadd.f32 %v2952_v22, %v977_v58  ;;  %v6656_v56 = vpop.f32.mrb[222].mxu1 }
 0x434   : > { %4415 = vmatprep.mubr.bf16.mxu0 %v7272_v23  ;;  %v3317_v41 = vmax.f32 %v2961_v49, 0.0  ;;  %v2964_v48 = vadd.f32 %v6656_v56, %v980_v3  ;;  %v2955_v21 = vpop.f32.mrb[223].mxu1 }
 0x435   : > { %v3315_v4 = vmax.f32 %v2953_v24, 0.0  ;;  %v2956_v13 = vadd.f32 %v2955_v21, %v978_v47 }
 0x436   : > { %v3889_v30 = vpop.f32.mrb[120].mxu0  ;;  %4944 = vmatmul.mubr.bf16.gmra.mrb[72].mxu1 %v8053_v18  ;;  %v3318_v8 = vmax.f32 %v2964_v48, 0.0 }
 0x437   : > { %4040 = vst [vmem:[%s7555_s26 + $0x3c0] sm:$0xff] %v3889_v30  ;;  %v3891_v60 = vpop.f32.mrb[121].mxu0  ;;  %4953 = vmatprep.mubr.bf16.mxu1 %v7272_v23  ;;  %v3316_v17 = vmax.f32 %v2956_v13, 0.0 }
 0x438   : > { %4041 = vst [vmem:[%s7555_s26 + $0x3c8] sm:$0xff] %v3891_v60  ;;  %v3893_v44 = vpop.f32.mrb[122].mxu0  ;;  %v8218_v51 = vpack.c.bf16 %v3318_v8, %v3317_v41  ;;  %v985_v8 = vld [vmem:[#allocation8 + $0x720] sm:$0xff] }
 0x439   : > { %4042 = vst [vmem:[%s7555_s26 + $0x3d0] sm:$0xff] %v3893_v44  ;;  %v3895_v27 = vpop.f32.mrb[123].mxu0  ;;  %v8221_v11 = vpack.c.bf16 %v3316_v17, %v3315_v4  ;;  %v6659_v0 = vpop.f32.mrb[224].mxu1  ;;  %v987_v4 = vld [vmem:[#allocation8 + $0x730] sm:$0xff]  ;;  %v988_v44 = vld [vmem:[#allocation8 + $0x738] sm:$0xff] }
 0x43a   : > { %4043 = vst [vmem:[%s7555_s26 + $0x3d8] sm:$0xff] %v3895_v27  ;;  %v2977_v18 = vadd.f32 %v6659_v0, %v983_v20  ;;  %v2968_v58 = vpop.f32.mrb[225].mxu1  ;;  %v986_v27 = vld [vmem:[#allocation8 + $0x728] sm:$0xff] }
 0x43b   : > { %4416 = vmatmul.mubr.bf16.gmra.mrb[228].mxu0 %v7838_v33  ;;  %v2969_v45 = vadd.f32 %v2968_v58, %v981_v7  ;;  %v6660_v3 = vpop.f32.mrb[226].mxu1 }
 0x43c   : > { %4425 = vmatprep.mubr.bf16.mxu0 %v7272_v23  ;;  %v3321_v49 = vmax.f32 %v2977_v18, 0.0  ;;  %v2980_v22 = vadd.f32 %v6660_v3, %v984_v34  ;;  %v2971_v47 = vpop.f32.mrb[227].mxu1 }
 0x43d   : > { %v3319_v24 = vmax.f32 %v2969_v45, 0.0  ;;  %v2972_v56 = vadd.f32 %v2971_v47, %v982_v63 }
 0x43e   : > { %v3899_v41 = vpop.f32.mrb[124].mxu0  ;;  %4954 = vmatmul.mubr.bf16.gmra.mrb[76].mxu1 %v8050_v31  ;;  %v3322_v48 = vmax.f32 %v2980_v22, 0.0 }
 0x43f   : > { %4044 = vst [vmem:[%s7555_s26 + $0x3e0] sm:$0xff] %v3899_v41  ;;  %v3901_v21 = vpop.f32.mrb[125].mxu0  ;;  %4963 = vmatprep.mubr.bf16.mxu1 %v7272_v23  ;;  %v3320_v33 = vmax.f32 %v2972_v56, 0.0 }
 0x440   : > { %4045 = vst [vmem:[%s7555_s26 + $0x3e8] sm:$0xff] %v3901_v21  ;;  %v3903_v13 = vpop.f32.mrb[126].mxu0  ;;  %v8230_v30 = vpack.c.bf16 %v3322_v48, %v3321_v49  ;;  %v989_v48 = vld [vmem:[#allocation8 + $0x740] sm:$0xff] }
 0x441   : > { %4046 = vst [vmem:[%s7555_s26 + $0x3f0] sm:$0xff] %v3903_v13  ;;  %v3905_v60 = vpop.f32.mrb[127].mxu0  ;;  %v8233_v17 = vpack.c.bf16 %v3320_v33, %v3319_v24  ;;  %v6663_v20 = vpop.f32.mrb[228].mxu1  ;;  %v991_v24 = vld [vmem:[#allocation8 + $0x750] sm:$0xff]  ;;  %v992_v13 = vld [vmem:[#allocation8 + $0x758] sm:$0xff] }
 0x442   : > { %4047 = vst [vmem:[%s7555_s26 + $0x3f8] sm:$0xff] %v3905_v60  ;;  %v2993_v31 = vadd.f32 %v6663_v20, %v987_v4  ;;  %v2984_v7 = vpop.f32.mrb[229].mxu1  ;;  %v990_v60 = vld [vmem:[#allocation8 + $0x748] sm:$0xff] }
 0x443   : > { %4426 = vmatmul.mubr.bf16.gmra.mrb[232].mxu0 %v7853_v16  ;;  %v2985_v0 = vadd.f32 %v2984_v7, %v985_v8  ;;  %v6664_v34 = vpop.f32.mrb[230].mxu1 }
 0x444   : > { %4435 = vmatprep.mubr.bf16.mxu0 %v7272_v23  ;;  %v3325_v18 = vmax.f32 %v2993_v31, 0.0  ;;  %v2996_v58 = vadd.f32 %v6664_v34, %v988_v44  ;;  %v2987_v63 = vpop.f32.mrb[231].mxu1 }
 0x445   : > { %v3323_v45 = vmax.f32 %v2985_v0, 0.0  ;;  %v2988_v3 = vadd.f32 %v2987_v63, %v986_v27 }
 0x446   : > { %v3909_v49 = vpop.f32.mrb[128].mxu0  ;;  %4964 = vmatmul.mubr.bf16.gmra.mrb[80].mxu1 %v8065_v10  ;;  %v3326_v22 = vmax.f32 %v2996_v58, 0.0 }
 0x447   : > { %4048 = vst [vmem:[%s7555_s26 + $0x400] sm:$0xff] %v3909_v49  ;;  %v3911_v47 = vpop.f32.mrb[129].mxu0  ;;  %4973 = vmatprep.mubr.bf16.mxu1 %v7272_v23  ;;  %v3324_v16 = vmax.f32 %v2988_v3, 0.0 }
 0x448   : > { %4049 = vst [vmem:[%s7555_s26 + $0x408] sm:$0xff] %v3911_v47  ;;  %v3913_v56 = vpop.f32.mrb[130].mxu0  ;;  %v8242_v41 = vpack.c.bf16 %v3326_v22, %v3325_v18  ;;  %v993_v22 = vld [vmem:[#allocation8 + $0x760] sm:$0xff] }
 0x449   : > { %4050 = vst [vmem:[%s7555_s26 + $0x410] sm:$0xff] %v3913_v56  ;;  %v3915_v21 = vpop.f32.mrb[131].mxu0  ;;  %v8245_v33 = vpack.c.bf16 %v3324_v16, %v3323_v45  ;;  %v6667_v4 = vpop.f32.mrb[232].mxu1  ;;  %v995_v45 = vld [vmem:[#allocation8 + $0x770] sm:$0xff]  ;;  %v996_v56 = vld [vmem:[#allocation8 + $0x778] sm:$0xff] }
 0x44a   : > { %4051 = vst [vmem:[%s7555_s26 + $0x418] sm:$0xff] %v3915_v21  ;;  %v3009_v10 = vadd.f32 %v6667_v4, %v991_v24  ;;  %v3000_v8 = vpop.f32.mrb[233].mxu1  ;;  %v994_v21 = vld [vmem:[#allocation8 + $0x768] sm:$0xff] }
 0x44b   : > { %4436 = vmatmul.mubr.bf16.gmra.mrb[236].mxu0 %v7850_v12  ;;  %v3001_v20 = vadd.f32 %v3000_v8, %v989_v48  ;;  %v6668_v44 = vpop.f32.mrb[234].mxu1 }
 0x44c   : > { %4445 = vmatprep.mubr.bf16.mxu0 %v7272_v23  ;;  %v3329_v31 = vmax.f32 %v3009_v10, 0.0  ;;  %v3012_v7 = vadd.f32 %v6668_v44, %v992_v13  ;;  %v3003_v27 = vpop.f32.mrb[235].mxu1 }
 0x44d   : > { %v3327_v0 = vmax.f32 %v3001_v20, 0.0  ;;  %v3004_v34 = vadd.f32 %v3003_v27, %v990_v60 }
 0x44e   : > { %v3919_v18 = vpop.f32.mrb[132].mxu0  ;;  %4974 = vmatmul.mubr.bf16.gmra.mrb[84].mxu1 %v8062_v55  ;;  %v3330_v58 = vmax.f32 %v3012_v7, 0.0 }
 0x44f   : > { %4052 = vst [vmem:[%s7555_s26 + $0x420] sm:$0xff] %v3919_v18  ;;  %v3921_v63 = vpop.f32.mrb[133].mxu0  ;;  %4983 = vmatprep.mubr.bf16.mxu1 %v7272_v23  ;;  %v3328_v12 = vmax.f32 %v3004_v34, 0.0 }
 0x450   : > { %4053 = vst [vmem:[%s7555_s26 + $0x428] sm:$0xff] %v3921_v63  ;;  %v3923_v3 = vpop.f32.mrb[134].mxu0  ;;  %v8254_v49 = vpack.c.bf16 %v3330_v58, %v3329_v31  ;;  %v997_v58 = vld [vmem:[#allocation8 + $0x780] sm:$0xff] }
 0x451   : > { %4054 = vst [vmem:[%s7555_s26 + $0x430] sm:$0xff] %v3923_v3  ;;  %v3925_v47 = vpop.f32.mrb[135].mxu0  ;;  %v8257_v16 = vpack.c.bf16 %v3328_v12, %v3327_v0  ;;  %v6671_v24 = vpop.f32.mrb[236].mxu1  ;;  %v999_v0 = vld [vmem:[#allocation8 + $0x790] sm:$0xff]  ;;  %v1000_v3 = vld [vmem:[#allocation8 + $0x798] sm:$0xff] }
 0x452   : > { %4055 = vst [vmem:[%s7555_s26 + $0x438] sm:$0xff] %v3925_v47  ;;  %v3025_v55 = vadd.f32 %v6671_v24, %v995_v45  ;;  %v3016_v48 = vpop.f32.mrb[237].mxu1  ;;  %v998_v47 = vld [vmem:[#allocation8 + $0x788] sm:$0xff] }
 0x453   : > { %4446 = vmatmul.mubr.bf16.gmra.mrb[240].mxu0 %v7865_v57  ;;  %v3017_v4 = vadd.f32 %v3016_v48, %v993_v22  ;;  %v6672_v13 = vpop.f32.mrb[238].mxu1 }
 0x454   : > { %4455 = vmatprep.mubr.bf16.mxu0 %v7272_v23  ;;  %v3333_v10 = vmax.f32 %v3025_v55, 0.0  ;;  %v3028_v8 = vadd.f32 %v6672_v13, %v996_v56  ;;  %v3019_v60 = vpop.f32.mrb[239].mxu1 }
 0x455   : > { %v3331_v20 = vmax.f32 %v3017_v4, 0.0  ;;  %v3020_v44 = vadd.f32 %v3019_v60, %v994_v21 }
 0x456   : > { %v4187_v31 = vpop.f32.mrb[136].mxu0  ;;  %4984 = vmatmul.mubr.bf16.gmra.mrb[88].mxu1 %v8077_v61  ;;  %v3334_v7 = vmax.f32 %v3028_v8, 0.0 }
 0x457   : > { %4506 = vst [vmem:[%s7555_s26 + $0x440] sm:$0xff] %v4187_v31  ;;  %v4189_v27 = vpop.f32.mrb[137].mxu0  ;;  %4993 = vmatprep.mubr.bf16.mxu1 %v7272_v23  ;;  %v3332_v57 = vmax.f32 %v3020_v44, 0.0 }
 0x458   : > { %4507 = vst [vmem:[%s7555_s26 + $0x448] sm:$0xff] %v4189_v27  ;;  %v4191_v34 = vpop.f32.mrb[138].mxu0  ;;  %v8266_v18 = vpack.c.bf16 %v3334_v7, %v3333_v10  ;;  %v1001_v7 = vld [vmem:[#allocation8 + $0x7a0] sm:$0xff] }
 0x459   : > { %4508 = vst [vmem:[%s7555_s26 + $0x450] sm:$0xff] %v4191_v34  ;;  %v4193_v63 = vpop.f32.mrb[139].mxu0  ;;  %v8269_v12 = vpack.c.bf16 %v3332_v57, %v3331_v20  ;;  %v6675_v45 = vpop.f32.mrb[240].mxu1  ;;  %v1003_v20 = vld [vmem:[#allocation8 + $0x7b0] sm:$0xff]  ;;  %v1004_v34 = vld [vmem:[#allocation8 + $0x7b8] sm:$0xff] }
 0x45a   : > { %4509 = vst [vmem:[%s7555_s26 + $0x458] sm:$0xff] %v4193_v63  ;;  %v3041_v61 = vadd.f32 %v6675_v45, %v999_v0  ;;  %v3032_v22 = vpop.f32.mrb[241].mxu1  ;;  %v1002_v63 = vld [vmem:[#allocation8 + $0x7a8] sm:$0xff] }
 0x45b   : > { %4456 = vmatmul.mubr.bf16.gmra.mrb[244].mxu0 %v7862_v53  ;;  %v3033_v24 = vadd.f32 %v3032_v22, %v997_v58  ;;  %v6676_v56 = vpop.f32.mrb[242].mxu1 }
 0x45c   : > { %4465 = vmatprep.mubr.bf16.mxu0 %v7272_v23  ;;  %v3337_v55 = vmax.f32 %v3041_v61, 0.0  ;;  %v3044_v48 = vadd.f32 %v6676_v56, %v1000_v3  ;;  %v3035_v21 = vpop.f32.mrb[243].mxu1 }
 0x45d   : > { %v3335_v4 = vmax.f32 %v3033_v24, 0.0  ;;  %v3036_v13 = vadd.f32 %v3035_v21, %v998_v47 }
 0x45e   : > { %v4197_v10 = vpop.f32.mrb[140].mxu0  ;;  %4994 = vmatmul.mubr.bf16.gmra.mrb[92].mxu1 %v8074_v2  ;;  %v3338_v8 = vmax.f32 %v3044_v48, 0.0 }
 0x45f   : > { %4510 = vst [vmem:[%s7555_s26 + $0x460] sm:$0xff] %v4197_v10  ;;  %v4199_v60 = vpop.f32.mrb[141].mxu0  ;;  %5003 = vmatprep.mubr.bf16.mxu1 %v7272_v23  ;;  %v3336_v53 = vmax.f32 %v3036_v13, 0.0 }
 0x460   : > { %4511 = vst [vmem:[%s7555_s26 + $0x468] sm:$0xff] %v4199_v60  ;;  %v4201_v44 = vpop.f32.mrb[142].mxu0  ;;  %v8278_v31 = vpack.c.bf16 %v3338_v8, %v3337_v55  ;;  %v1005_v8 = vld [vmem:[#allocation8 + $0x7c0] sm:$0xff] }
 0x461   : > { %4512 = vst [vmem:[%s7555_s26 + $0x470] sm:$0xff] %v4201_v44  ;;  %v4203_v27 = vpop.f32.mrb[143].mxu0  ;;  %v8281_v57 = vpack.c.bf16 %v3336_v53, %v3335_v4  ;;  %v6679_v0 = vpop.f32.mrb[244].mxu1  ;;  %v1007_v4 = vld [vmem:[#allocation8 + $0x7d0] sm:$0xff]  ;;  %v1008_v44 = vld [vmem:[#allocation8 + $0x7d8] sm:$0xff] }
 0x462   : > { %4513 = vst [vmem:[%s7555_s26 + $0x478] sm:$0xff] %v4203_v27  ;;  %v3057_v2 = vadd.f32 %v6679_v0, %v1003_v20  ;;  %v3048_v58 = vpop.f32.mrb[245].mxu1  ;;  %v1006_v27 = vld [vmem:[#allocation8 + $0x7c8] sm:$0xff] }
 0x463   : > { %4466 = vmatmul.mubr.bf16.gmra.mrb[248].mxu0 %v7877_v43  ;;  %v3049_v45 = vadd.f32 %v3048_v58, %v1001_v7  ;;  %v6680_v3 = vpop.f32.mrb[246].mxu1 }
 0x464   : > { %4475 = vmatprep.mubr.bf16.mxu0 %v7272_v23  ;;  %v3341_v61 = vmax.f32 %v3057_v2, 0.0  ;;  %v3060_v22 = vadd.f32 %v6680_v3, %v1004_v34  ;;  %v3051_v47 = vpop.f32.mrb[247].mxu1 }
 0x465   : > { %v3339_v24 = vmax.f32 %v3049_v45, 0.0  ;;  %v3052_v56 = vadd.f32 %v3051_v47, %v1002_v63 }
 0x466   : > { %v4207_v55 = vpop.f32.mrb[144].mxu0  ;;  %5004 = vmatmul.mubr.bf16.gmra.mrb[96].mxu1 %v8089_v5  ;;  %v3342_v48 = vmax.f32 %v3060_v22, 0.0 }
 0x467   : > { %4514 = vst [vmem:[%s7555_s26 + $0x480] sm:$0xff] %v4207_v55  ;;  %v4209_v21 = vpop.f32.mrb[145].mxu0  ;;  %5013 = vmatprep.mubr.bf16.mxu1 %v7272_v23  ;;  %v3340_v43 = vmax.f32 %v3052_v56, 0.0 }
 0x468   : > { %4515 = vst [vmem:[%s7555_s26 + $0x488] sm:$0xff] %v4209_v21  ;;  %v4211_v13 = vpop.f32.mrb[146].mxu0  ;;  %v8290_v10 = vpack.c.bf16 %v3342_v48, %v3341_v61  ;;  %v1009_v48 = vld [vmem:[#allocation8 + $0x7e0] sm:$0xff] }
 0x469   : > { %4516 = vst [vmem:[%s7555_s26 + $0x490] sm:$0xff] %v4211_v13  ;;  %v4213_v60 = vpop.f32.mrb[147].mxu0  ;;  %v8293_v53 = vpack.c.bf16 %v3340_v43, %v3339_v24  ;;  %v6683_v20 = vpop.f32.mrb[248].mxu1  ;;  %v1011_v24 = vld [vmem:[#allocation8 + $0x7f0] sm:$0xff]  ;;  %v1012_v13 = vld [vmem:[#allocation8 + $0x7f8] sm:$0xff] }
 0x46a   : > { %4517 = vst [vmem:[%s7555_s26 + $0x498] sm:$0xff] %v4213_v60  ;;  %v3073_v5 = vadd.f32 %v6683_v20, %v1007_v4  ;;  %v3064_v7 = vpop.f32.mrb[249].mxu1  ;;  %v1010_v60 = vld [vmem:[#allocation8 + $0x7e8] sm:$0xff] }
 0x46b   : > { %4476 = vmatmul.mubr.bf16.gmra.mrb[252].mxu0 %v7874_v37  ;;  %v3065_v0 = vadd.f32 %v3064_v7, %v1005_v8  ;;  %v6684_v34 = vpop.f32.mrb[250].mxu1 }
 0x46c   : > { %4485 = vmatprep.mubr.bf16.mxu0 %v7272_v23  ;;  %v3345_v2 = vmax.f32 %v3073_v5, 0.0  ;;  %v3076_v58 = vadd.f32 %v6684_v34, %v1008_v44  ;;  %v3067_v63 = vpop.f32.mrb[251].mxu1 }
 0x46d   : > { %v3343_v45 = vmax.f32 %v3065_v0, 0.0  ;;  %v3068_v3 = vadd.f32 %v3067_v63, %v1006_v27 }
 0x46e   : > { %v4217_v61 = vpop.f32.mrb[148].mxu0  ;;  %5014 = vmatmul.mubr.bf16.gmra.mrb[100].mxu1 %v8086_v42  ;;  %v3346_v22 = vmax.f32 %v3076_v58, 0.0 }
 0x46f   : > { %4518 = vst [vmem:[%s7555_s26 + $0x4a0] sm:$0xff] %v4217_v61  ;;  %v4219_v47 = vpop.f32.mrb[149].mxu0  ;;  %5023 = vmatprep.mubr.bf16.mxu1 %v7272_v23  ;;  %v3344_v37 = vmax.f32 %v3068_v3, 0.0 }
 0x470   : > { %4519 = vst [vmem:[%s7555_s26 + $0x4a8] sm:$0xff] %v4219_v47  ;;  %v4221_v56 = vpop.f32.mrb[150].mxu0  ;;  %v8302_v55 = vpack.c.bf16 %v3346_v22, %v3345_v2 }
 0x471   : > { %4520 = vst [vmem:[%s7555_s26 + $0x4b0] sm:$0xff] %v4221_v56  ;;  %v4223_v21 = vpop.f32.mrb[151].mxu0  ;;  %v8305_v43 = vpack.c.bf16 %v3344_v37, %v3343_v45  ;;  %v6687_v4 = vpop.f32.mrb[252].mxu1 }
 0x472   : > { %4521 = vst [vmem:[%s7555_s26 + $0x4b8] sm:$0xff] %v4223_v21  ;;  %v3089_v42 = vadd.f32 %v6687_v4, %v1011_v24  ;;  %v3080_v8 = vpop.f32.mrb[253].mxu1 }
 0x473   : > { %4486 = vmatmul.mubr.bf16.gmra.mrb[0].mxu0 %v7889_v19  ;;  %v3081_v20 = vadd.f32 %v3080_v8, %v1009_v48  ;;  %v6688_v44 = vpop.f32.mrb[254].mxu1 }
 0x474   : > { %4495 = vmatprep.mubr.bf16.mxu0 %v7272_v23  ;;  %v3349_v5 = vmax.f32 %v3089_v42, 0.0  ;;  %v3092_v7 = vadd.f32 %v6688_v44, %v1012_v13  ;;  %v3083_v27 = vpop.f32.mrb[255].mxu1 }
 0x475   : > { %v3347_v0 = vmax.f32 %v3081_v20, 0.0  ;;  %v3084_v34 = vadd.f32 %v3083_v27, %v1010_v60 }
 0x476   : > { %v4227_v2 = vpop.f32.mrb[152].mxu0  ;;  %5024 = vmatmul.mubr.bf16.gmra.mrb[104].mxu1 %v8101_v9  ;;  %v3350_v58 = vmax.f32 %v3092_v7, 0.0 }
 0x477   : > { %4522 = vst [vmem:[%s7555_s26 + $0x4c0] sm:$0xff] %v4227_v2  ;;  %v4229_v19 = vpop.f32.mrb[153].mxu0  ;;  %5033 = vmatprep.mubr.bf16.mxu1 %v7272_v23  ;;  %v3348_v63 = vmax.f32 %v3084_v34, 0.0 }
 0x478   : > { %4523 = vst [vmem:[%s7555_s26 + $0x4c8] sm:$0xff] %v4229_v19  ;;  %v4231_v45 = vpop.f32.mrb[154].mxu0  ;;  %v8314_v3 = vpack.c.bf16 %v3350_v58, %v3349_v5 }
 0x479   : > { %4524 = vst [vmem:[%s7555_s26 + $0x4d0] sm:$0xff] %v4231_v45  ;;  %v4233_v61 = vpop.f32.mrb[155].mxu0  ;;  %v8317_v22 = vpack.c.bf16 %v3348_v63, %v3347_v0  ;;  %v4765_v47 = vpop.f32.mrb[0].mxu1 }
 0x47a   : > { %4525 = vst [vmem:[%s7555_s26 + $0x4d8] sm:$0xff] %v4233_v61  ;;  %5084 = vst [vmem:[%s7555_s26 + $0x840] sm:$0xff] %v4765_v47  ;;  %v4767_v9 = vpop.f32.mrb[1].mxu1 }
 0x47b   : > { %4496 = vmatmul.mubr.bf16.gmra.mrb[4].mxu0 %v7886_v14  ;;  %5085 = vst [vmem:[%s7555_s26 + $0x848] sm:$0xff] %v4767_v9  ;;  %v4769_v37 = vpop.f32.mrb[2].mxu1 }
 0x47c   : > { %5341 = vmatprep.mubr.bf16.mxu0 %v7272_v23  ;;  %5086 = vst [vmem:[%s7555_s26 + $0x850] sm:$0xff] %v4769_v37  ;;  %v4771_v24 = vpop.f32.mrb[3].mxu1 }
 0x47d   : > { %5087 = vst [vmem:[%s7555_s26 + $0x858] sm:$0xff] %v4771_v24 }
 0x47e   : > { %v4237_v56 = vpop.f32.mrb[156].mxu0  ;;  %5034 = vmatmul.mubr.bf16.gmra.mrb[108].mxu1 %v8098_v36 }
 0x47f   : > { %4526 = vst [vmem:[%s7555_s26 + $0x4e0] sm:$0xff] %v4237_v56  ;;  %v4239_v48 = vpop.f32.mrb[157].mxu0  ;;  %5043 = vmatprep.mubr.bf16.mxu1 %v7272_v23 }
 0x480   : > { %4527 = vst [vmem:[%s7555_s26 + $0x4e8] sm:$0xff] %v4239_v48  ;;  %v4241_v14 = vpop.f32.mrb[158].mxu0 }
 0x481   : > { %4528 = vst [vmem:[%s7555_s26 + $0x4f0] sm:$0xff] %v4241_v14  ;;  %v4243_v21 = vpop.f32.mrb[159].mxu0  ;;  %v4775_v4 = vpop.f32.mrb[4].mxu1 }
 0x482   : > { %4529 = vst [vmem:[%s7555_s26 + $0x4f8] sm:$0xff] %v4243_v21  ;;  %5088 = vst [vmem:[%s7555_s26 + $0x860] sm:$0xff] %v4775_v4  ;;  %v4777_v13 = vpop.f32.mrb[5].mxu1 }
 0x483   : > { %5342 = vmatmul.mubr.bf16.vlgmr.msra.gmra.mrb[8].mxu0 %v8137_v59  ;;  %5089 = vst [vmem:[%s7555_s26 + $0x868] sm:$0xff] %v4777_v13  ;;  %v4779_v36 = vpop.f32.mrb[6].mxu1 }
 0x484   : > { %5351 = vmatprep.mubr.bf16.mxu0 %v7272_v23  ;;  %5090 = vst [vmem:[%s7555_s26 + $0x870] sm:$0xff] %v4779_v36  ;;  %v4781_v42 = vpop.f32.mrb[7].mxu1 }
 0x485   : > { %5091 = vst [vmem:[%s7555_s26 + $0x878] sm:$0xff] %v4781_v42 }
 0x486   : > { %v4247_v8 = vpop.f32.mrb[160].mxu0  ;;  %5044 = vmatmul.mubr.bf16.gmra.mrb[112].mxu1 %v8113_v15 }
 0x487   : > { %4530 = vst [vmem:[%s7555_s26 + $0x500] sm:$0xff] %v4247_v8  ;;  %v4249_v60 = vpop.f32.mrb[161].mxu0  ;;  %5053 = vmatprep.mubr.bf16.mxu1 %v7272_v23 }
 0x488   : > { %4531 = vst [vmem:[%s7555_s26 + $0x508] sm:$0xff] %v4249_v60  ;;  %v4251_v59 = vpop.f32.mrb[162].mxu0 }
 0x489   : > { %4532 = vst [vmem:[%s7555_s26 + $0x510] sm:$0xff] %v4251_v59  ;;  %v4253_v20 = vpop.f32.mrb[163].mxu0  ;;  %v4785_v44 = vpop.f32.mrb[8].mxu1 }
 0x48a   : > { %4533 = vst [vmem:[%s7555_s26 + $0x518] sm:$0xff] %v4253_v20  ;;  %5092 = vst [vmem:[%s7555_s26 + $0x880] sm:$0xff] %v4785_v44  ;;  %v4787_v5 = vpop.f32.mrb[9].mxu1 }
 0x48b   : > { %5352 = vmatmul.mubr.bf16.gmra.mrb[12].mxu0 %v8134_v50  ;;  %5093 = vst [vmem:[%s7555_s26 + $0x888] sm:$0xff] %v4787_v5  ;;  %v4789_v15 = vpop.f32.mrb[10].mxu1 }
 0x48c   : > { %5361 = vmatprep.mubr.bf16.mxu0 %v7272_v23  ;;  %5094 = vst [vmem:[%s7555_s26 + $0x890] sm:$0xff] %v4789_v15  ;;  %v4791_v7 = vpop.f32.mrb[11].mxu1 }
 0x48d   : > { %5095 = vst [vmem:[%s7555_s26 + $0x898] sm:$0xff] %v4791_v7 }
 0x48e   : > { %v4257_v27 = vpop.f32.mrb[164].mxu0  ;;  %5054 = vmatmul.mubr.bf16.gmra.mrb[116].mxu1 %v8110_v25 }
 0x48f   : > { %4534 = vst [vmem:[%s7555_s26 + $0x520] sm:$0xff] %v4257_v27  ;;  %v4259_v0 = vpop.f32.mrb[165].mxu0  ;;  %5063 = vmatprep.mubr.bf16.mxu1 %v7272_v23 }
 0x490   : > { %4535 = vst [vmem:[%s7555_s26 + $0x528] sm:$0xff] %v4259_v0  ;;  %v4261_v50 = vpop.f32.mrb[166].mxu0 }
 0x491   : > { %4536 = vst [vmem:[%s7555_s26 + $0x530] sm:$0xff] %v4261_v50  ;;  %v4263_v34 = vpop.f32.mrb[167].mxu0  ;;  %v4795_v2 = vpop.f32.mrb[12].mxu1 }
 0x492   : > { %4537 = vst [vmem:[%s7555_s26 + $0x538] sm:$0xff] %v4263_v34  ;;  %5096 = vst [vmem:[%s7555_s26 + $0x8a0] sm:$0xff] %v4795_v2  ;;  %v4797_v58 = vpop.f32.mrb[13].mxu1 }
 0x493   : > { %5362 = vmatmul.mubr.bf16.gmra.mrb[16].mxu0 %v8153_v1  ;;  %5097 = vst [vmem:[%s7555_s26 + $0x8a8] sm:$0xff] %v4797_v58  ;;  %v4799_v25 = vpop.f32.mrb[14].mxu1 }
 0x494   : > { %5371 = vmatprep.mubr.bf16.mxu0 %v7272_v23  ;;  %5098 = vst [vmem:[%s7555_s26 + $0x8b0] sm:$0xff] %v4799_v25  ;;  %v4801_v19 = vpop.f32.mrb[15].mxu1 }
 0x495   : > { %5099 = vst [vmem:[%s7555_s26 + $0x8b8] sm:$0xff] %v4801_v19 }
 0x496   : > { %v4267_v63 = vpop.f32.mrb[168].mxu0  ;;  %5064 = vmatmul.mubr.bf16.gmra.mrb[120].mxu1 %v8125_v28 }
 0x497   : > { %4538 = vst [vmem:[%s7555_s26 + $0x540] sm:$0xff] %v4267_v63  ;;  %v4269_v45 = vpop.f32.mrb[169].mxu0  ;;  %5073 = vmatprep.mubr.bf16.mxu1 %v7272_v23 }
 0x498   : > { %4539 = vst [vmem:[%s7555_s26 + $0x548] sm:$0xff] %v4269_v45  ;;  %v4271_v1 = vpop.f32.mrb[170].mxu0 }
 0x499   : > { %4540 = vst [vmem:[%s7555_s26 + $0x550] sm:$0xff] %v4271_v1  ;;  %v4273_v61 = vpop.f32.mrb[171].mxu0  ;;  %v4805_v47 = vpop.f32.mrb[16].mxu1 }
 0x49a   : > { %4541 = vst [vmem:[%s7555_s26 + $0x558] sm:$0xff] %v4273_v61  ;;  %5100 = vst [vmem:[%s7555_s26 + $0x8c0] sm:$0xff] %v4805_v47  ;;  %v4807_v9 = vpop.f32.mrb[17].mxu1 }
 0x49b   : > { %5372 = vmatmul.mubr.bf16.gmra.mrb[20].mxu0 %v8150_v32  ;;  %5101 = vst [vmem:[%s7555_s26 + $0x8c8] sm:$0xff] %v4807_v9  ;;  %v4809_v28 = vpop.f32.mrb[18].mxu1 }
 0x49c   : > { %5381 = vmatprep.mubr.bf16.mxu0 %v7272_v23  ;;  %5102 = vst [vmem:[%s7555_s26 + $0x8d0] sm:$0xff] %v4809_v28  ;;  %v4811_v37 = vpop.f32.mrb[19].mxu1 }
 0x49d   : > { %5103 = vst [vmem:[%s7555_s26 + $0x8d8] sm:$0xff] %v4811_v37 }
 0x49e   : > { %v4277_v24 = vpop.f32.mrb[172].mxu0  ;;  %5074 = vmatmul.mubr.bf16.gmra.mrb[124].mxu1 %v8122_v6 }
 0x49f   : > { %4542 = vst [vmem:[%s7555_s26 + $0x560] sm:$0xff] %v4277_v24  ;;  %v4279_v56 = vpop.f32.mrb[173].mxu0  ;;  %5631 = vmatprep.mubr.bf16.mxu1 %v7272_v23 }
 0x4a0   : > { %4543 = vst [vmem:[%s7555_s26 + $0x568] sm:$0xff] %v4279_v56  ;;  %v4281_v32 = vpop.f32.mrb[174].mxu0 }
 0x4a1   : > { %4544 = vst [vmem:[%s7555_s26 + $0x570] sm:$0xff] %v4281_v32  ;;  %v4283_v48 = vpop.f32.mrb[175].mxu0  ;;  %v4815_v14 = vpop.f32.mrb[20].mxu1 }
 0x4a2   : > { %4545 = vst [vmem:[%s7555_s26 + $0x578] sm:$0xff] %v4283_v48  ;;  %5104 = vst [vmem:[%s7555_s26 + $0x8e0] sm:$0xff] %v4815_v14  ;;  %v4817_v21 = vpop.f32.mrb[21].mxu1 }
 0x4a3   : > { %5382 = vmatmul.mubr.bf16.gmra.mrb[24].mxu0 %v8172_v39  ;;  %5105 = vst [vmem:[%s7555_s26 + $0x8e8] sm:$0xff] %v4817_v21  ;;  %v4819_v6 = vpop.f32.mrb[22].mxu1 }
 0x4a4   : > { %5391 = vmatprep.mubr.bf16.mxu0 %v7272_v23  ;;  %5106 = vst [vmem:[%s7555_s26 + $0x8f0] sm:$0xff] %v4819_v6  ;;  %v4821_v4 = vpop.f32.mrb[23].mxu1 }
 0x4a5   : > { %5107 = vst [vmem:[%s7555_s26 + $0x8f8] sm:$0xff] %v4821_v4 }
 0x4a6   : > { %v4287_v13 = vpop.f32.mrb[176].mxu0  ;;  %5632 = vmatmul.mubr.bf16.vlgmr.msra.gmra.mrb[128].mxu1 %v8302_v55 }
 0x4a7   : > { %4546 = vst [vmem:[%s7555_s26 + $0x580] sm:$0xff] %v4287_v13  ;;  %v4289_v36 = vpop.f32.mrb[177].mxu0  ;;  %5641 = vmatprep.mubr.bf16.mxu1 %v7272_v23 }
 0x4a8   : > { %4547 = vst [vmem:[%s7555_s26 + $0x588] sm:$0xff] %v4289_v36  ;;  %v4291_v39 = vpop.f32.mrb[178].mxu0 }
 0x4a9   : > { %4548 = vst [vmem:[%s7555_s26 + $0x590] sm:$0xff] %v4291_v39  ;;  %v4293_v42 = vpop.f32.mrb[179].mxu0  ;;  %v4825_v8 = vpop.f32.mrb[24].mxu1 }
 0x4aa   : > { %4549 = vst [vmem:[%s7555_s26 + $0x598] sm:$0xff] %v4293_v42  ;;  %5108 = vst [vmem:[%s7555_s26 + $0x900] sm:$0xff] %v4825_v8  ;;  %v4827_v60 = vpop.f32.mrb[25].mxu1 }
 0x4ab   : > { %5392 = vmatmul.mubr.bf16.gmra.mrb[28].mxu0 %v8168_v38  ;;  %5109 = vst [vmem:[%s7555_s26 + $0x908] sm:$0xff] %v4827_v60  ;;  %v4829_v55 = vpop.f32.mrb[26].mxu1 }
 0x4ac   : > { %5401 = vmatprep.mubr.bf16.mxu0 %v7272_v23  ;;  %5110 = vst [vmem:[%s7555_s26 + $0x910] sm:$0xff] %v4829_v55  ;;  %v4831_v59 = vpop.f32.mrb[27].mxu1 }
 0x4ad   : > { %5111 = vst [vmem:[%s7555_s26 + $0x918] sm:$0xff] %v4831_v59 }
 0x4ae   : > { %v4297_v20 = vpop.f32.mrb[180].mxu0  ;;  %5642 = vmatmul.mubr.bf16.gmra.mrb[132].mxu1 %v8317_v22 }
 0x4af   : > { %4550 = vst [vmem:[%s7555_s26 + $0x5a0] sm:$0xff] %v4297_v20  ;;  %v4299_v44 = vpop.f32.mrb[181].mxu0  ;;  %5651 = vmatprep.mubr.bf16.mxu1 %v7272_v23 }
 0x4b0   : > { %4551 = vst [vmem:[%s7555_s26 + $0x5a8] sm:$0xff] %v4299_v44  ;;  %v4301_v38 = vpop.f32.mrb[182].mxu0 }
 0x4b1   : > { %4552 = vst [vmem:[%s7555_s26 + $0x5b0] sm:$0xff] %v4301_v38  ;;  %v4303_v5 = vpop.f32.mrb[183].mxu0  ;;  %v4835_v15 = vpop.f32.mrb[28].mxu1 }
 0x4b2   : > { %4553 = vst [vmem:[%s7555_s26 + $0x5b8] sm:$0xff] %v4303_v5  ;;  %5112 = vst [vmem:[%s7555_s26 + $0x920] sm:$0xff] %v4835_v15  ;;  %v4837_v7 = vpop.f32.mrb[29].mxu1 }
 0x4b3   : > { %5402 = vmatmul.mubr.bf16.gmra.mrb[32].mxu0 %v8180_v40  ;;  %5113 = vst [vmem:[%s7555_s26 + $0x928] sm:$0xff] %v4837_v7  ;;  %v4839_v22 = vpop.f32.mrb[30].mxu1 }
 0x4b4   : > { %5411 = vmatprep.mubr.bf16.mxu0 %v7272_v23  ;;  %5114 = vst [vmem:[%s7555_s26 + $0x930] sm:$0xff] %v4839_v22  ;;  %v4841_v27 = vpop.f32.mrb[31].mxu1 }
 0x4b5   : > { %5115 = vst [vmem:[%s7555_s26 + $0x938] sm:$0xff] %v4841_v27 }
 0x4b6   : > { %v4307_v0 = vpop.f32.mrb[184].mxu0  ;;  %5652 = vmatmul.mubr.bf16.gmra.mrb[136].mxu1 %v8314_v3 }
 0x4b7   : > { %4554 = vst [vmem:[%s7555_s26 + $0x5c0] sm:$0xff] %v4307_v0  ;;  %v4309_v50 = vpop.f32.mrb[185].mxu0 }
 0x4b8   : > { %4555 = vst [vmem:[%s7555_s26 + $0x5c8] sm:$0xff] %v4309_v50  ;;  %v4311_v40 = vpop.f32.mrb[186].mxu0 }
 0x4b9   : > { %4556 = vst [vmem:[%s7555_s26 + $0x5d0] sm:$0xff] %v4311_v40  ;;  %v4313_v34 = vpop.f32.mrb[187].mxu0  ;;  %v4845_v2 = vpop.f32.mrb[32].mxu1 }
 0x4ba   : > { %4557 = vst [vmem:[%s7555_s26 + $0x5d8] sm:$0xff] %v4313_v34  ;;  %5116 = vst [vmem:[%s7555_s26 + $0x940] sm:$0xff] %v4845_v2  ;;  %v4847_v58 = vpop.f32.mrb[33].mxu1 }
 0x4bb   : > { %5412 = vmatmul.mubr.bf16.gmra.mrb[36].mxu0 %v8177_v46  ;;  %5117 = vst [vmem:[%s7555_s26 + $0x948] sm:$0xff] %v4847_v58  ;;  %v4849_v3 = vpop.f32.mrb[34].mxu1 }
 0x4bc   : > { %5421 = vmatprep.mubr.bf16.mxu0 %v7272_v23  ;;  %5118 = vst [vmem:[%s7555_s26 + $0x950] sm:$0xff] %v4849_v3  ;;  %v4851_v25 = vpop.f32.mrb[35].mxu1 }
 0x4bd   : > { %5119 = vst [vmem:[%s7555_s26 + $0x958] sm:$0xff] %v4851_v25 }
 0x4be   : > { %v4317_v19 = vpop.f32.mrb[188].mxu0 }
 0x4bf   : > { %4558 = vst [vmem:[%s7555_s26 + $0x5e0] sm:$0xff] %v4317_v19  ;;  %v4319_v63 = vpop.f32.mrb[189].mxu0 }
 0x4c0   : > { %4559 = vst [vmem:[%s7555_s26 + $0x5e8] sm:$0xff] %v4319_v63  ;;  %v4321_v45 = vpop.f32.mrb[190].mxu0 }
 0x4c1   : > { %4560 = vst [vmem:[%s7555_s26 + $0x5f0] sm:$0xff] %v4321_v45  ;;  %v4323_v46 = vpop.f32.mrb[191].mxu0  ;;  %v4855_v1 = vpop.f32.mrb[36].mxu1 }
 0x4c2   : > { %4561 = vst [vmem:[%s7555_s26 + $0x5f8] sm:$0xff] %v4323_v46  ;;  %5120 = vst [vmem:[%s7555_s26 + $0x960] sm:$0xff] %v4855_v1  ;;  %v4857_v61 = vpop.f32.mrb[37].mxu1 }
 0x4c3   : > { %5422 = vmatmul.mubr.bf16.gmra.mrb[40].mxu0 %v8188_v52  ;;  %5121 = vst [vmem:[%s7555_s26 + $0x968] sm:$0xff] %v4857_v61  ;;  %v4859_v47 = vpop.f32.mrb[38].mxu1 }
 0x4c4   : > { %5431 = vmatprep.mubr.bf16.mxu0 %v7272_v23  ;;  %5122 = vst [vmem:[%s7555_s26 + $0x970] sm:$0xff] %v4859_v47  ;;  %v4861_v9 = vpop.f32.mrb[39].mxu1 }
 0x4c5   : > { %5123 = vst [vmem:[%s7555_s26 + $0x978] sm:$0xff] %v4861_v9 }
 0x4c6   : > { %v4327_v28 = vpop.f32.mrb[192].mxu0 }
 0x4c7   : > { %4562 = vst [vmem:[%s7555_s26 + $0x600] sm:$0xff] %v4327_v28  ;;  %v4329_v37 = vpop.f32.mrb[193].mxu0 }
 0x4c8   : > { %4563 = vst [vmem:[%s7555_s26 + $0x608] sm:$0xff] %v4329_v37  ;;  %v4331_v24 = vpop.f32.mrb[194].mxu0 }
 0x4c9   : > { %4564 = vst [vmem:[%s7555_s26 + $0x610] sm:$0xff] %v4331_v24  ;;  %v4333_v52 = vpop.f32.mrb[195].mxu0  ;;  %v4865_v56 = vpop.f32.mrb[40].mxu1 }
 0x4ca   : > { %4565 = vst [vmem:[%s7555_s26 + $0x618] sm:$0xff] %v4333_v52  ;;  %5124 = vst [vmem:[%s7555_s26 + $0x980] sm:$0xff] %v4865_v56  ;;  %v4867_v32 = vpop.f32.mrb[41].mxu1 }
 0x4cb   : > { %5432 = vmatmul.mubr.bf16.gmra.mrb[44].mxu0 %v8185_v35  ;;  %5125 = vst [vmem:[%s7555_s26 + $0x988] sm:$0xff] %v4867_v32  ;;  %v4869_v48 = vpop.f32.mrb[42].mxu1 }
 0x4cc   : > { %5441 = vmatprep.mubr.bf16.mxu0 %v7272_v23  ;;  %5126 = vst [vmem:[%s7555_s26 + $0x990] sm:$0xff] %v4869_v48  ;;  %v4871_v14 = vpop.f32.mrb[43].mxu1 }
 0x4cd   : > { %5127 = vst [vmem:[%s7555_s26 + $0x998] sm:$0xff] %v4871_v14 }
 0x4ce   : > { %v4337_v21 = vpop.f32.mrb[196].mxu0 }
 0x4cf   : > { %4566 = vst [vmem:[%s7555_s26 + $0x620] sm:$0xff] %v4337_v21  ;;  %v4339_v6 = vpop.f32.mrb[197].mxu0 }
 0x4d0   : > { %4567 = vst [vmem:[%s7555_s26 + $0x628] sm:$0xff] %v4339_v6  ;;  %v4341_v4 = vpop.f32.mrb[198].mxu0 }
 0x4d1   : > { %4568 = vst [vmem:[%s7555_s26 + $0x630] sm:$0xff] %v4341_v4  ;;  %v4343_v35 = vpop.f32.mrb[199].mxu0  ;;  %v4875_v13 = vpop.f32.mrb[44].mxu1 }
 0x4d2   : > { %4569 = vst [vmem:[%s7555_s26 + $0x638] sm:$0xff] %v4343_v35  ;;  %5128 = vst [vmem:[%s7555_s26 + $0x9a0] sm:$0xff] %v4875_v13  ;;  %v4877_v36 = vpop.f32.mrb[45].mxu1 }
 0x4d3   : > { %5442 = vmatmul.mubr.bf16.gmra.mrb[48].mxu0 %v8197_v29  ;;  %5129 = vst [vmem:[%s7555_s26 + $0x9a8] sm:$0xff] %v4877_v36  ;;  %v4879_v39 = vpop.f32.mrb[46].mxu1 }
 0x4d4   : > { %5451 = vmatprep.mubr.bf16.mxu0 %v7272_v23  ;;  %5130 = vst [vmem:[%s7555_s26 + $0x9b0] sm:$0xff] %v4879_v39  ;;  %v4881_v42 = vpop.f32.mrb[47].mxu1 }
 0x4d5   : > { %5131 = vst [vmem:[%s7555_s26 + $0x9b8] sm:$0xff] %v4881_v42 }
 0x4d6   : > { %v4347_v8 = vpop.f32.mrb[200].mxu0 }
 0x4d7   : > { %4570 = vst [vmem:[%s7555_s26 + $0x640] sm:$0xff] %v4347_v8  ;;  %v4349_v60 = vpop.f32.mrb[201].mxu0 }
 0x4d8   : > { %4571 = vst [vmem:[%s7555_s26 + $0x648] sm:$0xff] %v4349_v60  ;;  %v4351_v55 = vpop.f32.mrb[202].mxu0 }
 0x4d9   : > { %4572 = vst [vmem:[%s7555_s26 + $0x650] sm:$0xff] %v4351_v55  ;;  %v4353_v29 = vpop.f32.mrb[203].mxu0  ;;  %v4885_v59 = vpop.f32.mrb[48].mxu1 }
 0x4da   : > { %4573 = vst [vmem:[%s7555_s26 + $0x658] sm:$0xff] %v4353_v29  ;;  %5132 = vst [vmem:[%s7555_s26 + $0x9c0] sm:$0xff] %v4885_v59  ;;  %v4887_v20 = vpop.f32.mrb[49].mxu1 }
 0x4db   : > { %5452 = vmatmul.mubr.bf16.gmra.mrb[52].mxu0 %v8194_v54  ;;  %5133 = vst [vmem:[%s7555_s26 + $0x9c8] sm:$0xff] %v4887_v20  ;;  %v4889_v44 = vpop.f32.mrb[50].mxu1 }
 0x4dc   : > { %5461 = vmatprep.mubr.bf16.mxu0 %v7272_v23  ;;  %5134 = vst [vmem:[%s7555_s26 + $0x9d0] sm:$0xff] %v4889_v44  ;;  %v4891_v38 = vpop.f32.mrb[51].mxu1 }
 0x4dd   : > { %5135 = vst [vmem:[%s7555_s26 + $0x9d8] sm:$0xff] %v4891_v38 }
 0x4de   : > { %v4357_v5 = vpop.f32.mrb[204].mxu0 }
 0x4df   : > { %4574 = vst [vmem:[%s7555_s26 + $0x660] sm:$0xff] %v4357_v5  ;;  %v4359_v15 = vpop.f32.mrb[205].mxu0 }
 0x4e0   : > { %4575 = vst [vmem:[%s7555_s26 + $0x668] sm:$0xff] %v4359_v15  ;;  %v4361_v7 = vpop.f32.mrb[206].mxu0 }
 0x4e1   : > { %4576 = vst [vmem:[%s7555_s26 + $0x670] sm:$0xff] %v4361_v7  ;;  %v4363_v54 = vpop.f32.mrb[207].mxu0  ;;  %v4895_v22 = vpop.f32.mrb[52].mxu1 }
 0x4e2   : > { %4577 = vst [vmem:[%s7555_s26 + $0x678] sm:$0xff] %v4363_v54  ;;  %5136 = vst [vmem:[%s7555_s26 + $0x9e0] sm:$0xff] %v4895_v22  ;;  %v4897_v27 = vpop.f32.mrb[53].mxu1 }
 0x4e3   : > { %5462 = vmatmul.mubr.bf16.gmra.mrb[56].mxu0 %v8209_v26  ;;  %5137 = vst [vmem:[%s7555_s26 + $0x9e8] sm:$0xff] %v4897_v27  ;;  %v4899_v0 = vpop.f32.mrb[54].mxu1 }
 0x4e4   : > { %5471 = vmatprep.mubr.bf16.mxu0 %v7272_v23  ;;  %5138 = vst [vmem:[%s7555_s26 + $0x9f0] sm:$0xff] %v4899_v0  ;;  %v4901_v50 = vpop.f32.mrb[55].mxu1 }
 0x4e5   : > { %5139 = vst [vmem:[%s7555_s26 + $0x9f8] sm:$0xff] %v4901_v50 }
 0x4e6   : > { %v4367_v40 = vpop.f32.mrb[208].mxu0 }
 0x4e7   : > { %4578 = vst [vmem:[%s7555_s26 + $0x680] sm:$0xff] %v4367_v40  ;;  %v4369_v34 = vpop.f32.mrb[209].mxu0 }
 0x4e8   : > { %4579 = vst [vmem:[%s7555_s26 + $0x688] sm:$0xff] %v4369_v34  ;;  %v4371_v2 = vpop.f32.mrb[210].mxu0 }
 0x4e9   : > { %4580 = vst [vmem:[%s7555_s26 + $0x690] sm:$0xff] %v4371_v2  ;;  %v4373_v26 = vpop.f32.mrb[211].mxu0  ;;  %v4905_v58 = vpop.f32.mrb[56].mxu1 }
 0x4ea   : > { %4581 = vst [vmem:[%s7555_s26 + $0x698] sm:$0xff] %v4373_v26  ;;  %5140 = vst [vmem:[%s7555_s26 + $0xa00] sm:$0xff] %v4905_v58  ;;  %v4907_v3 = vpop.f32.mrb[57].mxu1 }
 0x4eb   : > { %5472 = vmatmul.mubr.bf16.gmra.mrb[60].mxu0 %v8206_v62  ;;  %5141 = vst [vmem:[%s7555_s26 + $0xa08] sm:$0xff] %v4907_v3  ;;  %v4909_v25 = vpop.f32.mrb[58].mxu1 }
 0x4ec   : > { %5481 = vmatprep.mubr.bf16.mxu0 %v7272_v23  ;;  %5142 = vst [vmem:[%s7555_s26 + $0xa10] sm:$0xff] %v4909_v25  ;;  %v4911_v19 = vpop.f32.mrb[59].mxu1 }
 0x4ed   : > { %5143 = vst [vmem:[%s7555_s26 + $0xa18] sm:$0xff] %v4911_v19 }
 0x4ee   : > { %v4377_v63 = vpop.f32.mrb[212].mxu0 }
 0x4ef   : > { %4582 = vst [vmem:[%s7555_s26 + $0x6a0] sm:$0xff] %v4377_v63  ;;  %v4379_v45 = vpop.f32.mrb[213].mxu0 }
 0x4f0   : > { %4583 = vst [vmem:[%s7555_s26 + $0x6a8] sm:$0xff] %v4379_v45  ;;  %v4381_v46 = vpop.f32.mrb[214].mxu0 }
 0x4f1   : > { %4584 = vst [vmem:[%s7555_s26 + $0x6b0] sm:$0xff] %v4381_v46  ;;  %v4383_v62 = vpop.f32.mrb[215].mxu0  ;;  %v4915_v1 = vpop.f32.mrb[60].mxu1 }
 0x4f2   : > { %4585 = vst [vmem:[%s7555_s26 + $0x6b8] sm:$0xff] %v4383_v62  ;;  %5144 = vst [vmem:[%s7555_s26 + $0xa20] sm:$0xff] %v4915_v1  ;;  %v4917_v61 = vpop.f32.mrb[61].mxu1 }
 0x4f3   : > { %5482 = vmatmul.mubr.bf16.gmra.mrb[64].mxu0 %v8221_v11  ;;  %5145 = vst [vmem:[%s7555_s26 + $0xa28] sm:$0xff] %v4917_v61  ;;  %v4919_v47 = vpop.f32.mrb[62].mxu1 }
 0x4f4   : > { %5491 = vmatprep.mubr.bf16.mxu0 %v7272_v23  ;;  %5146 = vst [vmem:[%s7555_s26 + $0xa30] sm:$0xff] %v4919_v47  ;;  %v4921_v9 = vpop.f32.mrb[63].mxu1 }
 0x4f5   : > { %5147 = vst [vmem:[%s7555_s26 + $0xa38] sm:$0xff] %v4921_v9 }
 0x4f6   : > { %v4387_v28 = vpop.f32.mrb[216].mxu0 }
 0x4f7   : > { %4586 = vst [vmem:[%s7555_s26 + $0x6c0] sm:$0xff] %v4387_v28  ;;  %v4389_v37 = vpop.f32.mrb[217].mxu0 }
 0x4f8   : > { %4587 = vst [vmem:[%s7555_s26 + $0x6c8] sm:$0xff] %v4389_v37  ;;  %v4391_v24 = vpop.f32.mrb[218].mxu0 }
 0x4f9   : > { %4588 = vst [vmem:[%s7555_s26 + $0x6d0] sm:$0xff] %v4391_v24  ;;  %v4393_v11 = vpop.f32.mrb[219].mxu0  ;;  %v4925_v52 = vpop.f32.mrb[64].mxu1 }
 0x4fa   : > { %4589 = vst [vmem:[%s7555_s26 + $0x6d8] sm:$0xff] %v4393_v11  ;;  %5148 = vst [vmem:[%s7555_s26 + $0xa40] sm:$0xff] %v4925_v52  ;;  %v4927_v56 = vpop.f32.mrb[65].mxu1 }
 0x4fb   : > { %5492 = vmatmul.mubr.bf16.gmra.mrb[68].mxu0 %v8218_v51  ;;  %5149 = vst [vmem:[%s7555_s26 + $0xa48] sm:$0xff] %v4927_v56  ;;  %v4929_v32 = vpop.f32.mrb[66].mxu1 }
 0x4fc   : > { %5501 = vmatprep.mubr.bf16.mxu0 %v7272_v23  ;;  %5150 = vst [vmem:[%s7555_s26 + $0xa50] sm:$0xff] %v4929_v32  ;;  %v4931_v48 = vpop.f32.mrb[67].mxu1 }
 0x4fd   : > { %5151 = vst [vmem:[%s7555_s26 + $0xa58] sm:$0xff] %v4931_v48 }
 0x4fe   : > { %v4397_v14 = vpop.f32.mrb[220].mxu0 }
 0x4ff   : > { %4590 = vst [vmem:[%s7555_s26 + $0x6e0] sm:$0xff] %v4397_v14  ;;  %v4399_v21 = vpop.f32.mrb[221].mxu0 }
 0x500   : > { %4591 = vst [vmem:[%s7555_s26 + $0x6e8] sm:$0xff] %v4399_v21  ;;  %v4401_v6 = vpop.f32.mrb[222].mxu0 }
 0x501   : > { %4592 = vst [vmem:[%s7555_s26 + $0x6f0] sm:$0xff] %v4401_v6  ;;  %v4403_v51 = vpop.f32.mrb[223].mxu0  ;;  %v4935_v4 = vpop.f32.mrb[68].mxu1 }
 0x502   : > { %4593 = vst [vmem:[%s7555_s26 + $0x6f8] sm:$0xff] %v4403_v51  ;;  %5152 = vst [vmem:[%s7555_s26 + $0xa60] sm:$0xff] %v4935_v4  ;;  %v4937_v35 = vpop.f32.mrb[69].mxu1 }
 0x503   : > { %5502 = vmatmul.mubr.bf16.gmra.mrb[72].mxu0 %v8233_v17  ;;  %5153 = vst [vmem:[%s7555_s26 + $0xa68] sm:$0xff] %v4937_v35  ;;  %v4939_v13 = vpop.f32.mrb[70].mxu1 }
 0x504   : > { %5511 = vmatprep.mubr.bf16.mxu0 %v7272_v23  ;;  %5154 = vst [vmem:[%s7555_s26 + $0xa70] sm:$0xff] %v4939_v13  ;;  %v4941_v36 = vpop.f32.mrb[71].mxu1 }
 0x505   : > { %5155 = vst [vmem:[%s7555_s26 + $0xa78] sm:$0xff] %v4941_v36 }
 0x506   : > { %v4407_v39 = vpop.f32.mrb[224].mxu0 }
 0x507   : > { %4594 = vst [vmem:[%s7555_s26 + $0x700] sm:$0xff] %v4407_v39  ;;  %v4409_v42 = vpop.f32.mrb[225].mxu0 }
 0x508   : > { %4595 = vst [vmem:[%s7555_s26 + $0x708] sm:$0xff] %v4409_v42  ;;  %v4411_v8 = vpop.f32.mrb[226].mxu0 }
 0x509   : > { %4596 = vst [vmem:[%s7555_s26 + $0x710] sm:$0xff] %v4411_v8  ;;  %v4413_v17 = vpop.f32.mrb[227].mxu0  ;;  %v4945_v60 = vpop.f32.mrb[72].mxu1 }
 0x50a   : > { %4597 = vst [vmem:[%s7555_s26 + $0x718] sm:$0xff] %v4413_v17  ;;  %5156 = vst [vmem:[%s7555_s26 + $0xa80] sm:$0xff] %v4945_v60  ;;  %v4947_v55 = vpop.f32.mrb[73].mxu1 }
 0x50b   : > { %5512 = vmatmul.mubr.bf16.gmra.mrb[76].mxu0 %v8230_v30  ;;  %5157 = vst [vmem:[%s7555_s26 + $0xa88] sm:$0xff] %v4947_v55  ;;  %v4949_v29 = vpop.f32.mrb[74].mxu1 }
 0x50c   : > { %5521 = vmatprep.mubr.bf16.mxu0 %v7272_v23  ;;  %5158 = vst [vmem:[%s7555_s26 + $0xa90] sm:$0xff] %v4949_v29  ;;  %v4951_v59 = vpop.f32.mrb[75].mxu1 }
 0x50d   : > { %5159 = vst [vmem:[%s7555_s26 + $0xa98] sm:$0xff] %v4951_v59 }
 0x50e   : > { %v4417_v20 = vpop.f32.mrb[228].mxu0 }
 0x50f   : > { %4598 = vst [vmem:[%s7555_s26 + $0x720] sm:$0xff] %v4417_v20  ;;  %v4419_v44 = vpop.f32.mrb[229].mxu0 }
 0x510   : > { %4599 = vst [vmem:[%s7555_s26 + $0x728] sm:$0xff] %v4419_v44  ;;  %v4421_v38 = vpop.f32.mrb[230].mxu0 }
 0x511   : > { %4600 = vst [vmem:[%s7555_s26 + $0x730] sm:$0xff] %v4421_v38  ;;  %v4423_v30 = vpop.f32.mrb[231].mxu0  ;;  %v4955_v5 = vpop.f32.mrb[76].mxu1 }
 0x512   : > { %4601 = vst [vmem:[%s7555_s26 + $0x738] sm:$0xff] %v4423_v30  ;;  %5160 = vst [vmem:[%s7555_s26 + $0xaa0] sm:$0xff] %v4955_v5  ;;  %v4957_v15 = vpop.f32.mrb[77].mxu1 }
 0x513   : > { %5522 = vmatmul.mubr.bf16.gmra.mrb[80].mxu0 %v8245_v33  ;;  %5161 = vst [vmem:[%s7555_s26 + $0xaa8] sm:$0xff] %v4957_v15  ;;  %v4959_v7 = vpop.f32.mrb[78].mxu1 }
 0x514   : > { %5162 = vst [vmem:[%s7555_s26 + $0xab0] sm:$0xff] %v4959_v7  ;;  %5531 = vmatprep.mubr.bf16.mxu0 %v7272_v23  ;;  %v4961_v54 = vpop.f32.mrb[79].mxu1 }
 0x515   : > { %5163 = vst [vmem:[%s7555_s26 + $0xab8] sm:$0xff] %v4961_v54 }
 0x516   : > { %v4427_v22 = vpop.f32.mrb[232].mxu0 }
 0x517   : > { %4602 = vst [vmem:[%s7555_s26 + $0x740] sm:$0xff] %v4427_v22  ;;  %v4429_v27 = vpop.f32.mrb[233].mxu0 }
 0x518   : > { %4603 = vst [vmem:[%s7555_s26 + $0x748] sm:$0xff] %v4429_v27  ;;  %v4431_v0 = vpop.f32.mrb[234].mxu0 }
 0x519   : > { %4604 = vst [vmem:[%s7555_s26 + $0x750] sm:$0xff] %v4431_v0  ;;  %v4433_v33 = vpop.f32.mrb[235].mxu0  ;;  %v4965_v50 = vpop.f32.mrb[80].mxu1 }
 0x51a   : > { %4605 = vst [vmem:[%s7555_s26 + $0x758] sm:$0xff] %v4433_v33  ;;  %5164 = vst [vmem:[%s7555_s26 + $0xac0] sm:$0xff] %v4965_v50  ;;  %v4967_v40 = vpop.f32.mrb[81].mxu1 }
 0x51b   : > { %5532 = vmatmul.mubr.bf16.gmra.mrb[84].mxu0 %v8242_v41  ;;  %5165 = vst [vmem:[%s7555_s26 + $0xac8] sm:$0xff] %v4967_v40  ;;  %v4969_v34 = vpop.f32.mrb[82].mxu1 }
 0x51c   : > { %5166 = vst [vmem:[%s7555_s26 + $0xad0] sm:$0xff] %v4969_v34  ;;  %v4971_v2 = vpop.f32.mrb[83].mxu1  ;;  %5541 = vmatprep.mubr.bf16.mxu0 %v7272_v23 }
 0x51d   : > { %5167 = vst [vmem:[%s7555_s26 + $0xad8] sm:$0xff] %v4971_v2 }
 0x51e   : > { %v4437_v26 = vpop.f32.mrb[236].mxu0 }
 0x51f   : > { %4606 = vst [vmem:[%s7555_s26 + $0x760] sm:$0xff] %v4437_v26  ;;  %v4439_v58 = vpop.f32.mrb[237].mxu0 }
 0x520   : > { %4607 = vst [vmem:[%s7555_s26 + $0x768] sm:$0xff] %v4439_v58  ;;  %v4441_v3 = vpop.f32.mrb[238].mxu0 }
 0x521   : > { %4608 = vst [vmem:[%s7555_s26 + $0x770] sm:$0xff] %v4441_v3  ;;  %v4443_v41 = vpop.f32.mrb[239].mxu0  ;;  %v4975_v25 = vpop.f32.mrb[84].mxu1 }
 0x522   : > { %4609 = vst [vmem:[%s7555_s26 + $0x778] sm:$0xff] %v4443_v41  ;;  %5168 = vst [vmem:[%s7555_s26 + $0xae0] sm:$0xff] %v4975_v25  ;;  %v4977_v19 = vpop.f32.mrb[85].mxu1 }
 0x523   : > { %5169 = vst [vmem:[%s7555_s26 + $0xae8] sm:$0xff] %v4977_v19  ;;  %v4979_v63 = vpop.f32.mrb[86].mxu1  ;;  %5542 = vmatmul.mubr.bf16.gmra.mrb[88].mxu0 %v8257_v16 }
 0x524   : > { %5170 = vst [vmem:[%s7555_s26 + $0xaf0] sm:$0xff] %v4979_v63  ;;  %v4981_v45 = vpop.f32.mrb[87].mxu1  ;;  %5551 = vmatprep.mubr.bf16.mxu0 %v7272_v23 }
 0x525   : > { %5171 = vst [vmem:[%s7555_s26 + $0xaf8] sm:$0xff] %v4981_v45 }
 0x526   : > { %v4447_v46 = vpop.f32.mrb[240].mxu0 }
 0x527   : > { %4610 = vst [vmem:[%s7555_s26 + $0x780] sm:$0xff] %v4447_v46  ;;  %v4449_v62 = vpop.f32.mrb[241].mxu0 }
 0x528   : > { %4611 = vst [vmem:[%s7555_s26 + $0x788] sm:$0xff] %v4449_v62  ;;  %v4451_v1 = vpop.f32.mrb[242].mxu0 }
 0x529   : > { %4612 = vst [vmem:[%s7555_s26 + $0x790] sm:$0xff] %v4451_v1  ;;  %v4453_v61 = vpop.f32.mrb[243].mxu0  ;;  %v4985_v47 = vpop.f32.mrb[88].mxu1 }
 0x52a   : > { %4613 = vst [vmem:[%s7555_s26 + $0x798] sm:$0xff] %v4453_v61  ;;  %5172 = vst [vmem:[%s7555_s26 + $0xb00] sm:$0xff] %v4985_v47  ;;  %v4987_v16 = vpop.f32.mrb[89].mxu1 }
 0x52b   : > { %5173 = vst [vmem:[%s7555_s26 + $0xb08] sm:$0xff] %v4987_v16  ;;  %v4989_v9 = vpop.f32.mrb[90].mxu1  ;;  %5552 = vmatmul.mubr.bf16.gmra.mrb[92].mxu0 %v8254_v49 }
 0x52c   : > { %5174 = vst [vmem:[%s7555_s26 + $0xb10] sm:$0xff] %v4989_v9  ;;  %v4991_v28 = vpop.f32.mrb[91].mxu1  ;;  %5561 = vmatprep.mubr.bf16.mxu0 %v7272_v23 }
 0x52d   : > { %5175 = vst [vmem:[%s7555_s26 + $0xb18] sm:$0xff] %v4991_v28 }
 0x52e   : > { %v4457_v37 = vpop.f32.mrb[244].mxu0 }
 0x52f   : > { %4614 = vst [vmem:[%s7555_s26 + $0x7a0] sm:$0xff] %v4457_v37  ;;  %v4459_v24 = vpop.f32.mrb[245].mxu0 }
 0x530   : > { %4615 = vst [vmem:[%s7555_s26 + $0x7a8] sm:$0xff] %v4459_v24  ;;  %v4461_v11 = vpop.f32.mrb[246].mxu0 }
 0x531   : > { %4616 = vst [vmem:[%s7555_s26 + $0x7b0] sm:$0xff] %v4461_v11  ;;  %v4463_v52 = vpop.f32.mrb[247].mxu0  ;;  %v4995_v56 = vpop.f32.mrb[92].mxu1 }
 0x532   : > { %4617 = vst [vmem:[%s7555_s26 + $0x7b8] sm:$0xff] %v4463_v52  ;;  %5176 = vst [vmem:[%s7555_s26 + $0xb20] sm:$0xff] %v4995_v56  ;;  %v4997_v49 = vpop.f32.mrb[93].mxu1 }
 0x533   : > { %5177 = vst [vmem:[%s7555_s26 + $0xb28] sm:$0xff] %v4997_v49  ;;  %v4999_v32 = vpop.f32.mrb[94].mxu1  ;;  %5562 = vmatmul.mubr.bf16.gmra.mrb[96].mxu0 %v8269_v12 }
 0x534   : > { %5178 = vst [vmem:[%s7555_s26 + $0xb30] sm:$0xff] %v4999_v32  ;;  %v5001_v48 = vpop.f32.mrb[95].mxu1  ;;  %5571 = vmatprep.mubr.bf16.mxu0 %v7272_v23 }
 0x535   : > { %5179 = vst [vmem:[%s7555_s26 + $0xb38] sm:$0xff] %v5001_v48 }
 0x536   : > { %v4467_v14 = vpop.f32.mrb[248].mxu0 }
 0x537   : > { %4618 = vst [vmem:[%s7555_s26 + $0x7c0] sm:$0xff] %v4467_v14  ;;  %v4469_v21 = vpop.f32.mrb[249].mxu0 }
 0x538   : > { %4619 = vst [vmem:[%s7555_s26 + $0x7c8] sm:$0xff] %v4469_v21  ;;  %v4471_v6 = vpop.f32.mrb[250].mxu0 }
 0x539   : > { %4620 = vst [vmem:[%s7555_s26 + $0x7d0] sm:$0xff] %v4471_v6  ;;  %v4473_v51 = vpop.f32.mrb[251].mxu0  ;;  %v5005_v4 = vpop.f32.mrb[96].mxu1 }
 0x53a   : > { %4621 = vst [vmem:[%s7555_s26 + $0x7d8] sm:$0xff] %v4473_v51  ;;  %5180 = vst [vmem:[%s7555_s26 + $0xb40] sm:$0xff] %v5005_v4  ;;  %v5007_v12 = vpop.f32.mrb[97].mxu1 }
 0x53b   : > { %5181 = vst [vmem:[%s7555_s26 + $0xb48] sm:$0xff] %v5007_v12  ;;  %v5009_v35 = vpop.f32.mrb[98].mxu1  ;;  %5572 = vmatmul.mubr.bf16.gmra.mrb[100].mxu0 %v8266_v18 }
 0x53c   : > { %5182 = vst [vmem:[%s7555_s26 + $0xb50] sm:$0xff] %v5009_v35  ;;  %v5011_v13 = vpop.f32.mrb[99].mxu1  ;;  %5581 = vmatprep.mubr.bf16.mxu0 %v7272_v23 }
 0x53d   : > { %5183 = vst [vmem:[%s7555_s26 + $0xb58] sm:$0xff] %v5011_v13 }
 0x53e   : > { %v4477_v36 = vpop.f32.mrb[252].mxu0 }
 0x53f   : > { %4622 = vst [vmem:[%s7555_s26 + $0x7e0] sm:$0xff] %v4477_v36  ;;  %v4479_v39 = vpop.f32.mrb[253].mxu0 }
 0x540   : > { %4623 = vst [vmem:[%s7555_s26 + $0x7e8] sm:$0xff] %v4479_v39  ;;  %v4481_v42 = vpop.f32.mrb[254].mxu0 }
 0x541   : > { %4624 = vst [vmem:[%s7555_s26 + $0x7f0] sm:$0xff] %v4481_v42  ;;  %v4483_v8 = vpop.f32.mrb[255].mxu0  ;;  %v5015_v17 = vpop.f32.mrb[100].mxu1 }
 0x542   : > { %4625 = vst [vmem:[%s7555_s26 + $0x7f8] sm:$0xff] %v4483_v8  ;;  %5184 = vst [vmem:[%s7555_s26 + $0xb60] sm:$0xff] %v5015_v17  ;;  %v5017_v18 = vpop.f32.mrb[101].mxu1 }
 0x543   : > { %5185 = vst [vmem:[%s7555_s26 + $0xb68] sm:$0xff] %v5017_v18  ;;  %v5019_v60 = vpop.f32.mrb[102].mxu1  ;;  %5582 = vmatmul.mubr.bf16.gmra.mrb[104].mxu0 %v8281_v57 }
 0x544   : > { %5186 = vst [vmem:[%s7555_s26 + $0xb70] sm:$0xff] %v5019_v60  ;;  %v5021_v55 = vpop.f32.mrb[103].mxu1  ;;  %5591 = vmatprep.mubr.bf16.mxu0 %v7272_v23 }
 0x545   : > { %5187 = vst [vmem:[%s7555_s26 + $0xb78] sm:$0xff] %v5021_v55 }
 0x546   : > { %v4487_v29 = vpop.f32.mrb[0].mxu0 }
 0x547   : > { %4626 = vst [vmem:[%s7555_s26 + $0x800] sm:$0xff] %v4487_v29  ;;  %v4489_v59 = vpop.f32.mrb[1].mxu0 }
 0x548   : > { %4627 = vst [vmem:[%s7555_s26 + $0x808] sm:$0xff] %v4489_v59  ;;  %v4491_v20 = vpop.f32.mrb[2].mxu0 }
 0x549   : > { %4628 = vst [vmem:[%s7555_s26 + $0x810] sm:$0xff] %v4491_v20  ;;  %v4493_v44 = vpop.f32.mrb[3].mxu0  ;;  %v5025_v38 = vpop.f32.mrb[104].mxu1 }
 0x54a   : > { %4629 = vst [vmem:[%s7555_s26 + $0x818] sm:$0xff] %v4493_v44  ;;  %5188 = vst [vmem:[%s7555_s26 + $0xb80] sm:$0xff] %v5025_v38  ;;  %v5027_v57 = vpop.f32.mrb[105].mxu1 }
 0x54b   : > { %5189 = vst [vmem:[%s7555_s26 + $0xb88] sm:$0xff] %v5027_v57  ;;  %v5029_v30 = vpop.f32.mrb[106].mxu1  ;;  %5592 = vmatmul.mubr.bf16.gmra.mrb[108].mxu0 %v8278_v31 }
 0x54c   : > { %5190 = vst [vmem:[%s7555_s26 + $0xb90] sm:$0xff] %v5029_v30  ;;  %v5031_v5 = vpop.f32.mrb[107].mxu1  ;;  %5601 = vmatprep.mubr.bf16.mxu0 %v7272_v23 }
 0x54d   : > { %5191 = vst [vmem:[%s7555_s26 + $0xb98] sm:$0xff] %v5031_v5 }
 0x54e   : > { %v4497_v15 = vpop.f32.mrb[4].mxu0 }
 0x54f   : > { %4630 = vst [vmem:[%s7555_s26 + $0x820] sm:$0xff] %v4497_v15  ;;  %v4499_v7 = vpop.f32.mrb[5].mxu0 }
 0x550   : > { %4631 = vst [vmem:[%s7555_s26 + $0x828] sm:$0xff] %v4499_v7  ;;  %v4501_v54 = vpop.f32.mrb[6].mxu0 }
 0x551   : > { %4632 = vst [vmem:[%s7555_s26 + $0x830] sm:$0xff] %v4501_v54  ;;  %v4503_v22 = vpop.f32.mrb[7].mxu0  ;;  %v5035_v27 = vpop.f32.mrb[108].mxu1 }
 0x552   : > { %4633 = vst [vmem:[%s7555_s26 + $0x838] sm:$0xff] %v4503_v22  ;;  %5192 = vst [vmem:[%s7555_s26 + $0xba0] sm:$0xff] %v5035_v27  ;;  %v5037_v31 = vpop.f32.mrb[109].mxu1 }
 0x553   : > { %5193 = vst [vmem:[%s7555_s26 + $0xba8] sm:$0xff] %v5037_v31  ;;  %v5039_v0 = vpop.f32.mrb[110].mxu1  ;;  %5602 = vmatmul.mubr.bf16.gmra.mrb[112].mxu0 %v8293_v53 }
 0x554   : > { %5194 = vst [vmem:[%s7555_s26 + $0xbb0] sm:$0xff] %v5039_v0  ;;  %v5041_v33 = vpop.f32.mrb[111].mxu1  ;;  %5611 = vmatprep.mubr.bf16.mxu0 %v7272_v23 }
 0x555   : > { %5195 = vst [vmem:[%s7555_s26 + $0xbb8] sm:$0xff] %v5041_v33 }
 0x556   : > { %v5343_v50 = vpop.f32.mrb[8].mxu0 }
 0x557   : > { %5662 = vst [vmem:[%s7555_s26 + $0xc40] sm:$0xff] %v5343_v50  ;;  %v5345_v40 = vpop.f32.mrb[9].mxu0 }
 0x558   : > { %5663 = vst [vmem:[%s7555_s26 + $0xc48] sm:$0xff] %v5345_v40  ;;  %v5347_v34 = vpop.f32.mrb[10].mxu0 }
 0x559   : > { %5664 = vst [vmem:[%s7555_s26 + $0xc50] sm:$0xff] %v5347_v34  ;;  %v5045_v2 = vpop.f32.mrb[112].mxu1  ;;  %v5349_v26 = vpop.f32.mrb[11].mxu0 }
 0x55a   : > { %5196 = vst [vmem:[%s7555_s26 + $0xbc0] sm:$0xff] %v5045_v2  ;;  %5665 = vst [vmem:[%s7555_s26 + $0xc58] sm:$0xff] %v5349_v26  ;;  %v5047_v53 = vpop.f32.mrb[113].mxu1 }
 0x55b   : > { %5197 = vst [vmem:[%s7555_s26 + $0xbc8] sm:$0xff] %v5047_v53  ;;  %v5049_v58 = vpop.f32.mrb[114].mxu1  ;;  %5612 = vmatmul.mubr.bf16.gmra.mrb[116].mxu0 %v8290_v10 }
 0x55c   : > { %5198 = vst [vmem:[%s7555_s26 + $0xbd0] sm:$0xff] %v5049_v58  ;;  %v5051_v3 = vpop.f32.mrb[115].mxu1  ;;  %5621 = vmatprep.mubr.bf16.mxu0 %v7272_v23 }
 0x55d   : > { %5199 = vst [vmem:[%s7555_s26 + $0xbd8] sm:$0xff] %v5051_v3 }
 0x55e   : > { %v5353_v41 = vpop.f32.mrb[12].mxu0 }
 0x55f   : > { %5666 = vst [vmem:[%s7555_s26 + $0xc60] sm:$0xff] %v5353_v41  ;;  %v5355_v25 = vpop.f32.mrb[13].mxu0 }
 0x560   : > { %5667 = vst [vmem:[%s7555_s26 + $0xc68] sm:$0xff] %v5355_v25  ;;  %v5357_v19 = vpop.f32.mrb[14].mxu0 }
 0x561   : > { %5668 = vst [vmem:[%s7555_s26 + $0xc70] sm:$0xff] %v5357_v19  ;;  %v5055_v63 = vpop.f32.mrb[116].mxu1  ;;  %v5359_v45 = vpop.f32.mrb[15].mxu0 }
 0x562   : > { %5200 = vst [vmem:[%s7555_s26 + $0xbe0] sm:$0xff] %v5055_v63  ;;  %5669 = vst [vmem:[%s7555_s26 + $0xc78] sm:$0xff] %v5359_v45  ;;  %v5057_v10 = vpop.f32.mrb[117].mxu1 }
 0x563   : > { %5201 = vst [vmem:[%s7555_s26 + $0xbe8] sm:$0xff] %v5057_v10  ;;  %v5059_v23 = vpop.f32.mrb[118].mxu1  ;;  %5622 = vmatmul.mubr.bf16.gmra.mrb[120].mxu0 %v8305_v43 }
 0x564   : > { %5202 = vst [vmem:[%s7555_s26 + $0xbf0] sm:$0xff] %v5059_v23  ;;  %v5061_v46 = vpop.f32.mrb[119].mxu1 }
 0x565   : > { %5203 = vst [vmem:[%s7555_s26 + $0xbf8] sm:$0xff] %v5061_v46 }
 0x566   : > { %v5363_v62 = vpop.f32.mrb[16].mxu0 }
 0x567   : > { %5670 = vst [vmem:[%s7555_s26 + $0xc80] sm:$0xff] %v5363_v62  ;;  %v5365_v1 = vpop.f32.mrb[17].mxu0 }
 0x568   : > { %5671 = vst [vmem:[%s7555_s26 + $0xc88] sm:$0xff] %v5365_v1  ;;  %v5367_v61 = vpop.f32.mrb[18].mxu0 }
 0x569   : > { %5672 = vst [vmem:[%s7555_s26 + $0xc90] sm:$0xff] %v5367_v61  ;;  %v5065_v47 = vpop.f32.mrb[120].mxu1  ;;  %v5369_v16 = vpop.f32.mrb[19].mxu0 }
 0x56a   : > { %5204 = vst [vmem:[%s7555_s26 + $0xc00] sm:$0xff] %v5065_v47  ;;  %5673 = vst [vmem:[%s7555_s26 + $0xc98] sm:$0xff] %v5369_v16  ;;  %v5067_v43 = vpop.f32.mrb[121].mxu1 }
 0x56b   : > { %5205 = vst [vmem:[%s7555_s26 + $0xc08] sm:$0xff] %v5067_v43  ;;  %v5069_v9 = vpop.f32.mrb[122].mxu1 }
 0x56c   : > { %5206 = vst [vmem:[%s7555_s26 + $0xc10] sm:$0xff] %v5069_v9  ;;  %v5071_v28 = vpop.f32.mrb[123].mxu1 }
 0x56d   : > { %5207 = vst [vmem:[%s7555_s26 + $0xc18] sm:$0xff] %v5071_v28 }
 0x56e   : > { %v5373_v37 = vpop.f32.mrb[20].mxu0 }
 0x56f   : > { %5674 = vst [vmem:[%s7555_s26 + $0xca0] sm:$0xff] %v5373_v37  ;;  %v5375_v24 = vpop.f32.mrb[21].mxu0 }
 0x570   : > { %5675 = vst [vmem:[%s7555_s26 + $0xca8] sm:$0xff] %v5375_v24  ;;  %v5377_v11 = vpop.f32.mrb[22].mxu0 }
 0x571   : > { %5676 = vst [vmem:[%s7555_s26 + $0xcb0] sm:$0xff] %v5377_v11  ;;  %v5075_v52 = vpop.f32.mrb[124].mxu1  ;;  %v5379_v56 = vpop.f32.mrb[23].mxu0 }
 0x572   : > { %5208 = vst [vmem:[%s7555_s26 + $0xc20] sm:$0xff] %v5075_v52  ;;  %5677 = vst [vmem:[%s7555_s26 + $0xcb8] sm:$0xff] %v5379_v56  ;;  %v5077_v49 = vpop.f32.mrb[125].mxu1 }
 0x573   : > { %5209 = vst [vmem:[%s7555_s26 + $0xc28] sm:$0xff] %v5077_v49  ;;  %v5079_v32 = vpop.f32.mrb[126].mxu1 }
 0x574   : > { %5210 = vst [vmem:[%s7555_s26 + $0xc30] sm:$0xff] %v5079_v32  ;;  %v5081_v48 = vpop.f32.mrb[127].mxu1 }
 0x575   : > { %5211 = vst [vmem:[%s7555_s26 + $0xc38] sm:$0xff] %v5081_v48 }
 0x576   : > { %v5383_v14 = vpop.f32.mrb[24].mxu0 }
 0x577   : > { %5678 = vst [vmem:[%s7555_s26 + $0xcc0] sm:$0xff] %v5383_v14  ;;  %v5385_v21 = vpop.f32.mrb[25].mxu0 }
 0x578   : > { %5679 = vst [vmem:[%s7555_s26 + $0xcc8] sm:$0xff] %v5385_v21  ;;  %v5387_v6 = vpop.f32.mrb[26].mxu0 }
 0x579   : > { %5680 = vst [vmem:[%s7555_s26 + $0xcd0] sm:$0xff] %v5387_v6  ;;  %v5389_v51 = vpop.f32.mrb[27].mxu0  ;;  %v5633_v4 = vpop.f32.mrb[128].mxu1 }
 0x57a   : > { %5681 = vst [vmem:[%s7555_s26 + $0xcd8] sm:$0xff] %v5389_v51  ;;  %5778 = vst [vmem:[%s7555_s26 + $0xfe0] sm:$0xff] %v5633_v4  ;;  %v5635_v12 = vpop.f32.mrb[129].mxu1 }
 0x57b   : > { %5779 = vst [vmem:[%s7555_s26 + $0xfe8] sm:$0xff] %v5635_v12  ;;  %v5637_v35 = vpop.f32.mrb[130].mxu1 }
 0x57c   : > { %5780 = vst [vmem:[%s7555_s26 + $0xff0] sm:$0xff] %v5637_v35  ;;  %v5639_v13 = vpop.f32.mrb[131].mxu1 }
 0x57d   : > { %5781 = vst [vmem:[%s7555_s26 + $0xff8] sm:$0xff] %v5639_v13 }
 0x57e   : > { %v5393_v36 = vpop.f32.mrb[28].mxu0 }
 0x57f   : > { %5682 = vst [vmem:[%s7555_s26 + $0xce0] sm:$0xff] %v5393_v36  ;;  %v5395_v39 = vpop.f32.mrb[29].mxu0 }
 0x580   : > { %5683 = vst [vmem:[%s7555_s26 + $0xce8] sm:$0xff] %v5395_v39  ;;  %v5397_v42 = vpop.f32.mrb[30].mxu0 }
 0x581   : > { %5684 = vst [vmem:[%s7555_s26 + $0xcf0] sm:$0xff] %v5397_v42  ;;  %v5399_v8 = vpop.f32.mrb[31].mxu0  ;;  %v5643_v17 = vpop.f32.mrb[132].mxu1 }
 0x582   : > { %5685 = vst [vmem:[%s7555_s26 + $0xcf8] sm:$0xff] %v5399_v8  ;;  %5782 = vst [vmem:[%s7555_s26 + $0x1000] sm:$0xff] %v5643_v17  ;;  %v5645_v18 = vpop.f32.mrb[133].mxu1 }
 0x583   : > { %5783 = vst [vmem:[%s7555_s26 + $0x1008] sm:$0xff] %v5645_v18  ;;  %v5647_v60 = vpop.f32.mrb[134].mxu1 }
 0x584   : > { %5784 = vst [vmem:[%s7555_s26 + $0x1010] sm:$0xff] %v5647_v60  ;;  %v5649_v55 = vpop.f32.mrb[135].mxu1 }
 0x585   : > { %5785 = vst [vmem:[%s7555_s26 + $0x1018] sm:$0xff] %v5649_v55 }
 0x586   : > { %v5403_v29 = vpop.f32.mrb[32].mxu0 }
 0x587   : > { %5686 = vst [vmem:[%s7555_s26 + $0xd00] sm:$0xff] %v5403_v29  ;;  %v5405_v59 = vpop.f32.mrb[33].mxu0 }
 0x588   : > { %5687 = vst [vmem:[%s7555_s26 + $0xd08] sm:$0xff] %v5405_v59  ;;  %v5407_v20 = vpop.f32.mrb[34].mxu0 }
 0x589   : > { %5688 = vst [vmem:[%s7555_s26 + $0xd10] sm:$0xff] %v5407_v20  ;;  %v5409_v44 = vpop.f32.mrb[35].mxu0  ;;  %v5653_v38 = vpop.f32.mrb[136].mxu1 }
 0x58a   : > { %5689 = vst [vmem:[%s7555_s26 + $0xd18] sm:$0xff] %v5409_v44  ;;  %5786 = vst [vmem:[%s7555_s26 + $0x1020] sm:$0xff] %v5653_v38  ;;  %v5655_v57 = vpop.f32.mrb[137].mxu1 }
 0x58b   : > { %5787 = vst [vmem:[%s7555_s26 + $0x1028] sm:$0xff] %v5655_v57  ;;  %v5657_v30 = vpop.f32.mrb[138].mxu1 }
 0x58c   : > { %5788 = vst [vmem:[%s7555_s26 + $0x1030] sm:$0xff] %v5657_v30  ;;  %v5659_v5 = vpop.f32.mrb[139].mxu1 }
 0x58d   : > { %5789 = vst [vmem:[%s7555_s26 + $0x1038] sm:$0xff] %v5659_v5 }
 0x58e   : > { %v5413_v15 = vpop.f32.mrb[36].mxu0 }
 0x58f   : > { %5690 = vst [vmem:[%s7555_s26 + $0xd20] sm:$0xff] %v5413_v15  ;;  %v5415_v7 = vpop.f32.mrb[37].mxu0 }
 0x590   : > { %5691 = vst [vmem:[%s7555_s26 + $0xd28] sm:$0xff] %v5415_v7  ;;  %v5417_v54 = vpop.f32.mrb[38].mxu0 }
 0x591   : > { %5692 = vst [vmem:[%s7555_s26 + $0xd30] sm:$0xff] %v5417_v54  ;;  %v5419_v22 = vpop.f32.mrb[39].mxu0 }
 0x592   : > { %5693 = vst [vmem:[%s7555_s26 + $0xd38] sm:$0xff] %v5419_v22 }
 0x596   : > { %v5423_v27 = vpop.f32.mrb[40].mxu0 }
 0x597   : > { %5694 = vst [vmem:[%s7555_s26 + $0xd40] sm:$0xff] %v5423_v27  ;;  %v5425_v31 = vpop.f32.mrb[41].mxu0 }
 0x598   : > { %5695 = vst [vmem:[%s7555_s26 + $0xd48] sm:$0xff] %v5425_v31  ;;  %v5427_v0 = vpop.f32.mrb[42].mxu0 }
 0x599   : > { %5696 = vst [vmem:[%s7555_s26 + $0xd50] sm:$0xff] %v5427_v0  ;;  %v5429_v33 = vpop.f32.mrb[43].mxu0 }
 0x59a   : > { %5697 = vst [vmem:[%s7555_s26 + $0xd58] sm:$0xff] %v5429_v33 }
 0x59e   : > { %v5433_v50 = vpop.f32.mrb[44].mxu0 }
 0x59f   : > { %5698 = vst [vmem:[%s7555_s26 + $0xd60] sm:$0xff] %v5433_v50  ;;  %v5435_v40 = vpop.f32.mrb[45].mxu0 }
 0x5a0   : > { %5699 = vst [vmem:[%s7555_s26 + $0xd68] sm:$0xff] %v5435_v40  ;;  %v5437_v34 = vpop.f32.mrb[46].mxu0 }
 0x5a1   : > { %5700 = vst [vmem:[%s7555_s26 + $0xd70] sm:$0xff] %v5437_v34  ;;  %v5439_v2 = vpop.f32.mrb[47].mxu0 }
 0x5a2   : > { %5701 = vst [vmem:[%s7555_s26 + $0xd78] sm:$0xff] %v5439_v2 }
 0x5a6   : > { %v5443_v26 = vpop.f32.mrb[48].mxu0 }
 0x5a7   : > { %5702 = vst [vmem:[%s7555_s26 + $0xd80] sm:$0xff] %v5443_v26  ;;  %v5445_v53 = vpop.f32.mrb[49].mxu0 }
 0x5a8   : > { %5703 = vst [vmem:[%s7555_s26 + $0xd88] sm:$0xff] %v5445_v53  ;;  %v5447_v58 = vpop.f32.mrb[50].mxu0 }
 0x5a9   : > { %5704 = vst [vmem:[%s7555_s26 + $0xd90] sm:$0xff] %v5447_v58  ;;  %v5449_v3 = vpop.f32.mrb[51].mxu0 }
 0x5aa   : > { %5705 = vst [vmem:[%s7555_s26 + $0xd98] sm:$0xff] %v5449_v3 }
 0x5ae   : > { %v5453_v41 = vpop.f32.mrb[52].mxu0 }
 0x5af   : > { %5706 = vst [vmem:[%s7555_s26 + $0xda0] sm:$0xff] %v5453_v41  ;;  %v5455_v25 = vpop.f32.mrb[53].mxu0 }
 0x5b0   : > { %5707 = vst [vmem:[%s7555_s26 + $0xda8] sm:$0xff] %v5455_v25  ;;  %v5457_v19 = vpop.f32.mrb[54].mxu0 }
 0x5b1   : > { %5708 = vst [vmem:[%s7555_s26 + $0xdb0] sm:$0xff] %v5457_v19  ;;  %v5459_v63 = vpop.f32.mrb[55].mxu0 }
 0x5b2   : > { %5709 = vst [vmem:[%s7555_s26 + $0xdb8] sm:$0xff] %v5459_v63 }
 0x5b6   : > { %v5463_v45 = vpop.f32.mrb[56].mxu0 }
 0x5b7   : > { %5710 = vst [vmem:[%s7555_s26 + $0xdc0] sm:$0xff] %v5463_v45  ;;  %v5465_v10 = vpop.f32.mrb[57].mxu0 }
 0x5b8   : > { %5711 = vst [vmem:[%s7555_s26 + $0xdc8] sm:$0xff] %v5465_v10  ;;  %v5467_v23 = vpop.f32.mrb[58].mxu0 }
 0x5b9   : > { %5712 = vst [vmem:[%s7555_s26 + $0xdd0] sm:$0xff] %v5467_v23  ;;  %v5469_v46 = vpop.f32.mrb[59].mxu0 }
 0x5ba   : > { %5713 = vst [vmem:[%s7555_s26 + $0xdd8] sm:$0xff] %v5469_v46 }
 0x5be   : > { %v5473_v62 = vpop.f32.mrb[60].mxu0 }
 0x5bf   : > { %5714 = vst [vmem:[%s7555_s26 + $0xde0] sm:$0xff] %v5473_v62  ;;  %v5475_v1 = vpop.f32.mrb[61].mxu0 }
 0x5c0   : > { %5715 = vst [vmem:[%s7555_s26 + $0xde8] sm:$0xff] %v5475_v1  ;;  %v5477_v61 = vpop.f32.mrb[62].mxu0 }
 0x5c1   : > { %5716 = vst [vmem:[%s7555_s26 + $0xdf0] sm:$0xff] %v5477_v61  ;;  %v5479_v47 = vpop.f32.mrb[63].mxu0 }
 0x5c2   : > { %5717 = vst [vmem:[%s7555_s26 + $0xdf8] sm:$0xff] %v5479_v47 }
 0x5c6   : > { %v5483_v16 = vpop.f32.mrb[64].mxu0 }
 0x5c7   : > { %5718 = vst [vmem:[%s7555_s26 + $0xe00] sm:$0xff] %v5483_v16  ;;  %v5485_v43 = vpop.f32.mrb[65].mxu0 }
 0x5c8   : > { %5719 = vst [vmem:[%s7555_s26 + $0xe08] sm:$0xff] %v5485_v43  ;;  %v5487_v9 = vpop.f32.mrb[66].mxu0 }
 0x5c9   : > { %5720 = vst [vmem:[%s7555_s26 + $0xe10] sm:$0xff] %v5487_v9  ;;  %v5489_v28 = vpop.f32.mrb[67].mxu0 }
 0x5ca   : > { %5721 = vst [vmem:[%s7555_s26 + $0xe18] sm:$0xff] %v5489_v28 }
 0x5ce   : > { %v5493_v37 = vpop.f32.mrb[68].mxu0 }
 0x5cf   : > { %5722 = vst [vmem:[%s7555_s26 + $0xe20] sm:$0xff] %v5493_v37  ;;  %v5495_v24 = vpop.f32.mrb[69].mxu0 }
 0x5d0   : > { %5723 = vst [vmem:[%s7555_s26 + $0xe28] sm:$0xff] %v5495_v24  ;;  %v5497_v11 = vpop.f32.mrb[70].mxu0 }
 0x5d1   : > { %5724 = vst [vmem:[%s7555_s26 + $0xe30] sm:$0xff] %v5497_v11  ;;  %v5499_v52 = vpop.f32.mrb[71].mxu0 }
 0x5d2   : > { %5725 = vst [vmem:[%s7555_s26 + $0xe38] sm:$0xff] %v5499_v52 }
 0x5d6   : > { %v5503_v56 = vpop.f32.mrb[72].mxu0 }
 0x5d7   : > { %5726 = vst [vmem:[%s7555_s26 + $0xe40] sm:$0xff] %v5503_v56  ;;  %v5505_v49 = vpop.f32.mrb[73].mxu0 }
 0x5d8   : > { %5727 = vst [vmem:[%s7555_s26 + $0xe48] sm:$0xff] %v5505_v49  ;;  %v5507_v32 = vpop.f32.mrb[74].mxu0 }
 0x5d9   : > { %5728 = vst [vmem:[%s7555_s26 + $0xe50] sm:$0xff] %v5507_v32  ;;  %v5509_v48 = vpop.f32.mrb[75].mxu0 }
 0x5da   : > { %5729 = vst [vmem:[%s7555_s26 + $0xe58] sm:$0xff] %v5509_v48 }
 0x5de   : > { %v5513_v14 = vpop.f32.mrb[76].mxu0 }
 0x5df   : > { %5730 = vst [vmem:[%s7555_s26 + $0xe60] sm:$0xff] %v5513_v14  ;;  %v5515_v21 = vpop.f32.mrb[77].mxu0 }
 0x5e0   : > { %5731 = vst [vmem:[%s7555_s26 + $0xe68] sm:$0xff] %v5515_v21  ;;  %v5517_v6 = vpop.f32.mrb[78].mxu0 }
 0x5e1   : > { %5732 = vst [vmem:[%s7555_s26 + $0xe70] sm:$0xff] %v5517_v6  ;;  %v5519_v51 = vpop.f32.mrb[79].mxu0 }
 0x5e2   : > { %5733 = vst [vmem:[%s7555_s26 + $0xe78] sm:$0xff] %v5519_v51 }
 0x5e6   : > { %v5523_v4 = vpop.f32.mrb[80].mxu0 }
 0x5e7   : > { %5734 = vst [vmem:[%s7555_s26 + $0xe80] sm:$0xff] %v5523_v4  ;;  %v5525_v12 = vpop.f32.mrb[81].mxu0 }
 0x5e8   : > { %5735 = vst [vmem:[%s7555_s26 + $0xe88] sm:$0xff] %v5525_v12  ;;  %v5527_v35 = vpop.f32.mrb[82].mxu0 }
 0x5e9   : > { %5736 = vst [vmem:[%s7555_s26 + $0xe90] sm:$0xff] %v5527_v35  ;;  %v5529_v13 = vpop.f32.mrb[83].mxu0 }
 0x5ea   : > { %5737 = vst [vmem:[%s7555_s26 + $0xe98] sm:$0xff] %v5529_v13 }
 0x5ee   : > { %v5533_v36 = vpop.f32.mrb[84].mxu0 }
 0x5ef   : > { %5738 = vst [vmem:[%s7555_s26 + $0xea0] sm:$0xff] %v5533_v36  ;;  %v5535_v39 = vpop.f32.mrb[85].mxu0 }
 0x5f0   : > { %5739 = vst [vmem:[%s7555_s26 + $0xea8] sm:$0xff] %v5535_v39  ;;  %v5537_v42 = vpop.f32.mrb[86].mxu0 }
 0x5f1   : > { %5740 = vst [vmem:[%s7555_s26 + $0xeb0] sm:$0xff] %v5537_v42  ;;  %v5539_v8 = vpop.f32.mrb[87].mxu0 }
 0x5f2   : > { %5741 = vst [vmem:[%s7555_s26 + $0xeb8] sm:$0xff] %v5539_v8 }
 0x5f6   : > { %v5543_v17 = vpop.f32.mrb[88].mxu0 }
 0x5f7   : > { %5742 = vst [vmem:[%s7555_s26 + $0xec0] sm:$0xff] %v5543_v17  ;;  %v5545_v18 = vpop.f32.mrb[89].mxu0 }
 0x5f8   : > { %5743 = vst [vmem:[%s7555_s26 + $0xec8] sm:$0xff] %v5545_v18  ;;  %v5547_v60 = vpop.f32.mrb[90].mxu0 }
 0x5f9   : > { %5744 = vst [vmem:[%s7555_s26 + $0xed0] sm:$0xff] %v5547_v60  ;;  %v5549_v55 = vpop.f32.mrb[91].mxu0 }
 0x5fa   : > { %5745 = vst [vmem:[%s7555_s26 + $0xed8] sm:$0xff] %v5549_v55 }
 0x5fe   : > { %v5553_v29 = vpop.f32.mrb[92].mxu0 }
 0x5ff   : > { %5746 = vst [vmem:[%s7555_s26 + $0xee0] sm:$0xff] %v5553_v29  ;;  %v5555_v59 = vpop.f32.mrb[93].mxu0 }
 0x600   : > { %5747 = vst [vmem:[%s7555_s26 + $0xee8] sm:$0xff] %v5555_v59  ;;  %v5557_v20 = vpop.f32.mrb[94].mxu0 }
 0x601   : > { %5748 = vst [vmem:[%s7555_s26 + $0xef0] sm:$0xff] %v5557_v20  ;;  %v5559_v44 = vpop.f32.mrb[95].mxu0 }
 0x602   : > { %5749 = vst [vmem:[%s7555_s26 + $0xef8] sm:$0xff] %v5559_v44 }
 0x606   : > { %v5563_v38 = vpop.f32.mrb[96].mxu0 }
 0x607   : > { %5750 = vst [vmem:[%s7555_s26 + $0xf00] sm:$0xff] %v5563_v38  ;;  %v5565_v57 = vpop.f32.mrb[97].mxu0 }
 0x608   : > { %5751 = vst [vmem:[%s7555_s26 + $0xf08] sm:$0xff] %v5565_v57  ;;  %v5567_v30 = vpop.f32.mrb[98].mxu0 }
 0x609   : > { %5752 = vst [vmem:[%s7555_s26 + $0xf10] sm:$0xff] %v5567_v30  ;;  %v5569_v5 = vpop.f32.mrb[99].mxu0 }
 0x60a   : > { %5753 = vst [vmem:[%s7555_s26 + $0xf18] sm:$0xff] %v5569_v5 }
 0x60e   : > { %v5573_v15 = vpop.f32.mrb[100].mxu0 }
 0x60f   : > { %5754 = vst [vmem:[%s7555_s26 + $0xf20] sm:$0xff] %v5573_v15  ;;  %v5575_v7 = vpop.f32.mrb[101].mxu0 }
 0x610   : > { %5755 = vst [vmem:[%s7555_s26 + $0xf28] sm:$0xff] %v5575_v7  ;;  %v5577_v54 = vpop.f32.mrb[102].mxu0 }
 0x611   : > { %5756 = vst [vmem:[%s7555_s26 + $0xf30] sm:$0xff] %v5577_v54  ;;  %v5579_v22 = vpop.f32.mrb[103].mxu0 }
 0x612   : > { %5757 = vst [vmem:[%s7555_s26 + $0xf38] sm:$0xff] %v5579_v22 }
 0x616   : > { %v5583_v27 = vpop.f32.mrb[104].mxu0 }
 0x617   : > { %5758 = vst [vmem:[%s7555_s26 + $0xf40] sm:$0xff] %v5583_v27  ;;  %v5585_v31 = vpop.f32.mrb[105].mxu0 }
 0x618   : > { %5759 = vst [vmem:[%s7555_s26 + $0xf48] sm:$0xff] %v5585_v31  ;;  %v5587_v0 = vpop.f32.mrb[106].mxu0 }
 0x619   : > { %5760 = vst [vmem:[%s7555_s26 + $0xf50] sm:$0xff] %v5587_v0  ;;  %v5589_v33 = vpop.f32.mrb[107].mxu0 }
 0x61a   : > { %5761 = vst [vmem:[%s7555_s26 + $0xf58] sm:$0xff] %v5589_v33 }
 0x61e   : > { %v5593_v50 = vpop.f32.mrb[108].mxu0 }
 0x61f   : > { %5762 = vst [vmem:[%s7555_s26 + $0xf60] sm:$0xff] %v5593_v50  ;;  %v5595_v40 = vpop.f32.mrb[109].mxu0 }
 0x620   : > { %5763 = vst [vmem:[%s7555_s26 + $0xf68] sm:$0xff] %v5595_v40  ;;  %v5597_v34 = vpop.f32.mrb[110].mxu0 }
 0x621   : > { %5764 = vst [vmem:[%s7555_s26 + $0xf70] sm:$0xff] %v5597_v34  ;;  %v5599_v2 = vpop.f32.mrb[111].mxu0 }
 0x622   : > { %5765 = vst [vmem:[%s7555_s26 + $0xf78] sm:$0xff] %v5599_v2 }
 0x626   : > { %v5603_v26 = vpop.f32.mrb[112].mxu0 }
 0x627   : > { %5766 = vst [vmem:[%s7555_s26 + $0xf80] sm:$0xff] %v5603_v26  ;;  %v5605_v53 = vpop.f32.mrb[113].mxu0 }
 0x628   : > { %5767 = vst [vmem:[%s7555_s26 + $0xf88] sm:$0xff] %v5605_v53  ;;  %v5607_v58 = vpop.f32.mrb[114].mxu0 }
 0x629   : > { %5768 = vst [vmem:[%s7555_s26 + $0xf90] sm:$0xff] %v5607_v58  ;;  %v5609_v3 = vpop.f32.mrb[115].mxu0 }
 0x62a   : > { %5769 = vst [vmem:[%s7555_s26 + $0xf98] sm:$0xff] %v5609_v3 }
 0x62e   : > { %v5613_v41 = vpop.f32.mrb[116].mxu0 }
 0x62f   : > { %5770 = vst [vmem:[%s7555_s26 + $0xfa0] sm:$0xff] %v5613_v41  ;;  %v5615_v25 = vpop.f32.mrb[117].mxu0 }
 0x630   : > { %5771 = vst [vmem:[%s7555_s26 + $0xfa8] sm:$0xff] %v5615_v25  ;;  %v5617_v19 = vpop.f32.mrb[118].mxu0 }
 0x631   : > { %5772 = vst [vmem:[%s7555_s26 + $0xfb0] sm:$0xff] %v5617_v19  ;;  %v5619_v63 = vpop.f32.mrb[119].mxu0 }
 0x632   : > { %5773 = vst [vmem:[%s7555_s26 + $0xfb8] sm:$0xff] %v5619_v63 }
 0x636   : > { %v5623_v45 = vpop.f32.mrb[120].mxu0 }
 0x637   : > { %5774 = vst [vmem:[%s7555_s26 + $0xfc0] sm:$0xff] %v5623_v45  ;;  %v5625_v10 = vpop.f32.mrb[121].mxu0 }
 0x638   : > { %5775 = vst [vmem:[%s7555_s26 + $0xfc8] sm:$0xff] %v5625_v10  ;;  %v5627_v23 = vpop.f32.mrb[122].mxu0 }
 0x639   : > { %5776 = vst [vmem:[%s7555_s26 + $0xfd0] sm:$0xff] %v5627_v23  ;;  %v5629_v46 = vpop.f32.mrb[123].mxu0 }
 0x63a   : > { %5777 = vst [vmem:[%s7555_s26 + $0xfd8] sm:$0xff] %v5629_v46 }
 0x63b   : > { %7198 = shalt.err (!%p7195_p13)
}
 0x63c   : > { %s7199_s16 = scalar_lea.hbm %s8760_s11, 66560  ;;  %s7203_s14 = scalar_lea.hbm %s8814_s5, 133120 }
 0x63d   : > { %p7200_p9 = scmp.ne.s32.totalorder %s8760_s11, %s7199_s16  ;;  %p7204_p6 = scmp.lt.u32.totalorder %s8760_s11, %s8814_s5 }
 0x63e   : > { %p7205_p4 = scmp.lt.u32.totalorder %s7203_s14, %s7199_s16  ;;  %p7207_p10 = scmp.lt.u32.totalorder %s7199_s16, %s8760_s11 }
 0x63f   : > { %p7201_p0 = pnand %p7200_p9, %p7484_p3 }
 0x640   : > { %p7206_p8 = por %p7205_p4, %p7204_p6 }
 0x641   : > { %p7202_p11 = pneg %p7201_p0 }
 0x642   : > { %p7208_p5 = por %p7207_p10, %p7206_p8 }
 0x644   : > { %p7209_p7 = pnand %p7208_p5, %p7202_p11 }
 0x646   : > { %7212 = shalt.err (!%p7209_p7)
}
 0x647   : > { %s7274_s28 = smov 256   ;;  %s7275_s27 = smov 16  }
 0x648   : > { %6725 = dma.vmem_to_hbm [thread:$0]  (%p7484_p3), %s8762_s6, 66560, %s8760_s11, %s5791_s22, %s7274_s28, %s7274_s28, %s7275_s27  }
 0x649 PF: > { %s5819_s17 = sand.u32 1, %s7247_s18   ;;  %p8834_p12 = scmp.ne.s32.totalorder %s8820_s25, 0 }
 0x64a   : > { %p8835_p1 = scmp.ge.s32.totalorder %s7259_s21, 2  ;;  %s5820_s15 = scalar_lea.sflag [#allocation4], %s5819_s17 }
 0x64c   : > { %p6745_p2 = pnand %p8835_p1, %p8834_p12 }
 0x64e   : > { %7242 = dma.done.wait (!%p6745_p2), %s5820_s15, 66560  }
 0x64f   : > { %7244 = vsyncadd (!%p6745_p2), %s5820_s15, 4294900736  ;;  %p20_p13 = scmp.ge.s32.totalorder %s7471_s29, 4   ;;  %s8836_s18 = smov %s7251_s19 }
 0x650   : > { %s8837_s19 = smov %s7255_s20  ;;  %s8838_s20 = smov %s7480_s8 }
 0x651   : > { %s8839_s21 = smov %s7471_s29  ;;  %22 = sbr.rel (!%p20_p13) target bundleno = 7 (0x7), region = 104 }
 0x658   :  { %5825 = vsyncpa [#allocation3], 1 }
 0x659   :  { %5827 = vsyncpa [#allocation3 + $0x1], 1 }
 0x65a   :  { %5828 = vsyncpa [#allocation6], 1 }
 0x65b   :  { %5829 = vsyncpa [#allocation9], 1 }
 0x65c   :  { %5830 = vsyncpa [#allocation4], 1 }
 0x65d   :  { %5832 = vsyncpa [#allocation4 + $0x1], 1 }

</bundles_post_ra>
